<compile_context>
chip_gen: v5e
topology: v5e:2x2
jax: 0.10.0
libtpu: 0.0.40
codegen_flags: <defaults>
</compile_context>

<pallas_src>
import functools

import jax
import jax.numpy as jnp
import numpy as np
from jax import lax
from jax.experimental import pallas as pl
from jax.experimental.pallas import tpu as pltpu

LEAKY_SLOPE = 0.2


def _leaky(t):
    return jnp.where(t >= 0, t, LEAKY_SLOPE * t)


def _round_up(x, m):
    return ((x + m - 1) // m) * m


def _cat(lst, axis=1):
    return lst[0] if len(lst) == 1 else jnp.concatenate(lst, axis=axis)


# -----------------------------------------------------------------------------
# Kernel
# -----------------------------------------------------------------------------
def addgcn_kernel(xf_ref, wfcct_ref, bct_ref, wsa_ref, wsw_ref, bsw_ref,
                  wcg_ref, bcg_ref, bns_ref, bnb_ref, wcmg_ref, wcmx_ref,
                  bcm_ref, wdw_ref, bdw_ref, wllt_ref, bll_ref,
                  out1_ref, out2_ref, *, bt, hw, hwp, n_real, n_pad, inv_n,
                  cdt):
    f32 = jnp.float32
    xf = xf_ref[...]                                           # (C, Bt*HWp) cdt

    # One stacked matmul for fc + conv_transform over the whole Bt slab.
    fcxt = jnp.dot(wfcct_ref[...], xf, preferred_element_type=f32)
    fcx = fcxt[:n_pad, :]                                      # (Np, Bt*HWp)
    xt = fcxt[n_pad:, :] + bct_ref[...]                        # (D,  Bt*HWp)

    # Slab-wide spatial-padding mask and SAM sigmoid (hoisted out of the loop).
    if hwp != hw:
        hw1 = (lax.broadcasted_iota(jnp.int32, (1, hwp), 1) < hw).astype(f32)
        hw_f = hw1 if bt == 1 else jnp.concatenate([hw1] * bt, axis=1)
        fcx_m = jnp.where(hw_f > 0.5, fcx, -jnp.inf)
        mask_all = jax.nn.sigmoid(fcx) * hw_f
    else:
        fcx_m = fcx
        mask_all = jax.nn.sigmoid(fcx)

    mask_c = mask_all.astype(cdt)
    xt_c = xt.astype(cdt)
    wsa = wsa_ref[...]                                         # f32 (Np, Np)

    # Per-item loop A: out1 max, SAM matmul and static-adjacency matmul.
    # (Their contraction axes are per-item, so they cannot be widened; the
    #  results are gathered into (D, Bt*Np) slabs for the batched matmuls.)
    v_list, t_list = [], []
    for bi in range(bt):
        lo = bi * hwp
        # forward_classification_sm: topk(1).mean over HW == max over HW.
        out1_ref[0, bi, :] = jnp.max(fcx_m[:, lo:lo + hwp], axis=-1)
        v_b = lax.dot_general(xt_c[:, lo:lo + hwp], mask_c[:, lo:lo + hwp],
                              (((1,), (1,)), ((), ())),
                              preferred_element_type=f32)      # (D, Np)
        t_b = _leaky(lax.dot_general(v_b, wsa, (((1,), (1,)), ((), ())),
                                     preferred_element_type=f32))  # (D, Np)
        v_list.append(v_b)
        t_list.append(t_b.astype(cdt))
    v_slab = _cat(v_list)                                      # (D, Bt*Np) f32
    t_slab = _cat(t_list)                                      # (D, Bt*Np) cdt

    # Batched static_weight conv: ONE (D,D) x (D, Bt*Np) matmul.
    s = _leaky(jnp.dot(wsw_ref[...], t_slab, preferred_element_type=f32)
               + bsw_ref[...])
    xg = v_slab + s
    if n_pad != n_real:      # zero the padded class columns (feed x_glb / dyn)
        n1 = (lax.broadcasted_iota(jnp.int32, (1, n_pad), 1)
              < n_real).astype(f32)
        n_f = n1 if bt == 1 else jnp.concatenate([n1] * bt, axis=1)
        xg = xg * n_f
    xg_c = xg.astype(cdt)

    # Global pooling for all Bt items -> (D, Bt); batched conv_global + BN.
    # TODO(synk): BatchNorm1d folded to running-stats (eval) mode; training
    # batch statistics are not implemented.
    glb = [jnp.sum(xg[:, bi * n_pad:(bi + 1) * n_pad], axis=-1, keepdims=True)
           for bi in range(bt)]
    x_glb = _cat(glb) * inv_n                                  # (D, Bt)
    g = _leaky(bns_ref[...] * (jnp.dot(wcg_ref[...], x_glb.astype(cdt),
                                       preferred_element_type=f32)
                               + bcg_ref[...]) + bnb_ref[...])  # (D, Bt)

    # Batched halves of conv_create_co_mat.
    cm_g = jnp.dot(wcmg_ref[...], g.astype(cdt),
                   preferred_element_type=f32)                 # (Np, Bt)
    cm_x = jnp.dot(wcmx_ref[...], xg_c,
                   preferred_element_type=f32)                 # (Np, Bt*Np)
    bcm = bcm_ref[...]

    # Per-item loop B: dynamic adjacency + dynamic-GCN matmul.
    y_list = []
    for bi in range(bt):
        lo = bi * n_pad
        dyn_b = jax.nn.sigmoid(cm_x[:, lo:lo + n_pad]
                               + cm_g[:, bi:bi + 1] + bcm)     # (Np, Np)
        y_b = _leaky(jnp.dot(xg_c[:, lo:lo + n_pad], dyn_b.astype(cdt),
                             preferred_element_type=f32) * inv_n)  # (D, Np)
        y_list.append(y_b.astype(cdt))
    y_slab = _cat(y_list)                                      # (D, Bt*Np) cdt

    # Batched dynamic_weight conv: ONE (D,D) x (D, Bt*Np) matmul.
    z = _leaky(jnp.dot(wdw_ref[...], y_slab, preferred_element_type=f32)
               + bdw_ref[...])
    zf = v_slab + z                                            # (D, Bt*Np)

    # last_linear with mask_mat == I -> diagonal only; one elementwise
    # product + one sublane reduction over the whole slab.
    wll_t = wllt_ref[...]                                      # (D, Np) f32
    wll_tiled = wll_t if bt == 1 else jnp.concatenate([wll_t] * bt, axis=1)
    col = jnp.sum(wll_tiled * zf, axis=0, keepdims=True)       # (1, Bt*Np)
    for bi in range(bt):
        lo = bi * n_pad
        out2_ref[0, bi, :] = col[0, lo:lo + n_pad] + bll_ref[0]


# -----------------------------------------------------------------------------
# Parameter preparation
# -----------------------------------------------------------------------------
_WEIGHT_ORDER = ("W_fcct", "b_ct", "W_sa", "W_sw", "b_sw", "W_cg", "b_cg",
                 "bn_scale", "bn_shift", "W_cm_g", "W_cm_x", "b_cm", "W_dw",
                 "b_dw", "W_ll_t", "b_ll")


def prepare_params(params, *, compute_dtype=jnp.bfloat16):
    """One-time prep: pad class dim to a multiple of 128, stack fc/conv_transform
    weights, fold 1/num_nodes into the (f32) static adjacency, cast the big MXU
    operands to compute_dtype (biases / BN / adjacency / last_linear stay f32)."""
    p = params
    f32 = jnp.float32
    n = int(p["W_fc"].shape[0])
    n_pad = _round_up(n, 128)

    # TODO(synk): the diagonal fast path assumes mask_mat == I (the module's
    # init value); a trained non-identity mask_mat would need the full (N, N)
    # last_linear matmul + masked sum.
    assert np.allclose(np.asarray(p["mask_mat"]), np.eye(n)), \
        "kernel assumes mask_mat == identity"

    def pad_rows(w):
        return jnp.pad(w, ((0, n_pad - w.shape[0]), (0, 0)))

    # fc + conv_transform stacked into one LHS: xf streams through the MXU once.
    w_fcct = jnp.concatenate([pad_rows(p["W_fc"]), p["W_ct"]], axis=0)

    # 1/num_nodes folded into the static adjacency (exact: LeakyReLU is
    # positively homogeneous); kept in f32 for accuracy (tiny matrix).
    w_sa = jnp.pad(p["W_sa"], ((0, n_pad - n), (0, n_pad - n))) * (1.0 / n)

    return {
        "W_fcct": w_fcct.astype(compute_dtype),
        "b_ct": p["b_ct"].astype(f32),
        "W_sa": w_sa.astype(f32),
        "W_sw": p["W_sw"].astype(compute_dtype),
        "b_sw": p["b_sw"].astype(f32),
        "W_cg": p["W_cg"].astype(compute_dtype),
        "b_cg": p["b_cg"].astype(f32),
        "bn_scale": p["bn_scale"].astype(f32),
        "bn_shift": p["bn_shift"].astype(f32),
        "W_cm_g": pad_rows(p["W_cm_g"]).astype(compute_dtype),
        "W_cm_x": pad_rows(p["W_cm_x"]).astype(compute_dtype),
        "b_cm": pad_rows(p["b_cm"]).astype(f32),
        "W_dw": p["W_dw"].astype(compute_dtype),
        "b_dw": p["b_dw"].astype(f32),
        "W_ll_t": jnp.pad(p["W_ll"].T, ((0, 0), (0, n_pad - n))).astype(f32),
        "b_ll": jnp.pad(p["b_ll"].T, ((0, 0), (0, n_pad - n))).astype(f32),
    }


# -----------------------------------------------------------------------------
# Wrapper
# -----------------------------------------------------------------------------
def _vmem_capacity():
    try:
        return int(pltpu.get_tpu_info().vmem_capacity_bytes)
    except Exception:
        return 64 << 20          # conservative (v7x per-TC VMEM)


def _num_tensorcores_per_device():
    try:
        kind = jax.devices()[0].device_kind.lower()
    except Exception:
        return 1
    return 2 if any(t in kind for t in ("v4", "v5p", "v7")) else 1


def _choose_bt(B, max_bt):
    """Pick the per-block batch: minimize padding, then keep the block count a
    multiple of the TensorCore count (v7x load balance), then maximize width."""
    num_tc = _num_tensorcores_per_device()
    best_key, best_bt = None, 1
    for bt in range(1, max(1, min(B, max_bt)) + 1):
        nblk = -(-B // bt)
        pad = nblk * bt - B
        uneven = 0 if (nblk % num_tc == 0) else 1
        key = (pad, uneven, -bt)
        if best_key is None or key < best_key:
            best_key, best_bt = key, bt
    return best_bt


def add_gcn_forward(x, prepped, num_classes, *, max_bt=None):
    """x: (B, C_feat, H, W) post-backbone feature map.
    Returns (out1, out2), each (B, num_classes) float32."""
    B, C, H, W = x.shape
    hw = H * W
    hwp = _round_up(hw, 128)
    n_pad = int(prepped["W_sa"].shape[0])
    d = int(prepped["W_sw"].shape[0])
    cdt = prepped["W_fcct"].dtype

    if max_bt is None:           # v6e (128 MiB VMEM) can afford wider blocks
        max_bt = 8 if _vmem_capacity() >= (100 << 20) else 4
    bt = _choose_bt(B, max_bt)
    nblk = -(-B // bt)
    b_pad = nblk * bt

    # Cast to the compute dtype BEFORE the relayout (halves preamble HBM traffic).
    xf = x.reshape(B, C, hw).astype(cdt)
    xf = jnp.pad(xf, ((0, b_pad - B), (0, 0), (0, hwp - hw)))
    # Lane-dense (C, Bt*HWp) blocks: batch packed into the lane axis so the
    # dominant stacked fc/conv_transform matmul runs at full MXU width.
    x2 = jnp.transpose(xf, (1, 0, 2)).reshape(C, b_pad * hwp)

    weights = [prepped[k] for k in _WEIGHT_ORDER]

    def _const_spec(shape):
        idx = lambda i, _nd=len(shape): (0,) * _nd
        try:    # constant index_map -> one VMEM buffer is enough
            return pl.BlockSpec(shape, idx, pipeline_mode=pl.Buffered(1))
        except (TypeError, AttributeError):
            return pl.BlockSpec(shape, idx)

    in_specs = [pl.BlockSpec((C, bt * hwp), lambda i: (0, i))]
    in_specs += [_const_spec(tuple(w.shape)) for w in weights]
    out_specs = (pl.BlockSpec((1, bt, n_pad), lambda i: (i, 0, 0)),
                 pl.BlockSpec((1, bt, n_pad), lambda i: (i, 0, 0)))
    out_shape = (jax.ShapeDtypeStruct((nblk, bt, n_pad), jnp.float32),
                 jax.ShapeDtypeStruct((nblk, bt, n_pad), jnp.float32))

    kern = functools.partial(
        addgcn_kernel, bt=bt, hw=hw, hwp=hwp, n_real=int(num_classes),
        n_pad=n_pad, inv_n=1.0 / float(num_classes), cdt=cdt)

    # Explicit VMEM budget: single-buffered weights + double-buffered input
    # block + outputs + slab intermediates, capped at 85% of the chip's VMEM.
    cdt_bytes = np.dtype(cdt).itemsize
    est = sum(int(w.size) * np.dtype(w.dtype).itemsize for w in weights)
    est += 2 * C * bt * hwp * cdt_bytes                       # double-buffered x
    est += (n_pad + d) * bt * hwp * (4 + cdt_bytes)           # fcxt + cdt copies
    est += n_pad * bt * hwp * 4                               # masked fcx slab
    est += d * bt * n_pad * (6 * 4 + 3 * cdt_bytes)           # GCN slabs
    est += 2 * n_pad * bt * n_pad * 4                         # cm_x + dyn
    est += 2 * 2 * bt * n_pad * 4                             # outputs
    cap = _vmem_capacity()
    vmem_limit = int(min(max(est + (8 << 20), 32 << 20), int(cap * 0.85)))

    out1, out2 = pl.pallas_call(
        kern,
        grid_spec=pltpu.PrefetchScalarGridSpec(
            num_scalar_prefetch=0,
            grid=(nblk,),
            in_specs=in_specs,
            out_specs=out_specs),
        out_shape=out_shape,
        compiler_params=pltpu.CompilerParams(
            dimension_semantics=("parallel",),    # v7x: split blocks over 2 TCs
            vmem_limit_bytes=vmem_limit),
    )(x2, *weights)

    out1 = out1.reshape(b_pad, n_pad)[:B, :num_classes]
    out2 = out2.reshape(b_pad, n_pad)[:B, :num_classes]
    return out1, out2


# -----------------------------------------------------------------------------
# Pure-JAX reference (mirrors the PyTorch code structure literally, f32)
# -----------------------------------------------------------------------------
def reference_forward(x_feat, p):
    N = p["W_fc"].shape[0]
    leaky = _leaky
    fcx = jnp.einsum('oc,bch->boh', p['W_fc'], x_feat)
    out1 = jnp.max(fcx, axis=-1)
    mask = jnp.transpose(jax.nn.sigmoid(fcx), (0, 2, 1))                   # (B,HW,N)
    xt = jnp.einsum('dc,bch->bdh', p['W_ct'], x_feat) + p['b_ct'][None]
    v = jnp.einsum('bdh,bhn->bdn', xt, mask)                               # (B,D,N)
    vt = jnp.transpose(v, (0, 2, 1))
    t = leaky(jnp.einsum('mn,bnd->bmd', p['W_sa'], vt)) / N
    tt = jnp.transpose(t, (0, 2, 1))
    s = leaky(jnp.einsum('ed,bdn->ben', p['W_sw'], tt) + p['b_sw'][None])
    xg = v + s
    x_glb = jnp.mean(xg, axis=-1, keepdims=True)
    g = jnp.einsum('ed,bdo->beo', p['W_cg'], x_glb) + p['b_cg'][None]
    g = leaky(p['bn_scale'][None] * g + p['bn_shift'][None])
    g_exp = jnp.broadcast_to(g, xg.shape)
    cat = jnp.concatenate([g_exp, xg], axis=1)
    W_cm = jnp.concatenate([p['W_cm_g'], p['W_cm_x']], axis=1)
    dyn = jax.nn.sigmoid(jnp.einsum('nk,bkm->bnm', W_cm, cat) + p['b_cm'][None])
    y = leaky(jnp.einsum('bdn,bnm->bdm', xg, dyn) / N)
    z = leaky(jnp.einsum('ed,bdn->ben', p['W_dw'], y) + p['b_dw'][None])
    zf = v + z
    o2 = jnp.einsum('nd,bdm->bnm', p['W_ll'], zf) + p['b_ll'][None]
    out2 = jnp.sum(o2 * p['mask_mat'][None], axis=-1)
    return out1, out2


def make_params(key, c_feat, d, n, eps=1e-5):
    ks = jax.random.split(key, 20)
    f32 = jnp.float32
    adj = jax.random.uniform(ks[0], (n, n), f32)
    gamma = 1.0 + 0.1 * jax.random.normal(ks[1], (d, 1), f32)
    beta = 0.1 * jax.random.normal(ks[2], (d, 1), f32)
    rmean = 0.1 * jax.random.normal(ks[3], (d, 1), f32)
    rvar = jnp.abs(1.0 + 0.1 * jax.random.normal(ks[4], (d, 1), f32))
    bn_scale = gamma / jnp.sqrt(rvar + eps)
    bn_shift = beta - rmean * bn_scale
    sd = 0.1
    return {
        "W_fc":   sd * jax.random.normal(ks[5], (n, c_feat), f32),
        "W_ct":   sd * jax.random.normal(ks[6], (d, c_feat), f32),
        "b_ct":   sd * jax.random.normal(ks[7], (d, 1), f32),
        "W_sa":   adj.T,
        "W_sw":   sd * jax.random.normal(ks[8], (d, d), f32),
        "b_sw":   sd * jax.random.normal(ks[9], (d, 1), f32),
        "W_cg":   sd * jax.random.normal(ks[10], (d, d), f32),
        "b_cg":   sd * jax.random.normal(ks[11], (d, 1), f32),
        "bn_scale": bn_scale,
        "bn_shift": bn_shift,
        "W_cm_g": sd * jax.random.normal(ks[12], (n, d), f32),
        "W_cm_x": sd * jax.random.normal(ks[13], (n, d), f32),
        "b_cm":   sd * jax.random.normal(ks[14], (n, 1), f32),
        "W_dw":   sd * jax.random.normal(ks[15], (d, d), f32),
        "b_dw":   sd * jax.random.normal(ks[16], (d, 1), f32),
        "W_ll":   sd * jax.random.normal(ks[17], (n, d), f32),
        "b_ll":   sd * jax.random.normal(ks[18], (n, 1), f32),
        "mask_mat": jnp.eye(n, dtype=f32),
    }


if __name__ == "__main__":
    # Small synthetic shapes (stand-ins for 2048-ch ResNet features, 1024-d GCN).
    # B=6 -> bt=3, nblk=2: exercises the multi-item slab paths and the grid.
    B, C_FEAT, H, W = 6, 32, 4, 4
    D = 32            # in_features == out_features
    N = 8             # num_classes
    HW = H * W

    key = jax.random.PRNGKey(0)
    k_x, k_p = jax.random.split(key)
    x_nchw = jax.random.normal(k_x, (B, C_FEAT, H, W), jnp.float32)
    params = make_params(k_p, C_FEAT, D, N)

    ref1, ref2 = reference_forward(x_nchw.reshape(B, C_FEAT, HW), params)

    # 1) f32 compute path: tight check against the pure-JAX reference.
    pf32 = prepare_params(params, compute_dtype=jnp.float32)
    o1, o2 = jax.block_until_ready(add_gcn_forward(x_nchw, pf32, N))
    np.testing.assert_allclose(np.asarray(o1), np.asarray(ref1), rtol=2e-3, atol=2e-3)
    np.testing.assert_allclose(np.asarray(o2), np.asarray(ref2), rtol=2e-3, atol=2e-3)

    # 2) bf16 MXU path (production config): looser tolerance from bf16 operands.
    pbf16 = prepare_params(params, compute_dtype=jnp.bfloat16)
    b1, b2 = jax.block_until_ready(add_gcn_forward(x_nchw, pbf16, N))
    np.testing.assert_allclose(np.asarray(b1), np.asarray(ref1), rtol=1e-1, atol=1e-1)
    np.testing.assert_allclose(np.asarray(b2), np.asarray(ref2), rtol=1e-1, atol=1e-1)

    print("KERNEL_OK")
</pallas_src>

<mosaic_0001>
module attributes {stable_mosaic.version = 11 : i64} {
  func.func @addgcn_kernel(%arg0: i32, %arg1: memref<32x384xf32, #tpu.memory_space<vmem>>, %arg2: memref<160x32xf32, #tpu.memory_space<vmem>>, %arg3: memref<32x1xf32, #tpu.memory_space<vmem>>, %arg4: memref<128x128xf32, #tpu.memory_space<vmem>>, %arg5: memref<32x32xf32, #tpu.memory_space<vmem>>, %arg6: memref<32x1xf32, #tpu.memory_space<vmem>>, %arg7: memref<32x32xf32, #tpu.memory_space<vmem>>, %arg8: memref<32x1xf32, #tpu.memory_space<vmem>>, %arg9: memref<32x1xf32, #tpu.memory_space<vmem>>, %arg10: memref<32x1xf32, #tpu.memory_space<vmem>>, %arg11: memref<128x32xf32, #tpu.memory_space<vmem>>, %arg12: memref<128x32xf32, #tpu.memory_space<vmem>>, %arg13: memref<128x1xf32, #tpu.memory_space<vmem>>, %arg14: memref<32x32xf32, #tpu.memory_space<vmem>>, %arg15: memref<32x1xf32, #tpu.memory_space<vmem>>, %arg16: memref<32x128xf32, #tpu.memory_space<vmem>>, %arg17: memref<1x128xf32, #tpu.memory_space<vmem>>, %arg18: memref<1x3x128xf32, #tpu.memory_space<vmem>>, %arg19: memref<1x3x128xf32, #tpu.memory_space<vmem>>) attributes {dimension_semantics = [#tpu.dimension_semantics<parallel>], iteration_bounds = array<i64: 2>, scalar_prefetch = 0 : i64, scratch_operands = 0 : i64, tpu.core_type = #tpu.core_type<tc>, window_params = [{transform_indices = @transform_0, window_bounds = array<i64: 32, 384>}, {pipeline_mode = #tpu.pipeline_mode<synchronous>, transform_indices = @transform_1, window_bounds = array<i64: 160, 32>}, {pipeline_mode = #tpu.pipeline_mode<synchronous>, transform_indices = @transform_2, window_bounds = array<i64: 32, 1>}, {pipeline_mode = #tpu.pipeline_mode<synchronous>, transform_indices = @transform_3, window_bounds = array<i64: 128, 128>}, {pipeline_mode = #tpu.pipeline_mode<synchronous>, transform_indices = @transform_4, window_bounds = array<i64: 32, 32>}, {pipeline_mode = #tpu.pipeline_mode<synchronous>, transform_indices = @transform_5, window_bounds = array<i64: 32, 1>}, {pipeline_mode = #tpu.pipeline_mode<synchronous>, transform_indices = @transform_6, window_bounds = array<i64: 32, 32>}, {pipeline_mode = #tpu.pipeline_mode<synchronous>, transform_indices = @transform_7, window_bounds = array<i64: 32, 1>}, {pipeline_mode = #tpu.pipeline_mode<synchronous>, transform_indices = @transform_8, window_bounds = array<i64: 32, 1>}, {pipeline_mode = #tpu.pipeline_mode<synchronous>, transform_indices = @transform_9, window_bounds = array<i64: 32, 1>}, {pipeline_mode = #tpu.pipeline_mode<synchronous>, transform_indices = @transform_10, window_bounds = array<i64: 128, 32>}, {pipeline_mode = #tpu.pipeline_mode<synchronous>, transform_indices = @transform_11, window_bounds = array<i64: 128, 32>}, {pipeline_mode = #tpu.pipeline_mode<synchronous>, transform_indices = @transform_12, window_bounds = array<i64: 128, 1>}, {pipeline_mode = #tpu.pipeline_mode<synchronous>, transform_indices = @transform_13, window_bounds = array<i64: 32, 32>}, {pipeline_mode = #tpu.pipeline_mode<synchronous>, transform_indices = @transform_14, window_bounds = array<i64: 32, 1>}, {pipeline_mode = #tpu.pipeline_mode<synchronous>, transform_indices = @transform_15, window_bounds = array<i64: 32, 128>}, {pipeline_mode = #tpu.pipeline_mode<synchronous>, transform_indices = @transform_16, window_bounds = array<i64: 1, 128>}, {transform_indices = @transform_17, window_bounds = array<i64: 1, 3, 128>}, {transform_indices = @transform_18, window_bounds = array<i64: 1, 3, 128>}]} {
    %c0 = arith.constant 0 : index
    %c0_0 = arith.constant 0 : index
    %0 = vector.load %arg1[%c0, %c0_0] : memref<32x384xf32, #tpu.memory_space<vmem>>, vector<32x384xf32>
    %c0_1 = arith.constant 0 : index
    %c0_2 = arith.constant 0 : index
    %1 = vector.load %arg2[%c0_1, %c0_2] : memref<160x32xf32, #tpu.memory_space<vmem>>, vector<160x32xf32>
    %cst = arith.constant dense<0.000000e+00> : vector<160x384xf32>
    %2 = tpu.matmul %1, %0, %cst {dimension_numbers = #tpu.dot_dimension_numbers<[1], [0], [0], [1], [0, 0, 1, 1], [], []>} : vector<160x32xf32>, vector<32x384xf32>, vector<160x384xf32> -> vector<160x384xf32>
    %3 = vector.extract_strided_slice %2 {offsets = [0, 0], sizes = [128, 384], strides = [1, 1]} : vector<160x384xf32> to vector<128x384xf32>
    %4 = vector.extract_strided_slice %2 {offsets = [128, 0], sizes = [32, 384], strides = [1, 1]} : vector<160x384xf32> to vector<32x384xf32>
    %c0_3 = arith.constant 0 : index
    %c0_4 = arith.constant 0 : index
    %5 = vector.load %arg3[%c0_3, %c0_4] : memref<32x1xf32, #tpu.memory_space<vmem>>, vector<32x1xf32>
    %6 = vector.broadcast %5 : vector<32x1xf32> to vector<32x384xf32>
    %7 = arith.addf %4, %6 : vector<32x384xf32>
    %8 = tpu.iota {dimensions = array<i32: 1>} : vector<1x128xi32>
    %c16_i32 = arith.constant 16 : i32
    %9 = vector.broadcast %c16_i32 : i32 to vector<1x128xi32>
    %10 = arith.cmpi slt, %8, %9 : vector<1x128xi32>
    %11 = arith.extui %10 : vector<1x128xi1> to vector<1x128xi32>
    %12 = arith.sitofp %11 : vector<1x128xi32> to vector<1x128xf32>
    %13 = tpu.concatenate %12, %12, %12 in 1 : vector<1x128xf32>, vector<1x128xf32>, vector<1x128xf32> -> vector<1x384xf32>
    %cst_5 = arith.constant 5.000000e-01 : f32
    %14 = vector.broadcast %cst_5 : f32 to vector<1x384xf32>
    %15 = arith.cmpf ogt, %13, %14 : vector<1x384xf32>
    %cst_6 = arith.constant 0xFF800000 : f32
    %16 = vector.shape_cast %15 : vector<1x384xi1> to vector<1x384xi1>
    %17 = vector.broadcast %16 : vector<1x384xi1> to vector<128x384xi1>
    %18 = vector.broadcast %cst_6 : f32 to vector<128x384xf32>
    %19 = arith.select %17, %3, %18 : vector<128x384xi1>, vector<128x384xf32>
    %20 = arith.negf %3 : vector<128x384xf32>
    %21 = math.exp %20 : vector<128x384xf32>
    %cst_7 = arith.constant 1.000000e+00 : f32
    %22 = vector.broadcast %cst_7 : f32 to vector<128x384xf32>
    %23 = arith.addf %22, %21 : vector<128x384xf32>
    %24 = arith.divf %22, %23 : vector<128x384xf32>
    %25 = vector.broadcast %13 : vector<1x384xf32> to vector<128x384xf32>
    %26 = arith.mulf %24, %25 : vector<128x384xf32>
    %c0_8 = arith.constant 0 : index
    %c0_9 = arith.constant 0 : index
    %27 = vector.load %arg4[%c0_8, %c0_9] : memref<128x128xf32, #tpu.memory_space<vmem>>, vector<128x128xf32>
    %28 = vector.extract_strided_slice %19 {offsets = [0, 0], sizes = [128, 128], strides = [1, 1]} : vector<128x384xf32> to vector<128x128xf32>
    %cst_10 = arith.constant dense<0xFF800000> : vector<128xf32>
    %29 = vector.multi_reduction <maximumf>, %28, %cst_10 [1] : vector<128x128xf32> to vector<128xf32>
    %c0_11 = arith.constant 0 : index
    %c0_12 = arith.constant 0 : index
    %c0_13 = arith.constant 0 : index
    %30 = vector.load %arg18[%c0_11, %c0_12, %c0_13] : memref<1x3x128xf32, #tpu.memory_space<vmem>>, vector<1x1x128xf32>
    %31 = vector.shape_cast %30 : vector<1x1x128xf32> to vector<128xf32>
    %32 = vector.shape_cast %29 : vector<128xf32> to vector<1x1x128xf32>
    tpu.vector_store %arg18[%c0_11, %c0_12, %c0_13], %32 {strides = array<i32>} : memref<1x3x128xf32, #tpu.memory_space<vmem>>, vector<1x1x128xf32>,
    %33 = vector.extract_strided_slice %7 {offsets = [0, 0], sizes = [32, 128], strides = [1, 1]} : vector<32x384xf32> to vector<32x128xf32>
    %34 = vector.extract_strided_slice %26 {offsets = [0, 0], sizes = [128, 128], strides = [1, 1]} : vector<128x384xf32> to vector<128x128xf32>
    %cst_14 = arith.constant dense<0.000000e+00> : vector<32x128xf32>
    %35 = tpu.matmul %33, %34, %cst_14 {dimension_numbers = #tpu.dot_dimension_numbers<[1], [1], [0], [0], [0, 0, 1, 0], [], []>} : vector<32x128xf32>, vector<128x128xf32>, vector<32x128xf32> -> vector<32x128xf32>
    %cst_15 = arith.constant dense<0.000000e+00> : vector<32x128xf32>
    %36 = tpu.matmul %35, %27, %cst_15 {dimension_numbers = #tpu.dot_dimension_numbers<[1], [1], [0], [0], [0, 0, 1, 0], [], []>} : vector<32x128xf32>, vector<128x128xf32>, vector<32x128xf32> -> vector<32x128xf32>
    %cst_16 = arith.constant 0.000000e+00 : f32
    %37 = vector.broadcast %cst_16 : f32 to vector<32x128xf32>
    %38 = arith.cmpf oge, %36, %37 : vector<32x128xf32>
    %cst_17 = arith.constant 2.000000e-01 : f32
    %39 = vector.broadcast %cst_17 : f32 to vector<32x128xf32>
    %40 = arith.mulf %39, %36 : vector<32x128xf32>
    %41 = arith.select %38, %36, %40 : vector<32x128xi1>, vector<32x128xf32>
    %42 = vector.extract_strided_slice %19 {offsets = [0, 128], sizes = [128, 128], strides = [1, 1]} : vector<128x384xf32> to vector<128x128xf32>
    %cst_18 = arith.constant dense<0xFF800000> : vector<128xf32>
    %43 = vector.multi_reduction <maximumf>, %42, %cst_18 [1] : vector<128x128xf32> to vector<128xf32>
    %c0_19 = arith.constant 0 : index
    %c1 = arith.constant 1 : index
    %c0_20 = arith.constant 0 : index
    %44 = vector.load %arg18[%c0_19, %c1, %c0_20] : memref<1x3x128xf32, #tpu.memory_space<vmem>>, vector<1x1x128xf32>
    %45 = vector.shape_cast %44 : vector<1x1x128xf32> to vector<128xf32>
    %46 = vector.shape_cast %43 : vector<128xf32> to vector<1x1x128xf32>
    tpu.vector_store %arg18[%c0_19, %c1, %c0_20], %46 {strides = array<i32>} : memref<1x3x128xf32, #tpu.memory_space<vmem>>, vector<1x1x128xf32>,
    %47 = vector.extract_strided_slice %7 {offsets = [0, 128], sizes = [32, 128], strides = [1, 1]} : vector<32x384xf32> to vector<32x128xf32>
    %48 = vector.extract_strided_slice %26 {offsets = [0, 128], sizes = [128, 128], strides = [1, 1]} : vector<128x384xf32> to vector<128x128xf32>
    %cst_21 = arith.constant dense<0.000000e+00> : vector<32x128xf32>
    %49 = tpu.matmul %47, %48, %cst_21 {dimension_numbers = #tpu.dot_dimension_numbers<[1], [1], [0], [0], [0, 0, 1, 0], [], []>} : vector<32x128xf32>, vector<128x128xf32>, vector<32x128xf32> -> vector<32x128xf32>
    %cst_22 = arith.constant dense<0.000000e+00> : vector<32x128xf32>
    %50 = tpu.matmul %49, %27, %cst_22 {dimension_numbers = #tpu.dot_dimension_numbers<[1], [1], [0], [0], [0, 0, 1, 0], [], []>} : vector<32x128xf32>, vector<128x128xf32>, vector<32x128xf32> -> vector<32x128xf32>
    %cst_23 = arith.constant 0.000000e+00 : f32
    %51 = vector.broadcast %cst_23 : f32 to vector<32x128xf32>
    %52 = arith.cmpf oge, %50, %51 : vector<32x128xf32>
    %cst_24 = arith.constant 2.000000e-01 : f32
    %53 = vector.broadcast %cst_24 : f32 to vector<32x128xf32>
    %54 = arith.mulf %53, %50 : vector<32x128xf32>
    %55 = arith.select %52, %50, %54 : vector<32x128xi1>, vector<32x128xf32>
    %56 = vector.extract_strided_slice %19 {offsets = [0, 256], sizes = [128, 128], strides = [1, 1]} : vector<128x384xf32> to vector<128x128xf32>
    %cst_25 = arith.constant dense<0xFF800000> : vector<128xf32>
    %57 = vector.multi_reduction <maximumf>, %56, %cst_25 [1] : vector<128x128xf32> to vector<128xf32>
    %c0_26 = arith.constant 0 : index
    %c2 = arith.constant 2 : index
    %c0_27 = arith.constant 0 : index
    %58 = vector.load %arg18[%c0_26, %c2, %c0_27] : memref<1x3x128xf32, #tpu.memory_space<vmem>>, vector<1x1x128xf32>
    %59 = vector.shape_cast %58 : vector<1x1x128xf32> to vector<128xf32>
    %60 = vector.shape_cast %57 : vector<128xf32> to vector<1x1x128xf32>
    tpu.vector_store %arg18[%c0_26, %c2, %c0_27], %60 {strides = array<i32>} : memref<1x3x128xf32, #tpu.memory_space<vmem>>, vector<1x1x128xf32>,
    %61 = vector.extract_strided_slice %7 {offsets = [0, 256], sizes = [32, 128], strides = [1, 1]} : vector<32x384xf32> to vector<32x128xf32>
    %62 = vector.extract_strided_slice %26 {offsets = [0, 256], sizes = [128, 128], strides = [1, 1]} : vector<128x384xf32> to vector<128x128xf32>
    %cst_28 = arith.constant dense<0.000000e+00> : vector<32x128xf32>
    %63 = tpu.matmul %61, %62, %cst_28 {dimension_numbers = #tpu.dot_dimension_numbers<[1], [1], [0], [0], [0, 0, 1, 0], [], []>} : vector<32x128xf32>, vector<128x128xf32>, vector<32x128xf32> -> vector<32x128xf32>
    %cst_29 = arith.constant dense<0.000000e+00> : vector<32x128xf32>
    %64 = tpu.matmul %63, %27, %cst_29 {dimension_numbers = #tpu.dot_dimension_numbers<[1], [1], [0], [0], [0, 0, 1, 0], [], []>} : vector<32x128xf32>, vector<128x128xf32>, vector<32x128xf32> -> vector<32x128xf32>
    %cst_30 = arith.constant 0.000000e+00 : f32
    %65 = vector.broadcast %cst_30 : f32 to vector<32x128xf32>
    %66 = arith.cmpf oge, %64, %65 : vector<32x128xf32>
    %cst_31 = arith.constant 2.000000e-01 : f32
    %67 = vector.broadcast %cst_31 : f32 to vector<32x128xf32>
    %68 = arith.mulf %67, %64 : vector<32x128xf32>
    %69 = arith.select %66, %64, %68 : vector<32x128xi1>, vector<32x128xf32>
    %70 = tpu.concatenate %35, %49, %63 in 1 : vector<32x128xf32>, vector<32x128xf32>, vector<32x128xf32> -> vector<32x384xf32>
    %71 = tpu.concatenate %41, %55, %69 in 1 : vector<32x128xf32>, vector<32x128xf32>, vector<32x128xf32> -> vector<32x384xf32>
    %c0_32 = arith.constant 0 : index
    %c0_33 = arith.constant 0 : index
    %72 = vector.load %arg5[%c0_32, %c0_33] : memref<32x32xf32, #tpu.memory_space<vmem>>, vector<32x32xf32>
    %cst_34 = arith.constant dense<0.000000e+00> : vector<32x384xf32>
    %73 = tpu.matmul %72, %71, %cst_34 {dimension_numbers = #tpu.dot_dimension_numbers<[1], [0], [0], [1], [0, 0, 1, 1], [], []>} : vector<32x32xf32>, vector<32x384xf32>, vector<32x384xf32> -> vector<32x384xf32>
    %c0_35 = arith.constant 0 : index
    %c0_36 = arith.constant 0 : index
    %74 = vector.load %arg6[%c0_35, %c0_36] : memref<32x1xf32, #tpu.memory_space<vmem>>, vector<32x1xf32>
    %75 = vector.broadcast %74 : vector<32x1xf32> to vector<32x384xf32>
    %76 = arith.addf %73, %75 : vector<32x384xf32>
    %cst_37 = arith.constant 0.000000e+00 : f32
    %77 = vector.broadcast %cst_37 : f32 to vector<32x384xf32>
    %78 = arith.cmpf oge, %76, %77 : vector<32x384xf32>
    %cst_38 = arith.constant 2.000000e-01 : f32
    %79 = vector.broadcast %cst_38 : f32 to vector<32x384xf32>
    %80 = arith.mulf %79, %76 : vector<32x384xf32>
    %81 = arith.select %78, %76, %80 : vector<32x384xi1>, vector<32x384xf32>
    %82 = arith.addf %70, %81 : vector<32x384xf32>
    %83 = tpu.iota {dimensions = array<i32: 1>} : vector<1x128xi32>
    %c8_i32 = arith.constant 8 : i32
    %84 = vector.broadcast %c8_i32 : i32 to vector<1x128xi32>
    %85 = arith.cmpi slt, %83, %84 : vector<1x128xi32>
    %86 = arith.extui %85 : vector<1x128xi1> to vector<1x128xi32>
    %87 = arith.sitofp %86 : vector<1x128xi32> to vector<1x128xf32>
    %88 = tpu.concatenate %87, %87, %87 in 1 : vector<1x128xf32>, vector<1x128xf32>, vector<1x128xf32> -> vector<1x384xf32>
    %89 = vector.broadcast %88 : vector<1x384xf32> to vector<32x384xf32>
    %90 = arith.mulf %82, %89 : vector<32x384xf32>
    %91 = vector.extract_strided_slice %90 {offsets = [0, 0], sizes = [32, 128], strides = [1, 1]} : vector<32x384xf32> to vector<32x128xf32>
    %cst_39 = arith.constant dense<0.000000e+00> : vector<32xf32>
    %92 = vector.multi_reduction <add>, %91, %cst_39 [1] : vector<32x128xf32> to vector<32xf32>
    %93 = vector.shape_cast %92 : vector<32xf32> to vector<32x1xf32>
    %94 = vector.extract_strided_slice %90 {offsets = [0, 128], sizes = [32, 128], strides = [1, 1]} : vector<32x384xf32> to vector<32x128xf32>
    %cst_40 = arith.constant dense<0.000000e+00> : vector<32xf32>
    %95 = vector.multi_reduction <add>, %94, %cst_40 [1] : vector<32x128xf32> to vector<32xf32>
    %96 = vector.shape_cast %95 : vector<32xf32> to vector<32x1xf32>
    %97 = vector.extract_strided_slice %90 {offsets = [0, 256], sizes = [32, 128], strides = [1, 1]} : vector<32x384xf32> to vector<32x128xf32>
    %cst_41 = arith.constant dense<0.000000e+00> : vector<32xf32>
    %98 = vector.multi_reduction <add>, %97, %cst_41 [1] : vector<32x128xf32> to vector<32xf32>
    %99 = vector.shape_cast %98 : vector<32xf32> to vector<32x1xf32>
    %100 = tpu.concatenate %93, %96, %99 in 1 : vector<32x1xf32>, vector<32x1xf32>, vector<32x1xf32> -> vector<32x3xf32>
    %cst_42 = arith.constant 1.250000e-01 : f32
    %101 = vector.broadcast %cst_42 : f32 to vector<32x3xf32>
    %102 = arith.mulf %100, %101 : vector<32x3xf32>
    %c0_43 = arith.constant 0 : index
    %c0_44 = arith.constant 0 : index
    %103 = vector.load %arg9[%c0_43, %c0_44] : memref<32x1xf32, #tpu.memory_space<vmem>>, vector<32x1xf32>
    %c0_45 = arith.constant 0 : index
    %c0_46 = arith.constant 0 : index
    %104 = vector.load %arg7[%c0_45, %c0_46] : memref<32x32xf32, #tpu.memory_space<vmem>>, vector<32x32xf32>
    %cst_47 = arith.constant dense<0.000000e+00> : vector<32x3xf32>
    %105 = tpu.matmul %104, %102, %cst_47 {dimension_numbers = #tpu.dot_dimension_numbers<[1], [0], [0], [1], [0, 0, 1, 1], [], []>} : vector<32x32xf32>, vector<32x3xf32>, vector<32x3xf32> -> vector<32x3xf32>
    %c0_48 = arith.constant 0 : index
    %c0_49 = arith.constant 0 : index
    %106 = vector.load %arg8[%c0_48, %c0_49] : memref<32x1xf32, #tpu.memory_space<vmem>>, vector<32x1xf32>
    %107 = vector.broadcast %106 : vector<32x1xf32> to vector<32x3xf32>
    %108 = arith.addf %105, %107 : vector<32x3xf32>
    %109 = vector.broadcast %103 : vector<32x1xf32> to vector<32x3xf32>
    %110 = arith.mulf %109, %108 : vector<32x3xf32>
    %c0_50 = arith.constant 0 : index
    %c0_51 = arith.constant 0 : index
    %111 = vector.load %arg10[%c0_50, %c0_51] : memref<32x1xf32, #tpu.memory_space<vmem>>, vector<32x1xf32>
    %112 = vector.broadcast %111 : vector<32x1xf32> to vector<32x3xf32>
    %113 = arith.addf %110, %112 : vector<32x3xf32>
    %cst_52 = arith.constant 0.000000e+00 : f32
    %114 = vector.broadcast %cst_52 : f32 to vector<32x3xf32>
    %115 = arith.cmpf oge, %113, %114 : vector<32x3xf32>
    %cst_53 = arith.constant 2.000000e-01 : f32
    %116 = vector.broadcast %cst_53 : f32 to vector<32x3xf32>
    %117 = arith.mulf %116, %113 : vector<32x3xf32>
    %118 = arith.select %115, %113, %117 : vector<32x3xi1>, vector<32x3xf32>
    %c0_54 = arith.constant 0 : index
    %c0_55 = arith.constant 0 : index
    %119 = vector.load %arg11[%c0_54, %c0_55] : memref<128x32xf32, #tpu.memory_space<vmem>>, vector<128x32xf32>
    %cst_56 = arith.constant dense<0.000000e+00> : vector<128x3xf32>
    %120 = tpu.matmul %119, %118, %cst_56 {dimension_numbers = #tpu.dot_dimension_numbers<[1], [0], [0], [1], [0, 0, 1, 1], [], []>} : vector<128x32xf32>, vector<32x3xf32>, vector<128x3xf32> -> vector<128x3xf32>
    %c0_57 = arith.constant 0 : index
    %c0_58 = arith.constant 0 : index
    %121 = vector.load %arg12[%c0_57, %c0_58] : memref<128x32xf32, #tpu.memory_space<vmem>>, vector<128x32xf32>
    %cst_59 = arith.constant dense<0.000000e+00> : vector<128x384xf32>
    %122 = tpu.matmul %121, %90, %cst_59 {dimension_numbers = #tpu.dot_dimension_numbers<[1], [0], [0], [1], [0, 0, 1, 1], [], []>} : vector<128x32xf32>, vector<32x384xf32>, vector<128x384xf32> -> vector<128x384xf32>
    %c0_60 = arith.constant 0 : index
    %c0_61 = arith.constant 0 : index
    %123 = vector.load %arg13[%c0_60, %c0_61] : memref<128x1xf32, #tpu.memory_space<vmem>>, vector<128x1xf32>
    %124 = vector.extract_strided_slice %122 {offsets = [0, 0], sizes = [128, 128], strides = [1, 1]} : vector<128x384xf32> to vector<128x128xf32>
    %125 = vector.extract_strided_slice %120 {offsets = [0, 0], sizes = [128, 1], strides = [1, 1]} : vector<128x3xf32> to vector<128x1xf32>
    %126 = vector.broadcast %125 : vector<128x1xf32> to vector<128x128xf32>
    %127 = arith.addf %124, %126 : vector<128x128xf32>
    %128 = vector.broadcast %123 : vector<128x1xf32> to vector<128x128xf32>
    %129 = arith.addf %127, %128 : vector<128x128xf32>
    %130 = arith.negf %129 : vector<128x128xf32>
    %131 = math.exp %130 : vector<128x128xf32>
    %cst_62 = arith.constant 1.000000e+00 : f32
    %132 = vector.broadcast %cst_62 : f32 to vector<128x128xf32>
    %133 = arith.addf %132, %131 : vector<128x128xf32>
    %134 = arith.divf %132, %133 : vector<128x128xf32>
    %135 = vector.extract_strided_slice %90 {offsets = [0, 0], sizes = [32, 128], strides = [1, 1]} : vector<32x384xf32> to vector<32x128xf32>
    %cst_63 = arith.constant dense<0.000000e+00> : vector<32x128xf32>
    %136 = tpu.matmul %135, %134, %cst_63 {dimension_numbers = #tpu.dot_dimension_numbers<[1], [0], [0], [1], [0, 0, 1, 1], [], []>} : vector<32x128xf32>, vector<128x128xf32>, vector<32x128xf32> -> vector<32x128xf32>
    %cst_64 = arith.constant 1.250000e-01 : f32
    %137 = vector.broadcast %cst_64 : f32 to vector<32x128xf32>
    %138 = arith.mulf %136, %137 : vector<32x128xf32>
    %cst_65 = arith.constant 0.000000e+00 : f32
    %139 = vector.broadcast %cst_65 : f32 to vector<32x128xf32>
    %140 = arith.cmpf oge, %138, %139 : vector<32x128xf32>
    %cst_66 = arith.constant 2.000000e-01 : f32
    %141 = vector.broadcast %cst_66 : f32 to vector<32x128xf32>
    %142 = arith.mulf %141, %138 : vector<32x128xf32>
    %143 = arith.select %140, %138, %142 : vector<32x128xi1>, vector<32x128xf32>
    %144 = vector.extract_strided_slice %122 {offsets = [0, 128], sizes = [128, 128], strides = [1, 1]} : vector<128x384xf32> to vector<128x128xf32>
    %145 = vector.extract_strided_slice %120 {offsets = [0, 1], sizes = [128, 1], strides = [1, 1]} : vector<128x3xf32> to vector<128x1xf32>
    %146 = vector.broadcast %145 : vector<128x1xf32> to vector<128x128xf32>
    %147 = arith.addf %144, %146 : vector<128x128xf32>
    %148 = vector.broadcast %123 : vector<128x1xf32> to vector<128x128xf32>
    %149 = arith.addf %147, %148 : vector<128x128xf32>
    %150 = arith.negf %149 : vector<128x128xf32>
    %151 = math.exp %150 : vector<128x128xf32>
    %cst_67 = arith.constant 1.000000e+00 : f32
    %152 = vector.broadcast %cst_67 : f32 to vector<128x128xf32>
    %153 = arith.addf %152, %151 : vector<128x128xf32>
    %154 = arith.divf %152, %153 : vector<128x128xf32>
    %155 = vector.extract_strided_slice %90 {offsets = [0, 128], sizes = [32, 128], strides = [1, 1]} : vector<32x384xf32> to vector<32x128xf32>
    %cst_68 = arith.constant dense<0.000000e+00> : vector<32x128xf32>
    %156 = tpu.matmul %155, %154, %cst_68 {dimension_numbers = #tpu.dot_dimension_numbers<[1], [0], [0], [1], [0, 0, 1, 1], [], []>} : vector<32x128xf32>, vector<128x128xf32>, vector<32x128xf32> -> vector<32x128xf32>
    %cst_69 = arith.constant 1.250000e-01 : f32
    %157 = vector.broadcast %cst_69 : f32 to vector<32x128xf32>
    %158 = arith.mulf %156, %157 : vector<32x128xf32>
    %cst_70 = arith.constant 0.000000e+00 : f32
    %159 = vector.broadcast %cst_70 : f32 to vector<32x128xf32>
    %160 = arith.cmpf oge, %158, %159 : vector<32x128xf32>
    %cst_71 = arith.constant 2.000000e-01 : f32
    %161 = vector.broadcast %cst_71 : f32 to vector<32x128xf32>
    %162 = arith.mulf %161, %158 : vector<32x128xf32>
    %163 = arith.select %160, %158, %162 : vector<32x128xi1>, vector<32x128xf32>
    %164 = vector.extract_strided_slice %122 {offsets = [0, 256], sizes = [128, 128], strides = [1, 1]} : vector<128x384xf32> to vector<128x128xf32>
    %165 = vector.extract_strided_slice %120 {offsets = [0, 2], sizes = [128, 1], strides = [1, 1]} : vector<128x3xf32> to vector<128x1xf32>
    %166 = vector.broadcast %165 : vector<128x1xf32> to vector<128x128xf32>
    %167 = arith.addf %164, %166 : vector<128x128xf32>
    %168 = vector.broadcast %123 : vector<128x1xf32> to vector<128x128xf32>
    %169 = arith.addf %167, %168 : vector<128x128xf32>
    %170 = arith.negf %169 : vector<128x128xf32>
    %171 = math.exp %170 : vector<128x128xf32>
    %cst_72 = arith.constant 1.000000e+00 : f32
    %172 = vector.broadcast %cst_72 : f32 to vector<128x128xf32>
    %173 = arith.addf %172, %171 : vector<128x128xf32>
    %174 = arith.divf %172, %173 : vector<128x128xf32>
    %175 = vector.extract_strided_slice %90 {offsets = [0, 256], sizes = [32, 128], strides = [1, 1]} : vector<32x384xf32> to vector<32x128xf32>
    %cst_73 = arith.constant dense<0.000000e+00> : vector<32x128xf32>
    %176 = tpu.matmul %175, %174, %cst_73 {dimension_numbers = #tpu.dot_dimension_numbers<[1], [0], [0], [1], [0, 0, 1, 1], [], []>} : vector<32x128xf32>, vector<128x128xf32>, vector<32x128xf32> -> vector<32x128xf32>
    %cst_74 = arith.constant 1.250000e-01 : f32
    %177 = vector.broadcast %cst_74 : f32 to vector<32x128xf32>
    %178 = arith.mulf %176, %177 : vector<32x128xf32>
    %cst_75 = arith.constant 0.000000e+00 : f32
    %179 = vector.broadcast %cst_75 : f32 to vector<32x128xf32>
    %180 = arith.cmpf oge, %178, %179 : vector<32x128xf32>
    %cst_76 = arith.constant 2.000000e-01 : f32
    %181 = vector.broadcast %cst_76 : f32 to vector<32x128xf32>
    %182 = arith.mulf %181, %178 : vector<32x128xf32>
    %183 = arith.select %180, %178, %182 : vector<32x128xi1>, vector<32x128xf32>
    %184 = tpu.concatenate %143, %163, %183 in 1 : vector<32x128xf32>, vector<32x128xf32>, vector<32x128xf32> -> vector<32x384xf32>
    %c0_77 = arith.constant 0 : index
    %c0_78 = arith.constant 0 : index
    %185 = vector.load %arg14[%c0_77, %c0_78] : memref<32x32xf32, #tpu.memory_space<vmem>>, vector<32x32xf32>
    %cst_79 = arith.constant dense<0.000000e+00> : vector<32x384xf32>
    %186 = tpu.matmul %185, %184, %cst_79 {dimension_numbers = #tpu.dot_dimension_numbers<[1], [0], [0], [1], [0, 0, 1, 1], [], []>} : vector<32x32xf32>, vector<32x384xf32>, vector<32x384xf32> -> vector<32x384xf32>
    %c0_80 = arith.constant 0 : index
    %c0_81 = arith.constant 0 : index
    %187 = vector.load %arg15[%c0_80, %c0_81] : memref<32x1xf32, #tpu.memory_space<vmem>>, vector<32x1xf32>
    %188 = vector.broadcast %187 : vector<32x1xf32> to vector<32x384xf32>
    %189 = arith.addf %186, %188 : vector<32x384xf32>
    %cst_82 = arith.constant 0.000000e+00 : f32
    %190 = vector.broadcast %cst_82 : f32 to vector<32x384xf32>
    %191 = arith.cmpf oge, %189, %190 : vector<32x384xf32>
    %cst_83 = arith.constant 2.000000e-01 : f32
    %192 = vector.broadcast %cst_83 : f32 to vector<32x384xf32>
    %193 = arith.mulf %192, %189 : vector<32x384xf32>
    %194 = arith.select %191, %189, %193 : vector<32x384xi1>, vector<32x384xf32>
    %195 = arith.addf %70, %194 : vector<32x384xf32>
    %c0_84 = arith.constant 0 : index
    %c0_85 = arith.constant 0 : index
    %196 = vector.load %arg16[%c0_84, %c0_85] : memref<32x128xf32, #tpu.memory_space<vmem>>, vector<32x128xf32>
    %197 = tpu.concatenate %196, %196, %196 in 1 : vector<32x128xf32>, vector<32x128xf32>, vector<32x128xf32> -> vector<32x384xf32>
    %198 = arith.mulf %197, %195 : vector<32x384xf32>
    %cst_86 = arith.constant dense<0.000000e+00> : vector<384xf32>
    %199 = vector.multi_reduction <add>, %198, %cst_86 [0] : vector<32x384xf32> to vector<384xf32>
    %200 = vector.shape_cast %199 : vector<384xf32> to vector<1x384xf32>
    %201 = vector.extract_strided_slice %200 {offsets = [0, 0], sizes = [1, 128], strides = [1, 1]} : vector<1x384xf32> to vector<1x128xf32>
    %202 = vector.shape_cast %201 : vector<1x128xf32> to vector<128xf32>
    %c0_87 = arith.constant 0 : index
    %c0_88 = arith.constant 0 : index
    %203 = vector.load %arg17[%c0_87, %c0_88] : memref<1x128xf32, #tpu.memory_space<vmem>>, vector<1x128xf32>
    %204 = vector.shape_cast %203 : vector<1x128xf32> to vector<128xf32>
    %205 = arith.addf %202, %204 : vector<128xf32>
    %c0_89 = arith.constant 0 : index
    %c0_90 = arith.constant 0 : index
    %c0_91 = arith.constant 0 : index
    %206 = vector.load %arg19[%c0_89, %c0_90, %c0_91] : memref<1x3x128xf32, #tpu.memory_space<vmem>>, vector<1x1x128xf32>
    %207 = vector.shape_cast %206 : vector<1x1x128xf32> to vector<128xf32>
    %208 = vector.shape_cast %205 : vector<128xf32> to vector<1x1x128xf32>
    tpu.vector_store %arg19[%c0_89, %c0_90, %c0_91], %208 {strides = array<i32>} : memref<1x3x128xf32, #tpu.memory_space<vmem>>, vector<1x1x128xf32>,
    %209 = vector.extract_strided_slice %200 {offsets = [0, 128], sizes = [1, 128], strides = [1, 1]} : vector<1x384xf32> to vector<1x128xf32>
    %210 = vector.shape_cast %209 : vector<1x128xf32> to vector<128xf32>
    %c0_92 = arith.constant 0 : index
    %c0_93 = arith.constant 0 : index
    %211 = vector.load %arg17[%c0_92, %c0_93] : memref<1x128xf32, #tpu.memory_space<vmem>>, vector<1x128xf32>
    %212 = vector.shape_cast %211 : vector<1x128xf32> to vector<128xf32>
    %213 = arith.addf %210, %212 : vector<128xf32>
    %c0_94 = arith.constant 0 : index
    %c1_95 = arith.constant 1 : index
    %c0_96 = arith.constant 0 : index
    %214 = vector.load %arg19[%c0_94, %c1_95, %c0_96] : memref<1x3x128xf32, #tpu.memory_space<vmem>>, vector<1x1x128xf32>
    %215 = vector.shape_cast %214 : vector<1x1x128xf32> to vector<128xf32>
    %216 = vector.shape_cast %213 : vector<128xf32> to vector<1x1x128xf32>
    tpu.vector_store %arg19[%c0_94, %c1_95, %c0_96], %216 {strides = array<i32>} : memref<1x3x128xf32, #tpu.memory_space<vmem>>, vector<1x1x128xf32>,
    %217 = vector.extract_strided_slice %200 {offsets = [0, 256], sizes = [1, 128], strides = [1, 1]} : vector<1x384xf32> to vector<1x128xf32>
    %218 = vector.shape_cast %217 : vector<1x128xf32> to vector<128xf32>
    %c0_97 = arith.constant 0 : index
    %c0_98 = arith.constant 0 : index
    %219 = vector.load %arg17[%c0_97, %c0_98] : memref<1x128xf32, #tpu.memory_space<vmem>>, vector<1x128xf32>
    %220 = vector.shape_cast %219 : vector<1x128xf32> to vector<128xf32>
    %221 = arith.addf %218, %220 : vector<128xf32>
    %c0_99 = arith.constant 0 : index
    %c2_100 = arith.constant 2 : index
    %c0_101 = arith.constant 0 : index
    %222 = vector.load %arg19[%c0_99, %c2_100, %c0_101] : memref<1x3x128xf32, #tpu.memory_space<vmem>>, vector<1x1x128xf32>
    %223 = vector.shape_cast %222 : vector<1x1x128xf32> to vector<128xf32>
    %224 = vector.shape_cast %221 : vector<128xf32> to vector<1x1x128xf32>
    tpu.vector_store %arg19[%c0_99, %c2_100, %c0_101], %224 {strides = array<i32>} : memref<1x3x128xf32, #tpu.memory_space<vmem>>, vector<1x1x128xf32>,
    return
  }
  func.func @transform_0(%arg0: i32) -> (i32, i32) {
    %c0_i32 = arith.constant 0 : i32
    %c0_i32_0 = arith.constant 0 : i32
    return %c0_i32, %arg0 : i32, i32
  }
  func.func @transform_1(%arg0: i32) -> (i32, i32) {
    %c0_i32 = arith.constant 0 : i32
    %c0_i32_0 = arith.constant 0 : i32
    %c0_i32_1 = arith.constant 0 : i32
    return %c0_i32, %c0_i32_0 : i32, i32
  }
  func.func @transform_2(%arg0: i32) -> (i32, i32) {
    %c0_i32 = arith.constant 0 : i32
    %c0_i32_0 = arith.constant 0 : i32
    %c0_i32_1 = arith.constant 0 : i32
    return %c0_i32, %c0_i32_0 : i32, i32
  }
  func.func @transform_3(%arg0: i32) -> (i32, i32) {
    %c0_i32 = arith.constant 0 : i32
    %c0_i32_0 = arith.constant 0 : i32
    %c0_i32_1 = arith.constant 0 : i32
    return %c0_i32, %c0_i32_0 : i32, i32
  }
  func.func @transform_4(%arg0: i32) -> (i32, i32) {
    %c0_i32 = arith.constant 0 : i32
    %c0_i32_0 = arith.constant 0 : i32
    %c0_i32_1 = arith.constant 0 : i32
    return %c0_i32, %c0_i32_0 : i32, i32
  }
  func.func @transform_5(%arg0: i32) -> (i32, i32) {
    %c0_i32 = arith.constant 0 : i32
    %c0_i32_0 = arith.constant 0 : i32
    %c0_i32_1 = arith.constant 0 : i32
    return %c0_i32, %c0_i32_0 : i32, i32
  }
  func.func @transform_6(%arg0: i32) -> (i32, i32) {
    %c0_i32 = arith.constant 0 : i32
    %c0_i32_0 = arith.constant 0 : i32
    %c0_i32_1 = arith.constant 0 : i32
    return %c0_i32, %c0_i32_0 : i32, i32
  }
  func.func @transform_7(%arg0: i32) -> (i32, i32) {
    %c0_i32 = arith.constant 0 : i32
    %c0_i32_0 = arith.constant 0 : i32
    %c0_i32_1 = arith.constant 0 : i32
    return %c0_i32, %c0_i32_0 : i32, i32
  }
  func.func @transform_8(%arg0: i32) -> (i32, i32) {
    %c0_i32 = arith.constant 0 : i32
    %c0_i32_0 = arith.constant 0 : i32
    %c0_i32_1 = arith.constant 0 : i32
    return %c0_i32, %c0_i32_0 : i32, i32
  }
  func.func @transform_9(%arg0: i32) -> (i32, i32) {
    %c0_i32 = arith.constant 0 : i32
    %c0_i32_0 = arith.constant 0 : i32
    %c0_i32_1 = arith.constant 0 : i32
    return %c0_i32, %c0_i32_0 : i32, i32
  }
  func.func @transform_10(%arg0: i32) -> (i32, i32) {
    %c0_i32 = arith.constant 0 : i32
    %c0_i32_0 = arith.constant 0 : i32
    %c0_i32_1 = arith.constant 0 : i32
    return %c0_i32, %c0_i32_0 : i32, i32
  }
  func.func @transform_11(%arg0: i32) -> (i32, i32) {
    %c0_i32 = arith.constant 0 : i32
    %c0_i32_0 = arith.constant 0 : i32
    %c0_i32_1 = arith.constant 0 : i32
    return %c0_i32, %c0_i32_0 : i32, i32
  }
  func.func @transform_12(%arg0: i32) -> (i32, i32) {
    %c0_i32 = arith.constant 0 : i32
    %c0_i32_0 = arith.constant 0 : i32
    %c0_i32_1 = arith.constant 0 : i32
    return %c0_i32, %c0_i32_0 : i32, i32
  }
  func.func @transform_13(%arg0: i32) -> (i32, i32) {
    %c0_i32 = arith.constant 0 : i32
    %c0_i32_0 = arith.constant 0 : i32
    %c0_i32_1 = arith.constant 0 : i32
    return %c0_i32, %c0_i32_0 : i32, i32
  }
  func.func @transform_14(%arg0: i32) -> (i32, i32) {
    %c0_i32 = arith.constant 0 : i32
    %c0_i32_0 = arith.constant 0 : i32
    %c0_i32_1 = arith.constant 0 : i32
    return %c0_i32, %c0_i32_0 : i32, i32
  }
  func.func @transform_15(%arg0: i32) -> (i32, i32) {
    %c0_i32 = arith.constant 0 : i32
    %c0_i32_0 = arith.constant 0 : i32
    %c0_i32_1 = arith.constant 0 : i32
    return %c0_i32, %c0_i32_0 : i32, i32
  }
  func.func @transform_16(%arg0: i32) -> (i32, i32) {
    %c0_i32 = arith.constant 0 : i32
    %c0_i32_0 = arith.constant 0 : i32
    %c0_i32_1 = arith.constant 0 : i32
    return %c0_i32, %c0_i32_0 : i32, i32
  }
  func.func @transform_17(%arg0: i32) -> (i32, i32, i32) {
    %c0_i32 = arith.constant 0 : i32
    %c0_i32_0 = arith.constant 0 : i32
    %c0_i32_1 = arith.constant 0 : i32
    return %arg0, %c0_i32, %c0_i32_0 : i32, i32, i32
  }
  func.func @transform_18(%arg0: i32) -> (i32, i32, i32) {
    %c0_i32 = arith.constant 0 : i32
    %c0_i32_0 = arith.constant 0 : i32
    %c0_i32_1 = arith.constant 0 : i32
    return %arg0, %c0_i32, %c0_i32_0 : i32, i32, i32
  }
}

</mosaic_0001>

<bundles_post_ra>
// kernel: tpu_custom_call.1
= control target key start
LH: loop header
LB: loop body
LE: loop exit
PB: predicated region body
PF: predicated region fallthrough
CT: control target
= control target key end

     0   :  { %s9720_s0 = inlined_call_operand.vmem [shape: f32[32,768], index: 0, kind: input, shape index: {}]   ;;  %s9721_s1 = inlined_call_operand.vmem [shape: f32[160,32], index: 1, kind: input, shape index: {}]   ;;  %s9722_s2 = inlined_call_operand.vmem [shape: f32[32,1], index: 2, kind: input, shape index: {}]   ;;  %s9723_s3 = inlined_call_operand.vmem [shape: f32[128,128], index: 3, kind: input, shape index: {}]   ;;  %s9724_s4 = inlined_call_operand.vmem [shape: f32[32,32], index: 4, kind: input, shape index: {}]   ;;  %s9725_s5 = inlined_call_operand.vmem [shape: f32[32,1], index: 5, kind: input, shape index: {}]   ;;  %s9726_s6 = inlined_call_operand.vmem [shape: f32[32,32], index: 6, kind: input, shape index: {}]   ;;  %s9727_s7 = inlined_call_operand.vmem [shape: f32[32,1], index: 7, kind: input, shape index: {}]   ;;  %s9728_s8 = inlined_call_operand.vmem [shape: f32[32,1], index: 8, kind: input, shape index: {}]   ;;  %s9729_s9 = inlined_call_operand.vmem [shape: f32[32,1], index: 9, kind: input, shape index: {}]   ;;  %s9730_s10 = inlined_call_operand.vmem [shape: f32[128,32], index: 10, kind: input, shape index: {}]   ;;  %s9731_s11 = inlined_call_operand.vmem [shape: f32[128,32], index: 11, kind: input, shape index: {}]   ;;  %s9732_s12 = inlined_call_operand.vmem [shape: f32[128,1], index: 12, kind: input, shape index: {}]   ;;  %s9733_s13 = inlined_call_operand.vmem [shape: f32[32,32], index: 13, kind: input, shape index: {}]   ;;  %s9734_s14 = inlined_call_operand.vmem [shape: f32[32,1], index: 14, kind: input, shape index: {}]   ;;  %s9735_s15 = inlined_call_operand.vmem [shape: f32[32,128], index: 15, kind: input, shape index: {}]   ;;  %s9736_s16 = inlined_call_operand.vmem [shape: f32[1,128], index: 16, kind: input, shape index: {}]   ;;  %s9737_s17 = inlined_call_operand.vmem [shape: f32[2,3,128], index: 17, kind: output, shape index: {0}]   ;;  %s9738_s18 = inlined_call_operand.vmem [shape: f32[2,3,128], index: 18, kind: output, shape index: {1}]  }
   0x1   :  { %9958 = sst [smem:[#allocation100_spill]] %s9720_s0 }
   0x2   :  { %9959 = sst [smem:[#allocation101_spill]] %s9721_s1 }
   0x3   :  { %9960 = sst [smem:[#allocation102_spill]] %s9722_s2 }
   0x4   :  { %s5878_s27 = smov 0   ;;  %s5880_s28 = smov 0  }
   0x5   :  { %s5882_s29 = smov 0  }
   0x6 LB: > { %s5895_s0 = sadd.s32 1, %s5777_s29   ;;  %s36_s1 = sadd.s32 1, %s5773_s28  ;;  %s5777_s29 = sphi %s5882_s29, %s10574_s29   ;;  %s5773_s28 = sphi %s5880_s28, %s10573_s28   ;;  %s5769_s27 = sphi %s5878_s27, %s10572_s27  }
   0x7   : > { %s33_s19 = ssub.s32 %s5777_s29, %s5895_s0  ;;  %p43_p1 = scmp.ne.s32.totalorder %s5773_s28, %s5769_s27 }
   0x8   : > { %p34_p0 = scmp.eq.s32.totalorder %s33_s19, 0  ;;  %p44_p2 = scmp.eq.s32.totalorder %s5777_s29, 0 }
   0x9   : > { %p5026_p4 = scmp.ge.s32.totalorder %s5777_s29, 2 }
   0xa   : > { %s5904_s20 = scalar_select %p34_p0, %s5773_s28, %s36_s1  }
   0xb   : > { %p45_p3 = por %p44_p2, %p43_p1  ;;  %505 = sbr.rel (%p5026_p4) target bundleno = 37 (0x25), region = 80 }
  0x10   : > { %508 = sbr.rel (!%p45_p3) target bundleno = 37 (0x25), region = 84  ;;  %s510_s21 = sand.u32 (%p45_p3), 1, %s5773_s28  }
  0x11   : > { %s5283_s22 = smul.u32 (%p45_p3), 24, %s5777_s29  ;;  %s9961_s25 = sld [smem:[#allocation100_spill]] (%p45_p3) }
  0x12   : > { %s5292_s2 = smul.u32 (%p45_p3), 96, %s510_s21 }
  0x14   : > { %s512_s19 = scalar_lea.vmem (%p45_p3), [#allocation2], %s5292_s2 }
  0x17   : > { %s515_s26 = scalar_lea.vmem %s9961_s25, %s5283_s22 }
  0x18   : > { %v528_v0 = vld [vmem:[%s515_s26] sm:$0xff]  ;;  %v530_v1 = vld [vmem:[%s515_s26 + $0x8] sm:$0xff]  ;;  %v532_v2 = vld [vmem:[%s515_s26 + $0x10] sm:$0xff] }
  0x19   : > { %529 = vst [vmem:[%s512_s19] sm:$0xff] %v528_v0  ;;  %v534_v3 = vld [vmem:[%s515_s26 + $0x30] sm:$0xff]  ;;  %v536_v4 = vld [vmem:[%s515_s26 + $0x38] sm:$0xff]  ;;  %v538_v5 = vld [vmem:[%s515_s26 + $0x40] sm:$0xff] }
  0x1a   : > { %531 = vst [vmem:[%s512_s19 + $0x8] sm:$0xff] %v530_v1  ;;  %v540_v6 = vld [vmem:[%s515_s26 + $0x60] sm:$0xff]  ;;  %v542_v7 = vld [vmem:[%s515_s26 + $0x68] sm:$0xff]  ;;  %v544_v8 = vld [vmem:[%s515_s26 + $0x70] sm:$0xff] }
  0x1b   : > { %533 = vst [vmem:[%s512_s19 + $0x10] sm:$0xff] %v532_v2  ;;  %v546_v9 = vld [vmem:[%s515_s26 + $0x90] sm:$0xff]  ;;  %v548_v10 = vld [vmem:[%s515_s26 + $0x98] sm:$0xff]  ;;  %v550_v11 = vld [vmem:[%s515_s26 + $0xa0] sm:$0xff] }
  0x1c   : > { %535 = vst [vmem:[%s512_s19 + $0x18] sm:$0xff] %v534_v3 }
  0x1d   : > { %537 = vst [vmem:[%s512_s19 + $0x20] sm:$0xff] %v536_v4 }
  0x1e   : > { %539 = vst [vmem:[%s512_s19 + $0x28] sm:$0xff] %v538_v5 }
  0x1f   : > { %541 = vst [vmem:[%s512_s19 + $0x30] sm:$0xff] %v540_v6 }
  0x20   : > { %543 = vst [vmem:[%s512_s19 + $0x38] sm:$0xff] %v542_v7 }
  0x21   : > { %545 = vst [vmem:[%s512_s19 + $0x40] sm:$0xff] %v544_v8 }
  0x22   : > { %547 = vst [vmem:[%s512_s19 + $0x48] sm:$0xff] %v546_v9 }
  0x23   : > { %549 = vst [vmem:[%s512_s19 + $0x50] sm:$0xff] %v548_v10 }
  0x24   : > { %551 = vst [vmem:[%s512_s19 + $0x58] sm:$0xff] %v550_v11 }
  0x25 PF: > { %p5028_p5 = scmp.ge.s32.totalorder %s5777_s29, 1  ;;  %p556_p6 = scmp.lt.s32.totalorder %s5777_s29, 3 }
  0x27   : > { %p557_p7 = pnand %p5028_p5, %p556_p6 }
  0x29   : > { %560 = sbr.rel (%p557_p7) target bundleno = 2120 (0x848), region = 107 }
  0x2e   : > { %s563_s1 = sand.u32 1, %s5769_s27   ;;  %v9741_v12 = vmov 0   ;;  %s9962_s23 = sld [smem:[#allocation102_spill]]  ;;  %vm9856_vm0 = vcmask 261120  }
  0x2f   : > { %s5293_s21 = smul.u32 96, %s563_s1  ;;  %5323 = vset.pattern.permute.xlu1 %v9741_v12  ;;  %5322 = vset.pattern.permute.xlu0 %v9741_v12  ;;  %s9963_s1 = sld [smem:[#allocation101_spill]] }
  0x30   : > { %5324 = vset.pattern.permute.xlu2 %v9741_v12  ;;  %s10324_s25 = sadd.s32 4294967295, %s5777_s29  }
  0x31   : > { %s5921_s24 = scalar_lea.vmem [#allocation2], %s5293_s21  ;;  %p620_p8 = scmp.lt.s32.totalorder %s10324_s25, 1 }
  0x32   : > { %v637_v14 = vld [vmem:[%s5921_s24 + $0x48] sm:$0xff]  ;;  %v638_v15 = vld [vmem:[%s5921_s24 + $0x50] sm:$0xff]  ;;  %v635_v17 = vld [vmem:[%s5921_s24 + $0x38] sm:$0xff]  ;;  %s10326_s26 = smov %s10324_s25 }
  0x33   : > { %v634_v16 = vld [vmem:[%s5921_s24 + $0x30] sm:$0xff]  ;;  %733 = vmatpush.msra.mxu0 %v637_v14  ;;  %5284 = vmatpush.msra.mxu2 %v637_v14  ;;  %v631_v18 = vld [vmem:[%s5921_s24 + $0x18] sm:$0xff]  ;;  %v632_v19 = vld [vmem:[%s5921_s24 + $0x20] sm:$0xff]  ;;  %s10576_s26 = smov (!%p620_p8, %s10326_s26), 1 }
  0x34   : > { %v954_v13 = vld [vmem:[%s9962_s23 + $0x10] sm:$0xff]  ;;  %810 = vmatpush.msra.mxu1 %v638_v15  ;;  %v628_v20 = vld [vmem:[%s5921_s24] sm:$0xff]  ;;  %v955_v21 = vld [vmem:[%s9962_s23 + $0x18] sm:$0xff]  ;;  %s5029_s30 = sshll.u32 %s10576_s26, 2 }
  0x35   : > { %968 = vperm.xlu1 %5323, %v954_v13   ;;  %734 = vmatpush.msra.mxu0 %v634_v16  ;;  %v629_v22 = vld [vmem:[%s5921_s24 + $0x8] sm:$0xff]  ;;  %v640_v23 = vld [vmem:[%s9963_s1] sm:$0xff]  ;;  %v5940_v24 = vld [vmem:[%s9963_s1 + $0x98] sm:$0xff]  ;;  %s8089_s19 = scalar_lea.vmem %s9737_s17, %s5029_s30  ;;  %s627_s25 = scalar_lea.vmem %s9738_s18, %s5029_s30 }
  0x36   : > { %5285 = vmatpush.msra.mxu2 %v634_v16  ;;  %811 = vmatpush.msra.mxu1 %v635_v17  ;;  %v641_v25 = vld [vmem:[%s9963_s1 + $0x8] sm:$0xff]  ;;  %v639_v26 = vld [vmem:[%s5921_s24 + $0x58] sm:$0xff]  ;;  %v636_v27 = vld [vmem:[%s5921_s24 + $0x40] sm:$0xff] }
  0x37   : > { %735 = vmatpush.msra.mxu0 %v631_v18  ;;  %v633_v28 = vld [vmem:[%s5921_s24 + $0x28] sm:$0xff]  ;;  %v630_v29 = vld [vmem:[%s5921_s24 + $0x10] sm:$0xff]  ;;  %v643_v31 = vld [vmem:[%s9963_s1 + $0x18] sm:$0xff] }
  0x38   : > { %5286 = vmatpush.msra.mxu2 %v631_v18  ;;  %812 = vmatpush.msra.mxu1 %v632_v19  ;;  %v642_v30 = vld [vmem:[%s9963_s1 + $0x10] sm:$0xff]  ;;  %v644_v32 = vld [vmem:[%s9963_s1 + $0x20] sm:$0xff]  ;;  %v645_v33 = vld [vmem:[%s9963_s1 + $0x28] sm:$0xff] }
  0x39   : > { %736 = vmatpush.msra.mxu0 %v628_v20  ;;  %v646_v34 = vld [vmem:[%s9963_s1 + $0x30] sm:$0xff]  ;;  %v647_v35 = vld [vmem:[%s9963_s1 + $0x38] sm:$0xff]  ;;  %v648_v36 = vld [vmem:[%s9963_s1 + $0x40] sm:$0xff] }
  0x3a   : > { %5287 = vmatpush.msra.mxu2 %v628_v20  ;;  %813 = vmatpush.msra.mxu1 %v629_v22  ;;  %v649_v37 = vld [vmem:[%s9963_s1 + $0x48] sm:$0xff]  ;;  %v650_v38 = vld [vmem:[%s9963_s1 + $0x50] sm:$0xff]  ;;  %v651_v39 = vld [vmem:[%s9963_s1 + $0x58] sm:$0xff] }
  0x3b   : > { %5031 = vmatmul.msk.f32.vlgmr.msra.gmra.mxu0 %vm9856_vm0, %v640_v23  ;;  %5050 = vmatmul.msk.f32.vlgmr.msra.gmra.mxu2 %vm9856_vm0, %v5940_v24  ;;  %v652_v40 = vld [vmem:[%s9963_s1 + $0x60] sm:$0xff]  ;;  %v653_v41 = vld [vmem:[%s9963_s1 + $0x68] sm:$0xff]  ;;  %v654_v42 = vld [vmem:[%s9963_s1 + $0x70] sm:$0xff] }
  0x3c   : > { %5051 = vmatmul.msk.f32.vlgmr.msra.gmra.mxu1 %vm9856_vm0, %v640_v23  ;;  %5288 = vmatpush.msrb.mxu2 %v638_v15  ;;  %v655_v43 = vld [vmem:[%s9963_s1 + $0x78] sm:$0xff]  ;;  %v656_v8 = vld [vmem:[%s9963_s1 + $0x80] sm:$0xff] }
  0x3d   : > { %973 = vperm.xlu1 %5323, %v955_v21  }
  0x3e   : > { %5289 = vmatpush.msrb.mxu2 %v635_v17 }
  0x40   : > { %5290 = vmatpush.msrb.mxu2 %v632_v19 }
  0x42   : > { %5291 = vmatpush.msrb.mxu2 %v629_v22 }
  0x43   : > { %5032 = vmatmul.msk.f32.gmra.mxu0 %vm9856_vm0, %v641_v25  ;;  %5070 = vmatmul.msk.f32.vlgmr.msrb.gmra.mxu2 %vm9856_vm0, %v5940_v24 }
  0x44   : > { %5052 = vmatmul.msk.f32.gmra.mxu1 %vm9856_vm0, %v641_v25  ;;  %887 = vmatpush.msra.mxu2 %v639_v26  ;;  %v657_v26 = vld [vmem:[%s9963_s1 + $0x88] sm:$0xff] }
  0x46   : > { %888 = vmatpush.msra.mxu2 %v636_v27 }
  0x48   : > { %889 = vmatpush.msra.mxu2 %v633_v28  ;;  %v952_v28 = vld [vmem:[%s9962_s23] sm:$0xff] }
  0x49   : > { %958 = vperm.xlu0 %5322, %v952_v28  }
  0x4a   : > { %890 = vmatpush.msra.mxu2 %v630_v29 }
  0x4b   : > { %5033 = vmatmul.msk.f32.gmra.mxu0 %vm9856_vm0, %v642_v30  ;;  %5071 = vmatmul.msk.f32.vlgmr.msra.gmra.mxu2 %vm9856_vm0, %v640_v23 }
  0x4c   : > { %5053 = vmatmul.msk.f32.gmra.mxu1 %vm9856_vm0, %v642_v30 }
  0x53   : > { %5034 = vmatmul.msk.f32.gmra.mxu0 %vm9856_vm0, %v643_v31  ;;  %5072 = vmatmul.msk.f32.gmra.mxu2 %vm9856_vm0, %v641_v25 }
  0x54   : > { %5054 = vmatmul.msk.f32.gmra.mxu1 %vm9856_vm0, %v643_v31 }
  0x5b   : > { %5035 = vmatmul.msk.f32.gmra.mxu0 %vm9856_vm0, %v644_v32  ;;  %5073 = vmatmul.msk.f32.gmra.mxu2 %vm9856_vm0, %v642_v30 }
  0x5c   : > { %5055 = vmatmul.msk.f32.gmra.mxu1 %vm9856_vm0, %v644_v32 }
  0x63   : > { %5036 = vmatmul.msk.f32.gmra.mxu0 %vm9856_vm0, %v645_v33  ;;  %5074 = vmatmul.msk.f32.gmra.mxu2 %vm9856_vm0, %v643_v31 }
  0x64   : > { %5056 = vmatmul.msk.f32.gmra.mxu1 %vm9856_vm0, %v645_v33 }
  0x6b   : > { %5037 = vmatmul.msk.f32.gmra.mxu0 %vm9856_vm0, %v646_v34  ;;  %5075 = vmatmul.msk.f32.gmra.mxu2 %vm9856_vm0, %v644_v32 }
  0x6c   : > { %5057 = vmatmul.msk.f32.gmra.mxu1 %vm9856_vm0, %v646_v34 }
  0x73   : > { %5038 = vmatmul.msk.f32.gmra.mxu0 %vm9856_vm0, %v647_v35  ;;  %5076 = vmatmul.msk.f32.gmra.mxu2 %vm9856_vm0, %v645_v33 }
  0x74   : > { %5058 = vmatmul.msk.f32.gmra.mxu1 %vm9856_vm0, %v647_v35 }
  0x7b   : > { %5039 = vmatmul.msk.f32.gmra.mxu0 %vm9856_vm0, %v648_v36  ;;  %5077 = vmatmul.msk.f32.gmra.mxu2 %vm9856_vm0, %v646_v34 }
  0x7c   : > { %5059 = vmatmul.msk.f32.gmra.mxu1 %vm9856_vm0, %v648_v36 }
  0x83   : > { %5040 = vmatmul.msk.f32.gmra.mxu0 %vm9856_vm0, %v649_v37  ;;  %5078 = vmatmul.msk.f32.gmra.mxu2 %vm9856_vm0, %v647_v35 }
  0x84   : > { %5060 = vmatmul.msk.f32.gmra.mxu1 %vm9856_vm0, %v649_v37 }
  0x8b   : > { %5041 = vmatmul.msk.f32.gmra.mxu0 %vm9856_vm0, %v650_v38  ;;  %5079 = vmatmul.msk.f32.gmra.mxu2 %vm9856_vm0, %v648_v36 }
  0x8c   : > { %5061 = vmatmul.msk.f32.gmra.mxu1 %vm9856_vm0, %v650_v38 }
  0x93   : > { %5042 = vmatmul.msk.f32.gmra.mxu0 %vm9856_vm0, %v651_v39  ;;  %5080 = vmatmul.msk.f32.gmra.mxu2 %vm9856_vm0, %v649_v37 }
  0x94   : > { %5062 = vmatmul.msk.f32.gmra.mxu1 %vm9856_vm0, %v651_v39 }
  0x9b   : > { %5043 = vmatmul.msk.f32.gmra.mxu0 %vm9856_vm0, %v652_v40  ;;  %5081 = vmatmul.msk.f32.gmra.mxu2 %vm9856_vm0, %v650_v38 }
  0x9c   : > { %5063 = vmatmul.msk.f32.gmra.mxu1 %vm9856_vm0, %v652_v40 }
  0xa3   : > { %5044 = vmatmul.msk.f32.gmra.mxu0 %vm9856_vm0, %v653_v41  ;;  %5082 = vmatmul.msk.f32.gmra.mxu2 %vm9856_vm0, %v651_v39 }
  0xa4   : > { %5064 = vmatmul.msk.f32.gmra.mxu1 %vm9856_vm0, %v653_v41 }
  0xab   : > { %5045 = vmatmul.msk.f32.gmra.mxu0 %vm9856_vm0, %v654_v42  ;;  %5083 = vmatmul.msk.f32.gmra.mxu2 %vm9856_vm0, %v652_v40 }
  0xac   : > { %5065 = vmatmul.msk.f32.gmra.mxu1 %vm9856_vm0, %v654_v42 }
  0xb3   : > { %5046 = vmatmul.msk.f32.gmra.mxu0 %vm9856_vm0, %v655_v43  ;;  %5084 = vmatmul.msk.f32.gmra.mxu2 %vm9856_vm0, %v653_v41 }
  0xb4   : > { %5066 = vmatmul.msk.f32.gmra.mxu1 %vm9856_vm0, %v655_v43 }
  0xb8   : > { %v6041_v44 = vpop.f32.mrf.mxu0 }
  0xb9   : > { %9964 = vst [vmem:[#allocation3_spill] sm:$0xff] %v6041_v44  ;;  %v6043_v45 = vpop.f32.mrf.mxu1  ;;  %v5092_v55 = vmul.f32 -1.442695, %v6041_v44 }
  0xba   : > { %9965 = vst [vmem:[#allocation4_spill] sm:$0xff] %v6043_v45  ;;  %v5093_v56 = vmul.f32 -1.442695, %v6043_v45 }
  0xbb   : > { %5085 = vmatmul.msk.f32.gmra.mxu2 %vm9856_vm0, %v654_v42  ;;  %5371 = vpow2.f32 %v5092_v55  ;;  %5047 = vmatmul.msk.f32.gmra.mxu0 %vm9856_vm0, %v656_v8 }
  0xbc   : > { %5373 = vpow2.f32 %v5093_v56  ;;  %5067 = vmatmul.msk.f32.gmra.mxu1 %vm9856_vm0, %v656_v8 }
  0xbe   : > { %v6046_v46 = vpop.f32.mrf.mxu2 }
  0xbf   : > { %9966 = vst [vmem:[#allocation5_spill] sm:$0xff] %v6046_v46 }
  0xc0   : > { %v6048_v47 = vpop.f32.mrf.mxu0 }
  0xc1   : > { %9967 = vst [vmem:[#allocation6_spill] sm:$0xff] %v6048_v47  ;;  %v6050_v48 = vpop.f32.mrf.mxu1  ;;  %v5095_v57 = vmul.f32 -1.442695, %v6048_v47  ;;  %v5372_v63 = vpop.eup %5371 }
  0xc2   : > { %9968 = vst [vmem:[#allocation7_spill] sm:$0xff] %v6050_v48  ;;  %v5096_v61 = vmul.f32 -1.442695, %v6050_v48  ;;  %v5374_v1 = vpop.eup %5373  ;;  %v6082_v6 = vadd.f32 1.0, %v5372_v63  ;;  %v953_v63 = vld [vmem:[%s9962_s23 + $0x8] sm:$0xff] }
  0xc3   : > { %5086 = vmatmul.msk.f32.gmra.mxu2 %vm9856_vm0, %v655_v43  ;;  %5375 = vpow2.f32 %v5095_v57  ;;  %v6089_v9 = vadd.f32 1.0, %v5374_v1  ;;  %5048 = vmatmul.msk.f32.gmra.mxu0 %vm9856_vm0, %v657_v26  ;;  %v658_v57 = vld [vmem:[%s9963_s1 + $0x90] sm:$0xff] }
  0xc4   : > { %5377 = vpow2.f32 %v5096_v61  ;;  %9980 = vst [vmem:[#allocation19_spill] sm:$0xff] %v6082_v6  ;;  %5068 = vmatmul.msk.f32.gmra.mxu1 %vm9856_vm0, %v657_v26  ;;  %963 = vperm.xlu0 %5322, %v953_v63  }
  0xc5   : > { %9982 = vst [vmem:[#allocation21_spill] sm:$0xff] %v6089_v9 }
  0xc6   : > { %v6053_v49 = vpop.f32.mrf.mxu2 }
  0xc7   : > { %9969 = vst [vmem:[#allocation8_spill] sm:$0xff] %v6053_v49 }
  0xc8   : > { %v6055_v50 = vpop.f32.mrf.mxu0 }
  0xc9   : > { %9970 = vst [vmem:[#allocation9_spill] sm:$0xff] %v6055_v50  ;;  %v6057_v51 = vpop.f32.mrf.mxu1  ;;  %v5098_v62 = vmul.f32 -1.442695, %v6055_v50  ;;  %v5376_v4 = vpop.eup %5375 }
  0xca   : > { %9971 = vst [vmem:[#allocation10_spill] sm:$0xff] %v6057_v51  ;;  %v5099_v0 = vmul.f32 -1.442695, %v6057_v51  ;;  %v6093_v10 = vadd.f32 1.0, %v5376_v4  ;;  %v5378_v13 = vpop.eup %5377 }
  0xcb   : > { %5379 = vpow2.f32 %v5098_v62  ;;  %5087 = vmatmul.msk.f32.gmra.mxu2 %vm9856_vm0, %v656_v8  ;;  %v6105_v20 = vadd.f32 1.0, %v5378_v13  ;;  %5049 = vmatmul.msk.f32.gmra.mxu0 %vm9856_vm0, %v658_v57 }
  0xcc   : > { %5381 = vpow2.f32 %v5099_v0  ;;  %9983 = vst [vmem:[#allocation22_spill] sm:$0xff] %v6093_v10  ;;  %5069 = vmatmul.msk.f32.gmra.mxu1 %vm9856_vm0, %v658_v57 }
  0xcd   : > { %9985 = vst [vmem:[#allocation24_spill] sm:$0xff] %v6105_v20 }
  0xce   : > { %v6059_v52 = vpop.f32.mrf.mxu2 }
  0xcf   : > { %9972 = vst [vmem:[#allocation11_spill] sm:$0xff] %v6059_v52  ;;  %v5094_v2 = vmul.f32 -1.442695, %v6059_v52 }
  0xd0   : > { %v6061_v53 = vpop.f32.mrf.mxu0 }
  0xd1   : > { %9973 = vst [vmem:[#allocation12_spill] sm:$0xff] %v6061_v53  ;;  %v6063_v54 = vpop.f32.mrf.mxu1  ;;  %5383 = vpow2.f32 %v5094_v2  ;;  %v5101_v11 = vmul.f32 -1.442695, %v6061_v53  ;;  %v5380_v15 = vpop.eup %5379 }
  0xd2   : > { %9974 = vst [vmem:[#allocation13_spill] sm:$0xff] %v6063_v54  ;;  %5385 = vrcp.f32 %v6082_v6  ;;  %v5102_v14 = vmul.f32 -1.442695, %v6063_v54  ;;  %v5382_v19 = vpop.eup %5381  ;;  %v6109_v23 = vadd.f32 1.0, %v5380_v15 }
  0xd3   : > { %5387 = vrcp.f32 %v6089_v9  ;;  %5088 = vmatmul.msk.f32.gmra.mxu2 %vm9856_vm0, %v657_v26  ;;  %v6124_v30 = vadd.f32 1.0, %v5382_v19 }
  0xd4   : > { %5389 = vrcp.f32 %v6093_v10  ;;  %9987 = vst [vmem:[#allocation26_spill] sm:$0xff] %v6109_v23 }
  0xd5   : > { %5391 = vpow2.f32 %v5101_v11  ;;  %9990 = vst [vmem:[#allocation29_spill] sm:$0xff] %v6124_v30 }
  0xd6   : > { %v6068_v58 = vpop.f32.mrf.mxu2  ;;  %5393 = vpow2.f32 %v5102_v14 }
  0xd7   : > { %9975 = vst [vmem:[#allocation14_spill] sm:$0xff] %v6068_v58  ;;  %v5097_v16 = vmul.f32 -1.442695, %v6068_v58  ;;  %v5384_v22 = vpop.eup %5383 }
  0xd8   : > { %v6070_v59 = vpop.f32.mrf.mxu0  ;;  %v6122_v29 = vpop.eup %5385  ;;  %v6130_v32 = vadd.f32 1.0, %v5384_v22 }
  0xd9   : > { %9976 = vst [vmem:[#allocation15_spill] sm:$0xff] %v6070_v59  ;;  %v6072_v60 = vpop.f32.mrf.mxu1  ;;  %v5104_v17 = vmul.f32 -1.442695, %v6070_v59  ;;  %5395 = vpow2.f32 %v5097_v16  ;;  %v6127_v31 = vpop.eup %5387 }
  0xda   : > { %9977 = vst [vmem:[#allocation16_spill] sm:$0xff] %v6072_v60  ;;  %v5105_v27 = vmul.f32 -1.442695, %v6072_v60  ;;  %v6132_v33 = vpop.eup %5389 }
  0xdb   : > { %9989 = vst [vmem:[#allocation28_spill] sm:$0xff] %v6122_v29  ;;  %5397 = vpow2.f32 %v5104_v17  ;;  %v5392_v35 = vpop.eup %5391  ;;  %5089 = vmatmul.msk.f32.gmra.mxu2 %vm9856_vm0, %v658_v57 }
  0xdc   : > { %9991 = vst [vmem:[#allocation30_spill] sm:$0xff] %v6127_v31  ;;  %5399 = vrcp.f32 %v6105_v20  ;;  %v5394_v37 = vpop.eup %5393  ;;  %v6145_v55 = vadd.f32 1.0, %v5392_v35 }
  0xdd   : > { %9992 = vst [vmem:[#allocation31_spill] sm:$0xff] %v6130_v32  ;;  %5401 = vrcp.f32 %v6109_v23  ;;  %v6154_v62 = vadd.f32 1.0, %v5394_v37  ;;  %v2510_v37 = vld [vmem:[%s9725_s5 + $0x8] sm:$0xff] }
  0xde   : > { %v6078_v3 = vpop.f32.mrf.mxu2  ;;  %9993 = vst [vmem:[#allocation32_spill] sm:$0xff] %v6132_v33  ;;  %5403 = vpow2.f32 %v5105_v27  ;;  %2520 = vperm.xlu0 %5322, %v2510_v37  }
  0xdf   : > { %9978 = vst [vmem:[#allocation17_spill] sm:$0xff] %v6078_v3  ;;  %v5100_v34 = vmul.f32 -1.442695, %v6078_v3  ;;  %5405 = vrcp.f32 %v6124_v30  ;;  %v5396_v40 = vpop.eup %5395 }
  0xe0   : > { %v6080_v5 = vpop.f32.mrf.mxu0  ;;  %5407 = vrcp.f32 %v6130_v32  ;;  %9996 = vst [vmem:[#allocation35_spill] sm:$0xff] %v6145_v55  ;;  %v6163_v1 = vadd.f32 1.0, %v5396_v40 }
  0xe1   : > { %9979 = vst [vmem:[#allocation18_spill] sm:$0xff] %v6080_v5  ;;  %v6084_v7 = vpop.f32.mrf.mxu1  ;;  %v5107_v36 = vmul.f32 -1.442695, %v6080_v5  ;;  %v5398_v43 = vpop.eup %5397  ;;  %5409 = vpow2.f32 %v5100_v34 }
  0xe2   : > { %9981 = vst [vmem:[#allocation20_spill] sm:$0xff] %v6084_v7  ;;  %v5108_v38 = vmul.f32 -1.442695, %v6084_v7  ;;  %v6152_v61 = vpop.eup %5399  ;;  %v6166_v4 = vadd.f32 1.0, %v5398_v43 }
  0xe3   : > { %9998 = vst [vmem:[#allocation37_spill] sm:$0xff] %v6152_v61  ;;  %5411 = vpow2.f32 %v5107_v36  ;;  %v6161_v0 = vpop.eup %5401  ;;  %5090 = vmatmul.msk.f32.gmra.mxu2 %vm9856_vm0, %v5940_v24 }
  0xe4   : > { %9999 = vst [vmem:[#allocation38_spill] sm:$0xff] %v6154_v62  ;;  %5413 = vpow2.f32 %v5108_v38  ;;  %v5404_v2 = vpop.eup %5403 }
  0xe5   : > { %10000 = vst [vmem:[#allocation39_spill] sm:$0xff] %v6161_v0  ;;  %v6168_v8 = vpop.eup %5405  ;;  %v6177_v16 = vadd.f32 1.0, %v5404_v2 }
  0xe6   : > { %v6103_v18 = vpop.f32.mrf.mxu2  ;;  %10001 = vst [vmem:[#allocation40_spill] sm:$0xff] %v6163_v1  ;;  %v6172_v13 = vpop.eup %5407 }
  0xe7   : > { %9984 = vst [vmem:[#allocation23_spill] sm:$0xff] %v6103_v18  ;;  %v5103_v41 = vmul.f32 -1.442695, %v6103_v18  ;;  %v5410_v15 = vpop.eup %5409 }
  0xe8   : > { %v6107_v21 = vpop.f32.mrf.mxu0  ;;  %10002 = vst [vmem:[#allocation41_spill] sm:$0xff] %v6166_v4  ;;  %v6188_v36 = vadd.f32 1.0, %v5410_v15 }
  0xe9   : > { %9986 = vst [vmem:[#allocation25_spill] sm:$0xff] %v6107_v21  ;;  %v6111_v25 = vpop.f32.mrf.mxu1  ;;  %5415 = vpow2.f32 %v5103_v41  ;;  %v5110_v11 = vmul.f32 -1.442695, %v6107_v21  ;;  %v5412_v19 = vpop.eup %5411 }
  0xea   : > { %9988 = vst [vmem:[#allocation27_spill] sm:$0xff] %v6111_v25  ;;  %5417 = vrcp.f32 %v6145_v55  ;;  %v5111_v14 = vmul.f32 -1.442695, %v6111_v25  ;;  %v5414_v26 = vpop.eup %5413  ;;  %v6198_v40 = vadd.f32 1.0, %v5412_v19 }
  0xeb   : > { %10003 = vst [vmem:[#allocation42_spill] sm:$0xff] %v6168_v8  ;;  %5419 = vrcp.f32 %v6154_v62  ;;  %v6202_v43 = vadd.f32 1.0, %v5414_v26 }
  0xec   : > { %10004 = vst [vmem:[#allocation43_spill] sm:$0xff] %v6172_v13  ;;  %5421 = vrcp.f32 %v6163_v1 }
  0xed   : > { %10005 = vst [vmem:[#allocation44_spill] sm:$0xff] %v6177_v16  ;;  %5423 = vrcp.f32 %v6166_v4 }
  0xee   : > { %v6139_v39 = vpop.f32.mrf.mxu2  ;;  %5425 = vpow2.f32 %v5110_v11  ;;  %10009 = vst [vmem:[#allocation48_spill] sm:$0xff] %v6188_v36 }
  0xef   : > { %9994 = vst [vmem:[#allocation33_spill] sm:$0xff] %v6139_v39  ;;  %v5106_v27 = vmul.f32 -1.442695, %v6139_v39  ;;  %v5416_v35 = vpop.eup %5415  ;;  %5427 = vpow2.f32 %v5111_v14 }
  0xf0   : > { %v6143_v42 = vpop.f32.mrf.mxu0  ;;  %v6195_v38 = vpop.eup %5417  ;;  %5429 = vrcp.f32 %v6177_v16  ;;  %10011 = vst [vmem:[#allocation50_spill] sm:$0xff] %v6198_v40  ;;  %v6206_v63 = vadd.f32 1.0, %v5416_v35 }
  0xf1   : > { %9995 = vst [vmem:[#allocation34_spill] sm:$0xff] %v6143_v42  ;;  %v6147_v56 = vpop.f32.mrf.mxu1  ;;  %v6200_v41 = vpop.eup %5419  ;;  %v5113_v2 = vmul.f32 -1.442695, %v6143_v42 }
  0xf2   : > { %9997 = vst [vmem:[#allocation36_spill] sm:$0xff] %v6147_v56  ;;  %v6204_v57 = vpop.eup %5421  ;;  %v5114_v14 = vmul.f32 -1.442695, %v6147_v56  ;;  %v988_v56 = vlaneseq }
  0xf3   : > { %10010 = vst [vmem:[#allocation49_spill] sm:$0xff] %v6195_v38  ;;  %v6208_v24 = vpop.eup %5423 }
  0xf4   : > { %10012 = vst [vmem:[#allocation51_spill] sm:$0xff] %v6200_v41  ;;  %v5426_v11 = vpop.eup %5425 }
  0xf5   : > { %10013 = vst [vmem:[#allocation52_spill] sm:$0xff] %v6202_v43  ;;  %v5428_v19 = vpop.eup %5427  ;;  %v6226_v39 = vadd.f32 1.0, %v5426_v11 }
  0xf6   : > { %v6179_v17 = vpop.f32.mrf.mxu2  ;;  %10014 = vst [vmem:[#allocation53_spill] sm:$0xff] %v6204_v57  ;;  %v6228_v3 = vadd.f32 1.0, %v5428_v19 }
  0xf7   : > { %10006 = vst [vmem:[#allocation45_spill] sm:$0xff] %v6179_v17 }
  0xf8   : > { %v6182_v22 = vpop.f32.mrf.mxu0  ;;  %10015 = vst [vmem:[#allocation54_spill] sm:$0xff] %v6206_v63 }
  0xf9   : > { %10007 = vst [vmem:[#allocation46_spill] sm:$0xff] %v6182_v22  ;;  %v5116_v28 = vmul.f32 -1.442695, %v6182_v22  ;;  %v6186_v34 = vpop.f32.mrf.mxu1 }
  0xfa   : > { %10008 = vst [vmem:[#allocation47_spill] sm:$0xff] %v6186_v34 }
  0xfb   : > { %5431 = vpow2.f32 %v5116_v28  ;;  %10016 = vst [vmem:[#allocation55_spill] sm:$0xff] %v6208_v24  ;;  %v6219_v28 = vpop.eup %5429 }
  0xfc   : > { %5433 = vpow2.f32 %v5106_v27  ;;  %10019 = vst [vmem:[#allocation58_spill] sm:$0xff] %v6219_v28  ;;  %v5117_v27 = vmul.f32 -1.442695, %v6186_v34  ;;  %v5109_v34 = vmul.f32 -1.442695, %v6179_v17 }
  0xfd   : > { %5435 = vrcp.f32 %v6188_v36 }
  0xfe   : > { %5437 = vrcp.f32 %v6198_v40  ;;  %v6214_v15 = vpop.f32.mrf.mxu2 }
  0xff   : > { %10017 = vst [vmem:[#allocation56_spill] sm:$0xff] %v6214_v15  ;;  %5439 = vrcp.f32 %v6202_v43 }
 0x100   : > { %v6217_v26 = vpop.f32.mrf.mxu0  ;;  %5441 = vrcp.f32 %v6206_v63 }
 0x101   : > { %10018 = vst [vmem:[#allocation57_spill] sm:$0xff] %v6217_v26  ;;  %v5119_v35 = vmul.f32 -1.442695, %v6217_v26  ;;  %v6224_v37 = vpop.f32.mrf.mxu1  ;;  %v5432_v12 = vpop.eup %5431  ;;  %5443 = vpow2.f32 %v5113_v2 }
 0x102   : > { %10020 = vst [vmem:[#allocation59_spill] sm:$0xff] %v6224_v37  ;;  %v5434_v58 = vpop.eup %5433  ;;  %5445 = vpow2.f32 %v5114_v14  ;;  %v6232_v51 = vadd.f32 1.0, %v5432_v12  ;;  %v5112_v14 = vmul.f32 -1.442695, %v6214_v15  ;;  %v2509_v15 = vld [vmem:[%s9725_s5] sm:$0xff] }
 0x103   : > { %v6230_v7 = vpop.eup %5435  ;;  %5447 = vpow2.f32 %v5119_v35  ;;  %v6240_v11 = vadd.f32 1.0, %v5434_v58  ;;  %2515 = vperm.xlu1 %5323, %v2509_v15  }
 0x104   : > { %10021 = vst [vmem:[#allocation60_spill] sm:$0xff] %v6230_v7  ;;  %v6234_v18 = vpop.eup %5437  ;;  %5449 = vpow2.f32 %v5117_v27  ;;  %vm1602_vm2 = vweird.f32 %v6232_v51 }
 0x105   : > { %10022 = vst [vmem:[#allocation61_spill] sm:$0xff] %v6234_v18  ;;  %v6237_v25 = vpop.eup %5439  ;;  %5451 = vrcp.f32 %v6226_v39 }
 0x106   : > { %10023 = vst [vmem:[#allocation62_spill] sm:$0xff] %v6237_v25  ;;  %v6242_v2 = vpop.eup %5441  ;;  %5453 = vrcp.f32 %v6228_v3  ;;  %v6246_v12 = vpop.f32.mrf.mxu2 }
 0x107   : > { %10024 = vst [vmem:[#allocation63_spill] sm:$0xff] %v6240_v11  ;;  %v5444_v19 = vpop.eup %5443  ;;  %5455 = vrcp.f32 %v6232_v51 }
 0x108   : > { %10025 = vst [vmem:[#allocation64_spill] sm:$0xff] %v6242_v2  ;;  %v6249_v35 = vpop.f32.mrf.mxu0  ;;  %v5446_v27 = vpop.eup %5445  ;;  %5457 = vpow2.f32 %v5109_v34  ;;  %v6259_v26 = vadd.f32 1.0, %v5444_v19 }
 0x109   : > { %10026 = vst [vmem:[#allocation65_spill] sm:$0xff] %v6246_v12  ;;  %v5122_v17 = vmul.f32 -1.442695, %v6249_v35  ;;  %v6252_v52 = vpop.f32.mrf.mxu1  ;;  %v5448_v58 = vpop.eup %5447  ;;  %5459 = vrcp.f32 %v6240_v11 }
 0x10a   : > { %10027 = vst [vmem:[#allocation66_spill] sm:$0xff] %v6249_v35  ;;  %v5123_v54 = vmul.f32 -1.442695, %v6252_v52  ;;  %v5450_v45 = vpop.eup %5449  ;;  %5461 = vpow2.f32 %v5112_v14  ;;  %v6261_v21 = vadd.f32 1.0, %v5448_v58  ;;  %v6265_v35 = vadd.f32 1.0, %v5446_v27 }
 0x10b   : > { %10028 = vst [vmem:[#allocation67_spill] sm:$0xff] %v6252_v52  ;;  %v6263_v34 = vpop.eup %5451  ;;  %5463 = vpow2.f32 %v5122_v17  ;;  %v5120_v52 = vmul.f32 -1.442695, %v6224_v37  ;;  %v6273_v19 = vadd.f32 1.0, %v5450_v45  ;;  %v6280_v27 = vand.u32 127, %v988_v56 }
 0x10c   : > { %v6267_v53 = vpop.eup %5453  ;;  %5465 = vrcp.f32 %v6261_v21  ;;  %v1651_v7 = vand.u32 2147483647, %v6261_v21  ;;  %v1653_v36 = vand.u32 2147483648, %v6261_v21  ;;  %vm1647_vm5 = vweird.f32 %v6261_v21 }
 0x10d   : > { %v6271_v60 = vpop.eup %5455  ;;  %5467 = vpow2.f32 %v5123_v54  ;;  %10031 = vst [vmem:[#allocation70_spill] sm:$0xff] %v6280_v27  ;;  %vm990_vm1 = vcmp.lt.s32.totalorder %v6280_v27, 16 }
 0x10e   : > { %v5458_v14 = vpop.eup %5457  ;;  %5469 = vrcp.f32 %v6259_v26  ;;  %v6276_v15 = vpop.f32.mrf.mxu2  ;;  %v1598_v44 = vmul.f32 %v6271_v60, %v6232_v51  ;;  %vm1603_vm4 = vweird.f32 %v6271_v60  ;;  %vm6375_vm8 = vcmp.eq.f32.partialorder %v1651_v7, 8.507059e+37 }
 0x10f   : > { %10029 = vst [vmem:[#allocation68_spill] sm:$0xff] %v6276_v15  ;;  %v6278_v58 = vpop.eup %5459  ;;  %5471 = vrcp.f32 %v6265_v35  ;;  %v5118_v17 = vmul.f32 -1.442695, %v6276_v15  ;;  %v5115_v15 = vmul.f32 -1.442695, %v6246_v12  ;;  %v6322_v32 = vadd.f32 1.0, %v5458_v14  ;;  %vm6368_vm7 = vmor %vm1602_vm2, %vm1603_vm4 }
 0x110   : > { %10030 = vst [vmem:[#allocation69_spill] sm:$0xff] %v6278_v58  ;;  %v6284_v42 = vpop.f32.mrf.mxu0  ;;  %v5462_v37 = vpop.eup %5461  ;;  %5473 = vpow2.f32 %v5120_v52  ;;  %v1599_v52 = vsub.f32 1.0, %v1598_v44  ;;  %v1608_v14 = vand.u32 2147483648, %v6232_v51 }
 0x111   : > { %10032 = vst [vmem:[#allocation71_spill] sm:$0xff] %v6284_v42  ;;  %v5125_v45 = vmul.f32 -1.442695, %v6284_v42  ;;  %v6287_v54 = vpop.f32.mrf.mxu1  ;;  %v5464_v48 = vpop.eup %5463  ;;  %5475 = vrcp.f32 %v6273_v19  ;;  %v6299_v42 = vadd.f32 1.0, %v5462_v37 }
 0x112   : > { %10033 = vst [vmem:[#allocation72_spill] sm:$0xff] %v6287_v54  ;;  %v5126_v56 = vmul.f32 -1.442695, %v6287_v54  ;;  %v6293_v59 = vpop.eup %5465  ;;  %v6296_v47 = vadd.f32 1.0, %v5464_v48  ;;  %5477 = vpow2.f32 %v5118_v17  ;;  %v1606_v54 = vand.u32 2147483647, %v6232_v51 }
 0x113   : > { %v5468_v22 = vpop.eup %5467  ;;  %10034 = vst [vmem:[#allocation73_spill] sm:$0xff] %v6299_v42  ;;  %5479 = vpow2.f32 %v5125_v45  ;;  %v1643_v5 = vmul.f32 %v6293_v59, %v6261_v21  ;;  %v9781_v17 = vmov 0.0   ;;  %v1600_v49 = vmul.f32 %v6271_v60, %v1599_v52 }
 0x114   : > { %v6303_v50 = vpop.eup %5469  ;;  %5481 = vrcp.f32 %v6296_v47  ;;  %v6310_v27 = vsel %vm990_vm1, 1.0, %v9781_v17  ;;  %v6312_v37 = vadd.f32 1.0, %v5468_v22  ;;  %10037 = vst [vmem:[#allocation76_spill] sm:$0xff] %v6322_v32  ;;  %vm6332_vm3 = vcmp.eq.f32.partialorder %v1606_v54, 8.507059e+37 }
 0x115   : > { %v6307_v12 = vpop.eup %5471  ;;  %5483 = vpow2.f32 %v5126_v56  ;;  %v1644_v48 = vsub.f32 1.0, %v1643_v5  ;;  %10035 = vst [vmem:[#allocation74_spill] sm:$0xff] %v6310_v27  ;;  %v6320_v13 = vperm.slane %v6310_v27, 0  ;;  %v1601_v54 = vadd.f32 %v6271_v60, %v1600_v49 }
 0x116   : > { %v5474_v44 = vpop.eup %5473  ;;  %5485 = vpow2.f32 %v5115_v15  ;;  %v6314_v45 = vpop.f32.mrf.mxu2  ;;  %vm1648_vm6 = vweird.f32 %v6293_v59  ;;  %vm1692_vm9 = vweird.f32 %v6296_v47  ;;  %v1698_v29 = vand.u32 2147483648, %v6296_v47 }
 0x117   : > { %10036 = vst [vmem:[#allocation75_spill] sm:$0xff] %v6314_v45  ;;  %v6317_v46 = vpop.eup %5475  ;;  %5487 = vrcp.f32 %v6299_v42  ;;  %v1645_v52 = vmul.f32 %v6293_v59, %v1644_v48  ;;  %v6337_v57 = vadd.f32 1.0, %v5474_v44  ;;  %vm6392_vm10 = vmor %vm1647_vm5, %vm1648_vm6 }
 0x118   : > { %v6325_v5 = vpop.f32.mrf.mxu0  ;;  %v5478_v15 = vpop.eup %5477  ;;  %5489 = vrcp.f32 %v6312_v37 }
 0x119   : > { %10038 = vst [vmem:[#allocation77_spill] sm:$0xff] %v6325_v5  ;;  %v5128_v22 = vmul.f32 -1.442695, %v6325_v5  ;;  %v6329_v56 = vpop.f32.mrf.mxu1  ;;  %v5480_v27 = vpop.eup %5479  ;;  %v1646_v49 = vadd.f32 %v6293_v59, %v1645_v52  ;;  %v1699_v52 = vor.u32 1.1754944e-38, %v1698_v29 }
 0x11a   : > { %10039 = vst [vmem:[#allocation78_spill] sm:$0xff] %v6329_v56  ;;  %v5129_v1 = vmul.f32 -1.442695, %v6329_v56  ;;  %v6342_v5 = vpop.eup %5481  ;;  %v6345_v48 = vadd.f32 1.0, %v5480_v27  ;;  %v5121_v27 = vmul.f32 -1.442695, %v6314_v45 }
 0x11b   : > { %v5484_v2 = vpop.eup %5483  ;;  %5491 = vpow2.f32 %v5128_v22  ;;  %v1688_v44 = vmul.f32 %v6342_v5, %v6296_v47  ;;  %v6362_v22 = vadd.f32 1.0, %v5478_v15  ;;  %v1654_v15 = vor.u32 1.1754944e-38, %v1653_v36 }
 0x11c   : > { %v6353_v56 = vpop.eup %5485  ;;  %5493 = vrcp.f32 %v6345_v48  ;;  %v6356_v63 = vadd.f32 1.0, %v5484_v2  ;;  %v1609_v2 = vor.u32 1.1754944e-38, %v1608_v14  ;;  %v1696_v14 = vand.u32 2147483647, %v6296_v47 }
 0x11d   : > { %10042 = vst [vmem:[#allocation79_spill] sm:$0xff] %v6353_v56  ;;  %v6360_v58 = vpop.eup %5487  ;;  %5495 = vpow2.f32 %v5129_v1  ;;  %v1689_v11 = vsub.f32 1.0, %v1688_v44  ;;  %v1605_v1 = vsel %vm6368_vm7, %v6271_v60, %v1601_v54  ;;  %vm1693_vm11 = vweird.f32 %v6342_v5 }
 0x11e   : > { %10043 = vst [vmem:[#allocation80_spill] sm:$0xff] %v6360_v58  ;;  %5497 = vrcp.f32 %v6337_v57  ;;  %v6373_v45 = vpop.f32.mrf.mxu2  ;;  %v6396_v31 = vpop.eup %5489  ;;  %vm6432_vm12 = vcmp.eq.f32.partialorder %v1696_v14, 8.507059e+37  ;;  %vm1737_vm13 = vweird.f32 %v6345_v48  ;;  %vm6460_vm15 = vmor %vm1692_vm9, %vm1693_vm11 }
 0x11f   : > { %10044 = vst [vmem:[#allocation81_spill] sm:$0xff] %v6362_v22  ;;  %5499 = vrcp.f32 %v6356_v63  ;;  %v5124_v51 = vmul.f32 -1.442695, %v6373_v45  ;;  %v1690_v54 = vmul.f32 %v6342_v5, %v1689_v11  ;;  %v1741_v11 = vand.u32 2147483647, %v6345_v48 }
 0x120   : > { %10047 = vst [vmem:[#allocation82_spill] sm:$0xff] %v6373_v45  ;;  %v6384_v44 = vpop.f32.mrf.mxu0  ;;  %5501 = vpow2.f32 %v5121_v27  ;;  %v1650_v45 = vsel %vm6392_vm10, %v6293_v59, %v1646_v49  ;;  %v1610_v27 = vsel %vm6332_vm3, %v1609_v2, %v1605_v1  ;;  %v1553_v59 = vmul.f32 %v6303_v50, %v6259_v26 }
 0x121   : > { %10050 = vst [vmem:[#allocation83_spill] sm:$0xff] %v6384_v44  ;;  %v5131_v60 = vmul.f32 -1.442695, %v6384_v44  ;;  %v6399_v36 = vpop.f32.mrf.mxu1  ;;  %v5492_v9 = vpop.eup %5491  ;;  %5503 = vrcp.f32 %v6362_v22  ;;  %v1655_v17 = vsel %vm6375_vm8, %v1654_v15, %v1650_v45  ;;  %v1691_v1 = vadd.f32 %v6342_v5, %v1690_v54 }
 0x122   : > { %10053 = vst [vmem:[#allocation84_spill] sm:$0xff] %v6399_v36  ;;  %v5132_v21 = vmul.f32 -1.442695, %v6399_v36  ;;  %v6410_v6 = vpop.eup %5493  ;;  %v6412_v44 = vadd.f32 1.0, %v5492_v9  ;;  %5505 = vpow2.f32 %v5124_v51  ;;  %v1703_v36 = vmul.f32 %v6396_v31, %v6312_v37 }
 0x123   : > { %v5496_v49 = vpop.eup %5495  ;;  %5507 = vpow2.f32 %v5131_v60  ;;  %v1733_v7 = vmul.f32 %v6410_v6, %v6345_v48  ;;  %v6441_v54 = vmul.f32 %v6320_v13, %v1655_v17  ;;  %v6444_v58 = vmul.f32 %v6320_v13, %v1610_v27 }
 0x124   : > { %v6423_v2 = vpop.eup %5497  ;;  %5509 = vrcp.f32 %v6412_v44  ;;  %v6426_v9 = vadd.f32 1.0, %v5496_v49  ;;  %v1743_v49 = vand.u32 2147483648, %v6345_v48  ;;  %vm6452_vm14 = vcmp.eq.f32.partialorder %v1741_v11, 8.507059e+37 }
 0x125   : > { %v6430_v51 = vpop.eup %5499  ;;  %5511 = vpow2.f32 %v5132_v21  ;;  %v1734_v60 = vsub.f32 1.0, %v1733_v7  ;;  %10057 = vst [vmem:[#allocation86_spill] sm:$0xff] %v6444_v58  ;;  %v1704_v27 = vsub.f32 1.0, %v1703_v36  ;;  %v1554_v61 = vsub.f32 1.0, %v1553_v59 }
 0x126   : > { %v5502_v45 = vpop.eup %5501  ;;  %v6436_v15 = vpop.f32.mrf.mxu2  ;;  %5513 = vrcp.f32 %v6426_v9  ;;  %v1748_v11 = vmul.f32 %v6430_v51, %v6356_v63  ;;  %v1695_v47 = vsel %vm6460_vm15, %v6342_v5, %v1691_v1  ;;  %vm1738_vm1 = vweird.f32 %v6410_v6 }
 0x127   : > { %10056 = vst [vmem:[#allocation85_spill] sm:$0xff] %v6436_v15  ;;  %v6446_v21 = vpop.eup %5503  ;;  %v5127_v14 = vmul.f32 -1.442695, %v6436_v15  ;;  %v1735_v29 = vmul.f32 %v6410_v6, %v1734_v60  ;;  %v1788_v30 = vand.u32 2147483648, %v6412_v44  ;;  %v1744_v0 = vor.u32 1.1754944e-38, %v1743_v49  ;;  %vm6494_vm2 = vmor %vm1737_vm13, %vm1738_vm1 }
 0x128   : > { %10058 = vst [vmem:[#allocation87_spill] sm:$0xff] %v6446_v21  ;;  %v6449_v7 = vpop.f32.mrf.mxu0  ;;  %v5506_v20 = vpop.eup %5505  ;;  %v1700_v1 = vsel %vm6432_vm12, %v1699_v52, %v1695_v47  ;;  %v1705_v52 = vmul.f32 %v6396_v31, %v1704_v27  ;;  %vm1782_vm6 = vweird.f32 %v6412_v44  ;;  %vm1707_vm1 = vweird.f32 %v6312_v37 }
 0x129   : > { %10059 = vst [vmem:[#allocation88_spill] sm:$0xff] %v6449_v7  ;;  %v5134_v15 = vmul.f32 -1.442695, %v6449_v7  ;;  %v6466_v60 = vpop.f32.mrf.mxu1  ;;  %v5508_v33 = vpop.eup %5507  ;;  %5515 = vpow2.f32 %v5127_v14  ;;  %v1736_v36 = vadd.f32 %v6410_v6, %v1735_v29  ;;  %v6478_v7 = vadd.f32 1.0, %v5502_v45 }
 0x12a   : > { %10064 = vst [vmem:[#allocation89_spill] sm:$0xff] %v6466_v60  ;;  %v5135_v10 = vmul.f32 -1.442695, %v6466_v60  ;;  %v6476_v59 = vpop.eup %5509  ;;  %v6480_v8 = vadd.f32 1.0, %v5508_v33  ;;  %v6483_v17 = vadd.f32 1.0, %v5506_v20  ;;  %v1749_v45 = vsub.f32 1.0, %v1748_v11 }
 0x12b   : > { %10065 = vst [vmem:[#allocation90_spill] sm:$0xff] %v6478_v7  ;;  %v5512_v23 = vpop.eup %5511  ;;  %5517 = vpow2.f32 %v5134_v15  ;;  %v1778_v5 = vmul.f32 %v6476_v59, %v6412_v44  ;;  %v6499_v20 = vmul.f32 %v6303_v50, %v1554_v61  ;;  %v1740_v32 = vsel %vm6494_vm2, %v6410_v6, %v1736_v36 }
 0x12c   : > { %10066 = vst [vmem:[#allocation91_spill] sm:$0xff] %v6483_v17  ;;  %5519 = vrcp.f32 %v6480_v8  ;;  %v6490_v14 = vadd.f32 1.0, %v5512_v23  ;;  %v6505_v23 = vpop.eup %5513  ;;  %v6512_v29 = vmul.f32 %v6320_v13, %v1700_v1  ;;  %v1833_v11 = vand.u32 2147483648, %v6480_v8 }
 0x12d   : > { %5521 = vpow2.f32 %v5135_v10  ;;  %v1779_v15 = vsub.f32 1.0, %v1778_v5  ;;  %v6516_v10 = vmul.f32 %v6423_v2, %v6337_v57  ;;  %v6523_v47 = vor.u32 1.1754944e-38, %v1788_v30 }
 0x12e   : > { %5523 = vrcp.f32 %v6490_v14  ;;  %v6508_v48 = vpop.f32.mrf.mxu2  ;;  %v1745_v33 = vsel %vm6452_vm14, %v1744_v0, %v1740_v32  ;;  %v1750_v49 = vmul.f32 %v6430_v51, %v1749_v45  ;;  %v6536_v30 = vadd.f32 %v6396_v31, %v1705_v52 }
 0x12f   : > { %10069 = vst [vmem:[#allocation92_spill] sm:$0xff] %v6508_v48  ;;  %v5516_v61 = vpop.eup %5515  ;;  %5525 = vrcp.f32 %v6483_v17  ;;  %v5130_v6 = vmul.f32 -1.442695, %v6508_v48  ;;  %v1780_v21 = vmul.f32 %v6476_v59, %v1779_v15  ;;  %v6545_v42 = vmul.f32 %v6505_v23, %v6426_v9 }
 0x130   : > { %v6520_v27 = vpop.f32.mrf.mxu0  ;;  %v6525_v36 = vadd.f32 1.0, %v5516_v61  ;;  %vm1827_vm3 = vweird.f32 %v6480_v8  ;;  %v1831_v32 = vand.u32 2147483647, %v6480_v8  ;;  %v6553_v52 = vmul.f32 %v6320_v13, %v1745_v33 }
 0x131   : > { %10070 = vst [vmem:[#allocation93_spill] sm:$0xff] %v6520_v27  ;;  %v5137_v5 = vmul.f32 -1.442695, %v6520_v27  ;;  %v6528_v1 = vpop.f32.mrf.mxu1  ;;  %v5518_v60 = vpop.eup %5517  ;;  %5527 = vpow2.f32 %v5130_v6  ;;  %v6570_v33 = vadd.f32 %v6476_v59, %v1780_v21  ;;  %vm1783_vm4 = vweird.f32 %v6476_v59 }
 0x132   : > { %10071 = vst [vmem:[#allocation94_spill] sm:$0xff] %v6525_v36  ;;  %v5138_v48 = vmul.f32 -1.442695, %v6528_v1  ;;  %v6538_v61 = vpop.eup %5519  ;;  %5529 = vrcp.f32 %v6525_v36  ;;  %v6541_v27 = vadd.f32 1.0, %v5518_v60  ;;  %vm6583_vm5 = vcmp.eq.f32.partialorder %v1831_v32, 8.507059e+37  ;;  %vm6673_vm0 = vmor %vm1782_vm6, %vm1783_vm4 }
 0x133   : > { %10072 = vst [vmem:[#allocation95_spill] sm:$0xff] %v6528_v1  ;;  %v5522_v45 = vpop.eup %5521  ;;  %5531 = vpow2.f32 %v5137_v5  ;;  %v1823_v15 = vmul.f32 %v6538_v61, %v6480_v8  ;;  %v6560_v1 = vor.u32 1.1754944e-38, %v1833_v11  ;;  %v6563_v5 = vadd.f32 %v6430_v51, %v1750_v49 }
 0x134   : > { %v6555_v60 = vpop.eup %5523  ;;  %5533 = vrcp.f32 %v6541_v27  ;;  %v6558_v6 = vadd.f32 1.0, %v5522_v45  ;;  %v1878_v11 = vand.u32 2147483648, %v6541_v27  ;;  %v1848_v49 = vand.u32 2147483648, %v6490_v14 }
 0x135   : > { %v6565_v0 = vpop.eup %5525  ;;  %5535 = vpow2.f32 %v5138_v48  ;;  %v1824_v22 = vsub.f32 1.0, %v1823_v15  ;;  %v1838_v41 = vmul.f32 %v6555_v60, %v6490_v14  ;;  %v1876_v56 = vand.u32 2147483647, %v6541_v27 }
 0x136   : > { %10073 = vst [vmem:[#allocation96_spill] sm:$0xff] %v6565_v0  ;;  %5537 = vrcp.f32 %v6558_v6  ;;  %v6574_v45 = vpop.f32.mrf.mxu2  ;;  %v1893_v21 = vand.u32 2147483648, %v6558_v6  ;;  %v1891_v62 = vand.u32 2147483647, %v6558_v6  ;;  %vm1828_vm7 = vweird.f32 %v6538_v61 }
 0x137   : > { %10074 = vst [vmem:[#allocation97_spill] sm:$0xff] %v6574_v45  ;;  %v5528_v48 = vpop.eup %5527  ;;  %v5133_v15 = vmul.f32 -1.442695, %v6574_v45  ;;  %v1825_v38 = vmul.f32 %v6538_v61, %v1824_v22  ;;  %v1839_v45 = vsub.f32 1.0, %v1838_v41  ;;  %vm1872_vm8 = vweird.f32 %v6541_v27  ;;  %vm6634_vm15 = vmor %vm1827_vm3, %vm1828_vm7 }
 0x138   : > { %v6588_v28 = vpop.eup %5529  ;;  %v6590_v16 = vadd.f32 1.0, %v5528_v48  ;;  %vm1842_vm9 = vweird.f32 %v6490_v14  ;;  %v6601_v0 = vor.u32 1.1754944e-38, %v1878_v11  ;;  %v1846_v48 = vand.u32 2147483647, %v6490_v14 }
 0x139   : > { %10077 = vst [vmem:[#allocation98_spill] sm:$0xff] %v6588_v28  ;;  %v5532_v24 = vpop.eup %5531  ;;  %5539 = vpow2.f32 %v5133_v15  ;;  %v1826_v22 = vadd.f32 %v6538_v61, %v1825_v38  ;;  %v10078_v41 = vand.u32 2147483647, %v6412_v44  ;;  %vm6614_vm12 = vcmp.eq.f32.partialorder %v1876_v56, 8.507059e+37 }
 0x13a   : > { %v6597_v32 = vpop.eup %5533  ;;  %v6599_v4 = vadd.f32 1.0, %v5532_v24  ;;  %5541 = vrcp.f32 %v6590_v16  ;;  %v6618_v11 = vor.u32 1.1754944e-38, %v1893_v21  ;;  %vm1843_vm13 = vweird.f32 %v6555_v60 }
 0x13b   : > { %vm6607_vm11 = vcmp.eq.f32.partialorder %v10078_v41, 8.507059e+37  ;;  %v5536_v17 = vpop.eup %5535  ;;  %v1868_v38 = vmul.f32 %v6597_v32, %v6541_v27  ;;  %vm6626_vm14 = vcmp.eq.f32.partialorder %v1891_v62, 8.507059e+37  ;;  %v1840_v21 = vmul.f32 %v6555_v60, %v1839_v45  ;;  %vm6687_vm4 = vmor %vm1842_vm9, %vm1843_vm13 }
 0x13c   : > { %v6621_v25 = vpop.eup %5537  ;;  %5543 = vrcp.f32 %v6599_v4  ;;  %v6624_v41 = vadd.f32 1.0, %v5536_v17  ;;  %v6639_v7 = vor.u32 1.1754944e-38, %v1848_v49  ;;  %v1923_v62 = vand.u32 2147483648, %v6599_v4 }
 0x13d   : > { %v1869_v17 = vsub.f32 1.0, %v1868_v38  ;;  %v1883_v18 = vmul.f32 %v6621_v25, %v6558_v6  ;;  %v1830_v8 = vsel %vm6634_vm15, %v6538_v61, %v1826_v22  ;;  %v1921_v45 = vand.u32 2147483647, %v6599_v4 }
 0x13e   : > { %5545 = vrcp.f32 %v6624_v41  ;;  %v6650_v40 = vpop.f32.mrf.mxu2  ;;  %vm1873_vm3 = vweird.f32 %v6597_v32  ;;  %vm6654_vm7 = vcmp.eq.f32.partialorder %v1846_v48, 8.507059e+37  ;;  %v1936_v56 = vand.u32 2147483647, %v6624_v41 }
 0x13f   : > { %10087 = vst [vmem:[#allocation99_spill] sm:$0xff] %v6650_v40  ;;  %v5540_v38 = vpop.eup %5539  ;;  %v5136_v28 = vmul.f32 -1.442695, %v6650_v40  ;;  %v1938_v61 = vand.u32 2147483648, %v6624_v41  ;;  %v1870_v22 = vmul.f32 %v6597_v32, %v1869_v17  ;;  %v1884_v58 = vsub.f32 1.0, %v1883_v18 }
 0x140   : > { %v6663_v36 = vadd.f32 1.0, %v5540_v38  ;;  %vm1888_vm15 = vweird.f32 %v6621_v25  ;;  %v1835_v48 = vsel %vm6583_vm5, %v6560_v1, %v1830_v8  ;;  %vm1708_vm2 = vweird.f32 %v6396_v31  ;;  %v6679_v17 = vpop.eup %5541  ;;  %vm1874_vm5 = vmor %vm1872_vm8, %vm1873_vm3 }
 0x141   : > { %5547 = vpow2.f32 %v5136_v28  ;;  %v1924_v18 = vor.u32 1.1754944e-38, %v1923_v62  ;;  %vm1932_vm10 = vweird.f32 %v6624_v41  ;;  %v1871_v55 = vadd.f32 %v6597_v32, %v1870_v22 }
 0x142   : > { %v5544_v1 = vpop.eup %5543  ;;  %v1939_v8 = vor.u32 1.1754944e-38, %v1938_v61  ;;  %v1885_v28 = vmul.f32 %v6621_v25, %v1884_v58  ;;  %v1841_v62 = vadd.f32 %v6555_v60, %v1840_v21  ;;  %v1785_v14 = vsel %vm6673_vm0, %v6476_v59, %v6570_v33 }
 0x143   : > { %v1913_v38 = vmul.f32 %v5544_v1, %v6599_v4  ;;  %vm6702_vm6 = vcmp.eq.f32.partialorder %v1921_v45, 8.507059e+37  ;;  %vm6706_vm9 = vcmp.eq.f32.partialorder %v1936_v56, 8.507059e+37  ;;  %v1875_v27 = vsel %vm1874_vm5, %v6597_v32, %v1871_v55 }
 0x144   : > { %vm10098_vm8 = vweird.f32 %v6558_v6  ;;  %v6720_v40 = vmul.f32 %v6320_v13, %v1835_v48  ;;  %v1790_v59 = vsel %vm6607_vm11, %v6523_v47, %v1785_v14  ;;  %v5546_v33 = vpop.eup %5545  ;;  %5549 = vrcp.f32 %v6663_v36 }
 0x145   : > { %vm6715_vm13 = vmor %vm10098_vm8, %vm1888_vm15  ;;  %vm1918_vm0 = vweird.f32 %v5544_v1  ;;  %v1880_v32 = vsel %vm6614_vm12, %v6601_v0, %v1875_v27  ;;  %v1886_v6 = vadd.f32 %v6621_v25, %v1885_v28  ;;  %v1914_v21 = vsub.f32 1.0, %v1913_v38 }
 0x146   : > { %v1928_v45 = vmul.f32 %v5546_v33, %v6624_v41  ;;  %v1845_v56 = vsel %vm6687_vm4, %v6555_v60, %v1841_v62  ;;  %v6735_v15 = vmul.f32 %v6320_v13, %v1790_v59  ;;  %v6737_v47 = vpop.f32.mrf.mxu2  ;;  %vm1933_vm11 = vweird.f32 %v5546_v33 }
 0x147   : > { %v1890_v24 = vsel %vm6715_vm13, %v6621_v25, %v1886_v6  ;;  %v10101_v0 = vsub.f32 1.0, %v6545_v42  ;;  %vm1797_vm12 = vweird.f32 %v6426_v9  ;;  %v5548_v55 = vpop.eup %5547  ;;  %v5139_v44 = vmul.f32 -1.442695, %v6737_v47 }
 0x148   : > { %v1915_v60 = vmul.f32 %v5544_v1, %v1914_v21  ;;  %v1929_v28 = vsub.f32 1.0, %v1928_v45  ;;  %v1895_v62 = vsel %vm6626_vm14, %v6618_v11, %v1890_v24  ;;  %vm10102_vm3 = vweird.f32 %v6430_v51  ;;  %vm6775_vm14 = vmor %vm1932_vm10, %vm1933_vm11 }
 0x149   : > { %v1795_v48 = vmul.f32 %v6505_v23, %v10101_v0  ;;  %vm10103_vm15 = vweird.f32 %v6356_v63  ;;  %v6758_v42 = vadd.f32 1.0, %v5548_v55  ;;  %vm10106_vm5 = vweird.f32 %v6599_v4  ;;  %vm6802_vm10 = vmor %vm1707_vm1, %vm1708_vm2 }
 0x14a   : > { %vm6754_vm4 = vmor %vm10103_vm15, %vm10102_vm3  ;;  %v2000_v43 = vmul.f32 %v6320_v13, %v1880_v32  ;;  %v1850_v11 = vsel %vm6654_vm7, %v6639_v7, %v1845_v56  ;;  %5551 = vpow2.f32 %v5139_v44  ;;  %v1916_v27 = vadd.f32 %v5544_v1, %v1915_v60  ;;  %v6780_v59 = vpop.eup %5549 }
 0x14b   : > { %vm6763_vm8 = vmor %vm10106_vm5, %vm1918_vm0  ;;  %v1796_v38 = vadd.f32 %v6505_v23, %v1795_v48  ;;  %v1930_v58 = vmul.f32 %v5546_v33, %v1929_v28  ;;  %vm1798_vm13 = vweird.f32 %v6505_v23  ;;  %5553 = vrcp.f32 %v6758_v42 }
 0x14c   : > { %v2001_v7 = vmul.f32 %v6320_v13, %v1895_v62  ;;  %vm6786_vm7 = vmor %vm1797_vm12, %vm1798_vm13  ;;  %v1801_v41 = vand.u32 2147483647, %v6426_v9  ;;  %v1803_v32 = vand.u32 2147483648, %v6426_v9  ;;  %v1920_v6 = vsel %vm6763_vm8, %v5544_v1, %v1916_v27 }
 0x14d   : > { %v1931_v21 = vadd.f32 %v5546_v33, %v1930_v58  ;;  %v1800_v45 = vsel %vm6786_vm7, %v6505_v23, %v1796_v38  ;;  %v1756_v56 = vand.u32 2147483647, %v6356_v63  ;;  %v1925_v9 = vsel %vm6702_vm6, %v1924_v18, %v1920_v6 }
 0x14e   : > { %vm1802_vm0 = vcmp.eq.f32.partialorder %v1801_v41, 8.507059e+37  ;;  %v1804_v1 = vor.u32 1.1754944e-38, %v1803_v32  ;;  %v1758_v0 = vand.u32 2147483648, %v6356_v63  ;;  %v2003_v48 = vmul.f32 %v6320_v13, %v1925_v9 }
 0x14f   : > { %v1935_v23 = vsel %vm6775_vm14, %v5546_v33, %v1931_v21  ;;  %v1755_v55 = vsel %vm6754_vm4, %v6430_v51, %v6563_v5  ;;  %vm1757_vm1 = vcmp.eq.f32.partialorder %v1756_v56, 8.507059e+37  ;;  %v1710_v63 = vsel %vm6802_vm10, %v6396_v31, %v6536_v30 }
 0x150   : > { %v1940_v44 = vsel %vm6706_vm9, %v1939_v8, %v1935_v23  ;;  %v1759_v22 = vor.u32 1.1754944e-38, %v1758_v0  ;;  %v1711_v18 = vand.u32 2147483647, %v6312_v37  ;;  %v5552_v60 = vpop.eup %5551  ;;  %2133 = vmatpush.xpose.msra.mxu3 %v2003_v48  ;;  %v1805_v28 = vsel %vm1802_vm0, %v1804_v1, %v1800_v45 }
 0x151   : > { %v2004_v33 = vmul.f32 %v6320_v13, %v1940_v44  ;;  %v1713_v62 = vand.u32 2147483648, %v6312_v37  ;;  %v10115_v51 = vsub.f32 1.0, %v6516_v10  ;;  %v6828_v8 = vpop.eup %5553  ;;  %v6830_v61 = vadd.f32 1.0, %v5552_v60 }
 0x152   : > { %v1760_v25 = vsel %vm1757_vm1, %v1759_v22, %v1755_v55  ;;  %vm1712_vm2 = vcmp.eq.f32.partialorder %v1711_v18, 8.507059e+37  ;;  %vm1662_vm6 = vweird.f32 %v6337_v57  ;;  %v1998_v31 = vmul.f32 %v6320_v13, %v1850_v11 }
 0x153   : > { %v1660_v5 = vmul.f32 %v6423_v2, %v10115_v51  ;;  %2284 = vmatpush.xpose.msrb.mxu0 %v2004_v33  ;;  %v1714_v30 = vor.u32 1.1754944e-38, %v1713_v62  ;;  %vm1663_vm9 = vweird.f32 %v6423_v2  ;;  %5555 = vrcp.f32 %v6830_v61 }
 0x154   : > { %v1995_v37 = vmul.f32 %v6320_v13, %v1805_v28  ;;  %v6839_v10 = vmul.f32 %v6320_v13, %v1760_v25  ;;  %v1953_v38 = vand.u32 2147483648, %v6830_v61  ;;  %vm6842_vm11 = vmor %vm1662_vm6, %vm1663_vm9  ;;  %2134 = vmatpush.xpose.msra.mxu3 %v2000_v43  ;;  %v1951_v58 = vand.u32 2147483647, %v6830_v61 }
 0x155   : > { %v1661_v14 = vadd.f32 %v6423_v2, %v1660_v5  ;;  %v1715_v11 = vsel %vm1712_vm2, %v1714_v30, %v1710_v63  ;;  %v1666_v4 = vand.u32 2147483647, %v6337_v57  ;;  %v1668_v49 = vand.u32 2147483648, %v6337_v57 }
 0x156   : > { %v6850_v41 = vmul.f32 %v6320_v13, %v1715_v11  ;;  %vm1947_vm12 = vweird.f32 %v6830_v61  ;;  %v6853_v32 = vor.u32 1.1754944e-38, %v1953_v38  ;;  %v1898_v43 = vmul.f32 %v6828_v8, %v6758_v42 }
 0x157   : > { %v1665_v6 = vsel %vm6842_vm11, %v6423_v2, %v1661_v14  ;;  %2285 = vmatpush.xpose.msrb.mxu0 %v2001_v7  ;;  %vm1667_vm3 = vcmp.eq.f32.partialorder %v1666_v4, 8.507059e+37  ;;  %v1669_v21 = vor.u32 1.1754944e-38, %v1668_v49  ;;  %vm1902_vm15 = vweird.f32 %v6758_v42 }
 0x158   : > { %vm1903_vm4 = vweird.f32 %v6828_v8  ;;  %v1899_v57 = vsub.f32 1.0, %v1898_v43  ;;  %v1906_v45 = vand.u32 2147483647, %v6758_v42  ;;  %v1908_v56 = vand.u32 2147483648, %v6758_v42  ;;  %2135 = vmatpush.xpose.msra.mxu3 %v6720_v40 }
 0x159   : > { %v1613_v24 = vmul.f32 %v6317_v46, %v6273_v19  ;;  %v1670_v2 = vsel %vm1667_vm3, %v1669_v21, %v1665_v6  ;;  %vm1617_vm5 = vweird.f32 %v6273_v19  ;;  %vm1618_vm8 = vweird.f32 %v6317_v46  ;;  %v5556_v9 = vpop.eup %5555  ;;  %vm1904_vm1 = vmor %vm1902_vm15, %vm1903_vm4 }
 0x15a   : > { %v1621_v7 = vand.u32 2147483647, %v6273_v19  ;;  %v6871_v1 = vmul.f32 %v6320_v13, %v1670_v2  ;;  %v1900_v0 = vmul.f32 %v6828_v8, %v1899_v57  ;;  %vm6874_vm14 = vcmp.eq.f32.partialorder %v1906_v45, 8.507059e+37  ;;  %vm6905_vm6 = vmor %vm1617_vm5, %vm1618_vm8 }
 0x15b   : > { %v1909_v23 = vor.u32 1.1754944e-38, %v1908_v56  ;;  %v1943_v40 = vmul.f32 %v5556_v9, %v6830_v61  ;;  %2286 = vmatpush.xpose.msrb.mxu0 %v1998_v31  ;;  %vm1948_vm13 = vweird.f32 %v5556_v9  ;;  %vm6879_vm7 = vcmp.eq.f32.partialorder %v1951_v58, 8.507059e+37 }
 0x15c   : > { %v1614_v44 = vsub.f32 1.0, %v1613_v24  ;;  %vm6883_vm10 = vcmp.eq.f32.partialorder %v1621_v7, 8.507059e+37  ;;  %v1901_v63 = vadd.f32 %v6828_v8, %v1900_v0  ;;  %v1623_v18 = vand.u32 2147483648, %v6273_v19  ;;  %2136 = vmatpush.xpose.msra.mxu3 %v6735_v15  ;;  %vm6925_vm11 = vmor %vm1947_vm12, %vm1948_vm13  ;;  %v10155_v0 = vld [vmem:[#allocation62_spill] sm:$0xff] }
 0x15d   : > { %v1853_v60 = vmul.f32 %v6780_v59, %v6663_v36  ;;  %vm1857_vm0 = vweird.f32 %v6663_v36  ;;  %v1944_v33 = vsub.f32 1.0, %v1943_v40  ;;  %vm1858_vm2 = vweird.f32 %v6780_v59 }
 0x15e   : > { %v1615_v28 = vmul.f32 %v6317_v46, %v1614_v44  ;;  %v1861_v62 = vand.u32 2147483647, %v6663_v36  ;;  %v1905_v51 = vsel %vm1904_vm1, %v6828_v8, %v1901_v63  ;;  %v1624_v15 = vor.u32 1.1754944e-38, %v1623_v18  ;;  %vm1859_vm12 = vmor %vm1857_vm0, %vm1858_vm2 }
 0x15f   : > { %v1854_v25 = vsub.f32 1.0, %v1853_v60  ;;  %v1863_v42 = vand.u32 2147483648, %v6663_v36  ;;  %2287 = vmatpush.xpose.msrb.mxu0 %v1995_v37  ;;  %v1945_v31 = vmul.f32 %v5556_v9, %v1944_v33  ;;  %v1910_v30 = vsel %vm6874_vm14, %v1909_v23, %v1905_v51 }
 0x160   : > { %v1616_v14 = vadd.f32 %v6317_v46, %v1615_v28  ;;  %vm6913_vm9 = vcmp.eq.f32.partialorder %v1861_v62, 8.507059e+37  ;;  %v2002_v19 = vmul.f32 %v6320_v13, %v1910_v30  ;;  %v1556_v11 = vadd.f32 %v6303_v50, %v6499_v20  ;;  %2137 = vmatpush.xpose.msra.mxu3 %v6553_v52 }
 0x161   : > { %v1855_v38 = vmul.f32 %v6780_v59, %v1854_v25  ;;  %v1864_v27 = vor.u32 1.1754944e-38, %v1863_v42  ;;  %v1946_v37 = vadd.f32 %v5556_v9, %v1945_v31  ;;  %vm1557_vm3 = vweird.f32 %v6259_v26 }
 0x162   : > { %v1620_v4 = vsel %vm6905_vm6, %v6317_v46, %v1616_v14  ;;  %vm1558_vm15 = vweird.f32 %v6303_v50  ;;  %v1561_v61 = vand.u32 2147483647, %v6259_v26  ;;  %v1563_v6 = vand.u32 2147483648, %v6259_v26 }
 0x163   : > { %v1625_v20 = vsel %vm6883_vm10, %v1624_v15, %v1620_v4  ;;  %v1856_v52 = vadd.f32 %v6780_v59, %v1855_v38  ;;  %vm6937_vm4 = vmor %vm1557_vm3, %vm1558_vm15  ;;  %2288 = vmatpush.xpose.msrb.mxu0 %v6839_v10  ;;  %v1950_v46 = vsel %vm6925_vm11, %v5556_v9, %v1946_v37  ;;  %v1568_v57 = vmul.f32 %v6307_v12, %v6265_v35  ;;  %v10142_v38 = vld [vmem:[#allocation98_spill] sm:$0xff] }
 0x164   : > { %v1983_v43 = vmul.f32 %v6320_v13, %v1625_v20  ;;  %v1560_v21 = vsel %vm6937_vm4, %v6303_v50, %v1556_v11  ;;  %v1955_v26 = vsel %vm6879_vm7, %v6853_v32, %v1950_v46  ;;  %vm1562_vm5 = vcmp.eq.f32.partialorder %v1561_v61, 8.507059e+37  ;;  %2138 = vmatpush.xpose.msra.mxu3 %v6512_v29  ;;  %v10166_v20 = vld [vmem:[#allocation44_spill] sm:$0xff] }
 0x165   : > { %v1860_v10 = vsel %vm1859_vm12, %v6780_v59, %v1856_v52  ;;  %v1564_v45 = vor.u32 1.1754944e-38, %v1563_v6  ;;  %v2005_v36 = vmul.f32 %v6320_v13, %v1955_v26  ;;  %v1569_v24 = vsub.f32 1.0, %v1568_v57  ;;  %v10150_v57 = vld [vmem:[#allocation61_spill] sm:$0xff] }
 0x166   : > { %v1865_v56 = vsel %vm6913_vm9, %v1864_v27, %v1860_v10  ;;  %vm1572_vm8 = vweird.f32 %v6265_v35  ;;  %vm1573_vm14 = vweird.f32 %v6307_v12  ;;  %v1576_v32 = vand.u32 2147483647, %v6265_v35  ;;  %v10151_v10 = vld [vmem:[#allocation90_spill] sm:$0xff] }
 0x167   : > { %v1999_v50 = vmul.f32 %v6320_v13, %v1865_v56  ;;  %v1565_v2 = vsel %vm1562_vm5, %v1564_v45, %v1560_v21  ;;  %2289 = vmatpush.xpose.msrb.mxu0 %v6850_v41  ;;  %2435 = vmatpush.xpose.msrb.mxu2 %v2005_v36  ;;  %v1570_v59 = vmul.f32 %v6307_v12, %v1569_v24  ;;  %v1578_v7 = vand.u32 2147483648, %v6265_v35  ;;  %vm6974_vm13 = vmor %vm1572_vm8, %vm1573_vm14  ;;  %v10149_v21 = vld [vmem:[#allocation50_spill] sm:$0xff] }
 0x168   : > { %v1979_v29 = vmul.f32 %v6320_v13, %v1565_v2  ;;  %v1808_v9 = vmul.f32 %v6679_v17, %v6590_v16  ;;  %vm6978_vm7 = vcmp.eq.f32.partialorder %v1576_v32, 8.507059e+37  ;;  %vm1812_vm10 = vweird.f32 %v6590_v16  ;;  %2139 = vmatpush.xpose.msra.mxu3 %v6441_v54 }
 0x169   : > { %vm1813_vm0 = vweird.f32 %v6679_v17  ;;  %v1816_v41 = vand.u32 2147483647, %v6590_v16  ;;  %v1571_v35 = vadd.f32 %v6307_v12, %v1570_v59  ;;  %v1579_v23 = vor.u32 1.1754944e-38, %v1578_v7 }
 0x16a   : > { %v1809_v40 = vsub.f32 1.0, %v1808_v9  ;;  %v1818_v55 = vand.u32 2147483648, %v6590_v16  ;;  %v1508_v22 = vmul.f32 %v6263_v34, %v6226_v39  ;;  %vm1512_vm2 = vweird.f32 %v6226_v39  ;;  %vm1814_vm3 = vmor %vm1812_vm10, %vm1813_vm0  ;;  %v10154_v9 = vld [vmem:[#allocation52_spill] sm:$0xff] }
 0x16b   : > { %vm6988_vm1 = vcmp.eq.f32.partialorder %v1816_v41, 8.507059e+37  ;;  %vm1513_vm6 = vweird.f32 %v6263_v34  ;;  %2290 = vmatpush.xpose.msrb.mxu0 %v6871_v1  ;;  %2436 = vmatpush.xpose.msrb.mxu2 %v2002_v19  ;;  %v1575_v54 = vsel %vm6974_vm13, %v6307_v12, %v1571_v35  ;;  %v1516_v60 = vand.u32 2147483647, %v6226_v39  ;;  %v10138_v1 = vld [vmem:[#allocation86_spill] sm:$0xff]  ;;  %v10175_v35 = vld [vmem:[#allocation49_spill] sm:$0xff] }
 0x16c   : > { %v1810_v63 = vmul.f32 %v6679_v17, %v1809_v40  ;;  %v1819_v18 = vor.u32 1.1754944e-38, %v1818_v55  ;;  %v1580_v33 = vsel %vm6978_vm7, %v1579_v23, %v1575_v54  ;;  %v1509_v28 = vsub.f32 1.0, %v1508_v22  ;;  %2140 = vmatpush.xpose.msra.mxu3 %v10138_v1  ;;  %v10141_v19 = vld [vmem:[#allocation94_spill] sm:$0xff]  ;;  %vm7033_vm4 = vmor %vm1512_vm2, %vm1513_vm6 }
 0x16d   : > { %v1518_v62 = vand.u32 2147483648, %v6226_v39  ;;  %v1523_v51 = vmul.f32 %v6267_v53, %v6228_v3  ;;  %v1980_v5 = vmul.f32 %v6320_v13, %v1580_v33  ;;  %vm7010_vm9 = vcmp.eq.f32.partialorder %v1516_v60, 8.507059e+37  ;;  %v10159_v60 = vld [vmem:[#allocation96_spill] sm:$0xff] }
 0x16e   : > { %v1811_v12 = vadd.f32 %v6679_v17, %v1810_v63  ;;  %vm1527_vm11 = vweird.f32 %v6228_v3  ;;  %v1510_v25 = vmul.f32 %v6263_v34, %v1509_v28  ;;  %vm1528_vm15 = vweird.f32 %v6267_v53 }
 0x16f   : > { %v1519_v42 = vor.u32 1.1754944e-38, %v1518_v62  ;;  %v1524_v31 = vsub.f32 1.0, %v1523_v51  ;;  %2291 = vmatpush.xpose.msrb.mxu0 %v1983_v43  ;;  %2437 = vmatpush.xpose.msrb.mxu2 %v1999_v50  ;;  %v1531_v14 = vand.u32 2147483647, %v6228_v3  ;;  %v1533_v8 = vand.u32 2147483648, %v6228_v3  ;;  %vm7042_vm5 = vmor %vm1527_vm11, %vm1528_vm15 }
 0x170   : > { %v1815_v30 = vsel %vm1814_vm3, %v6679_v17, %v1811_v12  ;;  %v1763_v27 = vmul.f32 %v10142_v38, %v10141_v19  ;;  %v1511_v11 = vadd.f32 %v6263_v34, %v1510_v25  ;;  %vm1767_vm12 = vweird.f32 %v10141_v19  ;;  %2141 = vmatpush.xpose.msra.mxu3 %v1979_v29 }
 0x171   : > { %v1820_v16 = vsel %vm6988_vm1, %v1819_v18, %v1815_v30  ;;  %v1525_v17 = vmul.f32 %v6267_v53, %v1524_v31  ;;  %vm7046_vm8 = vcmp.eq.f32.partialorder %v1531_v14, 8.507059e+37  ;;  %v1534_v39 = vor.u32 1.1754944e-38, %v1533_v8  ;;  %v10158_v18 = vld [vmem:[#allocation91_spill] sm:$0xff]  ;;  %v10162_v30 = vld [vmem:[#allocation41_spill] sm:$0xff] }
 0x172   : > { %v1996_v58 = vmul.f32 %v6320_v13, %v1820_v16  ;;  %v1764_v52 = vsub.f32 1.0, %v1763_v27  ;;  %v1515_v49 = vsel %vm7033_vm4, %v6263_v34, %v1511_v11  ;;  %vm1768_vm14 = vweird.f32 %v10142_v38  ;;  %v10163_v14 = vld [vmem:[#allocation55_spill] sm:$0xff] }
 0x173   : > { %v1526_v61 = vadd.f32 %v6267_v53, %v1525_v17  ;;  %v1771_v3 = vand.u32 2147483647, %v10141_v19  ;;  %2292 = vmatpush.xpose.msrb.mxu0 %v1980_v5  ;;  %v1520_v6 = vsel %vm7010_vm9, %v1519_v42, %v1515_v49  ;;  %v1773_v43 = vand.u32 2147483648, %v10141_v19  ;;  %vm1769_vm10 = vmor %vm1767_vm12, %vm1768_vm14  ;;  %v10180_v5 = vld [vmem:[#allocation51_spill] sm:$0xff] }
 0x174   : > { %2438 = vmatpush.xpose.msrb.mxu2 %v1996_v58  ;;  %v1765_v46 = vmul.f32 %v10142_v38, %v1764_v52  ;;  %v1463_v26 = vmul.f32 %v10150_v57, %v10149_v21  ;;  %5557 = vrcp.f32 %v10151_v10  ;;  %v1976_v34 = vmul.f32 %v6320_v13, %v1520_v6 }
 0x175   : > { %v1530_v45 = vsel %vm7042_vm5, %v6267_v53, %v1526_v61  ;;  %vm7067_vm13 = vcmp.eq.f32.partialorder %v1771_v3, 8.507059e+37  ;;  %vm1467_vm7 = vweird.f32 %v10149_v21  ;;  %v1774_v53 = vor.u32 1.1754944e-38, %v1773_v43 }
 0x176   : > { %v1535_v56 = vsel %vm7046_vm8, %v1534_v39, %v1530_v45  ;;  %v1766_v24 = vadd.f32 %v10142_v38, %v1765_v46  ;;  %v1464_v50 = vsub.f32 1.0, %v1463_v26  ;;  %2142 = vmatpush.xpose.msra.mxu3 %v1976_v34  ;;  %v1471_v32 = vand.u32 2147483647, %v10149_v21  ;;  %v10167_v39 = vld [vmem:[#allocation58_spill] sm:$0xff] }
 0x177   : > { %v1977_v2 = vmul.f32 %v6320_v13, %v1535_v56  ;;  %v1473_v29 = vand.u32 2147483648, %v10149_v21  ;;  %vm1468_vm0 = vweird.f32 %v10150_v57  ;;  %v1478_v48 = vmul.f32 %v10155_v0, %v10154_v9 }
 0x178   : > { %v1770_v59 = vsel %vm1769_vm10, %v10142_v38, %v1766_v24  ;;  %v1465_v7 = vmul.f32 %v10150_v57, %v1464_v50  ;;  %vm7089_vm1 = vcmp.eq.f32.partialorder %v1471_v32, 8.507059e+37  ;;  %vm1482_vm2 = vweird.f32 %v10154_v9  ;;  %vm1469_vm9 = vmor %vm1467_vm7, %vm1468_vm0 }
 0x179   : > { %2293 = vmatpush.xpose.msrb.mxu0 %v1977_v2  ;;  %v1775_v41 = vsel %vm7067_vm13, %v1774_v53, %v1770_v59  ;;  %vm1483_vm6 = vweird.f32 %v10155_v0  ;;  %v1479_v55 = vsub.f32 1.0, %v1478_v48  ;;  %v1486_v44 = vand.u32 2147483647, %v10154_v9  ;;  %v10189_v2 = vld [vmem:[#allocation29_spill] sm:$0xff] }
 0x17a   : > { %v1993_v23 = vmul.f32 %v6320_v13, %v1775_v41  ;;  %v1466_v40 = vadd.f32 %v10150_v57, %v1465_v7  ;;  %v7098_v22 = vpop.eup %5557  ;;  %v1474_v54 = vor.u32 1.1754944e-38, %v1473_v29  ;;  %v1488_v63 = vand.u32 2147483648, %v10154_v9  ;;  %vm7116_vm15 = vmor %vm1482_vm2, %vm1483_vm6  ;;  %v10174_v41 = vld [vmem:[#allocation35_spill] sm:$0xff] }
 0x17b   : > { %v1718_v33 = vmul.f32 %v10159_v60, %v10158_v18  ;;  %vm1722_vm11 = vweird.f32 %v10158_v18  ;;  %v1480_v62 = vmul.f32 %v10155_v0, %v1479_v55  ;;  %vm1723_vm3 = vweird.f32 %v10159_v60 }
 0x17c   : > { %2439 = vmatpush.xpose.msrb.mxu2 %v1993_v23  ;;  %v1470_v28 = vsel %vm1469_vm9, %v10150_v57, %v1466_v40  ;;  %v1726_v51 = vand.u32 2147483647, %v10158_v18  ;;  %v1489_v12 = vor.u32 1.1754944e-38, %v1488_v63  ;;  %v1728_v25 = vand.u32 2147483648, %v10158_v18  ;;  %vm1724_vm14 = vmor %vm1722_vm11, %vm1723_vm3  ;;  %v10176_v40 = vld [vmem:[#allocation79_spill] sm:$0xff] }
 0x17d   : > { %v1475_v1 = vsel %vm7089_vm1, %v1474_v54, %v1470_v28  ;;  %v1719_v15 = vsub.f32 1.0, %v1718_v33  ;;  %v1481_v31 = vadd.f32 %v10155_v0, %v1480_v62  ;;  %vm1487_vm4 = vcmp.eq.f32.partialorder %v1486_v44, 8.507059e+37 }
 0x17e   : > { %v1973_v42 = vmul.f32 %v6320_v13, %v1475_v1  ;;  %v1418_v8 = vmul.f32 %v10163_v14, %v10162_v30  ;;  %vm7126_vm12 = vcmp.eq.f32.partialorder %v1726_v51, 8.507059e+37  ;;  %v1729_v27 = vor.u32 1.1754944e-38, %v1728_v25  ;;  %v10179_v1 = vld [vmem:[#allocation38_spill] sm:$0xff] }
 0x17f   : > { %v1720_v19 = vmul.f32 %v10159_v60, %v1719_v15  ;;  %vm1422_vm5 = vweird.f32 %v10162_v30  ;;  %v1485_v16 = vsel %vm7116_vm15, %v10155_v0, %v1481_v31  ;;  %vm1423_vm8 = vweird.f32 %v10163_v14 }
 0x180   : > { %2143 = vmatpush.xpose.msra.mxu3 %v1973_v42  ;;  %v1419_v11 = vsub.f32 1.0, %v1418_v8  ;;  %v1426_v37 = vand.u32 2147483647, %v10162_v30  ;;  %v1490_v17 = vsel %vm1487_vm4, %v1489_v12, %v1485_v16  ;;  %v1428_v4 = vand.u32 2147483648, %v10162_v30  ;;  %vm1424_vm0 = vmor %vm1422_vm5, %vm1423_vm8  ;;  %v10181_v8 = vld [vmem:[#allocation81_spill] sm:$0xff] }
 0x181   : > { %v1721_v58 = vadd.f32 %v10159_v60, %v1720_v19  ;;  %v1433_v52 = vmul.f32 %v10167_v39, %v10166_v20  ;;  %v1974_v49 = vmul.f32 %v6320_v13, %v1490_v17  ;;  %vm1437_vm7 = vweird.f32 %v10166_v20  ;;  %v10182_v19 = vld [vmem:[#allocation87_spill] sm:$0xff] }
 0x182   : > { %v1420_v61 = vmul.f32 %v10163_v14, %v1419_v11  ;;  %vm7146_vm13 = vcmp.eq.f32.partialorder %v1426_v37, 8.507059e+37  ;;  %vm1438_vm10 = vweird.f32 %v10167_v39  ;;  %v1441_v43 = vand.u32 2147483647, %v10166_v20  ;;  %v10201_v37 = vld [vmem:[#allocation24_spill] sm:$0xff] }
 0x183   : > { %v1725_v6 = vsel %vm1724_vm14, %v10159_v60, %v1721_v58  ;;  %v1434_v46 = vsub.f32 1.0, %v1433_v52  ;;  %2294 = vmatpush.xpose.msrb.mxu0 %v1974_v49  ;;  %v1443_v26 = vand.u32 2147483648, %v10166_v20  ;;  %v1673_v34 = vmul.f32 %v7098_v22, %v10151_v10  ;;  %vm7173_vm2 = vmor %vm1437_vm7, %vm1438_vm10 }
 0x184   : > { %v1730_v21 = vsel %vm7126_vm12, %v1729_v27, %v1725_v6  ;;  %v1421_v57 = vadd.f32 %v10163_v14, %v1420_v61  ;;  %v1429_v36 = vor.u32 1.1754944e-38, %v1428_v4  ;;  %vm7166_vm1 = vcmp.eq.f32.partialorder %v1441_v43, 8.507059e+37  ;;  %v10187_v43 = vld [vmem:[#allocation26_spill] sm:$0xff]  ;;  %v10203_v6 = vld [vmem:[#allocation73_spill] sm:$0xff] }
 0x185   : > { %v1990_v45 = vmul.f32 %v6320_v13, %v1730_v21  ;;  %v1435_v56 = vmul.f32 %v10167_v39, %v1434_v46  ;;  %v1444_v53 = vor.u32 1.1754944e-38, %v1443_v26  ;;  %v1674_v32 = vsub.f32 1.0, %v1673_v34  ;;  %v10188_v21 = vld [vmem:[#allocation39_spill] sm:$0xff] }
 0x186   : > { %v1425_v50 = vsel %vm1424_vm0, %v10163_v14, %v1421_v57  ;;  %vm1677_vm6 = vweird.f32 %v10151_v10  ;;  %v1681_v7 = vand.u32 2147483647, %v10151_v10  ;;  %v1683_v9 = vand.u32 2147483648, %v10151_v10 }
 0x187   : > { %2440 = vmatpush.xpose.msrb.mxu2 %v1990_v45  ;;  %v1430_v29 = vsel %vm7146_vm13, %v1429_v36, %v1425_v50  ;;  %v1436_v59 = vadd.f32 %v10167_v39, %v1435_v56  ;;  %v1675_v48 = vmul.f32 %v7098_v22, %v1674_v32  ;;  %vm1678_vm9 = vweird.f32 %v7098_v22 }
 0x188   : > { %v1970_v0 = vmul.f32 %v6320_v13, %v1430_v29  ;;  %v1373_v23 = vmul.f32 %v10175_v35, %v10174_v41  ;;  %v7189_v55 = vadd.f32 1.0, %v10176_v40  ;;  %vm7194_vm11 = vcmp.eq.f32.partialorder %v1681_v7, 8.507059e+37  ;;  %vm1679_vm15 = vmor %vm1677_vm6, %vm1678_vm9 }
 0x189   : > { %v1440_v44 = vsel %vm7173_vm2, %v10167_v39, %v1436_v59  ;;  %vm1377_vm3 = vweird.f32 %v10174_v41  ;;  %v1676_v18 = vadd.f32 %v7098_v22, %v1675_v48  ;;  %v1684_v60 = vor.u32 1.1754944e-38, %v1683_v9  ;;  %v10210_v59 = vld [vmem:[#allocation19_spill] sm:$0xff] }
 0x18a   : > { %2144 = vmatpush.xpose.msra.mxu3 %v1970_v0  ;;  %v1445_v63 = vsel %vm7166_vm1, %v1444_v53, %v1440_v44  ;;  %v1374_v33 = vsub.f32 1.0, %v1373_v23  ;;  %v1381_v62 = vand.u32 2147483647, %v10174_v41  ;;  %v1383_v51 = vand.u32 2147483648, %v10174_v41  ;;  %v10190_v53 = vld [vmem:[#allocation42_spill] sm:$0xff] }
 0x18b   : > { %v1971_v28 = vmul.f32 %v6320_v13, %v1445_v63  ;;  %v1388_v12 = vmul.f32 %v10180_v5, %v10179_v1  ;;  %v1680_v15 = vsel %vm1679_vm15, %v7098_v22, %v1676_v18  ;;  %vm1378_vm4 = vweird.f32 %v10175_v35 }
 0x18c   : > { %v1375_v25 = vmul.f32 %v10175_v35, %v1374_v33  ;;  %vm1392_vm12 = vweird.f32 %v10179_v1  ;;  %v1685_v10 = vsel %vm7194_vm11, %v1684_v60, %v1680_v15  ;;  %vm1393_vm5 = vweird.f32 %v10180_v5  ;;  %vm1379_vm8 = vmor %vm1377_vm3, %vm1378_vm4 }
 0x18d   : > { %2295 = vmatpush.xpose.msrb.mxu0 %v1971_v28  ;;  %v1389_v42 = vsub.f32 1.0, %v1388_v12  ;;  %v1396_v31 = vand.u32 2147483647, %v10179_v1  ;;  %v1987_v30 = vmul.f32 %v6320_v13, %v1685_v10  ;;  %v1398_v22 = vand.u32 2147483648, %v10179_v1  ;;  %vm7229_vm13 = vmor %vm1392_vm12, %vm1393_vm5  ;;  %v10198_v12 = vld [vmem:[#allocation32_spill] sm:$0xff] }
 0x18e   : > { %v1376_v14 = vadd.f32 %v10175_v35, %v1375_v25  ;;  %v1628_v38 = vmul.f32 %v10182_v19, %v10181_v8  ;;  %5559 = vrcp.f32 %v7189_v55  ;;  %vm1382_vm14 = vcmp.eq.f32.partialorder %v1381_v62, 8.507059e+37 }
 0x18f   : > { %v1384_v27 = vor.u32 1.1754944e-38, %v1383_v51  ;;  %v1390_v16 = vmul.f32 %v10180_v5, %v1389_v42  ;;  %2441 = vmatpush.xpose.msrb.mxu2 %v1987_v30  ;;  %v1399_v17 = vor.u32 1.1754944e-38, %v1398_v22  ;;  %v1636_v4 = vand.u32 2147483647, %v10181_v8 }
 0x190   : > { %v1380_v11 = vsel %vm1379_vm8, %v10175_v35, %v1376_v14  ;;  %v1629_v58 = vsub.f32 1.0, %v1628_v38  ;;  %vm1397_vm7 = vcmp.eq.f32.partialorder %v1396_v31, 8.507059e+37  ;;  %v1638_v52 = vand.u32 2147483648, %v10181_v8 }
 0x191   : > { %v1385_v20 = vsel %vm1382_vm14, %v1384_v27, %v1380_v11  ;;  %v1391_v39 = vadd.f32 %v10180_v5, %v1390_v16  ;;  %vm1632_vm10 = vweird.f32 %v10181_v8  ;;  %vm1633_vm0 = vweird.f32 %v10182_v19 }
 0x192   : > { %v1967_v49 = vmul.f32 %v6320_v13, %v1385_v20  ;;  %v1630_v61 = vmul.f32 %v10182_v19, %v1629_v58  ;;  %vm7243_vm1 = vcmp.eq.f32.partialorder %v1636_v4, 8.507059e+37  ;;  %v1639_v46 = vor.u32 1.1754944e-38, %v1638_v52  ;;  %vm1634_vm6 = vmor %vm1632_vm10, %vm1633_vm0 }
 0x193   : > { %v1395_v3 = vsel %vm7229_vm13, %v10180_v5, %v1391_v39  ;;  %v1328_v57 = vmul.f32 %v10188_v21, %v10187_v43  ;;  %vm1332_vm2 = vweird.f32 %v10187_v43  ;;  %v1336_v45 = vand.u32 2147483647, %v10187_v43  ;;  %v10197_v5 = vld [vmem:[#allocation22_spill] sm:$0xff] }
 0x194   : > { %2145 = vmatpush.xpose.msra.mxu3 %v1967_v49  ;;  %v1400_v26 = vsel %vm1397_vm7, %v1399_v17, %v1395_v3  ;;  %v1631_v34 = vadd.f32 %v10182_v19, %v1630_v61  ;;  %v5560_v36 = vpop.eup %5559  ;;  %v1338_v50 = vand.u32 2147483648, %v10187_v43  ;;  %v1343_v32 = vmul.f32 %v10190_v53, %v10189_v2  ;;  %v10202_v17 = vld [vmem:[#allocation37_spill] sm:$0xff] }
 0x195   : > { %v1968_v56 = vmul.f32 %v6320_v13, %v1400_v26  ;;  %v1329_v24 = vsub.f32 1.0, %v1328_v57  ;;  %vm1333_vm9 = vweird.f32 %v10188_v21  ;;  %vm7258_vm11 = vcmp.eq.f32.partialorder %v1336_v45, 8.507059e+37 }
 0x196   : > { %v1635_v29 = vsel %vm1634_vm6, %v10182_v19, %v1631_v34  ;;  %vm1347_vm3 = vweird.f32 %v10189_v2  ;;  %v1344_v0 = vsub.f32 1.0, %v1343_v32  ;;  %vm1348_vm15 = vweird.f32 %v10190_v53  ;;  %vm1334_vm4 = vmor %vm1332_vm2, %vm1333_vm9 }
 0x197   : > { %2296 = vmatpush.xpose.msrb.mxu0 %v1968_v56  ;;  %v1640_v7 = vsel %vm7243_vm1, %v1639_v46, %v1635_v29  ;;  %v1330_v9 = vmul.f32 %v10188_v21, %v1329_v24  ;;  %v1351_v41 = vand.u32 2147483647, %v10189_v2  ;;  %v1353_v35 = vand.u32 2147483648, %v10189_v2  ;;  %vm7278_vm5 = vmor %vm1347_vm3, %vm1348_vm15  ;;  %v10204_v46 = vld [vmem:[#allocation80_spill] sm:$0xff] }
 0x198   : > { %v1984_v48 = vmul.f32 %v6320_v13, %v1640_v7  ;;  %v1583_v23 = vmul.f32 %v5560_v36, %v7189_v55  ;;  %v1339_v44 = vor.u32 1.1754944e-38, %v1338_v50  ;;  %v1345_v54 = vmul.f32 %v10190_v53, %v1344_v0  ;;  %v10211_v7 = vld [vmem:[#allocation28_spill] sm:$0xff] }
 0x199   : > { %v1331_v40 = vadd.f32 %v10188_v21, %v1330_v9  ;;  %vm1587_vm12 = vweird.f32 %v7189_v55  ;;  %vm7282_vm8 = vcmp.eq.f32.partialorder %v1351_v41, 8.507059e+37  ;;  %v1354_v60 = vor.u32 1.1754944e-38, %v1353_v35 }
 0x19a   : > { %2442 = vmatpush.xpose.msrb.mxu2 %v1984_v48  ;;  %v1584_v33 = vsub.f32 1.0, %v1583_v23  ;;  %v1591_v28 = vand.u32 2147483647, %v7189_v55  ;;  %v1346_v51 = vadd.f32 %v10190_v53, %v1345_v54  ;;  %v1593_v1 = vand.u32 2147483648, %v7189_v55 }
 0x19b   : > { %v1335_v62 = vsel %vm1334_vm4, %v10188_v21, %v1331_v40  ;;  %v1283_v15 = vmul.f32 %v10198_v12, %v10197_v5  ;;  %vm1588_vm14 = vweird.f32 %v5560_v36  ;;  %vm1288_vm7 = vweird.f32 %v10198_v12  ;;  %v10205_v21 = vld [vmem:[#allocation76_spill] sm:$0xff] }
 0x19c   : > { %v1340_v25 = vsel %vm7258_vm11, %v1339_v44, %v1335_v62  ;;  %v1585_v10 = vmul.f32 %v5560_v36, %v1584_v33  ;;  %vm7294_vm13 = vcmp.eq.f32.partialorder %v1591_v28, 8.507059e+37  ;;  %v1350_v30 = vsel %vm7278_vm5, %v10190_v53, %v1346_v51  ;;  %vm1589_vm10 = vmor %vm1587_vm12, %vm1588_vm14  ;;  %v10215_v33 = vld [vmem:[#allocation30_spill] sm:$0xff]  ;;  %v786_v62 = vpop.f32.mrf.mxu0 }
 0x19d   : > { %v1964_v31 = vmul.f32 %v6320_v13, %v1340_v25  ;;  %v1594_v14 = vor.u32 1.1754944e-38, %v1593_v1  ;;  %v1284_v22 = vsub.f32 1.0, %v1283_v15  ;;  %v1355_v8 = vsel %vm7282_vm8, %v1354_v60, %v1350_v30  ;;  %v10214_v60 = vld [vmem:[#allocation21_spill] sm:$0xff]  ;;  %v7381_v30 = vpop.permute.xlu0 %958 }
 0x19e   : > { %v1586_v19 = vadd.f32 %v5560_v36, %v1585_v10  ;;  %v1291_v38 = vand.u32 2147483647, %v10197_v5  ;;  %v1965_v27 = vmul.f32 %v6320_v13, %v1355_v8  ;;  %v1293_v11 = vand.u32 2147483648, %v10197_v5 }
 0x19f   : > { %2146 = vmatpush.xpose.msra.mxu3 %v1964_v31  ;;  %v1285_v16 = vmul.f32 %v10198_v12, %v1284_v22  ;;  %v1298_v58 = vmul.f32 %v10202_v17, %v10201_v37  ;;  %vm1287_vm0 = vweird.f32 %v10197_v5  ;;  %vm1302_vm1 = vweird.f32 %v10201_v37 }
 0x1a0   : > { %v1590_v4 = vsel %vm1589_vm10, %v5560_v36, %v1586_v19  ;;  %vm1303_vm2 = vweird.f32 %v10202_v17  ;;  %2297 = vmatpush.xpose.msrb.mxu0 %v1965_v27  ;;  %v1294_v39 = vor.u32 1.1754944e-38, %v1293_v11  ;;  %vm1289_vm6 = vmor %vm1287_vm0, %vm1288_vm7  ;;  %v1306_v61 = vand.u32 2147483647, %v10201_v37 }
 0x1a1   : > { %v1595_v20 = vsel %vm7294_vm13, %v1594_v14, %v1590_v4  ;;  %v1286_v55 = vadd.f32 %v10198_v12, %v1285_v16  ;;  %v1299_v52 = vsub.f32 1.0, %v1298_v58  ;;  %v1308_v3 = vand.u32 2147483648, %v10201_v37  ;;  %vm7333_vm11 = vmor %vm1302_vm1, %vm1303_vm2  ;;  %v863_v37 = vpop.f32.mrf.mxu1  ;;  %v10220_v4 = vld [vmem:[#allocation63_spill] sm:$0xff] }
 0x1a2   : > { %v1981_v49 = vmul.f32 %v6320_v13, %v1595_v20  ;;  %v1538_v43 = vmul.f32 %v10204_v46, %v10203_v6  ;;  %5561 = vrcp.f32 %v10205_v21  ;;  %vm1292_vm9 = vcmp.eq.f32.partialorder %v1291_v38, 8.507059e+37  ;;  %v10221_v20 = vld [vmem:[#allocation69_spill] sm:$0xff] }
 0x1a3   : > { %v1290_v57 = vsel %vm1289_vm6, %v10198_v12, %v1286_v55  ;;  %v1300_v26 = vmul.f32 %v10202_v17, %v1299_v52  ;;  %vm7337_vm3 = vcmp.eq.f32.partialorder %v1306_v61, 8.507059e+37  ;;  %v1309_v56 = vor.u32 1.1754944e-38, %v1308_v3 }
 0x1a4   : > { %2443 = vmatpush.xpose.msrb.mxu2 %v1981_v49  ;;  %v1295_v34 = vsel %vm1292_vm9, %v1294_v39, %v1290_v57  ;;  %v1539_v24 = vsub.f32 1.0, %v1538_v43  ;;  %v1546_v53 = vand.u32 2147483647, %v10203_v6  ;;  %v1548_v32 = vand.u32 2147483648, %v10203_v6 }
 0x1a5   : > { %v1961_v50 = vmul.f32 %v6320_v13, %v1295_v34  ;;  %v1301_v2 = vadd.f32 %v10202_v17, %v1300_v26  ;;  %vm1542_vm15 = vweird.f32 %v10203_v6  ;;  %vm1543_vm4 = vweird.f32 %v10204_v46 }
 0x1a6   : > { %v1540_v29 = vmul.f32 %v10204_v46, %v1539_v24  ;;  %v1238_v9 = vmul.f32 %v10211_v7, %v10210_v59  ;;  %vm7353_vm12 = vcmp.eq.f32.partialorder %v1546_v53, 8.507059e+37  ;;  %vm1242_vm5 = vweird.f32 %v10210_v59  ;;  %vm1544_vm14 = vmor %vm1542_vm15, %vm1543_vm4  ;;  %v10223_v24 = vld [vmem:[#allocation64_spill] sm:$0xff]  ;;  %v789_v53 = vpop.f32.mrf.mxu0 }
 0x1a7   : > { %2147 = vmatpush.xpose.msra.mxu3 %v1961_v50  ;;  %v1305_v0 = vsel %vm7333_vm11, %v10202_v17, %v1301_v2  ;;  %vm1243_vm8 = vweird.f32 %v10211_v7  ;;  %v1246_v40 = vand.u32 2147483647, %v10210_v59  ;;  %v1549_v63 = vor.u32 1.1754944e-38, %v1548_v32 }
 0x1a8   : > { %v1310_v41 = vsel %vm7337_vm3, %v1309_v56, %v1305_v0  ;;  %v1541_v35 = vadd.f32 %v10204_v46, %v1540_v29  ;;  %v1239_v23 = vsub.f32 1.0, %v1238_v9  ;;  %v7363_v44 = vpop.eup %5561  ;;  %v1248_v18 = vand.u32 2147483648, %v10210_v59  ;;  %vm1244_vm0 = vmor %vm1242_vm5, %vm1243_vm8  ;;  %v10222_v56 = vld [vmem:[#allocation54_spill] sm:$0xff] }
 0x1a9   : > { %v1962_v54 = vmul.f32 %v6320_v13, %v1310_v41  ;;  %v1253_v28 = vmul.f32 %v10215_v33, %v10214_v60  ;;  %vm1257_vm13 = vweird.f32 %v10214_v60  ;;  %vm1258_vm7 = vweird.f32 %v10215_v33 }
 0x1aa   : > { %v1545_v51 = vsel %vm1544_vm14, %v10204_v46, %v1541_v35  ;;  %v1240_v1 = vmul.f32 %v10211_v7, %v1239_v23  ;;  %v1261_v15 = vand.u32 2147483647, %v10214_v60  ;;  %v1263_v25 = vand.u32 2147483648, %v10214_v60  ;;  %vm7398_vm6 = vmor %vm1257_vm13, %vm1258_vm7  ;;  %v7442_v35 = vpop.permute.xlu0 %963 }
 0x1ab   : > { %2298 = vmatpush.xpose.msrb.mxu0 %v1962_v54  ;;  %v1550_v5 = vsel %vm7353_vm12, %v1549_v63, %v1545_v51  ;;  %v1254_v12 = vsub.f32 1.0, %v1253_v28  ;;  %vm1247_vm10 = vcmp.eq.f32.partialorder %v1246_v40, 8.507059e+37  ;;  %v1493_v31 = vmul.f32 %v7363_v44, %v10205_v21  ;;  %v10227_v54 = vld [vmem:[#allocation60_spill] sm:$0xff] }
 0x1ac   : > { %v1978_v10 = vmul.f32 %v6320_v13, %v1550_v5  ;;  %v1241_v42 = vadd.f32 %v10211_v7, %v1240_v1  ;;  %v1249_v14 = vor.u32 1.1754944e-38, %v1248_v18  ;;  %vm7388_vm1 = vcmp.eq.f32.partialorder %v1261_v15, 8.507059e+37  ;;  %v10229_v15 = vld [vmem:[#allocation53_spill] sm:$0xff] }
 0x1ad   : > { %v1255_v22 = vmul.f32 %v10215_v33, %v1254_v12  ;;  %vm1497_vm2 = vweird.f32 %v10205_v21  ;;  %v1264_v27 = vor.u32 1.1754944e-38, %v1263_v25  ;;  %v1494_v16 = vsub.f32 1.0, %v1493_v31  ;;  %v10228_v12 = vld [vmem:[#allocation40_spill] sm:$0xff] }
 0x1ae   : > { %2444 = vmatpush.xpose.msrb.mxu2 %v1978_v10  ;;  %v1245_v19 = vsel %vm1244_vm0, %v10211_v7, %v1241_v42  ;;  %v1503_v11 = vand.u32 2147483648, %v10205_v21  ;;  %vm1498_vm9 = vweird.f32 %v7363_v44  ;;  %v1448_v55 = vmul.f32 %v10221_v20, %v10220_v4  ;;  %v792_v8 = vpop.f32.mrf.mxu0 }
 0x1af   : > { %v1250_v17 = vsel %vm1247_vm10, %v1249_v14, %v1245_v19  ;;  %v1256_v58 = vadd.f32 %v10215_v33, %v1255_v22  ;;  %v1495_v52 = vmul.f32 %v7363_v44, %v1494_v16  ;;  %v1501_v49 = vand.u32 2147483647, %v10205_v21  ;;  %vm1499_vm3 = vmor %vm1497_vm2, %vm1498_vm9 }
 0x1b0   : > { %v1958_v39 = vmul.f32 %v6320_v13, %v1250_v17  ;;  %v976_v61 = vadd.f32 %v7381_v30, %v786_v62  ;;  %v1504_v6 = vor.u32 1.1754944e-38, %v1503_v11  ;;  %v1449_v46 = vsub.f32 1.0, %v1448_v55  ;;  %v7470_v11 = vpop.permute.xlu1 %968 }
 0x1b1   : > { %v1260_v3 = vsel %vm7398_vm6, %v10215_v33, %v1256_v58  ;;  %vm1452_vm11 = vweird.f32 %v10220_v4  ;;  %v1496_v57 = vadd.f32 %v7363_v44, %v1495_v52  ;;  %v1456_v26 = vand.u32 2147483647, %v10220_v4  ;;  %v866_v33 = vpop.f32.mrf.mxu1 }
 0x1b2   : > { %2148 = vmatpush.xpose.msra.mxu3 %v1958_v39  ;;  %v1265_v43 = vsel %vm7388_vm1, %v1264_v27, %v1260_v3  ;;  %v1458_v34 = vand.u32 2147483648, %v10220_v4  ;;  %v1450_v36 = vmul.f32 %v10221_v20, %v1449_v46  ;;  %vm1453_vm15 = vweird.f32 %v10221_v20  ;;  %v10230_v4 = vld [vmem:[#allocation31_spill] sm:$0xff] }
 0x1b3   : > { %v1959_v45 = vmul.f32 %v6320_v13, %v1265_v43  ;;  %v1403_v50 = vmul.f32 %v10223_v24, %v10222_v56  ;;  %v977_v2 = vadd.f32 %v7381_v30, %v863_v37  ;;  %v1500_v32 = vsel %vm1499_vm3, %v7363_v44, %v1496_v57  ;;  %vm1454_vm5 = vmor %vm1452_vm11, %vm1453_vm15  ;;  %v10226_v44 = vld [vmem:[#allocation48_spill] sm:$0xff] }
 0x1b4   : > { %vm1502_vm4 = vcmp.eq.f32.partialorder %v1501_v49, 8.507059e+37  ;;  %vm7431_vm12 = vcmp.eq.f32.partialorder %v1456_v26, 8.507059e+37  ;;  %v1451_v59 = vadd.f32 %v10221_v20, %v1450_v36  ;;  %v1459_v7 = vor.u32 1.1754944e-38, %v1458_v34  ;;  %v7485_v49 = vld [vmem:[%s9723_s3 + $0x78] sm:$0xff] }
 0x1b5   : > { %2299 = vmatpush.xpose.msrb.mxu0 %v1959_v45  ;;  %v1505_v21 = vsel %vm1502_vm4, %v1504_v6, %v1500_v32  ;;  %2149 = vmatmul.f32.vlgmr.msra.gmra.mxu3 %v976_v61  ;;  %v1404_v9 = vsub.f32 1.0, %v1403_v50  ;;  %vm1407_vm8 = vweird.f32 %v10222_v56  ;;  %v1411_v48 = vand.u32 2147483647, %v10222_v56  ;;  %v940_v50 = vpop.f32.mrf.mxu2 }
 0x1b6   : > { %v1975_v0 = vmul.f32 %v6320_v13, %v1505_v21  ;;  %v1413_v41 = vand.u32 2147483648, %v10222_v56  ;;  %v1455_v23 = vsel %vm1454_vm5, %v10221_v20, %v1451_v59  ;;  %vm1408_vm14 = vweird.f32 %v10223_v24  ;;  %v10231_v20 = vld [vmem:[#allocation43_spill] sm:$0xff]  ;;  %2162 = vmatpush.xpose.msrb.mxu3 %v7485_v49  ;;  %2313 = vmatpush.xpose.msrb.mxu1 %v7485_v49 }
 0x1b7   : > { %v1405_v40 = vmul.f32 %v10223_v24, %v1404_v9  ;;  %v1358_v63 = vmul.f32 %v10227_v54, %v10226_v44  ;;  %v1460_v18 = vsel %vm7431_vm12, %v1459_v7, %v1455_v23  ;;  %v979_v60 = vadd.f32 %v7442_v35, %v789_v53  ;;  %vm1409_vm7 = vmor %vm1407_vm8, %vm1408_vm14  ;;  %v7519_v7 = vld [vmem:[%s9723_s3 + $0x68] sm:$0xff]  ;;  %v2018_v23 = vld [vmem:[%s9723_s3 + $0x60] sm:$0xff] }
 0x1b8   : > { %2445 = vmatpush.xpose.msrb.mxu2 %v1975_v0  ;;  %2300 = vmatmul.f32.vlgmr.msrb.gmra.mxu0 %v977_v2  ;;  %vm1412_vm13 = vcmp.eq.f32.partialorder %v1411_v48, 8.507059e+37  ;;  %v1414_v62 = vor.u32 1.1754944e-38, %v1413_v41  ;;  %v1972_v1 = vmul.f32 %v6320_v13, %v1460_v18  ;;  %vm1362_vm10 = vweird.f32 %v10226_v44  ;;  %v974_v9 = vpop.permute.xlu1 %973  ;;  %v10232_v48 = vld [vmem:[#allocation5_spill] sm:$0xff] }
 0x1b9   : > { %v1406_v28 = vadd.f32 %v10223_v24, %v1405_v40  ;;  %v1359_v51 = vsub.f32 1.0, %v1358_v63  ;;  %v1368_v5 = vand.u32 2147483648, %v10226_v44  ;;  %v1313_v25 = vmul.f32 %v10229_v15, %v10228_v12  ;;  %v869_v46 = vpop.f32.mrf.mxu1  ;;  %v2016_v18 = vld [vmem:[%s9723_s3 + $0x50] sm:$0xff] }
 0x1ba   : > { %vm1363_vm0 = vweird.f32 %v10227_v54  ;;  %v1366_v31 = vand.u32 2147483647, %v10226_v44  ;;  %v980_v22 = vadd.f32 %v7442_v35, %v866_v33  ;;  %vm1317_vm1 = vweird.f32 %v10228_v12 }
 0x1bb   : > { %v1410_v10 = vsel %vm1409_vm7, %v10223_v24, %v1406_v28  ;;  %v1360_v42 = vmul.f32 %v10227_v54, %v1359_v51  ;;  %v1314_v19 = vsub.f32 1.0, %v1313_v25  ;;  %vm1318_vm2 = vweird.f32 %v10229_v15  ;;  %vm1364_vm6 = vmor %vm1362_vm10, %vm1363_vm0  ;;  %v7504_v24 = vld [vmem:[%s9723_s3 + $0x70] sm:$0xff]  ;;  %v2014_v28 = vld [vmem:[%s9723_s3 + $0x40] sm:$0xff] }
 0x1bc   : > { %2446 = vmatpush.xpose.msrb.mxu2 %v1972_v1  ;;  %v1415_v14 = vsel %vm1412_vm13, %v1414_v62, %v1410_v10  ;;  %v1321_v27 = vand.u32 2147483647, %v10228_v12  ;;  %v1323_v16 = vand.u32 2147483648, %v10228_v12  ;;  %v1369_v17 = vor.u32 1.1754944e-38, %v1368_v5  ;;  %vm1319_vm3 = vmor %vm1317_vm1, %vm1318_vm2  ;;  %2314 = vmatpush.xpose.msrb.mxu1 %v7504_v24  ;;  %v2012_v1 = vld [vmem:[%s9723_s3 + $0x30] sm:$0xff]  ;;  %v2011_v12 = vld [vmem:[%s9723_s3 + $0x28] sm:$0xff] }
 0x1bd   : > { %2152 = vmatmul.f32.gmra.mxu3 %v979_v60  ;;  %v1361_v38 = vadd.f32 %v10227_v54, %v1360_v42  ;;  %v1969_v37 = vmul.f32 %v6320_v13, %v1415_v14  ;;  %v1315_v58 = vmul.f32 %v10229_v15, %v1314_v19  ;;  %v1268_v55 = vmul.f32 %v10231_v20, %v10230_v4  ;;  %v943_v44 = vpop.f32.mrf.mxu2  ;;  %v2015_v60 = vld [vmem:[%s9723_s3 + $0x48] sm:$0xff]  ;;  %v2009_v25 = vld [vmem:[%s9723_s3 + $0x18] sm:$0xff]  ;;  %v2008_v10 = vld [vmem:[%s9723_s3 + $0x10] sm:$0xff] }
 0x1be   : > { %vm1367_vm9 = vcmp.eq.f32.partialorder %v1366_v31, 8.507059e+37  ;;  %v982_v52 = vadd.f32 %v7470_v11, %v792_v8  ;;  %vm1322_vm11 = vcmp.eq.f32.partialorder %v1321_v27, 8.507059e+37  ;;  %v1324_v43 = vor.u32 1.1754944e-38, %v1323_v16  ;;  %2163 = vmatpush.xpose.msrb.mxu3 %v7504_v24  ;;  %v2007_v42 = vld [vmem:[%s9723_s3 + $0x8] sm:$0xff]  ;;  %v2006_v31 = vld [vmem:[%s9723_s3] sm:$0xff] }
 0x1bf   : > { %v1365_v39 = vsel %vm1364_vm6, %v10227_v54, %v1361_v38  ;;  %v1316_v3 = vadd.f32 %v10229_v15, %v1315_v58  ;;  %v1269_v6 = vsub.f32 1.0, %v1268_v55  ;;  %vm1272_vm15 = vweird.f32 %v10230_v4  ;;  %v10233_v54 = vld [vmem:[#allocation8_spill] sm:$0xff] }
 0x1c0   : > { %2447 = vmatpush.xpose.msrb.mxu2 %v1969_v37  ;;  %2303 = vmatmul.f32.gmra.mxu0 %v980_v22  ;;  %v1370_v61 = vsel %vm1367_vm9, %v1369_v17, %v1365_v39  ;;  %vm1273_vm4 = vweird.f32 %v10231_v20  ;;  %v1278_v57 = vand.u32 2147483648, %v10230_v4  ;;  %v1276_v36 = vand.u32 2147483647, %v10230_v4 }
 0x1c1   : > { %v1966_v26 = vmul.f32 %v6320_v13, %v1370_v61  ;;  %v1320_v34 = vsel %vm1319_vm3, %v10229_v15, %v1316_v3  ;;  %v1270_v45 = vmul.f32 %v10231_v20, %v1269_v6  ;;  %v983_v2 = vadd.f32 %v7470_v11, %v869_v46  ;;  %vm1274_vm12 = vmor %vm1272_vm15, %vm1273_vm4  ;;  %2315 = vmatpush.xpose.msrb.mxu1 %v7519_v7  ;;  %v2010_v15 = vld [vmem:[%s9723_s3 + $0x20] sm:$0xff] }
 0x1c2   : > { %v1325_v56 = vsel %vm1322_vm11, %v1324_v43, %v1320_v34  ;;  %v1279_v32 = vor.u32 1.1754944e-38, %v1278_v57  ;;  %vm1277_vm5 = vcmp.eq.f32.partialorder %v1276_v36, 8.507059e+37  ;;  %2164 = vmatpush.xpose.msrb.mxu3 %v7519_v7  ;;  %v985_v41 = vadd.f32 %v974_v9, %v10232_v48  ;;  %v2505_v36 = vld [vmem:[%s9724_s4] sm:$0xff] }
 0x1c3   : > { %v1271_v53 = vadd.f32 %v10231_v20, %v1270_v45  ;;  %v1963_v29 = vmul.f32 %v6320_v13, %v1325_v56  ;;  %v978_v40 = vadd.f32 %v7381_v30, %v940_v50  ;;  %v986_v63 = vadd.f32 %v974_v9, %v10233_v54 }
 0x1c4   : > { %2448 = vmatpush.xpose.msrb.mxu2 %v1966_v26  ;;  %v981_v30 = vadd.f32 %v7442_v35, %v943_v44  ;;  %v2013_v35 = vld [vmem:[%s9723_s3 + $0x38] sm:$0xff]  ;;  %vm10246_vm0 = vcmask 261120  }
 0x1c5   : > { %2155 = vmatmul.f32.gmra.mxu3 %v982_v52  ;;  %v1275_v21 = vsel %vm1274_vm12, %v10231_v20, %v1271_v53  ;;  %2316 = vmatpush.xpose.msrb.mxu1 %v2018_v23  ;;  %v946_v33 = vpop.f32.mrf.mxu2  ;;  %vm10247_vm9 = vmmov %vm10246_vm0  ;;  %v2508_v44 = vld [vmem:[%s9724_s4 + $0x18] sm:$0xff] }
 0x1c6   : > { %v1280_v59 = vsel %vm1277_vm5, %v1279_v32, %v1275_v21  ;;  %2165 = vmatpush.xpose.msrb.mxu3 %v2018_v23  ;;  %v984_v62 = vadd.f32 %v7470_v11, %v946_v33  ;;  %vm10248_vm11 = vmmov %vm10246_vm0 }
 0x1c7   : > { %v1960_v0 = vmul.f32 %v6320_v13, %v1280_v59  ;;  %v2017_v13 = vld [vmem:[%s9723_s3 + $0x58] sm:$0xff]  ;;  %v2506_v59 = vld [vmem:[%s9724_s4 + $0x8] sm:$0xff]  ;;  %vm10249_vm3 = vmmov %vm10246_vm0 }
 0x1c8   : > { %2449 = vmatpush.xpose.msrb.mxu2 %v1963_v29  ;;  %2306 = vmatmul.f32.gmra.mxu0 %v983_v2  ;;  %vm10250_vm15 = vmmov %vm10246_vm0 }
 0x1c9   : > { %2317 = vmatpush.xpose.msrb.mxu1 %v2017_v13  ;;  %vm10251_vm4 = vmmov %vm10246_vm0 }
 0x1ca   : > { %2166 = vmatpush.xpose.msrb.mxu3 %v2017_v13  ;;  %vm10252_vm12 = vmmov %vm10246_vm0 }
 0x1cc   : > { %2450 = vmatpush.xpose.msrb.mxu2 %v1960_v0  ;;  %v2512_v0 = vld [vmem:[%s9725_s5 + $0x18] sm:$0xff] }
 0x1cd   : > { %2158 = vmatmul.f32.gmra.mxu3 %v985_v41  ;;  %2318 = vmatpush.xpose.msrb.mxu1 %v2016_v18  ;;  %v949_v51 = vpop.f32.mrf.mxu2  ;;  %v2511_v41 = vld [vmem:[%s9725_s5 + $0x10] sm:$0xff] }
 0x1ce   : > { %2167 = vmatpush.xpose.msrb.mxu3 %v2016_v18  ;;  %v987_v5 = vadd.f32 %v974_v9, %v949_v51  ;;  %2530 = vperm.xlu2 %5324, %v2512_v0  }
 0x1cf   : > { %2451 = vmatmul.f32.vlgmr.msrb.gmra.mxu2 %v978_v40 }
 0x1d0   : > { %2309 = vmatmul.f32.gmra.mxu0 %v986_v63 }
 0x1d1   : > { %2319 = vmatpush.xpose.msrb.mxu1 %v2015_v60 }
 0x1d2   : > { %2168 = vmatpush.xpose.msrb.mxu3 %v2015_v60 }
 0x1d5   : > { %2320 = vmatpush.xpose.msrb.mxu1 %v2014_v28 }
 0x1d6   : > { %2169 = vmatpush.xpose.msrb.mxu3 %v2014_v28  ;;  %2525 = vperm.xlu2 %5324, %v2511_v41  }
 0x1d7   : > { %2454 = vmatmul.f32.gmra.mxu2 %v981_v30 }
 0x1d9   : > { %2321 = vmatpush.xpose.msrb.mxu1 %v2013_v35 }
 0x1da   : > { %2170 = vmatpush.xpose.msrb.mxu3 %v2013_v35 }
 0x1dd   : > { %2322 = vmatpush.xpose.msrb.mxu1 %v2012_v1 }
 0x1de   : > { %2171 = vmatpush.xpose.msrb.mxu3 %v2012_v1 }
 0x1df   : > { %2457 = vmatmul.f32.gmra.mxu2 %v984_v62 }
 0x1e1   : > { %2323 = vmatpush.xpose.msrb.mxu1 %v2011_v12 }
 0x1e2   : > { %2172 = vmatpush.xpose.msrb.mxu3 %v2011_v12 }
 0x1e5   : > { %2324 = vmatpush.xpose.msrb.mxu1 %v2010_v15 }
 0x1e6   : > { %2173 = vmatpush.xpose.msrb.mxu3 %v2010_v15 }
 0x1e7   : > { %2460 = vmatmul.f32.gmra.mxu2 %v987_v5  ;;  %v7639_v5 = vpop.permute.xlu0 %2520 }
 0x1e9   : > { %2325 = vmatpush.xpose.msrb.mxu1 %v2009_v25 }
 0x1ea   : > { %2174 = vmatpush.xpose.msrb.mxu3 %v2009_v25 }
 0x1ed   : > { %2326 = vmatpush.xpose.msrb.mxu1 %v2008_v10 }
 0x1ee   : > { %2175 = vmatpush.xpose.msrb.mxu3 %v2008_v10 }
 0x1f1   : > { %2327 = vmatpush.xpose.msrb.mxu1 %v2007_v42 }
 0x1f2   : > { %2176 = vmatpush.xpose.msrb.mxu3 %v2007_v42 }
 0x1f5   : > { %2328 = vmatpush.xpose.msrb.mxu1 %v2006_v31 }
 0x1f6   : > { %2177 = vmatpush.xpose.msrb.mxu3 %v2006_v31 }
 0x1fa   : > { %2464 = vmatpush.xpose.msra.mxu3 %v7485_v49 }
 0x1fe   : > { %2465 = vmatpush.xpose.msra.mxu3 %v7504_v24 }
 0x202   : > { %2466 = vmatpush.xpose.msra.mxu3 %v7519_v7 }
 0x206   : > { %2467 = vmatpush.xpose.msra.mxu3 %v2018_v23  ;;  %v2507_v23 = vld [vmem:[%s9724_s4 + $0x10] sm:$0xff] }
 0x20a   : > { %2468 = vmatpush.xpose.msra.mxu3 %v2017_v13 }
 0x20e   : > { %2469 = vmatpush.xpose.msra.mxu3 %v2016_v18 }
 0x212   : > { %2470 = vmatpush.xpose.msra.mxu3 %v2015_v60 }
 0x216   : > { %2471 = vmatpush.xpose.msra.mxu3 %v2014_v28 }
 0x21a   : > { %2472 = vmatpush.xpose.msra.mxu3 %v2013_v35 }
 0x21e   : > { %2473 = vmatpush.xpose.msra.mxu3 %v2012_v1 }
 0x222   : > { %2474 = vmatpush.xpose.msra.mxu3 %v2011_v12 }
 0x226   : > { %2475 = vmatpush.xpose.msra.mxu3 %v2010_v15  ;;  %v10257_v15 = vld [vmem:[#allocation70_spill] sm:$0xff] }
 0x228   : > { %v7637_v1 = vpop.permute.xlu2 %2530 }
 0x22a   : > { %2476 = vmatpush.xpose.msra.mxu3 %v2009_v25 }
 0x22e   : > { %2477 = vmatpush.xpose.msra.mxu3 %v2008_v10 }
 0x232   : > { %2478 = vmatpush.xpose.msra.mxu3 %v2007_v42 }
 0x235   : > { %v7571_v14 = vpop.f32.mrf.mxu0 }
 0x236   : > { %10234 = vst [vmem:[#allocation86_spill] sm:$0xff] %v7571_v14  ;;  %2329 = vmatmul.f32.vlgmr.msrb.gmra.mxu1 %v7571_v14  ;;  %2479 = vmatpush.xpose.msra.mxu3 %v2006_v31  ;;  %v10258_v31 = vmov 0.0  }
 0x238   : > { %v7574_v22 = vpop.f32.mrf.mxu3 }
 0x239   : > { %10235 = vst [vmem:[#allocation94_spill] sm:$0xff] %v7574_v22  ;;  %2178 = vmatmul.f32.vlgmr.msrb.gmra.mxu3 %v7574_v22 }
 0x23d   : > { %v7577_v8 = vpop.f32.mrf.mxu0 }
 0x23e   : > { %10236 = vst [vmem:[#allocation98_spill] sm:$0xff] %v7577_v8  ;;  %2332 = vmatmul.f32.gmra.mxu1 %v7577_v8 }
 0x240   : > { %v7580_v19 = vpop.f32.mrf.mxu3 }
 0x241   : > { %10237 = vst [vmem:[#allocation50_spill] sm:$0xff] %v7580_v19  ;;  %2181 = vmatmul.f32.gmra.mxu3 %v7580_v19 }
 0x245   : > { %v7583_v38 = vpop.f32.mrf.mxu0 }
 0x246   : > { %10238 = vst [vmem:[#allocation61_spill] sm:$0xff] %v7583_v38  ;;  %2335 = vmatmul.f32.gmra.mxu1 %v7583_v38 }
 0x248   : > { %v7586_v27 = vpop.f32.mrf.mxu3 }
 0x249   : > { %10239 = vst [vmem:[#allocation90_spill] sm:$0xff] %v7586_v27  ;;  %2184 = vmatmul.f32.gmra.mxu3 %v7586_v27 }
 0x24d   : > { %v7589_v16 = vpop.f32.mrf.mxu0 }
 0x24e   : > { %10240 = vst [vmem:[#allocation52_spill] sm:$0xff] %v7589_v16  ;;  %2338 = vmatmul.f32.gmra.mxu1 %v7589_v16 }
 0x250   : > { %v7592_v11 = vpop.f32.mrf.mxu3 }
 0x251   : > { %10241 = vst [vmem:[#allocation62_spill] sm:$0xff] %v7592_v11  ;;  %2187 = vmatmul.f32.gmra.mxu3 %v7592_v11 }
 0x252   : > { %v7595_v37 = vpop.f32.mrf.mxu2 }
 0x253   : > { %10242 = vst [vmem:[#allocation91_spill] sm:$0xff] %v7595_v37 }
 0x259   : > { %2480 = vmatmul.f32.vlgmr.msra.gmra.mxu3 %v7595_v37 }
 0x25a   : > { %v7598_v17 = vpop.f32.mrf.mxu2 }
 0x25b   : > { %10243 = vst [vmem:[#allocation96_spill] sm:$0xff] %v7598_v17 }
 0x261   : > { %2483 = vmatmul.f32.gmra.mxu3 %v7598_v17 }
 0x262   : > { %v7601_v58 = vpop.f32.mrf.mxu2 }
 0x263   : > { %10244 = vst [vmem:[#allocation41_spill] sm:$0xff] %v7601_v58 }
 0x269   : > { %2486 = vmatmul.f32.gmra.mxu3 %v7601_v58 }
 0x26a   : > { %v7604_v4 = vpop.f32.mrf.mxu2 }
 0x26b   : > { %10245 = vst [vmem:[#allocation55_spill] sm:$0xff] %v7604_v4 }
 0x271   : > { %2489 = vmatmul.f32.gmra.mxu3 %v7604_v4 }
 0x2b3   : > { %v2330_v20 = vpop.f32.mrf.mxu1 }
 0x2b4   : > { %v2346_v26 = vmul.f32 0.2, %v2330_v20  ;;  %vm2342_vm7 = vcmp.ge.f32.partialorder %v2330_v20, 0.0 }
 0x2b6   : > { %v2350_v56 = vsel %vm2342_vm7, %v2330_v20, %v2346_v26 }
 0x2bb   : > { %v2333_v55 = vpop.f32.mrf.mxu1 }
 0x2bc   : > { %v2179_v39 = vpop.f32.mrf.mxu3  ;;  %v2347_v43 = vmul.f32 0.2, %v2333_v55  ;;  %vm2343_vm13 = vcmp.ge.f32.partialorder %v2333_v55, 0.0 }
 0x2bd   : > { %v2195_v29 = vmul.f32 0.2, %v2179_v39  ;;  %vm2191_vm6 = vcmp.ge.f32.partialorder %v2179_v39, 0.0 }
 0x2be   : > { %v2351_v45 = vsel %vm2343_vm13, %v2333_v55, %v2347_v43 }
 0x2bf   : > { %v2199_v48 = vsel %vm2191_vm6, %v2179_v39, %v2195_v29  ;;  %vm2680_vm6 = vcmp.lt.s32.totalorder %v10257_v15, 8  ;;  %v7644_v39 = vpop.permute.xlu2 %2525 }
 0x2c0   : > { %v5152_v20 = vsel %vm2680_vm6, 1.0, %v10258_v31  ;;  %vm2725_vm6 = vcmask 15360  }
 0x2c3   : > { %v2336_v52 = vpop.f32.mrf.mxu1 }
 0x2c4   : > { %v2182_v49 = vpop.f32.mrf.mxu3  ;;  %v2348_v3 = vmul.f32 0.2, %v2336_v52  ;;  %vm2344_vm14 = vcmp.ge.f32.partialorder %v2336_v52, 0.0 }
 0x2c5   : > { %v2196_v53 = vmul.f32 0.2, %v2182_v49  ;;  %vm2192_vm2 = vcmp.ge.f32.partialorder %v2182_v49, 0.0 }
 0x2c6   : > { %v2352_v34 = vsel %vm2344_vm14, %v2336_v52, %v2348_v3  ;;  %vm10253_vm14 = vmmov %vm10246_vm0 }
 0x2c7   : > { %v2200_v7 = vsel %vm2192_vm2, %v2182_v49, %v2196_v53  ;;  %vm10256_vm2 = vmmov %vm10246_vm0  ;;  %v7647_v49 = vperm.slane %v5152_v20, 0 }
 0x2cb   : > { %v2339_v61 = vpop.f32.mrf.mxu1 }
 0x2cc   : > { %v2349_v6 = vmul.f32 0.2, %v2339_v61  ;;  %v2185_v46 = vpop.f32.mrf.mxu3  ;;  %vm2345_vm8 = vcmp.ge.f32.partialorder %v2339_v61, 0.0 }
 0x2cd   : > { %v2197_v50 = vmul.f32 0.2, %v2185_v46  ;;  %vm2193_vm1 = vcmp.ge.f32.partialorder %v2185_v46, 0.0 }
 0x2ce   : > { %v2353_v57 = vsel %vm2345_vm8, %v2339_v61, %v2349_v6 }
 0x2cf   : > { %2586 = vmatpush.msra.mxu1 %v2353_v57  ;;  %v2201_v21 = vsel %vm2193_vm1, %v2185_v46, %v2197_v50  ;;  %vm10255_vm1 = vmmov %vm10246_vm0 }
 0x2d1   : > { %2587 = vmatpush.msra.mxu1 %v2352_v34 }
 0x2d3   : > { %2588 = vmatpush.msra.mxu1 %v2351_v45  ;;  %v2516_v45 = vpop.permute.xlu1 %2515 }
 0x2d4   : > { %v2188_v24 = vpop.f32.mrf.mxu3 }
 0x2d5   : > { %2589 = vmatpush.msra.mxu1 %v2350_v56  ;;  %v2198_v2 = vmul.f32 0.2, %v2188_v24  ;;  %vm2194_vm10 = vcmp.ge.f32.partialorder %v2188_v24, 0.0 }
 0x2d6   : > { %5144 = vmatmul.msk.f32.vlgmr.msra.gmra.mxu1 %vm10246_vm0, %v2505_v36 }
 0x2d7   : > { %v2202_v32 = vsel %vm2194_vm10, %v2188_v24, %v2198_v2  ;;  %vm10254_vm10 = vmmov %vm10246_vm0 }
 0x2d8   : > { %2557 = vmatpush.msra.mxu0 %v2202_v32 }
 0x2da   : > { %2558 = vmatpush.msra.mxu0 %v2201_v21 }
 0x2dc   : > { %v2481_v9 = vpop.f32.mrf.mxu3  ;;  %2559 = vmatpush.msra.mxu0 %v2200_v7 }
 0x2dd   : > { %v2497_v33 = vmul.f32 0.2, %v2481_v9  ;;  %vm2493_vm7 = vcmp.ge.f32.partialorder %v2481_v9, 0.0 }
 0x2de   : > { %5145 = vmatmul.msk.f32.gmra.mxu1 %vm10247_vm9, %v2506_v59  ;;  %2560 = vmatpush.msra.mxu0 %v2199_v48 }
 0x2df   : > { %5140 = vmatmul.msk.f32.vlgmr.msra.gmra.mxu0 %vm10248_vm11, %v2505_v36  ;;  %v2501_v35 = vsel %vm2493_vm7, %v2481_v9, %v2497_v33 }
 0x2e4   : > { %v2484_v40 = vpop.f32.mrf.mxu3 }
 0x2e5   : > { %v2498_v30 = vmul.f32 0.2, %v2484_v40  ;;  %vm2494_vm13 = vcmp.ge.f32.partialorder %v2484_v40, 0.0 }
 0x2e6   : > { %5146 = vmatmul.msk.f32.gmra.mxu1 %vm10249_vm3, %v2507_v23 }
 0x2e7   : > { %5141 = vmatmul.msk.f32.gmra.mxu0 %vm10250_vm15, %v2506_v59  ;;  %v2502_v62 = vsel %vm2494_vm13, %v2484_v40, %v2498_v30 }
 0x2ec   : > { %v2487_v54 = vpop.f32.mrf.mxu3 }
 0x2ed   : > { %v2499_v13 = vmul.f32 0.2, %v2487_v54  ;;  %vm2495_vm8 = vcmp.ge.f32.partialorder %v2487_v54, 0.0 }
 0x2ee   : > { %5147 = vmatmul.msk.f32.gmra.mxu1 %vm10251_vm4, %v2508_v44 }
 0x2ef   : > { %5142 = vmatmul.msk.f32.gmra.mxu0 %vm10252_vm12, %v2507_v23  ;;  %v2503_v28 = vsel %vm2495_vm8, %v2487_v54, %v2499_v13 }
 0x2f4   : > { %v2490_v63 = vpop.f32.mrf.mxu3 }
 0x2f5   : > { %v2500_v18 = vmul.f32 0.2, %v2490_v63  ;;  %vm2496_vm5 = vcmp.ge.f32.partialorder %v2490_v63, 0.0 }
 0x2f7   : > { %5143 = vmatmul.msk.f32.gmra.mxu0 %vm10253_vm14, %v2508_v44  ;;  %v2504_v60 = vsel %vm2496_vm5, %v2490_v63, %v2500_v18 }
 0x2f8   : > { %2615 = vmatpush.msra.mxu2 %v2504_v60 }
 0x2fa   : > { %2616 = vmatpush.msra.mxu2 %v2503_v28 }
 0x2fc   : > { %2617 = vmatpush.msra.mxu2 %v2502_v62 }
 0x2fe   : > { %2618 = vmatpush.msra.mxu2 %v2501_v35 }
 0x2ff   : > { %5148 = vmatmul.msk.f32.vlgmr.msra.gmra.mxu2 %vm10254_vm10, %v2505_v36 }
 0x307   : > { %5149 = vmatmul.msk.f32.gmra.mxu2 %vm10246_vm0, %v2506_v59 }
 0x30f   : > { %5150 = vmatmul.msk.f32.gmra.mxu2 %vm10255_vm1, %v2507_v23 }
 0x317   : > { %5151 = vmatmul.msk.f32.gmra.mxu2 %vm10256_vm2, %v2508_v44  ;;  %vm2720_vm2 = vcmask 7168  }
 0x353   : > { %v2591_v51 = vpop.f32.mrf.mxu1 }
 0x354   : > { %v2592_v24 = vadd.f32 %v2591_v51, %v2516_v45 }
 0x356   : > { %v2645_v7 = vmul.f32 0.2, %v2592_v24  ;;  %vm2633_vm4 = vcmp.ge.f32.partialorder %v2592_v24, 0.0 }
 0x358   : > { %v2657_v40 = vsel %vm2633_vm4, %v2592_v24, %v2645_v7  ;;  %vm2073_vm4 = vcmask 130112  }
 0x359   : > { %v2669_v60 = vadd.f32 %v2657_v40, %v7571_v14  ;;  %v2745_v40 = vld [vmem:[%s9727_s7 + $0x18] sm:$0xff]  ;;  %v8040_v14 = vadd.s32 4294967216, %v10257_v15 }
 0x35b   : > { %v2594_v12 = vpop.f32.mrf.mxu1  ;;  %v7683_v35 = vmul.f32 %v7647_v49, %v2669_v60  ;;  %v10271_v60 = vld [vmem:[#allocation74_spill] sm:$0xff]  ;;  %10321 = vst [vmem:[#allocation24_spill] sm:$0xff] %v8040_v14 }
 0x35c   : > { %v2595_v25 = vadd.f32 %v2594_v12, %v7639_v5  ;;  %v2562_v10 = vpop.f32.mrf.mxu0  ;;  %vm993_vm0 = vcmp.gt.f32.partialorder %v10271_v60, 0.5 }
 0x35d   : > { %v2563_v54 = vadd.f32 %v2562_v10, %v2516_v45  ;;  %10264 = vst [vmem:[#allocation38_spill] sm:$0xff] %v7683_v35 }
 0x35e   : > { %vm2636_vm9 = vcmp.ge.f32.partialorder %v2595_v25, 0.0  ;;  %v2648_v42 = vmul.f32 0.2, %v2595_v25 }
 0x35f   : > { %v2644_v33 = vmul.f32 0.2, %v2563_v54  ;;  %vm2632_vm8 = vcmp.ge.f32.partialorder %v2563_v54, 0.0 }
 0x360   : > { %v2660_v55 = vsel %vm2636_vm9, %v2595_v25, %v2648_v42  ;;  %vm10294_vm9 = vcmask 261120  }
 0x361   : > { %v2672_v52 = vadd.f32 %v2660_v55, %v7577_v8  ;;  %v2656_v12 = vsel %vm2632_vm8, %v2563_v54, %v2644_v33  ;;  %v2743_v54 = vld [vmem:[%s9727_s7 + $0x8] sm:$0xff]  ;;  %v10272_v33 = vmov 0   ;;  %vm2085_vm8 = vcmask 326912  }
 0x362   : > { %v2668_v10 = vadd.f32 %v2656_v12, %v7574_v22 }
 0x363   : > { %v2597_v61 = vpop.f32.mrf.mxu1  ;;  %v7650_v3 = vmul.f32 %v7647_v49, %v2672_v52 }
 0x364   : > { %v2598_v6 = vadd.f32 %v2597_v61, %v7644_v39  ;;  %v2565_v46 = vpop.f32.mrf.mxu0  ;;  %v7696_v31 = vmul.f32 %v7647_v49, %v2668_v10  ;;  %v10275_v10 = vld [vmem:[#allocation9_spill] sm:$0xff] }
 0x365   : > { %10259 = vst [vmem:[#allocation44_spill] sm:$0xff] %v7650_v3  ;;  %2706 = vadd.xlane.f32.xlu2 %v7650_v3  ;;  %v2566_v43 = vadd.f32 %v2565_v46, %v7639_v5 }
 0x366   : > { %vm2639_vm11 = vcmp.ge.f32.partialorder %v2598_v6, 0.0  ;;  %v2651_v57 = vmul.f32 0.2, %v2598_v6  ;;  %10266 = vst [vmem:[#allocation81_spill] sm:$0xff] %v7696_v31 }
 0x367   : > { %vm2635_vm3 = vcmp.ge.f32.partialorder %v2566_v43, 0.0  ;;  %v2647_v26 = vmul.f32 0.2, %v2566_v43 }
 0x368   : > { %v2663_v34 = vsel %vm2639_vm11, %v2598_v6, %v2651_v57  ;;  %vm10298_vm11 = vmmov %vm10294_vm9 }
 0x369   : > { %v2659_v36 = vsel %vm2635_vm3, %v2566_v43, %v2647_v26  ;;  %v2675_v56 = vadd.f32 %v2663_v34, %v7583_v38  ;;  %vm10302_vm3 = vmmov %vm10294_vm9 }
 0x36a   : > { %v2671_v50 = vadd.f32 %v2659_v36, %v7580_v19 }
 0x36b   : > { %v2600_v2 = vpop.f32.mrf.mxu1  ;;  %v7658_v53 = vmul.f32 %v7647_v49, %v2675_v56 }
 0x36c   : > { %v2601_v32 = vadd.f32 %v2600_v2, %v7637_v1  ;;  %v2568_v29 = vpop.f32.mrf.mxu0  ;;  %v7662_v21 = vmul.f32 %v7647_v49, %v2671_v50 }
 0x36d   : > { %10260 = vst [vmem:[#allocation58_spill] sm:$0xff] %v7658_v53  ;;  %2708 = vadd.xlane.f32.xlu2 %v7658_v53  ;;  %v2569_v59 = vadd.f32 %v2568_v29, %v7644_v39 }
 0x36e   : > { %10261 = vst [vmem:[#allocation35_spill] sm:$0xff] %v7662_v21  ;;  %vm2642_vm15 = vcmp.ge.f32.partialorder %v2601_v32, 0.0  ;;  %v2654_v9 = vmul.f32 0.2, %v2601_v32  ;;  %2698 = vadd.xlane.f32.xlu1 %v7662_v21 }
 0x36f   : > { %vm2638_vm12 = vcmp.ge.f32.partialorder %v2569_v59, 0.0  ;;  %v2650_v0 = vmul.f32 0.2, %v2569_v59 }
 0x370   : > { %v2666_v48 = vsel %vm2642_vm15, %v2601_v32, %v2654_v9  ;;  %vm10306_vm15 = vmmov %vm10302_vm3 }
 0x371   : > { %v2662_v41 = vsel %vm2638_vm12, %v2569_v59, %v2650_v0  ;;  %v2678_v23 = vadd.f32 %v2666_v48, %v7589_v16  ;;  %v2833_v48 = vld [vmem:[%s9729_s9 + $0x10] sm:$0xff]  ;;  %vm2077_vm12 = vcmask 195712  }
 0x372   : > { %v2674_v44 = vadd.f32 %v2662_v41, %v7586_v27  ;;  %v2737_v41 = vld [vmem:[%s9728_s8 + $0x18] sm:$0xff] }
 0x373   : > { %v7670_v63 = vmul.f32 %v7647_v49, %v2678_v23  ;;  %v2736_v23 = vld [vmem:[%s9728_s8 + $0x10] sm:$0xff] }
 0x374   : > { %v2571_v13 = vpop.f32.mrf.mxu0  ;;  %v7673_v18 = vmul.f32 %v7647_v49, %v2674_v44  ;;  %v2735_v44 = vld [vmem:[%s9728_s8 + $0x8] sm:$0xff] }
 0x375   : > { %10262 = vst [vmem:[#allocation49_spill] sm:$0xff] %v7670_v63  ;;  %2710 = vadd.xlane.f32.xlu0 %v7670_v63  ;;  %3141 = vmatpush.msrb.mxu2 %v7670_v63  ;;  %v2572_v30 = vadd.f32 %v2571_v13, %v7637_v1  ;;  %v2832_v13 = vld [vmem:[%s9729_s9 + $0x8] sm:$0xff] }
 0x376   : > { %10263 = vst [vmem:[#allocation79_spill] sm:$0xff] %v7673_v18  ;;  %2700 = vadd.xlane.f32.xlu2 %v7673_v18 }
 0x377   : > { %vm2641_vm5 = vcmp.ge.f32.partialorder %v2572_v30, 0.0  ;;  %v2653_v28 = vmul.f32 0.2, %v2572_v30  ;;  %3142 = vmatpush.msrb.mxu2 %v7658_v53 }
 0x379   : > { %v2665_v62 = vsel %vm2641_vm5, %v2572_v30, %v2653_v28  ;;  %3143 = vmatpush.msrb.mxu2 %v7650_v3  ;;  %v2742_v30 = vld [vmem:[%s9727_s7] sm:$0xff]  ;;  %v994_v28 = vsel %vm993_vm0, 1, %v10272_v33  ;;  %vm2081_vm5 = vcmask 261312   ;;  %vm9877_vm0 = vcmask 654912  }
 0x37a   : > { %v2677_v51 = vadd.f32 %v2665_v62, %v7592_v11  ;;  %v995_v62 = vperm.slane %v994_v28, 0 }
 0x37b   : > { %3144 = vmatpush.msrb.mxu2 %v7683_v35 }
 0x37c   : > { %v7688_v25 = vmul.f32 %v7647_v49, %v2677_v51  ;;  %v2734_v51 = vld [vmem:[%s9728_s8] sm:$0xff]  ;;  %vm7762_vm1 = vcmp.eq.s32.totalorder %v995_v62, 1  ;;  %v10288_v62 = vld [vmem:[#allocation36_spill] sm:$0xff] }
 0x37e   : > { %10265 = vst [vmem:[#allocation51_spill] sm:$0xff] %v7688_v25  ;;  %3076 = vmatpush.msrb.mxu1 %v7688_v25  ;;  %2702 = vadd.xlane.f32.xlu2 %v7688_v25 }
 0x380   : > { %3077 = vmatpush.msrb.mxu1 %v7673_v18 }
 0x382   : > { %v2620_v42 = vpop.f32.mrf.mxu2  ;;  %3078 = vmatpush.msrb.mxu1 %v7662_v21 }
 0x383   : > { %v2621_v57 = vadd.f32 %v2620_v42, %v2516_v45  ;;  %v1003_v42 = vsel %vm7762_vm1, %v10275_v10, -inf  ;;  %v10289_v10 = vld [vmem:[#allocation25_spill] sm:$0xff] }
 0x384   : > { %3079 = vmatpush.msrb.mxu1 %v7696_v31 }
 0x385   : > { %v2646_v36 = vmul.f32 0.2, %v2621_v57  ;;  %vm2634_vm7 = vcmp.ge.f32.partialorder %v2621_v57, 0.0 }
 0x386   : > { %2704 = vadd.xlane.f32.xlu2 %v7683_v35 }
 0x387   : > { %v2658_v2 = vsel %vm2634_vm7, %v2621_v57, %v2646_v36  ;;  %v10280_v36 = vld [vmem:[#allocation88_spill] sm:$0xff]  ;;  %vm9879_vm7 = vcmask 523712  }
 0x388   : > { %v2670_v29 = vadd.f32 %v2658_v2, %v7595_v37 }
 0x38a   : > { %v2623_v20 = vpop.f32.mrf.mxu2  ;;  %v7719_v9 = vmul.f32 %v7647_v49, %v2670_v29  ;;  %v10283_v29 = vld [vmem:[#allocation3_spill] sm:$0xff] }
 0x38b   : > { %v2624_v55 = vadd.f32 %v2623_v20, %v7639_v5  ;;  %v10276_v20 = vld [vmem:[#allocation18_spill] sm:$0xff] }
 0x38c   : > { %10269 = vst [vmem:[#allocation39_spill] sm:$0xff] %v7719_v9 }
 0x38d   : > { %vm2637_vm14 = vcmp.ge.f32.partialorder %v2624_v55, 0.0  ;;  %v2649_v52 = vmul.f32 0.2, %v2624_v55 }
 0x38f   : > { %v2661_v61 = vsel %vm2637_vm14, %v2624_v55, %v2649_v52  ;;  %v1012_v55 = vsel %vm7762_vm1, %v10276_v20, -inf  ;;  %v10277_v52 = vld [vmem:[#allocation46_spill] sm:$0xff]  ;;  %vm2089_vm14 = vcmask 392512  }
 0x390   : > { %v2673_v6 = vadd.f32 %v2661_v61, %v7598_v17  ;;  %v1021_v61 = vsel %vm7762_vm1, %v10277_v52, -inf }
 0x392   : > { %v2626_v46 = vpop.f32.mrf.mxu2  ;;  %v7703_v43 = vmul.f32 %v7647_v49, %v2673_v6  ;;  %v10278_v6 = vld [vmem:[#allocation71_spill] sm:$0xff] }
 0x393   : > { %v2627_v26 = vadd.f32 %v2626_v46, %v7644_v39  ;;  %v2744_v39 = vld [vmem:[%s9727_s7 + $0x10] sm:$0xff]  ;;  %v1030_v46 = vsel %vm7762_vm1, %v10278_v6, -inf }
 0x394   : > { %10267 = vst [vmem:[#allocation87_spill] sm:$0xff] %v7703_v43  ;;  %2714 = vadd.xlane.f32.xlu0 %v7703_v43 }
 0x395   : > { %vm2640_vm13 = vcmp.ge.f32.partialorder %v2627_v26, 0.0  ;;  %v2652_v34 = vmul.f32 0.2, %v2627_v26 }
 0x397   : > { %v2664_v56 = vsel %vm2640_vm13, %v2627_v26, %v2652_v34  ;;  %v10279_v26 = vld [vmem:[#allocation6_spill] sm:$0xff]  ;;  %vm2093_vm13 = vcmask 458112  }
 0x398   : > { %v2676_v5 = vadd.f32 %v2664_v56, %v7601_v58  ;;  %v1000_v34 = vsel %vm7762_vm1, %v10279_v26, -inf  ;;  %v1039_v56 = vsel %vm7762_vm1, %v10280_v36, -inf  ;;  %v8062_v58 = vadd.s32 4294967192, %v10257_v15 }
 0x39a   : > { %v2629_v24 = vpop.f32.mrf.mxu2  ;;  %v7709_v50 = vmul.f32 %v7647_v49, %v2676_v5  ;;  %v10281_v5 = vld [vmem:[#allocation15_spill] sm:$0xff]  ;;  %10325 = vst [vmem:[#allocation80_spill] sm:$0xff] %v8062_v58 }
 0x39b   : > { %v2630_v32 = vadd.f32 %v2629_v24, %v7637_v1  ;;  %v2834_v1 = vld [vmem:[%s9729_s9 + $0x18] sm:$0xff]  ;;  %v1009_v24 = vsel %vm7762_vm1, %v10281_v5, -inf }
 0x39c   : > { %10268 = vst [vmem:[#allocation26_spill] sm:$0xff] %v7709_v50  ;;  %2716 = vadd.xlane.f32.xlu0 %v7709_v50 }
 0x39d   : > { %vm2643_vm10 = vcmp.ge.f32.partialorder %v2630_v32, 0.0  ;;  %v2655_v45 = vmul.f32 0.2, %v2630_v32 }
 0x39e   : > { %2758 = vperm.xlu2 %5324, %v2744_v39   ;;  %v10282_v39 = vld [vmem:[#allocation7_spill] sm:$0xff] }
 0x39f   : > { %v2667_v59 = vsel %vm2643_vm10, %v2630_v32, %v2655_v45  ;;  %v1001_v45 = vsel %vm7762_vm1, %v10282_v39, -inf  ;;  %vm9878_vm10 = vcmask 589312  }
 0x3a0   : > { %v2679_v7 = vadd.f32 %v2667_v59, %v7604_v4  ;;  %v997_v59 = vsel %vm7762_vm1, %v10283_v29, -inf }
 0x3a2   : > { %v7722_v0 = vmul.f32 %v7647_v49, %v2679_v7  ;;  %v2831_v49 = vld [vmem:[%s9729_s9] sm:$0xff]  ;;  %v10284_v7 = vld [vmem:[#allocation34_spill] sm:$0xff] }
 0x3a4   : > { %10270 = vst [vmem:[#allocation29_spill] sm:$0xff] %v7722_v0  ;;  %2712 = vadd.xlane.f32.xlu0 %v7719_v9  ;;  %2718 = vadd.xlane.f32.xlu1 %v7722_v0 }
 0x3a6   : > { %2852 = vperm.xlu2 %5324, %v2834_v1   ;;  %v1018_v1 = vsel %vm7762_vm1, %v10284_v7, -inf }
 0x3ac   : > { %2696 = vadd.xlane.f32.xlu1 %v7696_v31 }
 0x3ae   : > { %2847 = vperm.xlu2 %5324, %v2833_v48  }
 0x3b6   : > { %2837 = vperm.xlu2 %5324, %v2831_v49  }
 0x3b8   : > { %2824 = vperm.xlu0 %5322, %v2737_v41   ;;  %v10285_v41 = vld [vmem:[#allocation16_spill] sm:$0xff] }
 0x3c0   : > { %2819 = vperm.xlu0 %5322, %v2736_v23   ;;  %v1010_v23 = vsel %vm7762_vm1, %v10285_v41, -inf }
 0x3c5   : > { %2763 = vperm.xlu1 %5323, %v2745_v40   ;;  %v10286_v40 = vld [vmem:[#allocation12_spill] sm:$0xff] }
 0x3c8   : > { %2814 = vperm.xlu0 %5322, %v2735_v44   ;;  %v1006_v44 = vsel %vm7762_vm1, %v10286_v40, -inf  ;;  %v10295_v40 = vld [vmem:[#allocation84_spill] sm:$0xff] }
 0x3cd   : > { %2753 = vperm.xlu1 %5323, %v2743_v54  }
 0x3d0   : > { %2842 = vperm.xlu0 %5322, %v2832_v13   ;;  %v10287_v13 = vld [vmem:[#allocation66_spill] sm:$0xff] }
 0x3d5   : > { %2748 = vperm.xlu1 %5323, %v2742_v30   ;;  %v1027_v30 = vsel %vm7762_vm1, %v10287_v13, -inf }
 0x3d8   : > { %v2707_v57 = vpop.xlane.xlu2 %2706 }
 0x3dd   : > { %2809 = vperm.xlu1 %5323, %v2734_v51   ;;  %v1019_v51 = vsel %vm7762_vm1, %v10288_v62, -inf }
 0x3df   : > { %2026 = vmax.xlane.f32.xlu2 %v1003_v42  ;;  %v1015_v42 = vsel %vm7762_vm1, %v10289_v10, -inf }
 0x3e0   : > { %v2709_v2 = vpop.xlane.xlu2 %2708 }
 0x3e1   : > { %v2699_v54 = vpop.xlane.xlu1 %2698 }
 0x3e7   : > { %2032 = vmax.xlane.f32.xlu2 %v1012_v55 }
 0x3e8   : > { %v2711_v32 = vpop.xlane.xlu0 %2710 }
 0x3e9   : > { %v2701_v48 = vpop.xlane.xlu2 %2700 }
 0x3ea   : > { %v2723_v20 = vsel %vm2720_vm2, %v2701_v48, %v2709_v2  ;;  %v10291_v2 = vld [vmem:[#allocation67_spill] sm:$0xff]  ;;  %v10293_v48 = vld [vmem:[#allocation4_spill] sm:$0xff] }
 0x3ef   : > { %2038 = vmax.xlane.f32.xlu2 %v1021_v61 }
 0x3f1   : > { %v2703_v60 = vpop.xlane.xlu2 %2702 }
 0x3f2   : > { %v2724_v55 = vsel %vm2720_vm2, %v2703_v60, %v2711_v32  ;;  %v1028_v32 = vsel %vm7762_vm1, %v10291_v2, -inf  ;;  %v10307_v2 = vld [vmem:[#allocation56_spill] sm:$0xff] }
 0x3f7   : > { %2044 = vmax.xlane.f32.xlu2 %v1030_v46  ;;  %v2722_v46 = vsel %vm2720_vm2, %v2699_v54, %v2707_v57  ;;  %v10292_v57 = vld [vmem:[#allocation57_spill] sm:$0xff] }
 0x3f8   : > { %v10296_v54 = vld [vmem:[#allocation77_spill] sm:$0xff] }
 0x3f9   : > { %v2705_v39 = vpop.xlane.xlu2 %2704  ;;  %v1033_v13 = vsel %vm7762_vm1, %v10296_v54, -inf }
 0x3fa   : > { %2024 = vmax.xlane.f32.xlu0 %v1000_v34  ;;  %v10290_v34 = vld [vmem:[#allocation83_spill] sm:$0xff] }
 0x3fb   : > { %v1036_v36 = vsel %vm7762_vm1, %v10290_v34, -inf  ;;  %v10304_v34 = vld [vmem:[#allocation10_spill] sm:$0xff] }
 0x3ff   : > { %2050 = vmax.xlane.f32.xlu2 %v1039_v56 }
 0x401   : > { %v7850_v62 = vpop.permute.xlu2 %2758 }
 0x402   : > { %2030 = vmax.xlane.f32.xlu0 %v1009_v24 }
 0x407   : > { %2205 = vmax.xlane.f32.xlu2 %v1001_v45  ;;  %2022 = vmax.xlane.f32.xlu1 %v997_v59  ;;  %v2715_v49 = vpop.xlane.xlu0 %2714  ;;  %v1024_v45 = vsel %vm7762_vm1, %v10292_v57, -inf }
 0x408   : > { %v2727_v56 = vsel %vm2725_vm6, %v2722_v46, %v2715_v49  ;;  %v998_v49 = vsel %vm7762_vm1, %v10293_v48, -inf  ;;  %v10303_v46 = vld [vmem:[#allocation23_spill] sm:$0xff] }
 0x409   : > { %v2731_v24 = vmul.f32 0.125, %v2727_v56  ;;  %v10305_v56 = vld [vmem:[#allocation59_spill] sm:$0xff] }
 0x40a   : > { %2036 = vmax.xlane.f32.xlu0 %v1018_v1 }
 0x40f   : > { %2211 = vmax.xlane.f32.xlu2 %v1010_v23  ;;  %2028 = vmax.xlane.f32.xlu1 %v1006_v44  ;;  %v2717_v28 = vpop.xlane.xlu0 %2716  ;;  %v2738_v23 = vld [vmem:[%s9726_s6] sm:$0xff]  ;;  %v1037_v44 = vsel %vm7762_vm1, %v10295_v40, -inf  ;;  %v10312_v40 = vld [vmem:[#allocation72_spill] sm:$0xff] }
 0x410   : > { %v2728_v61 = vsel %vm2725_vm6, %v2723_v20, %v2717_v28  ;;  %v2739_v28 = vld [vmem:[%s9726_s6 + $0x8] sm:$0xff] }
 0x411   : > { %v2732_v5 = vmul.f32 0.125, %v2728_v61  ;;  %v2740_v61 = vld [vmem:[%s9726_s6 + $0x10] sm:$0xff] }
 0x412   : > { %2042 = vmax.xlane.f32.xlu0 %v1027_v30  ;;  %v10297_v30 = vld [vmem:[#allocation13_spill] sm:$0xff] }
 0x413   : > { %v1007_v60 = vsel %vm7762_vm1, %v10297_v30, -inf }
 0x417   : > { %2217 = vmax.xlane.f32.xlu2 %v1019_v51  ;;  %v2719_v52 = vpop.xlane.xlu1 %2718  ;;  %2034 = vmax.xlane.f32.xlu1 %v1015_v42  ;;  %v2713_v59 = vpop.xlane.xlu0 %2712  ;;  %v10299_v51 = vld [vmem:[#allocation11_spill] sm:$0xff]  ;;  %v10300_v42 = vld [vmem:[#allocation93_spill] sm:$0xff] }
 0x418   : > { %v2729_v6 = vsel %vm2725_vm6, %v2724_v55, %v2719_v52  ;;  %v999_v10 = vsel %vm7762_vm1, %v10299_v51, -inf  ;;  %v1042_v20 = vsel %vm7762_vm1, %v10300_v42, -inf  ;;  %v10301_v55 = vld [vmem:[#allocation27_spill] sm:$0xff]  ;;  %v3273_v51 = vld [vmem:[%s9732_s12 + $0x70] sm:$0xff] }
 0x419   : > { %v2733_v26 = vmul.f32 0.125, %v2729_v6  ;;  %v1016_v52 = vsel %vm7762_vm1, %v10301_v55, -inf  ;;  %v7867_v6 = vpop.permute.xlu2 %2852 }
 0x41a   : > { %2048 = vmax.xlane.f32.xlu0 %v1036_v36  ;;  %v1004_v36 = vsel %vm7762_vm1, %v10304_v34, -inf  ;;  %v10316_v34 = vld [vmem:[#allocation14_spill] sm:$0xff] }
 0x41b   : > { %2790 = vmatpush.msrb.mxu3 %v2733_v26  ;;  %v1008_v26 = vsel %vm7762_vm1, %v10303_v46, -inf  ;;  %v3272_v46 = vld [vmem:[%s9732_s12 + $0x68] sm:$0xff] }
 0x41d   : > { %2791 = vmatpush.msrb.mxu3 %v2732_v5  ;;  %v1025_v5 = vsel %vm7762_vm1, %v10305_v56, -inf }
 0x41f   : > { %2223 = vmax.xlane.f32.xlu2 %v1028_v32  ;;  %2792 = vmatpush.msrb.mxu3 %v2731_v24  ;;  %v2697_v29 = vpop.xlane.xlu1 %2696  ;;  %v2741_v24 = vld [vmem:[%s9726_s6 + $0x18] sm:$0xff]  ;;  %v1017_v32 = vsel %vm7762_vm1, %v10307_v2, -inf  ;;  %v10317_v2 = vld [vmem:[#allocation33_spill] sm:$0xff] }
 0x420   : > { %2040 = vmax.xlane.f32.xlu1 %v1024_v45  ;;  %v2721_v7 = vsel %vm2720_vm2, %v2697_v29, %v2705_v39  ;;  %v10308_v39 = vld [vmem:[#allocation20_spill] sm:$0xff]  ;;  %v10309_v29 = vld [vmem:[#allocation78_spill] sm:$0xff]  ;;  %vm2109_vm2 = vcmask 720512  }
 0x421   : > { %v2726_v1 = vsel %vm2725_vm6, %v2721_v7, %v2713_v59  ;;  %v1013_v57 = vsel %vm7762_vm1, %v10308_v39, -inf  ;;  %v7888_v45 = vpop.permute.xlu2 %2847  ;;  %v1034_v59 = vsel %vm7762_vm1, %v10309_v29, -inf  ;;  %v3271_v29 = vld [vmem:[%s9732_s12 + $0x60] sm:$0xff]  ;;  %vm9880_vm6 = vcmask 786112  }
 0x422   : > { %2203 = vmax.xlane.f32.xlu0 %v998_v49  ;;  %v2730_v41 = vmul.f32 0.125, %v2726_v1  ;;  %v10310_v1 = vld [vmem:[#allocation47_spill] sm:$0xff] }
 0x423   : > { %v1022_v48 = vsel %vm7762_vm1, %v10310_v1, -inf  ;;  %v10311_v49 = vld [vmem:[#allocation95_spill] sm:$0xff] }
 0x424   : > { %2793 = vmatpush.msrb.mxu3 %v2730_v41  ;;  %v1043_v41 = vsel %vm7762_vm1, %v10311_v49, -inf }
 0x425   : > { %5153 = vmatmul.msk.f32.vlgmr.msrb.gmra.mxu3 %vm10294_vm9, %v2738_v23  ;;  %vm2117_vm9 = vcmask 851712  }
 0x426   : > { %3206 = vmatpush.msra.mxu3 %v7722_v0 }
 0x427   : > { %2229 = vmax.xlane.f32.xlu2 %v1037_v44  ;;  %v1031_v44 = vsel %vm7762_vm1, %v10312_v40, -inf  ;;  %v3266_v40 = vld [vmem:[%s9732_s12 + $0x38] sm:$0xff] }
 0x428   : > { %2046 = vmax.xlane.f32.xlu1 %v1033_v13  ;;  %3207 = vmatpush.msra.mxu3 %v7709_v50  ;;  %v10313_v13 = vld [vmem:[#allocation17_spill] sm:$0xff] }
 0x429   : > { %v7901_v23 = vpop.permute.xlu2 %2837  ;;  %v1005_v30 = vsel %vm7762_vm1, %v10313_v13, -inf }
 0x42a   : > { %3208 = vmatpush.msra.mxu3 %v7703_v43  ;;  %2209 = vmax.xlane.f32.xlu0 %v1007_v60  ;;  %v7893_v7 = vpop.permute.xlu0 %2824 }
 0x42c   : > { %3209 = vmatpush.msra.mxu3 %v7719_v9 }
 0x42d   : > { %5154 = vmatmul.msk.f32.gmra.mxu3 %vm10298_vm11, %v2739_v28  ;;  %vm2121_vm11 = vcmask 917312  }
 0x42f   : > { %2354 = vmax.xlane.f32.xlu2 %v999_v10  ;;  %v10314_v10 = vld [vmem:[#allocation89_spill] sm:$0xff] }
 0x430   : > { %2052 = vmax.xlane.f32.xlu1 %v1042_v20  ;;  %v1040_v42 = vsel %vm7762_vm1, %v10314_v10, -inf  ;;  %v10315_v20 = vld [vmem:[#allocation45_spill] sm:$0xff]  ;;  %v3264_v10 = vld [vmem:[%s9732_s12 + $0x28] sm:$0xff] }
 0x431   : > { %v1014_v55 = vsel %vm7762_vm1, %v10315_v20, -inf  ;;  %v3274_v20 = vld [vmem:[%s9732_s12 + $0x78] sm:$0xff] }
 0x432   : > { %2215 = vmax.xlane.f32.xlu0 %v1016_v52  ;;  %v7906_v54 = vpop.permute.xlu0 %2819 }
 0x435   : > { %5155 = vmatmul.msk.f32.gmra.mxu3 %vm10302_vm3, %v2740_v61  ;;  %vm2125_vm3 = vcmask 982912  }
 0x437   : > { %2360 = vmax.xlane.f32.xlu2 %v1008_v26  ;;  %v7913_v28 = vpop.permute.xlu1 %2763 }
 0x438   : > { %2207 = vmax.xlane.f32.xlu1 %v1004_v36  ;;  %v1002_v36 = vsel %vm7762_vm1, %v10316_v34, -inf }
 0x43a   : > { %2221 = vmax.xlane.f32.xlu0 %v1025_v5  ;;  %v7926_v61 = vpop.permute.xlu0 %2814  ;;  %v3270_v5 = vld [vmem:[%s9732_s12 + $0x58] sm:$0xff] }
 0x43d   : > { %5156 = vmatmul.msk.f32.gmra.mxu3 %vm10306_vm15, %v2741_v24  ;;  %vm2129_vm15 = vcmask 1048512  }
 0x43f   : > { %2366 = vmax.xlane.f32.xlu2 %v1017_v32  ;;  %v7931_v26 = vpop.permute.xlu1 %2753  ;;  %v1011_v32 = vsel %vm7762_vm1, %v10317_v2, -inf  ;;  %v7987_v2 = vadd.s32 4294967280, %v10257_v15 }
 0x440   : > { %2213 = vmax.xlane.f32.xlu1 %v1013_v57 }
 0x442   : > { %2227 = vmax.xlane.f32.xlu0 %v1034_v59  ;;  %v7941_v24 = vpop.permute.xlu0 %2842  ;;  %v3268_v59 = vld [vmem:[%s9732_s12 + $0x48] sm:$0xff] }
 0x447   : > { %v7946_v39 = vpop.permute.xlu1 %2748 }
 0x448   : > { %2219 = vmax.xlane.f32.xlu1 %v1022_v48 }
 0x44a   : > { %2233 = vmax.xlane.f32.xlu0 %v1043_v41  ;;  %v3267_v41 = vld [vmem:[%s9732_s12 + $0x40] sm:$0xff] }
 0x44f   : > { %v7956_v48 = vpop.permute.xlu1 %2809 }
 0x450   : > { %2225 = vmax.xlane.f32.xlu1 %v1031_v44 }
 0x452   : > { %2358 = vmax.xlane.f32.xlu0 %v1005_v30  ;;  %v7911_v60 = vpop.xlane.xlu2 %2026 }
 0x457   : > { %3443 = vperm.xlu2 %5324, %v3273_v51   ;;  %v3263_v51 = vld [vmem:[%s9732_s12 + $0x20] sm:$0xff] }
 0x458   : > { %2231 = vmax.xlane.f32.xlu1 %v1040_v42 }
 0x45a   : > { %2364 = vmax.xlane.f32.xlu0 %v1014_v55  ;;  %v7924_v52 = vpop.xlane.xlu2 %2032  ;;  %v7978_v55 = vadd.s32 4294967288, %v10257_v15 }
 0x45f   : > { %3438 = vperm.xlu2 %5324, %v3272_v46  }
 0x460   : > { %2356 = vmax.xlane.f32.xlu1 %v1002_v36  ;;  %v7984_v36 = vadd.s32 4294967272, %v10257_v15 }
 0x462   : > { %v7936_v56 = vpop.xlane.xlu2 %2038 }
 0x467   : > { %3428 = vperm.xlu2 %5324, %v3270_v5  }
 0x468   : > { %2362 = vmax.xlane.f32.xlu1 %v1011_v32 }
 0x46a   : > { %v7948_v57 = vpop.xlane.xlu2 %2044 }
 0x46d   : > { %v2025_v1 = vpop.xlane.xlu0 %2024 }
 0x46e   : > { %3433 = vperm.xlu0 %5322, %v3271_v29   ;;  %v2072_v32 = vperm.slane %v2025_v1, %v7978_v55  ;;  %v3262_v29 = vld [vmem:[%s9732_s12 + $0x18] sm:$0xff] }
 0x46f   : > { %3418 = vperm.xlu2 %5324, %v3268_v59  }
 0x472   : > { %v7958_v49 = vpop.xlane.xlu2 %2050 }
 0x475   : > { %v2031_v44 = vpop.xlane.xlu0 %2030 }
 0x476   : > { %3413 = vperm.xlu0 %5322, %v3267_v41  }
 0x477   : > { %3408 = vperm.xlu2 %5324, %v3266_v40  }
 0x47a   : > { %v7966_v13 = vpop.xlane.xlu2 %2205  ;;  %v2023_v30 = vpop.xlane.xlu1 %2022 }
 0x47b   : > { %v2070_v46 = vperm.slane %v2023_v30, %v10257_v15  ;;  %v3269_v30 = vld [vmem:[%s9732_s12 + $0x50] sm:$0xff] }
 0x47d   : > { %v2037_v42 = vpop.xlane.xlu0 %2036  ;;  %v2074_v41 = vsel %vm2073_vm4, %v2072_v32, %v2070_v46  ;;  %v8008_v46 = vadd.s32 4294967256, %v10257_v15 }
 0x47e   : > { %3393 = vperm.xlu0 %5322, %v3263_v51   ;;  %v2076_v51 = vperm.slane %v7911_v60, %v7987_v2 }
 0x47f   : > { %3398 = vperm.xlu2 %5324, %v3264_v10   ;;  %v8001_v10 = vadd.s32 4294967264, %v10257_v15 }
 0x480   : > { %v2078_v1 = vsel %vm2077_vm12, %v2076_v51, %v2074_v41  ;;  %v8019_v51 = vadd.s32 4294967240, %v10257_v15 }
 0x481   : > { %3448 = vperm.xlu1 %5323, %v3274_v20   ;;  %v8005_v20 = vadd.s32 4294967248, %v10257_v15  ;;  %v2084_v16 = vperm.slane %v2031_v44, %v8001_v10  ;;  %v8026_v44 = vadd.s32 4294967224, %v10257_v15 }
 0x482   : > { %v7981_v34 = vpop.xlane.xlu2 %2211  ;;  %v2029_v5 = vpop.xlane.xlu1 %2028  ;;  %10318 = vst [vmem:[#allocation42_spill] sm:$0xff] %v8019_v51 }
 0x483   : > { %v2080_v40 = vperm.slane %v2029_v5, %v7984_v36  ;;  %10319 = vst [vmem:[#allocation22_spill] sm:$0xff] %v8026_v44 }
 0x485   : > { %v2043_v59 = vpop.xlane.xlu0 %2042  ;;  %v2082_v5 = vsel %vm2081_vm5, %v2080_v40, %v2078_v1  ;;  %v3265_v40 = vld [vmem:[%s9732_s12 + $0x30] sm:$0xff] }
 0x486   : > { %v2086_v4 = vsel %vm2085_vm8, %v2084_v16, %v2082_v5  ;;  %v8029_v16 = vadd.s32 4294967232, %v10257_v15 }
 0x487   : > { %3388 = vperm.xlu2 %5324, %v3262_v29  }
 0x488   : > { %10320 = vst [vmem:[#allocation32_spill] sm:$0xff] %v8029_v16 }
 0x489   : > { %3423 = vperm.xlu1 %5323, %v3269_v30   ;;  %v2088_v30 = vperm.slane %v7924_v52, %v8008_v46  ;;  %v2096_v52 = vperm.slane %v2037_v42, %v8019_v51  ;;  %v3261_v42 = vld [vmem:[%s9732_s12 + $0x10] sm:$0xff] }
 0x48a   : > { %v8011_v32 = vpop.xlane.xlu2 %2217  ;;  %v2035_v60 = vpop.xlane.xlu1 %2034 }
 0x48b   : > { %v2092_v29 = vperm.slane %v2035_v60, %v8005_v20  ;;  %v2090_v1 = vsel %vm2089_vm14, %v2088_v30, %v2086_v4  ;;  %v2100_v30 = vperm.slane %v7936_v56, %v8029_v16  ;;  %v8051_v56 = vadd.s32 4294967200, %v10257_v15 }
 0x48d   : > { %v2049_v41 = vpop.xlane.xlu0 %2048  ;;  %v2094_v5 = vsel %vm2093_vm13, %v2092_v29, %v2090_v1  ;;  %v8047_v1 = vadd.s32 4294967208, %v10257_v15  ;;  %10323 = vst [vmem:[#allocation73_spill] sm:$0xff] %v8051_v56 }
 0x48e   : > { %v2098_v38 = vsel %vm9879_vm7, %v2096_v52, %v2094_v5  ;;  %v2108_v5 = vperm.slane %v2043_v59, %v8040_v14 }
 0x48f   : > { %10322 = vst [vmem:[#allocation37_spill] sm:$0xff] %v8047_v1 }
 0x491   : > { %3403 = vperm.xlu1 %5323, %v3265_v40   ;;  %v2102_v40 = vsel %vm9878_vm10, %v2100_v30, %v2098_v38  ;;  %v2112_v30 = vperm.slane %v7948_v57, %v8047_v1 }
 0x492   : > { %v8033_v60 = vpop.xlane.xlu2 %2223 }
 0x493   : > { %v2041_v11 = vpop.xlane.xlu1 %2040 }
 0x494   : > { %v2104_v4 = vperm.slane %v2041_v11, %v8026_v44 }
 0x495   : > { %v2204_v29 = vpop.xlane.xlu0 %2203 }
 0x496   : > { %v2106_v11 = vsel %vm9877_vm0, %v2104_v4, %v2102_v40  ;;  %v8071_v40 = vadd.s32 4294967184, %v10257_v15  ;;  %v2251_v17 = vperm.slane %v2204_v29, %v10257_v15 }
 0x497   : > { %v2110_v8 = vsel %vm2109_vm2, %v2108_v5, %v2106_v11  ;;  %v2120_v11 = vperm.slane %v2049_v41, %v8062_v58  ;;  %v8076_v5 = vadd.s32 4294967176, %v10257_v15 }
 0x498   : > { %v2114_v59 = vsel %vm9880_vm6, %v2112_v30, %v2110_v8  ;;  %10327 = vst [vmem:[#allocation76_spill] sm:$0xff] %v8071_v40  ;;  %v2124_v8 = vperm.slane %v7958_v49, %v8071_v40 }
 0x499   : > { %3383 = vperm.xlu1 %5323, %v3261_v42   ;;  %10328 = vst [vmem:[#allocation19_spill] sm:$0xff] %v8076_v5 }
 0x49a   : > { %v8056_v52 = vpop.xlane.xlu2 %2229 }
 0x49b   : > { %v2047_v38 = vpop.xlane.xlu1 %2046 }
 0x49c   : > { %v2116_v4 = vperm.slane %v2047_v38, %v8051_v56 }
 0x49d   : > { %v2210_v42 = vpop.xlane.xlu0 %2209 }
 0x49e   : > { %v2118_v57 = vsel %vm2117_vm9, %v2116_v4, %v2114_v59 }
 0x49f   : > { %v2122_v38 = vsel %vm2121_vm11, %v2120_v11, %v2118_v57 }
 0x4a0   : > { %v2126_v4 = vsel %vm2125_vm3, %v2124_v8, %v2122_v38 }
 0x4a2   : > { %v8080_v27 = vpop.xlane.xlu2 %2354 }
 0x4a3   : > { %v2053_v30 = vpop.xlane.xlu1 %2052 }
 0x4a4   : > { %v2128_v41 = vperm.slane %v2053_v30, %v8076_v5  ;;  %v2252_v30 = vperm.slane %v7966_v13, %v7978_v55  ;;  %v2258_v13 = vperm.slane %v7981_v34, %v8001_v10 }
 0x4a5   : > { %v2216_v57 = vpop.xlane.xlu0 %2215 }
 0x4a6   : > { %v2130_v59 = vsel %vm2129_vm15, %v2128_v41, %v2126_v4  ;;  %v2253_v38 = vsel %vm2073_vm4, %v2252_v30, %v2251_v17 }
 0x4a7   : > { %2132 = vst [vmem:[%s8089_s19] sm:$0x1] %v2130_v59  ;;  %v2256_v59 = vperm.slane %v2210_v42, %v7984_v36 }
 0x4a8   : > { %v2795_v11 = vpop.f32.mrf.mxu3 }
 0x4aa   : > { %v8095_v37 = vpop.xlane.xlu2 %2360 }
 0x4ab   : > { %v2208_v22 = vpop.xlane.xlu1 %2207 }
 0x4ac   : > { %v2254_v19 = vperm.slane %v2208_v22, %v7987_v2 }
 0x4ad   : > { %v2222_v41 = vpop.xlane.xlu0 %2221 }
 0x4ae   : > { %v2255_v8 = vsel %vm2077_vm12, %v2254_v19, %v2253_v38  ;;  %v2262_v38 = vperm.slane %v2216_v57, %v8005_v20 }
 0x4af   : > { %v2257_v29 = vsel %vm2081_vm5, %v2256_v59, %v2255_v8  ;;  %v2796_v59 = vadd.f32 %v2795_v11, %v7946_v39  ;;  %v2270_v39 = vperm.slane %v8033_v60, %v8040_v14 }
 0x4b0   : > { %v2798_v63 = vpop.f32.mrf.mxu3  ;;  %v2259_v17 = vsel %vm2085_vm8, %v2258_v13, %v2257_v29  ;;  %v2268_v13 = vperm.slane %v2222_v41, %v8026_v44 }
 0x4b1   : > { %v2799_v34 = vadd.f32 %v2798_v63, %v7931_v26 }
 0x4b2   : > { %v8105_v4 = vpop.xlane.xlu2 %2366 }
 0x4b3   : > { %v2214_v53 = vpop.xlane.xlu1 %2213 }
 0x4b4   : > { %v2260_v22 = vperm.slane %v2214_v53, %v8008_v46  ;;  %v2264_v53 = vperm.slane %v8011_v32, %v8019_v51 }
 0x4b5   : > { %v2228_v25 = vpop.xlane.xlu0 %2227 }
 0x4b6   : > { %v2261_v19 = vsel %vm2089_vm14, %v2260_v22, %v2259_v17  ;;  %v2828_v17 = vmul.f32 %v7926_v61, %v2799_v34 }
 0x4b7   : > { %v2263_v49 = vsel %vm2093_vm13, %v2262_v38, %v2261_v19  ;;  %v2274_v38 = vperm.slane %v2228_v25, %v8051_v56 }
 0x4b8   : > { %v2801_v30 = vpop.f32.mrf.mxu3  ;;  %v2265_v22 = vsel %vm9879_vm7, %v2264_v53, %v2263_v49  ;;  %v2856_v49 = vadd.f32 %v7941_v24, %v2828_v17 }
 0x4b9   : > { %v2802_v42 = vadd.f32 %v2801_v30, %v7850_v62  ;;  %v2827_v30 = vmul.f32 %v7956_v48, %v2796_v59 }
 0x4ba   : > { %vm2860_vm7 = vcmp.ge.f32.partialorder %v2856_v49, 0.0 }
 0x4bb   : > { %v2220_v0 = vpop.xlane.xlu1 %2219  ;;  %v2829_v29 = vmul.f32 %v7906_v54, %v2802_v42  ;;  %v2864_v42 = vmul.f32 0.2, %v2856_v49 }
 0x4bc   : > { %v2266_v8 = vperm.slane %v2220_v0, %v8029_v16 }
 0x4bd   : > { %v2857_v32 = vadd.f32 %v7888_v45, %v2829_v29  ;;  %v2234_v41 = vpop.xlane.xlu0 %2233  ;;  %v2868_v29 = vsel %vm2860_vm7, %v2856_v49, %v2864_v42  ;;  %v2881_v42 = vld [vmem:[%s9730_s10 + $0x50] sm:$0xff] }
 0x4be   : > { %v2267_v57 = vsel %vm9878_vm10, %v2266_v8, %v2265_v22  ;;  %v2280_v25 = vperm.slane %v2234_v41, %v8076_v5  ;;  %v3000_v41 = vld [vmem:[%s9731_s11] sm:$0xff] }
 0x4bf   : > { %v2269_v63 = vsel %vm9877_vm0, %v2268_v13, %v2267_v57  ;;  %vm2861_vm10 = vcmp.ge.f32.partialorder %v2857_v32, 0.0 }
 0x4c0   : > { %v2804_v62 = vpop.f32.mrf.mxu3  ;;  %v2271_v48 = vsel %vm2109_vm2, %v2270_v39, %v2269_v63  ;;  %v10330_v39 = vperm.slane %v8095_v37, %v7984_v36  ;;  %v2874_v37 = vld [vmem:[%s9730_s10 + $0x18] sm:$0xff]  ;;  %v2875_v36 = vld [vmem:[%s9730_s10 + $0x20] sm:$0xff] }
 0x4c1   : > { %v2805_v0 = vadd.f32 %v2804_v62, %v7913_v28  ;;  %v2855_v28 = vadd.f32 %v7901_v23, %v2827_v30 }
 0x4c3   : > { %v2830_v26 = vmul.f32 %v7893_v7, %v2805_v0  ;;  %v2226_v54 = vpop.xlane.xlu1 %2225  ;;  %v2865_v7 = vmul.f32 0.2, %v2857_v32  ;;  %v2863_v53 = vmul.f32 0.2, %v2855_v28  ;;  %v2402_v0 = vperm.slane %v8080_v27, %v10257_v15 }
 0x4c4   : > { %v2272_v11 = vperm.slane %v2226_v54, %v8047_v1 }
 0x4c5   : > { %v2858_v61 = vadd.f32 %v7867_v6, %v2830_v26  ;;  %v2276_v6 = vperm.slane %v8056_v52, %v8062_v58  ;;  %v2869_v24 = vsel %vm2861_vm10, %v2857_v32, %v2865_v7  ;;  %v2871_v52 = vld [vmem:[%s9730_s10] sm:$0xff]  ;;  %v2359_v13 = vpop.xlane.xlu0 %2358  ;;  %vm10329_vm10 = vcmask 261120   ;;  %v2872_v26 = vld [vmem:[%s9730_s10 + $0x8] sm:$0xff]  ;;  %v3002_v7 = vld [vmem:[%s9731_s11 + $0x10] sm:$0xff] }
 0x4c6   : > { %v2273_v45 = vsel %vm9880_vm6, %v2272_v11, %v2271_v48  ;;  %vm2859_vm6 = vcmp.ge.f32.partialorder %v2855_v28, 0.0  ;;  %v2405_v32 = vperm.slane %v2359_v13, %v7987_v2  ;;  %vm10331_vm7 = vmmov %vm10329_vm10  ;;  %v2878_v48 = vld [vmem:[%s9730_s10 + $0x38] sm:$0xff]  ;;  %v3010_v13 = vld [vmem:[%s9731_s11 + $0x50] sm:$0xff] }
 0x4c7   : > { %vm2862_vm0 = vcmp.ge.f32.partialorder %v2858_v61, 0.0  ;;  %v2866_v19 = vmul.f32 0.2, %v2858_v61  ;;  %v2275_v8 = vsel %vm2117_vm9, %v2274_v38, %v2273_v45  ;;  %v2867_v62 = vsel %vm2859_vm6, %v2855_v28, %v2863_v53  ;;  %v3001_v45 = vld [vmem:[%s9731_s11 + $0x8] sm:$0xff] }
 0x4c8   : > { %v2277_v59 = vsel %vm2121_vm11, %v2276_v6, %v2275_v8  ;;  %v2880_v38 = vld [vmem:[%s9730_s10 + $0x48] sm:$0xff]  ;;  %v3004_v8 = vld [vmem:[%s9731_s11 + $0x20] sm:$0xff]  ;;  %v2882_v6 = vld [vmem:[%s9730_s10 + $0x58] sm:$0xff] }
 0x4c9   : > { %v2870_v60 = vsel %vm2862_vm0, %v2858_v61, %v2866_v19  ;;  %v2873_v61 = vld [vmem:[%s9730_s10 + $0x10] sm:$0xff]  ;;  %v2879_v19 = vld [vmem:[%s9730_s10 + $0x40] sm:$0xff]  ;;  %v2884_v53 = vld [vmem:[%s9730_s10 + $0x68] sm:$0xff] }
 0x4ca   : > { %2947 = vmatpush.msrb.mxu0 %v2870_v60  ;;  %v3003_v60 = vld [vmem:[%s9731_s11 + $0x18] sm:$0xff] }
 0x4cb   : > { %v2232_v23 = vpop.xlane.xlu1 %2231 }
 0x4cc   : > { %v2278_v34 = vperm.slane %v2232_v23, %v8071_v40  ;;  %2948 = vmatpush.msrb.mxu0 %v2869_v24  ;;  %v2883_v23 = vld [vmem:[%s9730_s10 + $0x60] sm:$0xff]  ;;  %v3005_v24 = vld [vmem:[%s9731_s11 + $0x28] sm:$0xff] }
 0x4cd   : > { %v2365_v27 = vpop.xlane.xlu0 %2364 }
 0x4ce   : > { %v2279_v22 = vsel %vm2125_vm3, %v2278_v34, %v2277_v59  ;;  %2949 = vmatpush.msrb.mxu0 %v2868_v29  ;;  %v2411_v2 = vperm.slane %v2365_v27, %v8008_v46  ;;  %v2877_v46 = vld [vmem:[%s9730_s10 + $0x30] sm:$0xff]  ;;  %v3007_v59 = vld [vmem:[%s9731_s11 + $0x38] sm:$0xff]  ;;  %v3013_v27 = vld [vmem:[%s9731_s11 + $0x68] sm:$0xff] }
 0x4cf   : > { %v2281_v57 = vsel %vm2129_vm15, %v2280_v25, %v2279_v22  ;;  %v3006_v34 = vld [vmem:[%s9731_s11 + $0x30] sm:$0xff]  ;;  %v2886_v29 = vld [vmem:[%s9730_s10 + $0x78] sm:$0xff]  ;;  %v3008_v22 = vld [vmem:[%s9731_s11 + $0x40] sm:$0xff] }
 0x4d0   : > { %2283 = vst [vmem:[%s8089_s19 + $0x1] sm:$0x1] %v2281_v57  ;;  %2950 = vmatpush.msrb.mxu0 %v2867_v62  ;;  %v2885_v25 = vld [vmem:[%s9730_s10 + $0x70] sm:$0xff]  ;;  %v3009_v57 = vld [vmem:[%s9731_s11 + $0x48] sm:$0xff] }
 0x4d1   : > { %5157 = vmatmul.msk.f32.vlgmr.msrb.gmra.mxu0 %vm10329_vm10, %v2871_v52 }
 0x4d3   : > { %v2357_v17 = vpop.xlane.xlu1 %2356 }
 0x4d4   : > { %v2403_v30 = vperm.slane %v2357_v17, %v7978_v55 }
 0x4d6   : > { %v2404_v63 = vsel %vm2073_vm4, %v2403_v30, %v2402_v0  ;;  %vm10332_vm4 = vmmov %vm10331_vm7  ;;  %v9886_v0 = vmov 2   ;;  %v3011_v30 = vld [vmem:[%s9731_s11 + $0x58] sm:$0xff] }
 0x4d7   : > { %v2406_v54 = vsel %vm2077_vm12, %v2405_v32, %v2404_v63  ;;  %vm10333_vm12 = vmmov %vm10332_vm4  ;;  %v3012_v63 = vld [vmem:[%s9731_s11 + $0x60] sm:$0xff] }
 0x4d8   : > { %v2408_v11 = vsel %vm2081_vm5, %v10330_v39, %v2406_v54  ;;  %vm10334_vm5 = vmmov %vm10332_vm4 }
 0x4d9   : > { %5158 = vmatmul.msk.f32.gmra.mxu0 %vm10331_vm7, %v2872_v26  ;;  %vm10337_vm0 = vmmov %vm10332_vm4  ;;  %v8324_v26 = vpop.permute.xlu2 %3443 }
 0x4da   : > { %5205 = vmatmul.msk.f32.vlgmr.msra.gmra.mxu3 %vm10337_vm0, %v3000_v41  ;;  %vm10338_vm6 = vmmov %vm10337_vm0 }
 0x4db   : > { %v2363_v15 = vpop.xlane.xlu1 %2362  ;;  %5189 = vmatmul.msk.f32.vlgmr.msrb.gmra.mxu2 %vm10338_vm6, %v3000_v41  ;;  %vm10339_vm10 = vmmov %vm10337_vm0 }
 0x4dc   : > { %v2409_v55 = vperm.slane %v2363_v15, %v8001_v10  ;;  %v2876_v10 = vld [vmem:[%s9730_s10 + $0x28] sm:$0xff]  ;;  %5173 = vmatmul.msk.f32.vlgmr.msrb.gmra.mxu1 %vm10339_vm10, %v3000_v41  ;;  %vm10340_vm7 = vmmov %vm10337_vm0 }
 0x4dd   : > { %vm10346_vm6 = vmmov %vm10337_vm0 }
 0x4de   : > { %v2410_v49 = vsel %vm2085_vm8, %v2409_v55, %v2408_v11  ;;  %vm10335_vm8 = vmmov %vm10332_vm4  ;;  %v9884_v55 = vmov 1  }
 0x4df   : > { %v8177_v28 = vsel %vm2089_vm14, %v2411_v2, %v2410_v49  ;;  %vm10336_vm14 = vmmov %vm10332_vm4  ;;  %v3014_v49 = vld [vmem:[%s9731_s11 + $0x70] sm:$0xff] }
 0x4e0   : > { %vm10347_vm10 = vmmov %vm10337_vm0 }
 0x4e1   : > { %5159 = vmatmul.msk.f32.gmra.mxu0 %vm10332_vm4, %v2873_v61  ;;  %vm10341_vm4 = vmmov %vm10337_vm0  ;;  %v8333_v11 = vpop.permute.xlu2 %3438 }
 0x4e2   : > { %5206 = vmatmul.msk.f32.gmra.mxu3 %vm10341_vm4, %v3001_v45  ;;  %vm10349_vm4 = vmmov %vm10337_vm0 }
 0x4e9   : > { %5160 = vmatmul.msk.f32.gmra.mxu0 %vm10333_vm12, %v2874_v37  ;;  %vm10342_vm12 = vmmov %vm10337_vm0  ;;  %v8344_v2 = vpop.permute.xlu2 %3428 }
 0x4ea   : > { %5190 = vmatmul.msk.f32.gmra.mxu2 %vm10342_vm12, %v3001_v45  ;;  %vm10350_vm12 = vmmov %vm10337_vm0 }
 0x4f1   : > { %5161 = vmatmul.msk.f32.gmra.mxu0 %vm10334_vm5, %v2875_v36  ;;  %vm10343_vm5 = vmmov %vm10337_vm0  ;;  %v8355_v37 = vpop.permute.xlu2 %3418 }
 0x4f2   : > { %5174 = vmatmul.msk.f32.gmra.mxu1 %vm10343_vm5, %v3001_v45  ;;  %5191 = vmatmul.msk.f32.gmra.mxu2 %vm10337_vm0, %v3002_v7  ;;  %vm10351_vm5 = vmmov %vm10337_vm0 }
 0x4f9   : > { %5162 = vmatmul.msk.f32.gmra.mxu0 %vm10335_vm8, %v2876_v10  ;;  %vm10344_vm8 = vmmov %vm10337_vm0  ;;  %v3015_v10 = vld [vmem:[%s9731_s11 + $0x78] sm:$0xff] }
 0x4fa   : > { %5175 = vmatmul.msk.f32.gmra.mxu1 %vm10346_vm6, %v3002_v7  ;;  %5192 = vmatmul.msk.f32.gmra.mxu2 %vm10349_vm4, %v3003_v60  ;;  %vm10354_vm6 = vmmov %vm10337_vm0 }
 0x4fb   : > { %vm10357_vm4 = vmmov %vm10337_vm0 }
 0x501   : > { %5163 = vmatmul.msk.f32.gmra.mxu0 %vm10336_vm14, %v2877_v46  ;;  %vm10345_vm14 = vmmov %vm10337_vm0  ;;  %v8364_v46 = vpop.permute.xlu2 %3408 }
 0x502   : > { %5207 = vmatmul.msk.f32.gmra.mxu3 %vm10345_vm14, %v3002_v7  ;;  %5176 = vmatmul.msk.f32.gmra.mxu1 %vm10350_vm12, %v3003_v60  ;;  %vm10353_vm14 = vmmov %vm10337_vm0 }
 0x503   : > { %5193 = vmatmul.msk.f32.gmra.mxu2 %vm10353_vm14, %v3004_v8  ;;  %vm10358_vm12 = vmmov %vm10337_vm0 }
 0x504   : > { %vm10361_vm14 = vmmov %vm10337_vm0 }
 0x509   : > { %5164 = vmatmul.msk.f32.gmra.mxu0 %vm10340_vm7, %v2878_v48  ;;  %vm10348_vm7 = vmmov %vm10337_vm0 }
 0x50a   : > { %5208 = vmatmul.msk.f32.gmra.mxu3 %vm10348_vm7, %v3003_v60  ;;  %5177 = vmatmul.msk.f32.gmra.mxu1 %vm10337_vm0, %v3004_v8  ;;  %vm10356_vm7 = vmmov %vm10337_vm0 }
 0x50b   : > { %5194 = vmatmul.msk.f32.gmra.mxu2 %vm10356_vm7, %v3005_v24  ;;  %vm10364_vm7 = vmmov %vm10337_vm0 }
 0x511   : > { %5165 = vmatmul.msk.f32.gmra.mxu0 %vm10344_vm8, %v2879_v19  ;;  %vm10352_vm8 = vmmov %vm10337_vm0 }
 0x512   : > { %5209 = vmatmul.msk.f32.gmra.mxu3 %vm10352_vm8, %v3004_v8  ;;  %5178 = vmatmul.msk.f32.gmra.mxu1 %vm10357_vm4, %v3005_v24  ;;  %vm10360_vm8 = vmmov %vm10337_vm0 }
 0x513   : > { %5195 = vmatmul.msk.f32.gmra.mxu2 %vm10360_vm8, %v3006_v34  ;;  %vm10365_vm4 = vmmov %vm10337_vm0 }
 0x514   : > { %vm10368_vm8 = vmmov %vm10337_vm0 }
 0x519   : > { %5166 = vmatmul.msk.f32.gmra.mxu0 %vm10347_vm10, %v2880_v38  ;;  %vm10355_vm10 = vmmov %vm10337_vm0  ;;  %v8375_v38 = vpop.permute.xlu2 %3398 }
 0x51a   : > { %5210 = vmatmul.msk.f32.gmra.mxu3 %vm10355_vm10, %v3005_v24  ;;  %5179 = vmatmul.msk.f32.gmra.mxu1 %vm10361_vm14, %v3006_v34  ;;  %vm10363_vm10 = vmmov %vm10337_vm0 }
 0x51b   : > { %5196 = vmatmul.msk.f32.gmra.mxu2 %vm10363_vm10, %v3007_v59  ;;  %vm10369_vm14 = vmmov %vm10337_vm0 }
 0x51c   : > { %vm10371_vm10 = vmmov %vm10337_vm0 }
 0x521   : > { %5167 = vmatmul.msk.f32.gmra.mxu0 %vm10351_vm5, %v2881_v42  ;;  %vm10359_vm5 = vmmov %vm10337_vm0 }
 0x522   : > { %5211 = vmatmul.msk.f32.gmra.mxu3 %vm10359_vm5, %v3006_v34  ;;  %5180 = vmatmul.msk.f32.gmra.mxu1 %vm10364_vm7, %v3007_v59  ;;  %vm10367_vm5 = vmmov %vm10337_vm0  ;;  %v10389_v34 = vperm.slane %v8105_v4, %v8005_v20 }
 0x523   : > { %5197 = vmatmul.msk.f32.gmra.mxu2 %vm10367_vm5, %v3008_v22  ;;  %vm10372_vm7 = vmmov %vm10337_vm0 }
 0x524   : > { %vm10375_vm5 = vmmov %vm10337_vm0 }
 0x529   : > { %5168 = vmatmul.msk.f32.gmra.mxu0 %vm10354_vm6, %v2882_v6  ;;  %vm10362_vm6 = vmmov %vm10337_vm0 }
 0x52a   : > { %5212 = vmatmul.msk.f32.gmra.mxu3 %vm10362_vm6, %v3007_v59  ;;  %5181 = vmatmul.msk.f32.gmra.mxu1 %vm10368_vm8, %v3008_v22  ;;  %vm10370_vm6 = vmmov %vm10337_vm0 }
 0x52b   : > { %5198 = vmatmul.msk.f32.gmra.mxu2 %vm10370_vm6, %v3009_v57  ;;  %vm10376_vm8 = vmmov %vm10337_vm0 }
 0x52c   : > { %vm10378_vm6 = vmmov %vm10337_vm0 }
 0x531   : > { %5169 = vmatmul.msk.f32.gmra.mxu0 %vm10358_vm12, %v2883_v23  ;;  %vm10366_vm12 = vmmov %vm10337_vm0  ;;  %v8384_v23 = vpop.permute.xlu2 %3388 }
 0x532   : > { %5213 = vmatmul.msk.f32.gmra.mxu3 %vm10366_vm12, %v3008_v22  ;;  %5182 = vmatmul.msk.f32.gmra.mxu1 %vm10371_vm10, %v3009_v57  ;;  %vm10374_vm12 = vmmov %vm10337_vm0 }
 0x533   : > { %vm10379_vm10 = vmmov %vm10337_vm0 }
 0x539   : > { %5170 = vmatmul.msk.f32.gmra.mxu0 %vm10337_vm0, %v2884_v53 }
 0x53a   : > { %5214 = vmatmul.msk.f32.gmra.mxu3 %vm10337_vm0, %v3009_v57  ;;  %5183 = vmatmul.msk.f32.gmra.mxu1 %vm10374_vm12, %v3010_v13  ;;  %vm10382_vm12 = vmmov %vm10337_vm0 }
 0x541   : > { %5171 = vmatmul.msk.f32.gmra.mxu0 %vm10365_vm4, %v2885_v25  ;;  %vm10373_vm4 = vmmov %vm10337_vm0  ;;  %v8396_v25 = vsel %vm2093_vm13, %v10389_v34, %v8177_v28 }
 0x542   : > { %5215 = vmatmul.msk.f32.gmra.mxu3 %vm10372_vm7, %v3010_v13  ;;  %5199 = vmatmul.msk.f32.gmra.mxu2 %vm10373_vm4, %v3010_v13  ;;  %vm10380_vm7 = vmmov %vm10337_vm0  ;;  %10390 = vst [vmem:[#allocation21_spill] sm:$0xff] %v8396_v25  ;;  %v8403_v13 = vpop.permute.xlu1 %3448  ;;  %v4710_v25 = vld [vmem:[%s9734_s14] sm:$0xff] }
 0x543   : > { %vm10381_vm4 = vmmov %vm10337_vm0 }
 0x549   : > { %5172 = vmatmul.msk.f32.gmra.mxu0 %vm10369_vm14, %v2886_v29  ;;  %vm10377_vm14 = vmmov %vm10337_vm0 }
 0x54a   : > { %5216 = vmatmul.msk.f32.gmra.mxu3 %vm10375_vm5, %v3011_v30  ;;  %5200 = vmatmul.msk.f32.gmra.mxu2 %vm10376_vm8, %v3011_v30  ;;  %vm10383_vm5 = vmmov %vm10337_vm0 }
 0x54b   : > { %5184 = vmatmul.msk.f32.gmra.mxu1 %vm10377_vm14, %v3011_v30  ;;  %vm10384_vm8 = vmmov %vm10337_vm0  ;;  %v8405_v30 = vpop.permute.xlu0 %3433 }
 0x54c   : > { %vm10385_vm14 = vmmov %vm10337_vm0 }
 0x54e   : > { %v8286_v52 = vpop.f32.mrf.mxu0 }
 0x552   : > { %5217 = vmatmul.msk.f32.gmra.mxu3 %vm10337_vm0, %v3012_v63  ;;  %5201 = vmatmul.msk.f32.gmra.mxu2 %vm10378_vm6, %v3012_v63  ;;  %vm10386_vm6 = vmmov %vm10337_vm0 }
 0x553   : > { %5185 = vmatmul.msk.f32.gmra.mxu1 %vm10379_vm10, %v3012_v63  ;;  %vm10387_vm10 = vmmov %vm10337_vm0 }
 0x556   : > { %v8294_v62 = vpop.f32.mrf.mxu0 }
 0x557   : > { %3282 = vperm.xlu2 %5324, %v8294_v62  }
 0x559   : > { %v8373_v7 = vpop.f32.mrf.mxu1 }
 0x55a   : > { %5218 = vmatmul.msk.f32.gmra.mxu3 %vm10381_vm4, %v3013_v27  ;;  %5202 = vmatmul.msk.f32.gmra.mxu2 %vm10382_vm12, %v3013_v27 }
 0x55b   : > { %5186 = vmatmul.msk.f32.gmra.mxu1 %vm10380_vm7, %v3013_v27  ;;  %v8416_v27 = vpop.permute.xlu0 %3413 }
 0x55d   : > { %v8368_v48 = vpop.f32.mrf.mxu3 }
 0x55e   : > { %v8303_v17 = vpop.f32.mrf.mxu0  ;;  %v8371_v45 = vpop.f32.mrf.mxu2 }
 0x55f   : > { %3287 = vperm.xlu0 %5322, %v8303_v17   ;;  %5328 = vset.pattern.permute.xlu2 %v9886_v0  ;;  %10388 = vst [vmem:[#allocation28_spill] sm:$0xff] %v8371_v45 }
 0x562   : > { %5219 = vmatmul.msk.f32.gmra.mxu3 %vm10384_vm8, %v3014_v49  ;;  %5203 = vmatmul.msk.f32.gmra.mxu2 %vm10385_vm14, %v3014_v49 }
 0x563   : > { %5187 = vmatmul.msk.f32.gmra.mxu1 %vm10383_vm5, %v3014_v49 }
 0x565   : > { %v8378_v60 = vpop.f32.mrf.mxu3 }
 0x566   : > { %v8313_v32 = vpop.f32.mrf.mxu0 }
 0x567   : > { %5325 = vset.pattern.permute.xlu0 %v9886_v0  ;;  %3292 = vperm.xlu1 %5323, %v8313_v32  }
 0x568   : > { %4270 = vperm.xlu0 %5325, %v8303_v17  }
 0x56a   : > { %5220 = vmatmul.msk.f32.gmra.mxu3 %vm10337_vm0, %v3015_v10  ;;  %5204 = vmatmul.msk.f32.gmra.mxu2 %vm10387_vm10, %v3015_v10 }
 0x56b   : > { %5188 = vmatmul.msk.f32.gmra.mxu1 %vm10386_vm6, %v3015_v10 }
 0x56d   : > { %v8382_v8 = vpop.f32.mrf.mxu2 }
 0x56e   : > { %v8326_v54 = vpop.f32.mrf.mxu0 }
 0x56f   : > { %5326 = vset.pattern.permute.xlu1 %v9886_v0  ;;  %4278 = vperm.xlu2 %5328, %v8326_v54   ;;  %v3084_v6 = vpop.f32.mrf.mxu1 }
 0x570   : > { %5327 = vset.pattern.permute.xlu0 %v10272_v33  ;;  %4274 = vperm.xlu1 %5326, %v8313_v32  }
 0x571   : > { %3297 = vperm.xlu0 %5327, %v8326_v54  }
 0x575   : > { %v8398_v29 = vpop.f32.mrf.mxu2 }
 0x576   : > { %v2967_v39 = vpop.f32.mrf.mxu0 }
 0x577   : > { %5329 = vset.pattern.permute.xlu2 %v10272_v33  ;;  %v3087_v57 = vpop.f32.mrf.mxu1 }
 0x578   : > { %4282 = vperm.xlu1 %5326, %v2967_v39   ;;  %3302 = vperm.xlu2 %5329, %v2967_v39  }
 0x57d   : > { %v8412_v4 = vpop.f32.mrf.mxu2 }
 0x57e   : > { %v2970_v15 = vpop.f32.mrf.mxu0 }
 0x57f   : > { %3307 = vperm.xlu0 %5327, %v2970_v15   ;;  %v3090_v28 = vpop.f32.mrf.mxu1 }
 0x580   : > { %5330 = vset.pattern.permute.xlu1 %v9884_v55  ;;  %5332 = vset.pattern.permute.xlu2 %v9884_v55 }
 0x581   : > { %3837 = vperm.xlu1 %5330, %v2967_v39   ;;  %3841 = vperm.xlu2 %5332, %v2970_v15   ;;  %v8414_v39 = vpop.permute.xlu1 %3423 }
 0x585   : > { %v8387_v24 = vpop.f32.mrf.mxu3 }
 0x586   : > { %v2973_v61 = vpop.f32.mrf.mxu0 }
 0x587   : > { %5331 = vset.pattern.permute.xlu0 %v9886_v0  ;;  %v3093_v10 = vpop.f32.mrf.mxu1 }
 0x588   : > { %4286 = vperm.xlu0 %5331, %v2970_v15  }
 0x589   : > { %5333 = vset.pattern.permute.xlu1 %v10272_v33  ;;  %5337 = vset.pattern.permute.xlu2 %v9886_v0 }
 0x58a   : > { %3312 = vperm.xlu1 %5333, %v2973_v61  }
 0x58d   : > { %v3220_v63 = vpop.f32.mrf.mxu3 }
 0x58e   : > { %v2976_v36 = vpop.f32.mrf.mxu0 }
 0x58f   : > { %4294 = vperm.xlu2 %5337, %v2976_v36   ;;  %v3096_v5 = vpop.f32.mrf.mxu1 }
 0x590   : > { %5336 = vset.pattern.permute.xlu0 %v10272_v33 }
 0x591   : > { %3317 = vperm.xlu0 %5336, %v2976_v36  }
 0x592   : > { %5334 = vset.pattern.permute.xlu1 %v9886_v0 }
 0x593   : > { %4290 = vperm.xlu1 %5334, %v2973_v61  }
 0x595   : > { %v3223_v49 = vpop.f32.mrf.mxu3 }
 0x596   : > { %v2979_v41 = vpop.f32.mrf.mxu0 }
 0x597   : > { %5338 = vset.pattern.permute.xlu2 %v9884_v55 }
 0x598   : > { %3849 = vperm.xlu2 %5338, %v2976_v36  }
 0x59b   : > { %5335 = vset.pattern.permute.xlu1 %v9884_v55 }
 0x59c   : > { %3845 = vperm.xlu1 %5335, %v2973_v61   ;;  %v8420_v61 = vpop.f32.mrf.mxu2 }
 0x59e   : > { %v2982_v19 = vpop.f32.mrf.mxu0 }
 0x59f   : > { %3327 = vperm.xlu0 %5336, %v2982_v19  }
 0x5a0   : > { %5339 = vset.pattern.permute.xlu2 %v10272_v33 }
 0x5a1   : > { %3322 = vperm.xlu2 %5339, %v2979_v41  }
 0x5a4   : > { %5340 = vset.pattern.permute.xlu1 %v9886_v0 }
 0x5a5   : > { %4298 = vperm.xlu1 %5340, %v2979_v41  }
 0x5a6   : > { %v2985_v42 = vpop.f32.mrf.mxu0 }
 0x5a7   : > { %5342 = vset.pattern.permute.xlu0 %v9886_v0 }
 0x5a8   : > { %4302 = vperm.xlu0 %5342, %v2982_v19  }
 0x5a9   : > { %5343 = vset.pattern.permute.xlu2 %v9884_v55 }
 0x5aa   : > { %3857 = vperm.xlu2 %5343, %v2982_v19   ;;  %v8427_v19 = vpop.permute.xlu0 %3393 }
 0x5ad   : > { %5341 = vset.pattern.permute.xlu1 %v9884_v55 }
 0x5ae   : > { %3853 = vperm.xlu1 %5341, %v2979_v41   ;;  %v2988_v53 = vpop.f32.mrf.mxu0  ;;  %v8424_v41 = vpop.permute.xlu1 %3403 }
 0x5b0   : > { %5347 = vset.pattern.permute.xlu0 %v10272_v33 }
 0x5b1   : > { %v3283_v59 = vpop.permute.xlu2 %3282  ;;  %3337 = vperm.xlu0 %5347, %v2988_v53  }
 0x5b2   : > { %v8400_v22 = vadd.f32 %v3283_v59, %v3084_v6  ;;  %5348 = vset.pattern.permute.xlu2 %v9886_v0  ;;  %v3161_v59 = vpop.f32.mrf.mxu2 }
 0x5b3   : > { %4310 = vperm.xlu2 %5348, %v2988_v53  }
 0x5b6   : > { %5344 = vset.pattern.permute.xlu1 %v10272_v33  ;;  %v8408_v20 = vpop.f32.mrf.mxu0  ;;  %v8435_v40 = vpop.permute.xlu1 %3383 }
 0x5b7   : > { %3332 = vperm.xlu1 %5344, %v2985_v42  }
 0x5b9   : > { %5357 = vset.pattern.permute.xlu0 %v9886_v0 }
 0x5ba   : > { %v3164_v58 = vpop.f32.mrf.mxu2 }
 0x5bb   : > { %5349 = vset.pattern.permute.xlu2 %v9884_v55 }
 0x5bc   : > { %3865 = vperm.xlu2 %5349, %v2988_v53   ;;  %v3226_v53 = vpop.f32.mrf.mxu3 }
 0x5be   : > { %v2994_v15 = vpop.f32.mrf.mxu0 }
 0x5bf   : > { %5345 = vset.pattern.permute.xlu1 %v9886_v0 }
 0x5c0   : > { %4306 = vperm.xlu1 %5345, %v2985_v42  }
 0x5c4   : > { %5353 = vset.pattern.permute.xlu2 %v10272_v33 }
 0x5c5   : > { %3347 = vperm.xlu2 %5353, %v2994_v15  }
 0x5c6   : > { %v8422_v36 = vpop.f32.mrf.mxu0 }
 0x5c7   : > { %4322 = vperm.xlu0 %5357, %v8422_v36  }
 0x5c8   : > { %5346 = vset.pattern.permute.xlu1 %v9884_v55 }
 0x5c9   : > { %v4279_v6 = vpop.permute.xlu2 %4278  ;;  %3861 = vperm.xlu1 %5346, %v2985_v42  }
 0x5ca   : > { %v8430_v34 = vadd.f32 %v4279_v6, %v3223_v49  ;;  %v3229_v6 = vpop.f32.mrf.mxu3 }
 0x5cd   : > { %5354 = vset.pattern.permute.xlu2 %v9886_v0  ;;  %v10391_v0 = vmov 1  }
 0x5ce   : > { %4318 = vperm.xlu2 %5354, %v2994_v15  }
 0x5cf   : > { %5360 = vset.pattern.permute.xlu0 %v10272_v33 }
 0x5d0   : > { %3277 = vperm.xlu0 %5360, %v8286_v52  }
 0x5d1   : > { %v3288_v3 = vpop.permute.xlu0 %3287  ;;  %5350 = vset.pattern.permute.xlu1 %v10272_v33 }
 0x5d2   : > { %v8438_v55 = vadd.f32 %v3288_v3, %v3087_v57  ;;  %v3303_v42 = vpop.permute.xlu2 %3302  ;;  %3342 = vperm.xlu1 %5350, %v8408_v20   ;;  %v10392_v3 = vmov 2   ;;  %v8455_v1 = vpop.f32.mrf.mxu3 }
 0x5d3   : > { %v8441_v49 = vadd.f32 %v3303_v42, %v3096_v5 }
 0x5d6   : > { %5355 = vset.pattern.permute.xlu2 %v10391_v0 }
 0x5d7   : > { %3873 = vperm.xlu2 %5355, %v2994_v15   ;;  %v3099_v15 = vpop.f32.mrf.mxu1 }
 0x5d8   : > { %5365 = vset.pattern.permute.xlu0 %v10391_v0 }
 0x5d9   : > { %3825 = vperm.xlu0 %5365, %v8303_v17   ;;  %v3293_v50 = vpop.permute.xlu1 %3292 }
 0x5da   : > { %v8446_v18 = vadd.f32 %v3293_v50, %v3090_v28  ;;  %v4271_v56 = vpop.permute.xlu0 %4270  ;;  %5351 = vset.pattern.permute.xlu1 %v10392_v3  ;;  %v4712_v50 = vld [vmem:[%s9734_s14 + $0x10] sm:$0xff]  ;;  %v8471_v28 = vpop.f32.mrf.mxu2 }
 0x5db   : > { %v8450_v57 = vadd.f32 %v4271_v56, %v8387_v24  ;;  %v3842_v5 = vpop.permute.xlu2 %3841  ;;  %4314 = vperm.xlu1 %5351, %v8408_v20  }
 0x5dc   : > { %v8453_v42 = vadd.f32 %v3842_v5, %v3164_v58 }
 0x5df   : > { %3833 = vperm.xlu2 %5355, %v8326_v54   ;;  %v3260_v54 = vld [vmem:[%s9732_s12 + $0x8] sm:$0xff]  ;;  %v3102_v5 = vpop.f32.mrf.mxu1 }
 0x5e1   : > { %5370 = vset.pattern.permute.xlu0 %v10272_v33 }
 0x5e2   : > { %4726 = vperm.xlu0 %5370, %v4712_v50   ;;  %v4275_v17 = vpop.permute.xlu1 %4274  ;;  %v3235_v50 = vpop.f32.mrf.mxu3 }
 0x5e3   : > { %v8462_v56 = vadd.f32 %v4275_v17, %v3220_v63  ;;  %v3298_v24 = vpop.permute.xlu0 %3297  ;;  %5352 = vset.pattern.permute.xlu1 %v10391_v0 }
 0x5e4   : > { %v8465_v58 = vadd.f32 %v3298_v24, %v3093_v10  ;;  %3869 = vperm.xlu1 %5352, %v8408_v20   ;;  %v3170_v20 = vpop.f32.mrf.mxu2 }
 0x5e7   : > { %5361 = vset.pattern.permute.xlu2 %v10272_v33  ;;  %v3105_v10 = vpop.f32.mrf.mxu1 }
 0x5e8   : > { %3378 = vperm.xlu2 %5361, %v3260_v54  }
 0x5e9   : > { %v4295_v63 = vpop.permute.xlu2 %4294 }
 0x5ea   : > { %v8474_v17 = vadd.f32 %v4295_v63, %v3235_v50  ;;  %v4283_v35 = vpop.permute.xlu1 %4282 }
 0x5eb   : > { %v8476_v43 = vadd.f32 %v4283_v35, %v3226_v53  ;;  %v8489_v35 = vpop.f32.mrf.mxu3 }
 0x5ec   : > { %5356 = vset.pattern.permute.xlu1 %v10272_v33  ;;  %v8492_v53 = vpop.f32.mrf.mxu2 }
 0x5ed   : > { %3352 = vperm.xlu1 %5356, %v8422_v36  }
 0x5f0   : > { %5363 = vset.pattern.permute.xlu2 %v10392_v3 }
 0x5f1   : > { %v3308_v24 = vpop.permute.xlu0 %3307  ;;  %4262 = vperm.xlu2 %5363, %v8286_v52  }
 0x5f2   : > { %v8482_v44 = vadd.f32 %v3308_v24, %v3099_v15  ;;  %v3850_v54 = vpop.permute.xlu2 %3849  ;;  %v3108_v15 = vpop.f32.mrf.mxu1 }
 0x5f3   : > { %v8484_v14 = vadd.f32 %v3850_v54, %v3170_v20  ;;  %v3838_v50 = vpop.permute.xlu1 %3837 }
 0x5f4   : > { %v8486_v63 = vadd.f32 %v3838_v50, %v3161_v59 }
 0x5f5   : > { %5358 = vset.pattern.permute.xlu1 %v10391_v0 }
 0x5f6   : > { %3877 = vperm.xlu1 %5358, %v8422_v36   ;;  %v8504_v36 = vpop.f32.mrf.mxu3 }
 0x5f9   : > { %5366 = vset.pattern.permute.xlu2 %v10391_v0 }
 0x5fa   : > { %v4287_v21 = vpop.permute.xlu0 %4286  ;;  %3821 = vperm.xlu2 %5366, %v8294_v62  }
 0x5fb   : > { %v8496_v24 = vadd.f32 %v4287_v21, %v3229_v6  ;;  %v3323_v20 = vpop.permute.xlu2 %3322  ;;  %v4345_v21 = vadd.f32 %v8430_v34, %v8427_v19  ;;  %v3176_v6 = vpop.f32.mrf.mxu2  ;;  %v3454_v34 = vadd.f32 %v8384_v23, %v8446_v18 }
 0x5fc   : > { %v8498_v54 = vadd.f32 %v3323_v20, %v3108_v15  ;;  %v3313_v59 = vpop.permute.xlu1 %3312 }
 0x5fd   : > { %v8500_v50 = vadd.f32 %v3313_v59, %v3102_v5  ;;  %v3453_v5 = vadd.f32 %v8435_v40, %v8438_v55  ;;  %v3111_v59 = vpop.f32.mrf.mxu1  ;;  %v5257_v9 = vmul.f32 -1.442695, %v4345_v21  ;;  %v3902_v21 = vadd.f32 %v8453_v42, %v8424_v41 }
 0x5fe   : > { %5359 = vset.pattern.permute.xlu1 %v10392_v3  ;;  %v5224_v18 = vmul.f32 -1.442695, %v3454_v34  ;;  %v3455_v42 = vadd.f32 %v8427_v19, %v8465_v58 }
 0x5ff   : > { %4266 = vperm.xlu1 %5359, %v8294_v62   ;;  %v3456_v62 = vadd.f32 %v8375_v38, %v8441_v49  ;;  %v5223_v55 = vmul.f32 -1.442695, %v3453_v5  ;;  %5563 = vpow2.f32 %v5257_v9  ;;  %v5243_v5 = vmul.f32 -1.442695, %v3902_v21 }
 0x601   : > { %v5226_v49 = vmul.f32 -1.442695, %v3456_v62  ;;  %5565 = vpow2.f32 %v5223_v55 }
 0x602   : > { %5368 = vset.pattern.permute.xlu2 %v10272_v33 }
 0x603   : > { %v3318_v15 = vpop.permute.xlu0 %3317  ;;  %4716 = vperm.xlu2 %5368, %v4710_v25   ;;  %v4343_v25 = vadd.f32 %v8450_v57, %v8435_v40  ;;  %5567 = vpow2.f32 %v5226_v49  ;;  %v5225_v49 = vmul.f32 -1.442695, %v3455_v42 }
 0x604   : > { %v8516_v3 = vadd.f32 %v3318_v15, %v3105_v10  ;;  %v3858_v20 = vpop.permute.xlu2 %3857  ;;  %v4713_v10 = vld [vmem:[%s9734_s14 + $0x18] sm:$0xff]  ;;  %5569 = vpow2.f32 %v5224_v18  ;;  %v4346_v18 = vadd.f32 %v8476_v43, %v8375_v38  ;;  %v3457_v43 = vadd.f32 %v8424_v41, %v8482_v44 }
 0x605   : > { %v8518_v16 = vadd.f32 %v3858_v20, %v3176_v6  ;;  %v4291_v51 = vpop.permute.xlu1 %4290  ;;  %v5255_v57 = vmul.f32 -1.442695, %v4343_v25  ;;  %v10393_v6 = vld [vmem:[#allocation75_spill] sm:$0xff]  ;;  %v8550_v34 = vpop.f32.mrf.mxu1 }
 0x606   : > { %v8523_v31 = vadd.f32 %v4291_v51, %v8455_v1  ;;  %v4344_v51 = vadd.f32 %v8462_v56, %v8384_v23  ;;  %v8536_v1 = vpop.f32.mrf.mxu3  ;;  %v4349_v56 = vadd.f32 %v8474_v17, %v8416_v27  ;;  %v3259_v20 = vld [vmem:[%s9732_s12] sm:$0xff]  ;;  %v5564_v25 = vpop.eup %5563  ;;  %v5227_v44 = vmul.f32 -1.442695, %v3457_v43 }
 0x607   : > { %5362 = vset.pattern.permute.xlu1 %v10391_v0  ;;  %5571 = vpow2.f32 %v5255_v57  ;;  %v5566_v58 = vpop.eup %5565  ;;  %v8560_v57 = vadd.f32 1.0, %v5564_v25 }
 0x608   : > { %3829 = vperm.xlu1 %5362, %v8313_v32   ;;  %v1026_v32 = vsel %vm7762_vm1, %v10393_v6, -inf  ;;  %v5256_v15 = vmul.f32 -1.442695, %v4344_v51  ;;  %5573 = vpow2.f32 %v5243_v5  ;;  %v5261_v21 = vmul.f32 -1.442695, %v4349_v56 }
 0x609   : > { %v5568_v17 = vpop.eup %5567 }
 0x60a   : > { %5575 = vpow2.f32 %v5256_v15 }
 0x60b   : > { %4731 = vperm.xlu2 %5368, %v4713_v10   ;;  %5577 = vpow2.f32 %v5225_v49  ;;  %v3904_v49 = vadd.f32 %v8484_v14, %v8416_v27 }
 0x60c   : > { %2372 = vmax.xlane.f32.xlu0 %v1026_v32  ;;  %v5570_v32 = vpop.eup %5569  ;;  %5579 = vpow2.f32 %v5261_v21  ;;  %v3901_v21 = vadd.f32 %v8486_v63, %v8375_v38  ;;  %v4347_v63 = vadd.f32 %v8496_v24, %v8424_v41 }
 0x60d   : > { %v8543_v9 = vpop.permute.xlu2 %4310  ;;  %v5572_v42 = vpop.eup %5571  ;;  %5581 = vrcp.f32 %v8560_v57  ;;  %v8574_v25 = vadd.f32 1.0, %v5570_v32  ;;  %v5245_v38 = vmul.f32 -1.442695, %v3904_v49  ;;  %v3458_v49 = vadd.f32 %v8364_v46, %v8500_v50  ;;  %v4711_v50 = vld [vmem:[%s9734_s14 + $0x8] sm:$0xff] }
 0x60e   : > { %v3846_v62 = vpop.permute.xlu1 %3845  ;;  %v3247_v5 = vpop.f32.mrf.mxu3 }
 0x60f   : > { %v8553_v55 = vadd.f32 %v3846_v62, %v8471_v28  ;;  %v10394_v28 = vld [vmem:[#allocation97_spill] sm:$0xff]  ;;  %v8565_v62 = vadd.f32 1.0, %v5566_v58  ;;  %v5574_v56 = vpop.eup %5573  ;;  %10397 = vst [vmem:[#allocation69_spill] sm:$0xff] %v8574_v25 }
 0x610   : > { %5364 = vset.pattern.permute.xlu1 %v10272_v33  ;;  %v1038_v6 = vsel %vm7762_vm1, %v10394_v28, -inf  ;;  %v8589_v28 = vadd.f32 1.0, %v5574_v56 }
 0x611   : > { %v3328_v10 = vpop.permute.xlu0 %3327  ;;  %3373 = vperm.xlu1 %5364, %v3259_v20   ;;  %10395 = vst [vmem:[#allocation30_spill] sm:$0xff] %v8565_v62  ;;  %v8567_v20 = vadd.f32 1.0, %v5568_v17  ;;  %5583 = vrcp.f32 %v8565_v62  ;;  %v8579_v17 = vadd.f32 1.0, %v5572_v42 }
 0x612   : > { %v8558_v51 = vadd.f32 %v3328_v10, %v3111_v59  ;;  %v5258_v59 = vmul.f32 -1.442695, %v4346_v18  ;;  %v5576_v10 = vpop.eup %5575  ;;  %v8586_v18 = vpop.f32.mrf.mxu1  ;;  %10398 = vst [vmem:[#allocation54_spill] sm:$0xff] %v8589_v28 }
 0x613   : > { %10396 = vst [vmem:[#allocation63_spill] sm:$0xff] %v8567_v20  ;;  %5585 = vrcp.f32 %v8567_v20  ;;  %v5578_v32 = vpop.eup %5577  ;;  %v8595_v14 = vadd.f32 1.0, %v5576_v10 }
 0x614   : > { %2380 = vmax.xlane.f32.xlu0 %v1038_v6  ;;  %5587 = vpow2.f32 %v5258_v59  ;;  %v8591_v6 = vpop.f32.mrf.mxu2  ;;  %v5580_v42 = vpop.eup %5579  ;;  %v5242_v59 = vmul.f32 -1.442695, %v3901_v21  ;;  %v8609_v10 = vadd.f32 1.0, %v5578_v32  ;;  %v3459_v21 = vadd.f32 %v8416_v27, %v8516_v3 }
 0x615   : > { %5589 = vrcp.f32 %v8574_v25  ;;  %v8602_v43 = vpop.eup %5581  ;;  %v8616_v41 = vadd.f32 1.0, %v5580_v42  ;;  %v4337_v32 = vadd.f32 %v8543_v9, %v3247_v5  ;;  %v3906_v25 = vadd.f32 %v8518_v16, %v8414_v39 }
 0x616   : > { %v8571_v15 = vpop.permute.xlu2 %3865  ;;  %5591 = vrcp.f32 %v8579_v17  ;;  %10400 = vst [vmem:[#allocation48_spill] sm:$0xff] %v8609_v10  ;;  %v5228_v27 = vmul.f32 -1.442695, %v3458_v49  ;;  %v4348_v5 = vadd.f32 %v8523_v31, %v8364_v46 }
 0x617   : > { %v8576_v58 = vpop.permute.xlu1 %4298  ;;  %5593 = vpow2.f32 %v5227_v44  ;;  %v8606_v56 = vpop.eup %5583 }
 0x618   : > { %10399 = vst [vmem:[#allocation64_spill] sm:$0xff] %v8606_v56  ;;  %5595 = vrcp.f32 %v8589_v28 }
 0x619   : > { %5367 = vset.pattern.permute.xlu1 %v10391_v0  ;;  %v8600_v0 = vpop.f32.mrf.mxu3  ;;  %v8613_v62 = vpop.eup %5585  ;;  %5597 = vrcp.f32 %v8595_v14 }
 0x61a   : > { %3817 = vperm.xlu1 %5367, %v8286_v52   ;;  %v3460_v52 = vadd.f32 %v8355_v37, %v8498_v54  ;;  %10401 = vst [vmem:[#allocation60_spill] sm:$0xff] %v8613_v62  ;;  %v5588_v44 = vpop.eup %5587  ;;  %5599 = vpow2.f32 %v5245_v38  ;;  %v5259_v54 = vmul.f32 -1.442695, %v4347_v63 }
 0x61b   : > { %v8626_v56 = vpop.eup %5589  ;;  %5601 = vpow2.f32 %v5242_v59  ;;  %v8638_v9 = vadd.f32 1.0, %v5588_v44  ;;  %v8642_v59 = vpop.f32.mrf.mxu1 }
 0x61c   : > { %10402 = vst [vmem:[#allocation40_spill] sm:$0xff] %v8626_v56  ;;  %v5230_v42 = vmul.f32 -1.442695, %v3460_v52  ;;  %v8633_v63 = vpop.eup %5591  ;;  %5603 = vrcp.f32 %v8609_v10  ;;  %v3182_v52 = vpop.f32.mrf.mxu2 }
 0x61d   : > { %v5594_v3 = vpop.eup %5593  ;;  %5605 = vrcp.f32 %v8616_v41 }
 0x61e   : > { %v8644_v16 = vpop.eup %5595  ;;  %5607 = vpow2.f32 %v5259_v54  ;;  %v8649_v44 = vadd.f32 1.0, %v5594_v3  ;;  %v3903_v54 = vadd.f32 %v8553_v55, %v8364_v46 }
 0x61f   : > { %v8618_v24 = vpop.permute.xlu2 %3347  ;;  %10403 = vst [vmem:[#allocation53_spill] sm:$0xff] %v8644_v16  ;;  %v8647_v49 = vpop.eup %5597  ;;  %5609 = vpow2.f32 %v5230_v42 }
 0x620   : > { %v3854_v28 = vpop.permute.xlu1 %3853  ;;  %v5600_v56 = vpop.eup %5599  ;;  %10404 = vst [vmem:[#allocation31_spill] sm:$0xff] %v8649_v44  ;;  %5611 = vpow2.f32 %v5228_v27 }
 0x621   : > { %v8631_v38 = vadd.f32 %v3854_v28, %v8492_v53  ;;  %v5229_v53 = vmul.f32 -1.442695, %v3459_v21  ;;  %v4353_v28 = vadd.f32 %v4337_v32, %v8405_v30  ;;  %v3253_v10 = vpop.f32.mrf.mxu3  ;;  %v5602_v31 = vpop.eup %5601  ;;  %5613 = vrcp.f32 %v8638_v9 }
 0x622   : > { %5369 = vset.pattern.permute.xlu1 %v10272_v33  ;;  %v5247_v33 = vmul.f32 -1.442695, %v3906_v25  ;;  %v4303_v21 = vpop.permute.xlu0 %4302  ;;  %v8654_v16 = vpop.eup %5603  ;;  %v3461_v25 = vadd.f32 %v8414_v39, %v8558_v51  ;;  %v8660_v27 = vadd.f32 1.0, %v5600_v56  ;;  %v8663_v46 = vadd.f32 1.0, %v5602_v31 }
 0x623   : > { %4721 = vperm.xlu1 %5369, %v4711_v50   ;;  %v5260_v50 = vmul.f32 -1.442695, %v4348_v5  ;;  %10405 = vst [vmem:[#allocation43_spill] sm:$0xff] %v8654_v16  ;;  %5615 = vpow2.f32 %v5229_v53  ;;  %v5265_v32 = vmul.f32 -1.442695, %v4353_v28  ;;  %v8658_v3 = vpop.eup %5605  ;;  %v3892_v28 = vadd.f32 %v8571_v15, %v3182_v52  ;;  %v3123_v31 = vpop.f32.mrf.mxu1 }
 0x624   : > { %10406 = vst [vmem:[#allocation5_spill] sm:$0xff] %v8660_v27  ;;  %5617 = vpow2.f32 %v5247_v33  ;;  %v5608_v5 = vpop.eup %5607  ;;  %v5244_v53 = vmul.f32 -1.442695, %v3903_v54  ;;  %v5231_v51 = vmul.f32 -1.442695, %v3461_v25  ;;  %v8667_v56 = vpop.f32.mrf.mxu2  ;;  %v4334_v15 = vadd.f32 %v8576_v58, %v8489_v35 }
 0x625   : > { %5619 = vrcp.f32 %v8649_v44  ;;  %10407 = vst [vmem:[#allocation8_spill] sm:$0xff] %v8663_v46  ;;  %v5610_v55 = vpop.eup %5609 }
 0x626   : > { %5621 = vpow2.f32 %v5260_v50  ;;  %v5612_v16 = vpop.eup %5611  ;;  %v8675_v50 = vadd.f32 1.0, %v5610_v55 }
 0x627   : > { %5623 = vpow2.f32 %v5265_v32  ;;  %v8669_v33 = vpop.eup %5613  ;;  %v8679_v54 = vadd.f32 1.0, %v5612_v16  ;;  %v4335_v32 = vadd.f32 %v4303_v21, %v8504_v36  ;;  %v4350_v36 = vadd.f32 %v4334_v15, %v8355_v37 }
 0x628   : > { %v4319_v42 = vpop.permute.xlu2 %4318  ;;  %5625 = vrcp.f32 %v8660_v27  ;;  %10408 = vst [vmem:[#allocation70_spill] sm:$0xff] %v8675_v50 }
 0x629   : > { %v4339_v62 = vadd.f32 %v4319_v42, %v3253_v10  ;;  %v3333_v20 = vpop.permute.xlu1 %3332  ;;  %v8672_v10 = vadd.f32 1.0, %v5608_v5  ;;  %v5616_v42 = vpop.eup %5615  ;;  %5627 = vrcp.f32 %v8663_v46  ;;  %10409 = vst [vmem:[#allocation74_spill] sm:$0xff] %v8679_v54  ;;  %v3369_v5 = vadd.f32 %v8618_v24, %v3123_v31 }
 0x62a   : > { %v5618_v52 = vpop.eup %5617  ;;  %5629 = vpow2.f32 %v5244_v53  ;;  %v8687_v55 = vadd.f32 1.0, %v5616_v42  ;;  %v3338_v35 = vpop.permute.xlu0 %3337  ;;  %v4351_v24 = vadd.f32 %v4335_v32, %v8414_v39  ;;  %v5262_v32 = vmul.f32 -1.442695, %v4350_v36 }
 0x62b   : > { %v4355_v45 = vadd.f32 %v4339_v62, %v8324_v26  ;;  %v3908_v62 = vadd.f32 %v3892_v28, %v8405_v30  ;;  %v8683_v25 = vpop.eup %5619  ;;  %5631 = vpow2.f32 %v5231_v51  ;;  %v8690_v53 = vadd.f32 1.0, %v5618_v52  ;;  %v10414_v51 = vld [vmem:[#allocation68_spill] sm:$0xff] }
 0x62c   : > { %10410 = vst [vmem:[#allocation9_spill] sm:$0xff] %v8683_v25  ;;  %v5622_v46 = vpop.eup %5621  ;;  %5633 = vrcp.f32 %v8672_v10  ;;  %v1023_v31 = vsel %vm7762_vm1, %v10414_v51, -inf  ;;  %v3465_v52 = vadd.f32 %v8324_v26, %v3369_v5  ;;  %v3367_v15 = vadd.f32 %v3338_v35, %v8586_v18 }
 0x62d   : > { %v5267_v27 = vmul.f32 -1.442695, %v4355_v45  ;;  %10411 = vst [vmem:[#allocation18_spill] sm:$0xff] %v8687_v55  ;;  %v5624_v16 = vpop.eup %5623  ;;  %5635 = vrcp.f32 %v8675_v50  ;;  %v5249_v45 = vmul.f32 -1.442695, %v3908_v62  ;;  %v8702_v25 = vadd.f32 1.0, %v5622_v46 }
 0x62e   : > { %10412 = vst [vmem:[#allocation46_spill] sm:$0xff] %v8690_v53  ;;  %v8693_v28 = vpop.eup %5625  ;;  %5637 = vrcp.f32 %v8679_v54  ;;  %v8707_v62 = vadd.f32 1.0, %v5624_v16  ;;  %v3366_v51 = vadd.f32 %v3333_v20, %v8550_v34  ;;  %v5263_v5 = vmul.f32 -1.442695, %v4351_v24 }
 0x62f   : > { %10413 = vst [vmem:[#allocation71_spill] sm:$0xff] %v8693_v28  ;;  %v8700_v42 = vpop.eup %5627  ;;  %5639 = vpow2.f32 %v5267_v27  ;;  %v3905_v18 = vadd.f32 %v8631_v38, %v8355_v37  ;;  %v3256_v27 = vpop.f32.mrf.mxu3  ;;  %v5235_v16 = vmul.f32 -1.442695, %v3465_v52 }
 0x630   : > { %10415 = vst [vmem:[#allocation6_spill] sm:$0xff] %v8700_v42  ;;  %v5630_v28 = vpop.eup %5629  ;;  %5641 = vrcp.f32 %v8687_v55  ;;  %v3188_v42 = vpop.f32.mrf.mxu2  ;;  %v3462_v38 = vadd.f32 %v8344_v2, %v3366_v51  ;;  %vm4606_vm10 = vweird.f32 %v8707_v62 }
 0x631   : > { %v3874_v58 = vpop.permute.xlu2 %3873  ;;  %v5632_v39 = vpop.eup %5631  ;;  %5643 = vrcp.f32 %v8690_v53  ;;  %v8722_v34 = vadd.f32 1.0, %v5630_v28 }
 0x632   : > { %v4307_v21 = vpop.permute.xlu1 %4306  ;;  %v8711_v46 = vpop.eup %5633  ;;  %5645 = vpow2.f32 %v5249_v45  ;;  %v8724_v20 = vadd.f32 1.0, %v5632_v39  ;;  %v3894_v36 = vadd.f32 %v3874_v58, %v3188_v42 }
 0x633   : > { %v8715_v35 = vpop.eup %5635  ;;  %5647 = vrcp.f32 %v8702_v25  ;;  %10418 = vst [vmem:[#allocation7_spill] sm:$0xff] %v8722_v34  ;;  %v4336_v44 = vadd.f32 %v4307_v21, %v8536_v1 }
 0x634   : > { %2370 = vmax.xlane.f32.xlu2 %v1023_v31  ;;  %10416 = vst [vmem:[#allocation88_spill] sm:$0xff] %v8715_v35  ;;  %v3463_v31 = vadd.f32 %v8405_v30, %v3367_v15  ;;  %v8719_v53 = vpop.eup %5637  ;;  %5649 = vrcp.f32 %v8707_v62  ;;  %v5246_v30 = vmul.f32 -1.442695, %v3905_v18  ;;  %v3910_v21 = vadd.f32 %v3894_v36, %v8324_v26 }
 0x635   : > { %10417 = vst [vmem:[#allocation15_spill] sm:$0xff] %v8719_v53  ;;  %v5640_v37 = vpop.eup %5639  ;;  %5651 = vpow2.f32 %v5262_v32  ;;  %v10421_v53 = vld [vmem:[#allocation85_spill] sm:$0xff] }
 0x636   : > { %10419 = vst [vmem:[#allocation3_spill] sm:$0xff] %v8724_v20  ;;  %v8728_v54 = vpop.eup %5641  ;;  %5653 = vpow2.f32 %v5263_v5  ;;  %v1032_v28 = vsel %vm7762_vm1, %v10421_v53, -inf  ;;  %v5233_v58 = vmul.f32 -1.442695, %v3463_v31  ;;  %v8737_v1 = vadd.f32 1.0, %v5640_v37 }
 0x637   : > { %10420 = vst [vmem:[#allocation34_spill] sm:$0xff] %v8728_v54  ;;  %v8733_v39 = vpop.eup %5643  ;;  %5655 = vpow2.f32 %v5235_v16  ;;  %v5232_v5 = vmul.f32 -1.442695, %v3462_v38  ;;  %v4352_v53 = vadd.f32 %v4336_v44, %v8344_v2  ;;  %v5251_v36 = vmul.f32 -1.442695, %v3910_v21 }
 0x638   : > { %10422 = vst [vmem:[#allocation16_spill] sm:$0xff] %v8733_v39  ;;  %v5646_v32 = vpop.eup %5645  ;;  %5657 = vrcp.f32 %v8722_v34  ;;  %vm4636_vm13 = vweird.f32 %v8737_v1 }
 0x639   : > { %v3834_v45 = vpop.permute.xlu2 %3833  ;;  %v4323_v24 = vpop.permute.xlu0 %4322  ;;  %5659 = vrcp.f32 %v8724_v20  ;;  %v8748_v37 = vadd.f32 1.0, %v5646_v32  ;;  %v5264_v38 = vmul.f32 -1.442695, %v4352_v53 }
 0x63a   : > { %v4340_v52 = vadd.f32 %v4323_v24, %v3256_v27  ;;  %v8740_v51 = vpop.eup %5647  ;;  %v3884_v18 = vadd.f32 %v3834_v45, %v8420_v61  ;;  %5661 = vpow2.f32 %v5246_v30 }
 0x63b   : > { %v3862_v15 = vpop.permute.xlu1 %3861  ;;  %v8745_v27 = vpop.eup %5649  ;;  %10423 = vst [vmem:[#allocation12_spill] sm:$0xff] %v8748_v37  ;;  %5663 = vpow2.f32 %v5233_v58 }
 0x63c   : > { %v4356_v42 = vadd.f32 %v4340_v52, %v8403_v13  ;;  %2376 = vmax.xlane.f32.xlu2 %v1032_v28  ;;  %v3891_v31 = vadd.f32 %v3862_v15, %v8591_v6  ;;  %v5652_v24 = vpop.eup %5651  ;;  %5665 = vrcp.f32 %v8737_v1  ;;  %v3900_v44 = vadd.f32 %v3884_v18, %v8427_v19  ;;  %v10425_v28 = vld [vmem:[#allocation99_spill] sm:$0xff] }
 0x63d   : > { %v5654_v26 = vpop.eup %5653  ;;  %5667 = vpow2.f32 %v5232_v5  ;;  %v8758_v6 = vadd.f32 1.0, %v5652_v24  ;;  %v1041_v58 = vsel %vm7762_vm1, %v10425_v28, -inf  ;;  %vm4607_vm6 = vweird.f32 %v8745_v27 }
 0x63e   : > { %v5268_v16 = vmul.f32 -1.442695, %v4356_v42  ;;  %v5656_v52 = vpop.eup %5655  ;;  %v3907_v15 = vadd.f32 %v3891_v31, %v8344_v2  ;;  %v8767_v19 = vadd.f32 1.0, %v5654_v26  ;;  %v5241_v18 = vmul.f32 -1.442695, %v3900_v44 }
 0x63f   : > { %v8756_v30 = vpop.eup %5657  ;;  %v8769_v5 = vadd.f32 1.0, %v5656_v52 }
 0x640   : > { %10424 = vst [vmem:[#allocation66_spill] sm:$0xff] %v8756_v30  ;;  %5669 = vpow2.f32 %v5268_v16  ;;  %v8764_v42 = vpop.eup %5659  ;;  %v5248_v16 = vmul.f32 -1.442695, %v3907_v15 }
 0x641   : > { %10426 = vst [vmem:[#allocation36_spill] sm:$0xff] %v8764_v42  ;;  %5671 = vrcp.f32 %v8748_v37  ;;  %v5662_v21 = vpop.eup %5661 }
 0x642   : > { %v8752_v61 = vpop.permute.xlu2 %3378  ;;  %v8754_v45 = vpop.permute.xlu0 %3277  ;;  %5673 = vpow2.f32 %v5251_v36  ;;  %v8777_v28 = vadd.f32 1.0, %v5662_v21  ;;  %v10429_v21 = vld [vmem:[#allocation65_spill] sm:$0xff] }
 0x643   : > { %v5664_v53 = vpop.eup %5663  ;;  %5675 = vpow2.f32 %v5264_v38  ;;  %v3452_v36 = vadd.f32 %v8752_v61, %v8400_v22  ;;  %v1020_v30 = vsel %vm7762_vm1, %v10429_v21, -inf }
 0x644   : > { %2382 = vmax.xlane.f32.xlu2 %v1041_v58  ;;  %v3343_v32 = vpop.permute.xlu1 %3342  ;;  %v8771_v2 = vpop.eup %5665  ;;  %5677 = vrcp.f32 %v8758_v6  ;;  %10427 = vst [vmem:[#allocation25_spill] sm:$0xff] %v8777_v28  ;;  %v8787_v58 = vadd.f32 1.0, %v5664_v53 }
 0x645   : > { %v5668_v31 = vpop.eup %5667  ;;  %5679 = vrcp.f32 %v8767_v19  ;;  %v3368_v24 = vadd.f32 %v3343_v32, %v8642_v59  ;;  %v4632_v44 = vmul.f32 %v8771_v2, %v8737_v1  ;;  %v5222_v53 = vmul.f32 -1.442695, %v3452_v36 }
 0x646   : > { %v5670_v26 = vpop.eup %5669  ;;  %5681 = vrcp.f32 %v8769_v5  ;;  %v8794_v34 = vadd.f32 1.0, %v5668_v31  ;;  %vm4637_vm7 = vweird.f32 %v8771_v2 }
 0x647   : > { %v8781_v52 = vpop.eup %5671  ;;  %5683 = vpow2.f32 %v5241_v18  ;;  %v8783_v38 = vadd.f32 1.0, %v5670_v26  ;;  %v3464_v18 = vadd.f32 %v8333_v11, %v3368_v24  ;;  %v4633_v54 = vsub.f32 1.0, %v4632_v44  ;;  %vm8858_vm5 = vmor %vm4636_vm13, %vm4637_vm7 }
 0x648   : > { %10428 = vst [vmem:[#allocation83_spill] sm:$0xff] %v8781_v52  ;;  %v5674_v15 = vpop.eup %5673  ;;  %5685 = vpow2.f32 %v5248_v16  ;;  %vm8897_vm13 = vmor %vm4606_vm10, %vm4607_vm6  ;;  %vm4576_vm10 = vweird.f32 %v8767_v19 }
 0x649   : > { %v5676_v22 = vpop.eup %5675  ;;  %5687 = vrcp.f32 %v8783_v38  ;;  %v8804_v37 = vadd.f32 1.0, %v5674_v15  ;;  %v10431_v15 = vld [vmem:[#allocation82_spill] sm:$0xff]  ;;  %vm4651_vm12 = vweird.f32 %v8783_v38 }
 0x64a   : > { %v8799_v39 = vpop.eup %5677  ;;  %5689 = vrcp.f32 %v8777_v28 }
 0x64b   : > { %v8789_v59 = vpop.permute.xlu2 %4262  ;;  %v3826_v32 = vpop.permute.xlu0 %3825  ;;  %10430 = vst [vmem:[#allocation67_spill] sm:$0xff] %v8804_v37  ;;  %5691 = vrcp.f32 %v8787_v58 }
 0x64c   : > { %v3882_v26 = vadd.f32 %v3826_v32, %v8398_v29  ;;  %v8802_v52 = vpop.eup %5679  ;;  %v8811_v29 = vadd.f32 1.0, %v5676_v22  ;;  %5693 = vrcp.f32 %v8794_v34  ;;  %v4634_v22 = vmul.f32 %v8771_v2, %v4633_v54 }
 0x64d   : > { %2368 = vmax.xlane.f32.xlu1 %v1020_v30  ;;  %v4315_v16 = vpop.permute.xlu1 %4314  ;;  %v8808_v55 = vpop.eup %5681  ;;  %v5234_v30 = vmul.f32 -1.442695, %v3464_v18  ;;  %5695 = vpow2.f32 %v5222_v53  ;;  %v10433_v53 = vld [vmem:[#allocation92_spill] sm:$0xff]  ;;  %v4642_v54 = vand.u32 2147483648, %v8737_v1 }
 0x64e   : > { %v3898_v31 = vadd.f32 %v3882_v26, %v8435_v40  ;;  %v4338_v21 = vadd.f32 %v4315_v16, %v8600_v0  ;;  %v5684_v24 = vpop.eup %5683  ;;  %v1029_v40 = vsel %vm7762_vm1, %v10431_v15, -inf  ;;  %5697 = vrcp.f32 %v8804_v37 }
 0x64f   : > { %v5686_v32 = vpop.eup %5685  ;;  %5699 = vrcp.f32 %v8811_v29  ;;  %v8828_v15 = vadd.f32 1.0, %v5684_v24  ;;  %v4635_v37 = vadd.f32 %v8771_v2, %v4634_v22 }
 0x650   : > { %v4354_v36 = vadd.f32 %v4338_v21, %v8333_v11  ;;  %v5688_v0 = vpop.eup %5687  ;;  %v5239_v44 = vmul.f32 -1.442695, %v3898_v31  ;;  %v1035_v21 = vsel %vm7762_vm1, %v10433_v53, -inf  ;;  %5701 = vpow2.f32 %v5234_v30 }
 0x651   : > { %v8820_v16 = vpop.eup %5689  ;;  %v4647_v18 = vmul.f32 %v5688_v0, %v8783_v38  ;;  %10434 = vst [vmem:[#allocation4_spill] sm:$0xff] %v8828_v15  ;;  %v4655_v30 = vand.u32 2147483647, %v8783_v38  ;;  %v4657_v53 = vand.u32 2147483648, %v8783_v38  ;;  %vm4652_vm4 = vweird.f32 %v5688_v0 }
 0x652   : > { %v5266_v26 = vmul.f32 -1.442695, %v4354_v36  ;;  %10432 = vst [vmem:[#allocation57_spill] sm:$0xff] %v8820_v16  ;;  %v8832_v31 = vpop.eup %5691  ;;  %v8834_v36 = vadd.f32 1.0, %v5686_v32  ;;  %vm4653_vm8 = vmor %vm4651_vm12, %vm4652_vm4  ;;  %vm4591_vm12 = vweird.f32 %v8811_v29 }
 0x653   : > { %v4648_v35 = vsub.f32 1.0, %v4647_v18  ;;  %v8837_v50 = vpop.eup %5693  ;;  %vm4656_vm14 = vcmp.eq.f32.partialorder %v4655_v30, 8.507059e+37  ;;  %v4612_v30 = vand.u32 2147483648, %v8707_v62 }
 0x654   : > { %v3822_v28 = vpop.permute.xlu2 %3821  ;;  %10435 = vst [vmem:[#allocation84_spill] sm:$0xff] %v8834_v36  ;;  %5703 = vpow2.f32 %v5266_v26  ;;  %v5696_v42 = vpop.eup %5695 }
 0x655   : > { %v3881_v16 = vadd.f32 %v3822_v28, %v8382_v8  ;;  %2374 = vmax.xlane.f32.xlu1 %v1029_v40  ;;  %10436 = vst [vmem:[#allocation77_spill] sm:$0xff] %v8837_v50  ;;  %5705 = vpow2.f32 %v5239_v44  ;;  %v4649_v26 = vmul.f32 %v5688_v0, %v4648_v35  ;;  %v8844_v8 = vpop.eup %5697  ;;  %v4640_v28 = vand.u32 2147483647, %v8737_v1 }
 0x656   : > { %v3870_v24 = vpop.permute.xlu1 %3869  ;;  %10437 = vst [vmem:[#allocation13_spill] sm:$0xff] %v8844_v8  ;;  %5707 = vrcp.f32 %v8828_v15  ;;  %v4643_v40 = vor.u32 1.1754944e-38, %v4642_v54  ;;  %v4602_v44 = vmul.f32 %v8745_v27, %v8707_v62  ;;  %v8850_v18 = vpop.eup %5699  ;;  %v8863_v54 = vadd.f32 1.0, %v5696_v42 }
 0x657   : > { %v3897_v20 = vadd.f32 %v3881_v16, %v8752_v61  ;;  %v3893_v32 = vadd.f32 %v3870_v24, %v8667_v56  ;;  %v4650_v16 = vadd.f32 %v5688_v0, %v4649_v26  ;;  %v5702_v35 = vpop.eup %5701  ;;  %5709 = vrcp.f32 %v8834_v36 }
 0x658   : > { %v4639_v1 = vsel %vm8858_vm5, %v8771_v2, %v4635_v37  ;;  %v8872_v36 = vadd.f32 1.0, %v5702_v35  ;;  %vm4641_vm0 = vcmp.eq.f32.partialorder %v4640_v28, 8.507059e+37  ;;  %v4610_v2 = vand.u32 2147483647, %v8707_v62 }
 0x659   : > { %v5238_v22 = vmul.f32 -1.442695, %v3897_v20  ;;  %v3909_v50 = vadd.f32 %v3893_v32, %v8333_v11  ;;  %v4658_v20 = vor.u32 1.1754944e-38, %v4657_v53  ;;  %v4603_v11 = vsub.f32 1.0, %v4602_v44 }
 0x65a   : > { %v5704_v24 = vpop.eup %5703  ;;  %v4654_v38 = vsel %vm4653_vm8, %v5688_v0, %v4650_v16  ;;  %v4644_v37 = vsel %vm4641_vm0, %v4643_v40, %v4639_v1  ;;  %v8890_v40 = vadd.f32 %v8754_v45, %v8373_v7  ;;  %v1044_v16 = vsel %vm7762_vm1, %v6737_v47, -inf }
 0x65b   : > { %v5250_v32 = vmul.f32 -1.442695, %v3909_v50  ;;  %v5706_v26 = vpop.eup %5705  ;;  %v8869_v15 = vadd.f32 1.0, %v5704_v24  ;;  %5711 = vpow2.f32 %v5238_v22  ;;  %v4659_v8 = vsel %vm4656_vm14, %v4658_v20, %v4654_v38  ;;  %v3126_v50 = vpop.f32.mrf.mxu1 }
 0x65c   : > { %v4604_v42 = vmul.f32 %v8745_v27, %v4603_v11  ;;  %4661 = vmatpush.msra.mxu2 %v4659_v8  ;;  %v8875_v0 = vpop.eup %5707  ;;  %v8880_v53 = vadd.f32 1.0, %v5706_v26  ;;  %v8904_v62 = vadd.f32 %v8789_v59, %v8368_v48  ;;  %vm4611_vm1 = vcmp.eq.f32.partialorder %v4610_v2, 8.507059e+37  ;;  %v3191_v2 = vpop.f32.mrf.mxu2 }
 0x65d   : > { %5713 = vpow2.f32 %v5250_v32  ;;  %2378 = vmax.xlane.f32.xlu1 %v1035_v21  ;;  %v4627_v8 = vand.u32 2147483648, %v8869_v15  ;;  %v8885_v28 = vpop.eup %5709  ;;  %v4625_v7 = vand.u32 2147483647, %v8869_v15  ;;  %v4613_v35 = vor.u32 1.1754944e-38, %v4612_v30 }
 0x65e   : > { %5715 = vrcp.f32 %v8869_v15  ;;  %4662 = vmatpush.msra.mxu2 %v4644_v37  ;;  %v4605_v21 = vadd.f32 %v8745_v27, %v4604_v42  ;;  %v4587_v20 = vmul.f32 %v8850_v18, %v8811_v29  ;;  %vm4621_vm7 = vweird.f32 %v8869_v15 }
 0x65f   : > { %v3353_v44 = vpop.permute.xlu1 %3352  ;;  %5717 = vrcp.f32 %v8863_v54  ;;  %v4628_v48 = vor.u32 1.1754944e-38, %v4627_v8  ;;  %v4572_v1 = vmul.f32 %v8802_v52, %v8767_v19  ;;  %vm8922_vm4 = vcmp.eq.f32.partialorder %v4625_v7, 8.507059e+37 }
 0x660   : > { %v3370_v22 = vadd.f32 %v3353_v44, %v3126_v50  ;;  %5719 = vrcp.f32 %v8872_v36  ;;  %v4609_v45 = vsel %vm8897_vm13, %v8745_v27, %v4605_v21  ;;  %v4588_v27 = vsub.f32 1.0, %v4587_v20 }
 0x661   : > { %v5712_v12 = vpop.eup %5711  ;;  %5721 = vrcp.f32 %v8880_v53  ;;  %v8917_v38 = vsel %vm4611_vm1, %v4613_v35, %v4609_v45  ;;  %vm4592_vm5 = vweird.f32 %v8850_v18  ;;  %v4595_v50 = vand.u32 2147483647, %v8811_v29 }
 0x662   : > { %v3466_v47 = vadd.f32 %v8403_v13, %v3370_v22  ;;  %v8914_v24 = vadd.f32 1.0, %v5712_v12  ;;  %v4589_v30 = vmul.f32 %v8850_v18, %v4588_v27  ;;  %v4597_v44 = vand.u32 2147483648, %v8811_v29  ;;  %vm8954_vm6 = vmor %vm4591_vm12, %vm4592_vm5 }
 0x663   : > { %v5714_v11 = vpop.eup %5713  ;;  %v4573_v8 = vsub.f32 1.0, %v4572_v1  ;;  %vm4577_vm14 = vweird.f32 %v8802_v52  ;;  %v4582_v12 = vand.u32 2147483648, %v8767_v19  ;;  %vm8944_vm0 = vcmp.eq.f32.partialorder %v4595_v50, 8.507059e+37 }
 0x664   : > { %v5716_v59 = vpop.eup %5715  ;;  %v5236_v32 = vmul.f32 -1.442695, %v3466_v47  ;;  %5723 = vrcp.f32 %v8914_v24  ;;  %v8936_v22 = vadd.f32 1.0, %v5714_v11  ;;  %v4590_v7 = vadd.f32 %v8850_v18, %v4589_v30  ;;  %vm8967_vm13 = vmor %vm4576_vm10, %vm4577_vm14 }
 0x665   : > { %2384 = vmax.xlane.f32.xlu1 %v1044_v16  ;;  %v4617_v26 = vmul.f32 %v5716_v59, %v8869_v15  ;;  %v8929_v37 = vpop.eup %5717  ;;  %vm4622_vm8 = vweird.f32 %v5716_v59  ;;  %v4574_v45 = vmul.f32 %v8802_v52, %v4573_v8  ;;  %v4557_v11 = vmul.f32 %v8799_v39, %v8758_v6 }
 0x666   : > { %v8934_v21 = vpop.eup %5719  ;;  %5725 = vpow2.f32 %v5236_v32  ;;  %v4598_v1 = vor.u32 1.1754944e-38, %v4597_v44  ;;  %v4580_v50 = vand.u32 2147483647, %v8767_v19  ;;  %v4594_v8 = vsel %vm8954_vm6, %v8850_v18, %v4590_v7  ;;  %vm4623_vm1 = vmor %vm4621_vm7, %vm4622_vm8 }
 0x667   : > { %v4618_v16 = vsub.f32 1.0, %v4617_v26  ;;  %v8942_v47 = vpop.eup %5721  ;;  %v4575_v26 = vadd.f32 %v8802_v52, %v4574_v45  ;;  %v4558_v44 = vsub.f32 1.0, %v4557_v11  ;;  %v4583_v19 = vor.u32 1.1754944e-38, %v4582_v12 }
 0x668   : > { %v3878_v56 = vpop.permute.xlu1 %3877  ;;  %v4565_v18 = vand.u32 2147483647, %v8758_v6  ;;  %vm4562_vm12 = vweird.f32 %v8799_v39  ;;  %vm4581_vm7 = vcmp.eq.f32.partialorder %v4580_v50, 8.507059e+37  ;;  %vm4561_vm5 = vweird.f32 %v8758_v6 }
 0x669   : > { %v3895_v35 = vadd.f32 %v3878_v56, %v3191_v2  ;;  %v4619_v20 = vmul.f32 %v5716_v59, %v4618_v16  ;;  %v4567_v56 = vand.u32 2147483648, %v8758_v6  ;;  %vm8993_vm8 = vmor %vm4561_vm5, %vm4562_vm12  ;;  %v4550_v42 = vand.u32 2147483647, %v8616_v41 }
 0x66a   : > { %v8971_v16 = vpop.eup %5723  ;;  %vm4566_vm14 = vcmp.eq.f32.partialorder %v4565_v18, 8.507059e+37  ;;  %v4527_v50 = vmul.f32 %v8740_v51, %v8702_v25  ;;  %vm4531_vm6 = vweird.f32 %v8702_v25  ;;  %vm4517_vm12 = vweird.f32 %v8711_v46 }
 0x66b   : > { %v3911_v2 = vadd.f32 %v3895_v35, %v8403_v13  ;;  %v4620_v30 = vadd.f32 %v5716_v59, %v4619_v20  ;;  %v4579_v13 = vsel %vm8967_vm13, %v8802_v52, %v4575_v26  ;;  %v4559_v20 = vmul.f32 %v8799_v39, %v4558_v44 }
 0x66c   : > { %v5726_v7 = vpop.eup %5725  ;;  %v4599_v52 = vsel %vm8944_vm0, %v4598_v1, %v4594_v8  ;;  %v4584_v12 = vsel %vm4581_vm7, %v4583_v19, %v4579_v13  ;;  %vm4547_vm0 = vweird.f32 %v8658_v3  ;;  %v4528_v29 = vsub.f32 1.0, %v4527_v50 }
 0x66d   : > { %v5252_v45 = vmul.f32 -1.442695, %v3911_v2  ;;  %v4624_v35 = vsel %vm4623_vm1, %v5716_v59, %v4620_v30  ;;  %v8983_v11 = vadd.f32 1.0, %v5726_v7  ;;  %v4560_v32 = vadd.f32 %v8799_v39, %v4559_v20 }
 0x66e   : > { %v4629_v15 = vsel %vm8922_vm4, %v4628_v48, %v4624_v35  ;;  %v4542_v59 = vmul.f32 %v8658_v3, %v8616_v41  ;;  %v4568_v48 = vor.u32 1.1754944e-38, %v4567_v56  ;;  %vm4546_vm4 = vweird.f32 %v8616_v41 }
 0x66f   : > { %4663 = vmatpush.msra.mxu2 %v4629_v15  ;;  %5727 = vpow2.f32 %v5252_v45  ;;  %v4564_v27 = vsel %vm8993_vm8, %v8799_v39, %v4560_v32  ;;  %v4552_v30 = vand.u32 2147483648, %v8616_v41  ;;  %vm9012_vm10 = vcmp.eq.f32.partialorder %v4550_v42, 8.507059e+37  ;;  %vm4548_vm1 = vmor %vm4546_vm4, %vm4547_vm0 }
 0x670   : > { %v4543_v1 = vsub.f32 1.0, %v4542_v59  ;;  %5729 = vrcp.f32 %v8983_v11  ;;  %v4537_v13 = vand.u32 2147483648, %v8702_v25  ;;  %v4529_v18 = vmul.f32 %v8740_v51, %v4528_v29 }
 0x671   : > { %4664 = vmatpush.msra.mxu2 %v8917_v38  ;;  %v4267_v6 = vpop.permute.xlu1 %4266  ;;  %v4569_v38 = vsel %vm4566_vm14, %v4568_v48, %v4564_v27  ;;  %vm4532_vm13 = vweird.f32 %v8740_v51  ;;  %v4535_v56 = vand.u32 2147483647, %v8702_v25  ;;  %v4553_v45 = vor.u32 1.1754944e-38, %v4552_v30 }
 0x672   : > { %v4326_v2 = vadd.f32 %v4267_v6, %v8378_v60  ;;  %v4544_v8 = vmul.f32 %v8658_v3, %v4543_v1  ;;  %v4512_v60 = vmul.f32 %v8711_v46, %v8672_v10  ;;  %v4530_v15 = vadd.f32 %v8740_v51, %v4529_v18  ;;  %vm4533_vm7 = vmor %vm4531_vm6, %vm4532_vm13 }
 0x673   : > { %4665 = vmatpush.msra.mxu2 %v4599_v52  ;;  %v4520_v52 = vand.u32 2147483647, %v8672_v10  ;;  %v4538_v41 = vor.u32 1.1754944e-38, %v4537_v13  ;;  %vm4536_vm5 = vcmp.eq.f32.partialorder %v4535_v56, 8.507059e+37  ;;  %vm4516_vm8 = vweird.f32 %v8672_v10 }
 0x674   : > { %v4342_v39 = vadd.f32 %v4326_v2, %v8752_v61  ;;  %v4545_v19 = vadd.f32 %v8658_v3, %v4544_v8  ;;  %v4513_v35 = vsub.f32 1.0, %v4512_v60  ;;  %v4534_v48 = vsel %vm4533_vm7, %v8740_v51, %v4530_v15  ;;  %vm4518_vm4 = vmor %vm4516_vm8, %vm4517_vm12 }
 0x675   : > { %4666 = vmatpush.msra.mxu2 %v4584_v12  ;;  %v5728_v7 = vpop.eup %5727  ;;  %v4522_v12 = vand.u32 2147483648, %v8672_v10  ;;  %v4539_v42 = vsel %vm4536_vm5, %v4538_v41, %v4534_v48  ;;  %vm4521_vm14 = vcmp.eq.f32.partialorder %v4520_v52, 8.507059e+37  ;;  %vm4502_vm0 = vweird.f32 %v8669_v33 }
 0x676   : > { %v5254_v61 = vmul.f32 -1.442695, %v4342_v39  ;;  %v4549_v20 = vsel %vm4548_vm1, %v8658_v3, %v4545_v19  ;;  %v9032_v32 = vpop.eup %5729  ;;  %v4514_v26 = vmul.f32 %v8711_v46, %v4513_v35  ;;  %v4497_v3 = vmul.f32 %v8669_v33, %v8638_v9 }
 0x677   : > { %4667 = vmatpush.msra.mxu2 %v4569_v38  ;;  %v4554_v59 = vsel %vm9012_vm10, %v4553_v45, %v4549_v20  ;;  %v4523_v50 = vor.u32 1.1754944e-38, %v4522_v12  ;;  %v4507_v51 = vand.u32 2147483648, %v8638_v9  ;;  %v4505_v30 = vand.u32 2147483647, %v8638_v9 }
 0x678   : > { %5731 = vpow2.f32 %v5254_v61  ;;  %v4515_v27 = vadd.f32 %v8711_v46, %v4514_v26  ;;  %v4498_v25 = vsub.f32 1.0, %v4497_v3  ;;  %v3757_v38 = vmul.f32 %v9032_v32, %v8983_v11 }
 0x679   : > { %4668 = vmatpush.msra.mxu2 %v4554_v59  ;;  %5733 = vrcp.f32 %v8936_v22  ;;  %vm4501_vm6 = vweird.f32 %v8638_v9  ;;  %v3765_v44 = vand.u32 2147483647, %v8983_v11  ;;  %v4508_v19 = vor.u32 1.1754944e-38, %v4507_v51 }
 0x67a   : > { %v3830_v6 = vpop.permute.xlu1 %3829  ;;  %v4519_v2 = vsel %vm4518_vm4, %v8711_v46, %v4515_v27  ;;  %v4499_v10 = vmul.f32 %v8669_v33, %v4498_v25  ;;  %v3758_v46 = vsub.f32 1.0, %v3757_v38  ;;  %vm4503_vm10 = vmor %vm4501_vm6, %vm4502_vm0  ;;  %v3767_v18 = vand.u32 2147483648, %v8983_v11 }
 0x67b   : > { %4669 = vmatpush.msra.mxu2 %v4539_v42  ;;  %v3883_v1 = vadd.f32 %v3830_v6, %v8412_v4  ;;  %v9057_v4 = vadd.f32 1.0, %v5728_v7  ;;  %v4524_v29 = vsel %vm4521_vm14, %v4523_v50, %v4519_v2  ;;  %vm4506_vm13 = vcmp.eq.f32.partialorder %v4505_v30, 8.507059e+37 }
 0x67c   : > { %v4500_v39 = vadd.f32 %v8669_v33, %v4499_v10  ;;  %v3759_v7 = vmul.f32 %v9032_v32, %v3758_v46  ;;  %vm3762_vm1 = vweird.f32 %v9032_v32  ;;  %vm3761_vm12 = vweird.f32 %v8983_v11 }
 0x67d   : > { %v3899_v8 = vadd.f32 %v3883_v1, %v8384_v23  ;;  %4670 = vmatpush.msra.mxu2 %v4524_v29  ;;  %v4482_v23 = vmul.f32 %v8602_v43, %v8560_v57  ;;  %5735 = vrcp.f32 %v9057_v4  ;;  %vm3766_vm7 = vcmp.eq.f32.partialorder %v3765_v44, 8.507059e+37  ;;  %vm3763_vm5 = vmor %vm3761_vm12, %vm3762_vm1 }
 0x67e   : > { %v5732_v13 = vpop.eup %5731  ;;  %v4504_v56 = vsel %vm4503_vm10, %v8669_v33, %v4500_v39  ;;  %v3760_v45 = vadd.f32 %v9032_v32, %v3759_v7  ;;  %v3768_v33 = vor.u32 1.1754944e-38, %v3767_v18  ;;  %v4490_v15 = vand.u32 2147483647, %v8560_v57 }
 0x67f   : > { %v5240_v60 = vmul.f32 -1.442695, %v3899_v8  ;;  %v9072_v9 = vadd.f32 1.0, %v5732_v13  ;;  %v4509_v61 = vsel %vm4506_vm13, %v4508_v19, %v4504_v56  ;;  %v4483_v35 = vsub.f32 1.0, %v4482_v23  ;;  %v9076_v20 = vpop.eup %5733 }
 0x680   : > { %4671 = vmatpush.msra.mxu2 %v4509_v61  ;;  %v4492_v52 = vand.u32 2147483648, %v8560_v57  ;;  %v3742_v12 = vmul.f32 %v8808_v55, %v8769_v5  ;;  %v3764_v59 = vsel %vm3763_vm5, %v9032_v32, %v3760_v45  ;;  %vm4487_vm8 = vweird.f32 %v8602_v43 }
 0x681   : > { %5737 = vpow2.f32 %v5240_v60  ;;  %v4484_v11 = vmul.f32 %v8602_v43, %v4483_v35  ;;  %v3750_v41 = vand.u32 2147483647, %v8769_v5  ;;  %v3769_v26 = vsel %vm3766_vm7, %v3768_v33, %v3764_v59 }
 0x682   : > { %5739 = vrcp.f32 %v9072_v9  ;;  %vm4486_vm14 = vweird.f32 %v8560_v57  ;;  %v3743_v3 = vsub.f32 1.0, %v3742_v12  ;;  %3771 = vmatpush.msra.mxu0 %v3769_v26  ;;  %vm3746_vm4 = vweird.f32 %v8769_v5 }
 0x683   : > { %v4485_v48 = vadd.f32 %v8602_v43, %v4484_v11  ;;  %v3752_v42 = vand.u32 2147483648, %v8769_v5  ;;  %v4467_v32 = vmul.f32 %v8647_v49, %v8595_v14  ;;  %v9093_v6 = vpop.eup %5735  ;;  %vm4488_vm0 = vmor %vm4486_vm14, %vm4487_vm8  ;;  %vm4491_vm6 = vcmp.eq.f32.partialorder %v4490_v15, 8.507059e+37  ;;  %v9097_v57 = vpop.permute.xlu1 %3373 }
 0x684   : > { %v4493_v27 = vor.u32 1.1754944e-38, %v4492_v52  ;;  %v3744_v25 = vmul.f32 %v8808_v55, %v3743_v3  ;;  %vm3747_vm10 = vweird.f32 %v8808_v55  ;;  %vm9100_vm13 = vcmp.eq.f32.partialorder %v3750_v41, 8.507059e+37 }
 0x685   : > { %v4489_v50 = vsel %vm4488_vm0, %v8602_v43, %v4485_v48  ;;  %v4468_v2 = vsub.f32 1.0, %v4467_v32  ;;  %vm4472_vm1 = vweird.f32 %v8647_v49  ;;  %v4475_v38 = vand.u32 2147483647, %v8595_v14  ;;  %vm3748_vm12 = vmor %vm3746_vm4, %vm3747_vm10 }
 0x686   : > { %v4494_v10 = vsel %vm4491_vm6, %v4493_v27, %v4489_v50  ;;  %v3745_v30 = vadd.f32 %v8808_v55, %v3744_v25  ;;  %v4477_v8 = vand.u32 2147483648, %v8595_v14  ;;  %v3753_v29 = vor.u32 1.1754944e-38, %v3752_v42  ;;  %v10456_v50 = vld [vmem:[#allocation77_spill] sm:$0xff] }
 0x687   : > { %v5738_v1 = vpop.eup %5737  ;;  %4672 = vmatpush.msra.mxu2 %v4494_v10  ;;  %v4469_v43 = vmul.f32 %v8647_v49, %v4468_v2  ;;  %v3451_v39 = vadd.f32 %v9097_v57, %v8890_v40  ;;  %v4341_v46 = vadd.f32 %v8904_v62, %v9097_v57  ;;  %vm4471_vm7 = vweird.f32 %v8595_v14 }
 0x688   : > { %v9115_v44 = vpop.eup %5739  ;;  %v9117_v13 = vadd.f32 1.0, %v5738_v1  ;;  %v3749_v60 = vsel %vm3748_vm12, %v8808_v55, %v3745_v30  ;;  %v3727_v5 = vmul.f32 %v8934_v21, %v8872_v36  ;;  %vm4473_vm5 = vmor %vm4471_vm7, %vm4472_vm1  ;;  %vm4476_vm8 = vcmp.eq.f32.partialorder %v4475_v38, 8.507059e+37 }
 0x689   : > { %v3754_v19 = vsel %vm9100_vm13, %v3753_v29, %v3749_v60  ;;  %v4470_v18 = vadd.f32 %v8647_v49, %v4469_v43  ;;  %v5221_v40 = vmul.f32 -1.442695, %v3451_v39  ;;  %v5253_v23 = vmul.f32 -1.442695, %v4341_v46 }
 0x68a   : > { %3772 = vmatpush.msra.mxu0 %v3754_v19  ;;  %v4478_v62 = vor.u32 1.1754944e-38, %v4477_v8  ;;  %v3728_v56 = vsub.f32 1.0, %v3727_v5  ;;  %v3737_v55 = vand.u32 2147483648, %v8872_v36  ;;  %vm3732_vm14 = vweird.f32 %v8934_v21 }
 0x68b   : > { %v4474_v14 = vsel %vm4473_vm5, %v8647_v49, %v4470_v18  ;;  %5741 = vpow2.f32 %v5221_v40  ;;  %v4452_v7 = vmul.f32 %v8633_v63, %v8579_v17  ;;  %v3735_v35 = vand.u32 2147483647, %v8872_v36 }
 0x68c   : > { %v4479_v61 = vsel %vm4476_vm8, %v4478_v62, %v4474_v14  ;;  %5743 = vpow2.f32 %v5253_v23  ;;  %v3729_v45 = vmul.f32 %v8934_v21, %v3728_v56  ;;  %vm3731_vm4 = vweird.f32 %v8872_v36  ;;  %v10460_v62 = vld [vmem:[#allocation36_spill] sm:$0xff] }
 0x68d   : > { %5745 = vrcp.f32 %v9117_v13  ;;  %4673 = vmatpush.msra.mxu2 %v4479_v61  ;;  %v4453_v33 = vsub.f32 1.0, %v4452_v7  ;;  %vm4456_vm0 = vweird.f32 %v8579_v17  ;;  %v3738_v15 = vor.u32 1.1754944e-38, %v3737_v55  ;;  %vm3733_vm6 = vmor %vm3731_vm4, %vm3732_vm14 }
 0x68e   : > { %v3730_v49 = vadd.f32 %v8934_v21, %v3729_v45  ;;  %v4462_v52 = vand.u32 2147483648, %v8579_v17  ;;  %v3712_v12 = vmul.f32 %v8832_v31, %v8787_v58  ;;  %vm4457_vm10 = vweird.f32 %v8633_v63 }
 0x68f   : > { %v4454_v59 = vmul.f32 %v8633_v63, %v4453_v33  ;;  %v4460_v36 = vand.u32 2147483647, %v8579_v17  ;;  %v3720_v11 = vand.u32 2147483647, %v8787_v58  ;;  %vm3736_vm13 = vcmp.eq.f32.partialorder %v3735_v35, 8.507059e+37  ;;  %vm4458_vm7 = vmor %vm4456_vm0, %vm4457_vm10 }
 0x690   : > { %v3734_v41 = vsel %vm3733_vm6, %v8934_v21, %v3730_v49  ;;  %v3713_v26 = vsub.f32 1.0, %v3712_v12  ;;  %v3722_v3 = vand.u32 2147483648, %v8787_v58  ;;  %vm3716_vm1 = vweird.f32 %v8787_v58  ;;  %v3818_v49 = vpop.permute.xlu1 %3817 }
 0x691   : > { %v5742_v48 = vpop.eup %5741  ;;  %v3739_v42 = vsel %vm3736_vm13, %v3738_v15, %v3734_v41  ;;  %v4455_v32 = vadd.f32 %v8633_v63, %v4454_v59  ;;  %vm3717_vm12 = vweird.f32 %v8832_v31  ;;  %v4463_v21 = vor.u32 1.1754944e-38, %v4462_v52  ;;  %v10461_v59 = vld [vmem:[#allocation67_spill] sm:$0xff] }
 0x692   : > { %v5744_v27 = vpop.eup %5743  ;;  %v9153_v25 = vadd.f32 1.0, %v5742_v48  ;;  %3773 = vmatpush.msra.mxu0 %v3739_v42  ;;  %v3714_v1 = vmul.f32 %v8832_v31, %v3713_v26  ;;  %v3697_v51 = vmul.f32 %v10456_v50, %v8794_v34  ;;  %vm4461_vm5 = vcmp.eq.f32.partialorder %v4460_v36, 8.507059e+37  ;;  %vm3718_vm14 = vmor %vm3716_vm1, %vm3717_vm12  ;;  %v10462_v36 = vld [vmem:[#allocation13_spill] sm:$0xff] }
 0x693   : > { %v9162_v2 = vpop.eup %5745  ;;  %v9164_v10 = vadd.f32 1.0, %v5744_v27  ;;  %v4459_v30 = vsel %vm4458_vm7, %v8633_v63, %v4455_v32  ;;  %vm9167_vm8 = vcmp.eq.f32.partialorder %v3720_v11, 8.507059e+37  ;;  %v3723_v29 = vor.u32 1.1754944e-38, %v3722_v3 }
 0x694   : > { %v4464_v8 = vsel %vm4461_vm5, %v4463_v21, %v4459_v30  ;;  %v3715_v17 = vadd.f32 %v8832_v31, %v3714_v1  ;;  %v3698_v43 = vsub.f32 1.0, %v3697_v51  ;;  %vm3701_vm4 = vweird.f32 %v8794_v34  ;;  %v10465_v21 = vld [vmem:[#allocation28_spill] sm:$0xff] }
 0x695   : > { %4674 = vmatpush.msra.mxu2 %v4464_v8  ;;  %vm3702_vm0 = vweird.f32 %v10456_v50  ;;  %v3707_v63 = vand.u32 2147483648, %v8794_v34  ;;  %v4202_v39 = vmul.f32 %v9093_v6, %v9057_v4  ;;  %5747 = vrcp.f32 %v9153_v25  ;;  %v10467_v51 = vld [vmem:[#allocation88_spill] sm:$0xff] }
 0x696   : > { %v3719_v46 = vsel %vm3718_vm14, %v8832_v31, %v3715_v17  ;;  %v3699_v60 = vmul.f32 %v10456_v50, %v3698_v43  ;;  %v3705_v5 = vand.u32 2147483647, %v8794_v34  ;;  %5749 = vrcp.f32 %v9164_v10  ;;  %v10459_v31 = vld [vmem:[#allocation3_spill] sm:$0xff]  ;;  %vm3703_vm10 = vmor %vm3701_vm4, %vm3702_vm0 }
 0x697   : > { %v3724_v58 = vsel %vm9167_vm8, %v3723_v29, %v3719_v46  ;;  %v4203_v19 = vsub.f32 1.0, %v4202_v39  ;;  %vm4206_vm6 = vweird.f32 %v9057_v4  ;;  %v4210_v40 = vand.u32 2147483647, %v9057_v4 }
 0x698   : > { %3774 = vmatpush.msra.mxu0 %v3724_v58  ;;  %v3700_v18 = vadd.f32 %v10456_v50, %v3699_v60  ;;  %v4212_v23 = vand.u32 2147483648, %v9057_v4  ;;  %v3682_v56 = vmul.f32 %v10460_v62, %v10459_v31  ;;  %v3708_v55 = vor.u32 1.1754944e-38, %v3707_v63 }
 0x699   : > { %v4204_v14 = vmul.f32 %v9093_v6, %v4203_v19  ;;  %vm4207_vm13 = vweird.f32 %v9093_v6  ;;  %v3690_v7 = vand.u32 2147483647, %v10459_v31  ;;  %vm3706_vm1 = vcmp.eq.f32.partialorder %v3705_v5, 8.507059e+37 }
 0x69a   : > { %v3704_v61 = vsel %vm3703_vm10, %v10456_v50, %v3700_v18  ;;  %v3683_v45 = vsub.f32 1.0, %v3682_v56  ;;  %vm3686_vm12 = vweird.f32 %v10459_v31  ;;  %vm3687_vm7 = vweird.f32 %v10460_v62  ;;  %vm4208_vm5 = vmor %vm4206_vm6, %vm4207_vm13  ;;  %v10466_v50 = vld [vmem:[#allocation70_spill] sm:$0xff] }
 0x69b   : > { %v3709_v35 = vsel %vm3706_vm1, %v3708_v55, %v3704_v61  ;;  %v4205_v33 = vadd.f32 %v9093_v6, %v4204_v14  ;;  %v3692_v34 = vand.u32 2147483648, %v10459_v31  ;;  %v9206_v15 = vpop.eup %5747  ;;  %vm4211_vm8 = vcmp.eq.f32.partialorder %v4210_v40, 8.507059e+37  ;;  %vm3688_vm4 = vmor %vm3686_vm12, %vm3687_vm7  ;;  %v10470_v55 = vld [vmem:[#allocation18_spill] sm:$0xff] }
 0x69c   : > { %3775 = vmatpush.msra.mxu0 %v3709_v35  ;;  %v4213_v52 = vor.u32 1.1754944e-38, %v4212_v23  ;;  %v3684_v12 = vmul.f32 %v10460_v62, %v3683_v45  ;;  %v4187_v11 = vmul.f32 %v10462_v36, %v10461_v59  ;;  %v9213_v41 = vpop.eup %5749  ;;  %vm9216_vm14 = vcmp.eq.f32.partialorder %v3690_v7, 8.507059e+37  ;;  %v10471_v14 = vld [vmem:[#allocation34_spill] sm:$0xff] }
 0x69d   : > { %v4209_v26 = vsel %vm4208_vm5, %v9093_v6, %v4205_v33  ;;  %v4195_v48 = vand.u32 2147483647, %v10461_v59  ;;  %v4197_v4 = vand.u32 2147483648, %v10461_v59  ;;  %v3880_v1 = vadd.f32 %v3818_v49, %v10465_v21 }
 0x69e   : > { %v4214_v42 = vsel %vm4211_vm8, %v4213_v52, %v4209_v26  ;;  %v3685_v32 = vadd.f32 %v10460_v62, %v3684_v12  ;;  %v4188_v27 = vsub.f32 1.0, %v4187_v11  ;;  %v3693_v6 = vor.u32 1.1754944e-38, %v3692_v34  ;;  %v10475_v11 = vld [vmem:[#allocation83_spill] sm:$0xff] }
 0x69f   : > { %4216 = vmatpush.msra.mxu1 %v4214_v42  ;;  %vm4191_vm0 = vweird.f32 %v10461_v59  ;;  %vm4192_vm6 = vweird.f32 %v10462_v36  ;;  %v3667_v30 = vmul.f32 %v10467_v51, %v10466_v50  ;;  %vm9234_vm10 = vcmp.eq.f32.partialorder %v4195_v48, 8.507059e+37 }
 0x6a0   : > { %v3689_v38 = vsel %vm3688_vm4, %v10460_v62, %v3685_v32  ;;  %v4189_v8 = vmul.f32 %v10462_v36, %v4188_v27  ;;  %v3896_v29 = vadd.f32 %v3880_v1, %v9097_v57  ;;  %v4198_v63 = vor.u32 1.1754944e-38, %v4197_v4  ;;  %vm4193_vm13 = vmor %vm4191_vm0, %vm4192_vm6 }
 0x6a1   : > { %v3694_v43 = vsel %vm9216_vm14, %v3693_v6, %v3689_v38  ;;  %v3668_v39 = vsub.f32 1.0, %v3667_v30  ;;  %v3675_v46 = vand.u32 2147483647, %v10466_v50  ;;  %v3677_v58 = vand.u32 2147483648, %v10466_v50  ;;  %v10478_v30 = vld [vmem:[#allocation74_spill] sm:$0xff]  ;;  %v10479_v38 = vld [vmem:[#allocation15_spill] sm:$0xff] }
 0x6a2   : > { %3776 = vmatpush.msra.mxu0 %v3694_v43  ;;  %v4190_v60 = vadd.f32 %v10462_v36, %v4189_v8  ;;  %v5237_v5 = vmul.f32 -1.442695, %v3896_v29  ;;  %v4172_v19 = vmul.f32 %v9076_v20, %v8936_v22  ;;  %vm3671_vm1 = vweird.f32 %v10466_v50 }
 0x6a3   : > { %v3669_v57 = vmul.f32 %v10467_v51, %v3668_v39  ;;  %vm3672_vm12 = vweird.f32 %v10467_v51  ;;  %vm4176_vm7 = vweird.f32 %v8936_v22  ;;  %v4180_v23 = vand.u32 2147483647, %v8936_v22 }
 0x6a4   : > { %v4194_v18 = vsel %vm4193_vm13, %v10462_v36, %v4190_v60  ;;  %5751 = vpow2.f32 %v5237_v5  ;;  %v4173_v40 = vsub.f32 1.0, %v4172_v19  ;;  %v4182_v56 = vand.u32 2147483648, %v8936_v22  ;;  %vm3673_vm5 = vmor %vm3671_vm1, %vm3672_vm12  ;;  %v10474_v36 = vld [vmem:[#allocation12_spill] sm:$0xff] }
 0x6a5   : > { %v4199_v31 = vsel %vm9234_vm10, %v4198_v63, %v4194_v18  ;;  %v3670_v62 = vadd.f32 %v10467_v51, %v3669_v57  ;;  %v3652_v7 = vmul.f32 %v10471_v14, %v10470_v55  ;;  %vm3676_vm8 = vcmp.eq.f32.partialorder %v3675_v46, 8.507059e+37 }
 0x6a6   : > { %4217 = vmatpush.msra.mxu1 %v4199_v31  ;;  %v3678_v61 = vor.u32 1.1754944e-38, %v3677_v58  ;;  %v4174_v45 = vmul.f32 %v9076_v20, %v4173_v40  ;;  %vm4177_vm14 = vweird.f32 %v9076_v20  ;;  %vm9265_vm4 = vcmp.eq.f32.partialorder %v4180_v23, 8.507059e+37  ;;  %v10482_v58 = vld [vmem:[#allocation84_spill] sm:$0xff] }
 0x6a7   : > { %v3674_v35 = vsel %vm3673_vm5, %v10467_v51, %v3670_v62  ;;  %v3653_v34 = vsub.f32 1.0, %v3652_v7  ;;  %v3660_v49 = vand.u32 2147483647, %v10470_v55  ;;  %v3662_v59 = vand.u32 2147483648, %v10470_v55  ;;  %vm4178_vm0 = vmor %vm4176_vm7, %vm4177_vm14 }
 0x6a8   : > { %v3679_v52 = vsel %vm3676_vm8, %v3678_v61, %v3674_v35  ;;  %v4175_v12 = vadd.f32 %v9076_v20, %v4174_v45  ;;  %v4157_v26 = vmul.f32 %v10475_v11, %v10474_v36  ;;  %v4183_v3 = vor.u32 1.1754944e-38, %v4182_v56 }
 0x6a9   : > { %3777 = vmatpush.msra.mxu0 %v3679_v52  ;;  %v3654_v48 = vmul.f32 %v10471_v14, %v3653_v34  ;;  %vm3656_vm6 = vweird.f32 %v10470_v55  ;;  %vm3657_vm10 = vweird.f32 %v10471_v14  ;;  %vm9280_vm13 = vcmp.eq.f32.partialorder %v3660_v49, 8.507059e+37  ;;  %v10483_v55 = vld [vmem:[#allocation31_spill] sm:$0xff] }
 0x6aa   : > { %v5752_v4 = vpop.eup %5751  ;;  %v4179_v42 = vsel %vm4178_vm0, %v9076_v20, %v4175_v12  ;;  %v4158_v27 = vsub.f32 1.0, %v4157_v26  ;;  %v4165_v21 = vand.u32 2147483647, %v10474_v36  ;;  %v4167_v50 = vand.u32 2147483648, %v10474_v36  ;;  %vm3658_vm1 = vmor %vm3656_vm6, %vm3657_vm10 }
 0x6ab   : > { %v9285_v1 = vadd.f32 1.0, %v5752_v4  ;;  %v4184_v22 = vsel %vm9265_vm4, %v4183_v3, %v4179_v42  ;;  %v3655_v6 = vadd.f32 %v10471_v14, %v3654_v48  ;;  %v3663_v51 = vor.u32 1.1754944e-38, %v3662_v59  ;;  %v10499_v48 = vld [vmem:[#allocation5_spill] sm:$0xff] }
 0x6ac   : > { %4218 = vmatpush.msra.mxu1 %v4184_v22  ;;  %v4159_v20 = vmul.f32 %v10475_v11, %v4158_v27  ;;  %vm4162_vm12 = vweird.f32 %v10475_v11  ;;  %v3637_v8 = vmul.f32 %v10479_v38, %v10478_v30  ;;  %vm4161_vm7 = vweird.f32 %v10474_v36  ;;  %v10489_v27 = vld [vmem:[#allocation46_spill] sm:$0xff] }
 0x6ad   : > { %v3659_v17 = vsel %vm3658_vm1, %v10471_v14, %v3655_v6  ;;  %vm9297_vm5 = vcmp.eq.f32.partialorder %v4165_v21, 8.507059e+37  ;;  %vm3641_vm8 = vweird.f32 %v10478_v30  ;;  %v3645_v46 = vand.u32 2147483647, %v10478_v30  ;;  %vm4163_vm14 = vmor %vm4161_vm7, %vm4162_vm12  ;;  %v10484_v14 = vld [vmem:[#allocation9_spill] sm:$0xff]  ;;  %v10490_v21 = vld [vmem:[#allocation16_spill] sm:$0xff] }
 0x6ae   : > { %v3664_v43 = vsel %vm9280_vm13, %v3663_v51, %v3659_v17  ;;  %v4160_v63 = vadd.f32 %v10475_v11, %v4159_v20  ;;  %v3638_v39 = vsub.f32 1.0, %v3637_v8  ;;  %5753 = vrcp.f32 %v9285_v1 }
 0x6af   : > { %3778 = vmatpush.msra.mxu0 %v3664_v43  ;;  %v4168_v60 = vor.u32 1.1754944e-38, %v4167_v50  ;;  %v3647_v5 = vand.u32 2147483648, %v10478_v30  ;;  %v4142_v19 = vmul.f32 %v8885_v28, %v10482_v58  ;;  %vm3642_vm4 = vweird.f32 %v10479_v38 }
 0x6b0   : > { %v4164_v57 = vsel %vm4163_vm14, %v10475_v11, %v4160_v63  ;;  %v3639_v18 = vmul.f32 %v10479_v38, %v3638_v39  ;;  %v4150_v40 = vand.u32 2147483647, %v10482_v58  ;;  %vm4146_vm0 = vweird.f32 %v10482_v58  ;;  %vm3643_vm13 = vmor %vm3641_vm8, %vm3642_vm4 }
 0x6b1   : > { %v4169_v23 = vsel %vm9297_vm5, %v4168_v60, %v4164_v57  ;;  %v4143_v31 = vsub.f32 1.0, %v4142_v19  ;;  %v4152_v62 = vand.u32 2147483648, %v10482_v58  ;;  %vm3646_vm6 = vcmp.eq.f32.partialorder %v3645_v46, 8.507059e+37  ;;  %v10492_v46 = vld [vmem:[#allocation60_spill] sm:$0xff] }
 0x6b2   : > { %4219 = vmatpush.msra.mxu1 %v4169_v23  ;;  %v3640_v56 = vadd.f32 %v10479_v38, %v3639_v18  ;;  %vm4147_vm10 = vweird.f32 %v8885_v28  ;;  %v3622_v7 = vmul.f32 %v10484_v14, %v10483_v55  ;;  %v3648_v61 = vor.u32 1.1754944e-38, %v3647_v5 }
 0x6b3   : > { %v4144_v45 = vmul.f32 %v8885_v28, %v4143_v31  ;;  %vm9325_vm1 = vcmp.eq.f32.partialorder %v4150_v40, 8.507059e+37  ;;  %v3630_v33 = vand.u32 2147483647, %v10483_v55  ;;  %vm3626_vm12 = vweird.f32 %v10483_v55  ;;  %vm4148_vm7 = vmor %vm4146_vm0, %vm4147_vm10  ;;  %v10493_v31 = vld [vmem:[#allocation25_spill] sm:$0xff] }
 0x6b4   : > { %v3644_v34 = vsel %vm3643_vm13, %v10479_v38, %v3640_v56  ;;  %v3623_v49 = vsub.f32 1.0, %v3622_v7  ;;  %v4437_v52 = vmul.f32 %v9115_v44, %v9072_v9  ;;  %v9334_v12 = vpop.eup %5753  ;;  %v4153_v11 = vor.u32 1.1754944e-38, %v4152_v62  ;;  %v10494_v62 = vld [vmem:[#allocation57_spill] sm:$0xff] }
 0x6b5   : > { %v3649_v59 = vsel %vm3646_vm6, %v3648_v61, %v3644_v34  ;;  %v4145_v36 = vadd.f32 %v8885_v28, %v4144_v45  ;;  %v3632_v26 = vand.u32 2147483648, %v10483_v55  ;;  %vm3627_vm5 = vweird.f32 %v10484_v14  ;;  %v10496_v34 = vld [vmem:[#allocation43_spill] sm:$0xff] }
 0x6b6   : > { %3779 = vmatpush.msra.mxu0 %v3649_v59  ;;  %v3624_v3 = vmul.f32 %v10484_v14, %v3623_v49  ;;  %vm9344_vm8 = vcmp.eq.f32.partialorder %v3630_v33, 8.507059e+37  ;;  %v4438_v4 = vsub.f32 1.0, %v4437_v52  ;;  %vm4442_vm14 = vweird.f32 %v9115_v44  ;;  %vm3628_vm4 = vmor %vm3626_vm12, %vm3627_vm5  ;;  %v10495_v33 = vld [vmem:[#allocation48_spill] sm:$0xff] }
 0x6b7   : > { %v4149_v42 = vsel %vm4148_vm7, %v8885_v28, %v4145_v36  ;;  %v4447_v32 = vand.u32 2147483648, %v9072_v9  ;;  %v4127_v22 = vmul.f32 %v10490_v21, %v10489_v27  ;;  %v4445_v20 = vand.u32 2147483647, %v9072_v9 }
 0x6b8   : > { %v4154_v6 = vsel %vm9325_vm1, %v4153_v11, %v4149_v42  ;;  %v3625_v50 = vadd.f32 %v10484_v14, %v3624_v3  ;;  %v4439_v51 = vmul.f32 %v9115_v44, %v4438_v4  ;;  %v3633_v28 = vor.u32 1.1754944e-38, %v3632_v26  ;;  %v10500_v4 = vld [vmem:[#allocation71_spill] sm:$0xff] }
 0x6b9   : > { %4220 = vmatpush.msra.mxu1 %v4154_v6  ;;  %vm4441_vm0 = vweird.f32 %v9072_v9  ;;  %v4448_v30 = vor.u32 1.1754944e-38, %v4447_v32  ;;  %v4128_v38 = vsub.f32 1.0, %v4127_v22  ;;  %v4135_v29 = vand.u32 2147483647, %v10489_v27  ;;  %v10491_v9 = vld [vmem:[#allocation63_spill] sm:$0xff] }
 0x6ba   : > { %v3629_v8 = vsel %vm3628_vm4, %v10484_v14, %v3625_v50  ;;  %v4440_v17 = vadd.f32 %v9115_v44, %v4439_v51  ;;  %v4137_v43 = vand.u32 2147483648, %v10489_v27  ;;  %vm4443_vm6 = vmor %vm4441_vm0, %vm4442_vm14  ;;  %vm4132_vm10 = vweird.f32 %v10490_v21 }
 0x6bb   : > { %v3634_v63 = vsel %vm9344_vm8, %v3633_v28, %v3629_v8  ;;  %v4129_v39 = vmul.f32 %v10490_v21, %v4128_v38  ;;  %v3607_v60 = vmul.f32 %v10492_v46, %v10491_v9  ;;  %vm4446_vm13 = vcmp.eq.f32.partialorder %v4445_v20, 8.507059e+37  ;;  %v10504_v38 = vld [vmem:[#allocation40_spill] sm:$0xff] }
 0x6bc   : > { %3780 = vmatpush.msra.mxu0 %v3634_v63  ;;  %v4444_v5 = vsel %vm4443_vm6, %v9115_v44, %v4440_v17  ;;  %vm4131_vm1 = vweird.f32 %v10489_v27  ;;  %vm3611_vm12 = vweird.f32 %v10491_v9  ;;  %v3615_v18 = vand.u32 2147483647, %v10491_v9 }
 0x6bd   : > { %v4449_v58 = vsel %vm4446_vm13, %v4448_v30, %v4444_v5  ;;  %v4130_v19 = vadd.f32 %v10490_v21, %v4129_v39  ;;  %v3608_v57 = vsub.f32 1.0, %v3607_v60  ;;  %vm4133_vm7 = vmor %vm4131_vm1, %vm4132_vm10  ;;  %vm4136_vm5 = vcmp.eq.f32.partialorder %v4135_v29, 8.507059e+37  ;;  %v10503_v30 = vld [vmem:[#allocation69_spill] sm:$0xff] }
 0x6be   : > { %4675 = vmatpush.msra.mxu2 %v4449_v58  ;;  %v4138_v40 = vor.u32 1.1754944e-38, %v4137_v43  ;;  %v3617_v23 = vand.u32 2147483648, %v10491_v9  ;;  %v4112_v44 = vmul.f32 %v10494_v62, %v10493_v31  ;;  %vm3612_vm8 = vweird.f32 %v10492_v46 }
 0x6bf   : > { %v4134_v56 = vsel %vm4133_vm7, %v10490_v21, %v4130_v19  ;;  %v3609_v55 = vmul.f32 %v10492_v46, %v3608_v57  ;;  %v4120_v14 = vand.u32 2147483647, %v10493_v31  ;;  %vm4116_vm14 = vweird.f32 %v10493_v31  ;;  %vm3613_vm6 = vmor %vm3611_vm12, %vm3612_vm8 }
 0x6c0   : > { %v4139_v7 = vsel %vm4136_vm5, %v4138_v40, %v4134_v56  ;;  %v4113_v61 = vsub.f32 1.0, %v4112_v44  ;;  %v4122_v45 = vand.u32 2147483648, %v10493_v31  ;;  %vm3616_vm4 = vcmp.eq.f32.partialorder %v3615_v18, 8.507059e+37  ;;  %v10505_v40 = vld [vmem:[#allocation7_spill] sm:$0xff] }
 0x6c1   : > { %4221 = vmatpush.msra.mxu1 %v4139_v7  ;;  %v3610_v35 = vadd.f32 %v10492_v46, %v3609_v55  ;;  %vm4117_vm0 = vweird.f32 %v10494_v62  ;;  %v3592_v49 = vmul.f32 %v10496_v34, %v10495_v33  ;;  %v3618_v52 = vor.u32 1.1754944e-38, %v3617_v23  ;;  %v10506_v23 = vld [vmem:[#allocation66_spill] sm:$0xff] }
 0x6c2   : > { %v4114_v59 = vmul.f32 %v10494_v62, %v4113_v61  ;;  %vm9394_vm10 = vcmp.eq.f32.partialorder %v4120_v14, 8.507059e+37  ;;  %v3600_v11 = vand.u32 2147483647, %v10495_v33  ;;  %vm3596_vm13 = vweird.f32 %v10495_v33  ;;  %vm4118_vm1 = vmor %vm4116_vm14, %vm4117_vm0 }
 0x6c3   : > { %v3614_v26 = vsel %vm3613_vm6, %v10492_v46, %v3610_v35  ;;  %v3593_v3 = vsub.f32 1.0, %v3592_v49  ;;  %v4097_v42 = vmul.f32 %v10500_v4, %v10499_v48  ;;  %v4123_v21 = vor.u32 1.1754944e-38, %v4122_v45  ;;  %v10507_v45 = vld [vmem:[#allocation30_spill] sm:$0xff]  ;;  %v10508_v35 = vld [vmem:[#allocation64_spill] sm:$0xff] }
 0x6c4   : > { %v3619_v32 = vsel %vm3616_vm4, %v3618_v52, %v3614_v26  ;;  %v4115_v27 = vadd.f32 %v10494_v62, %v4114_v59  ;;  %v3602_v22 = vand.u32 2147483648, %v10495_v33  ;;  %vm3597_vm12 = vweird.f32 %v10496_v34 }
 0x6c5   : > { %3781 = vmatpush.msra.mxu0 %v3619_v32  ;;  %v3594_v6 = vmul.f32 %v10496_v34, %v3593_v3  ;;  %vm9411_vm7 = vcmp.eq.f32.partialorder %v3600_v11, 8.507059e+37  ;;  %v4098_v51 = vsub.f32 1.0, %v4097_v42  ;;  %vm4102_vm5 = vweird.f32 %v10500_v4  ;;  %vm3598_vm8 = vmor %vm3596_vm13, %vm3597_vm12  ;;  %v10509_v3 = vld [vmem:[#allocation54_spill] sm:$0xff] }
 0x6c6   : > { %v4119_v20 = vsel %vm4118_vm1, %v10494_v62, %v4115_v27  ;;  %v4107_v28 = vand.u32 2147483648, %v10499_v48  ;;  %v3577_v8 = vmul.f32 %v10504_v38, %v10503_v30  ;;  %v4105_v63 = vand.u32 2147483647, %v10499_v48 }
 0x6c7   : > { %v4124_v17 = vsel %vm9394_vm10, %v4123_v21, %v4119_v20  ;;  %v3595_v29 = vadd.f32 %v10496_v34, %v3594_v6  ;;  %v4099_v43 = vmul.f32 %v10500_v4, %v4098_v51  ;;  %v3603_v39 = vor.u32 1.1754944e-38, %v3602_v22  ;;  %v9470_v51 = vpop.permute.xlu2 %4716 }
 0x6c8   : > { %4222 = vmatpush.msra.mxu1 %v4124_v17  ;;  %vm4101_vm14 = vweird.f32 %v10499_v48  ;;  %v4108_v9 = vor.u32 1.1754944e-38, %v4107_v28  ;;  %v3578_v46 = vsub.f32 1.0, %v3577_v8  ;;  %v3585_v58 = vand.u32 2147483647, %v10503_v30  ;;  %v10510_v48 = vld [vmem:[#allocation53_spill] sm:$0xff] }
 0x6c9   : > { %v3599_v60 = vsel %vm3598_vm8, %v10496_v34, %v3595_v29  ;;  %v4100_v5 = vadd.f32 %v10500_v4, %v4099_v43  ;;  %v3587_v19 = vand.u32 2147483648, %v10503_v30  ;;  %vm4103_vm4 = vmor %vm4101_vm14, %vm4102_vm5  ;;  %vm3582_vm0 = vweird.f32 %v10504_v38 }
 0x6ca   : > { %v3604_v57 = vsel %vm9411_vm7, %v3603_v39, %v3599_v60  ;;  %v3579_v18 = vmul.f32 %v10504_v38, %v3578_v46  ;;  %v4082_v31 = vmul.f32 %v10506_v23, %v10505_v40  ;;  %vm4106_vm6 = vcmp.eq.f32.partialorder %v4105_v63, 8.507059e+37  ;;  %v10515_v39 = vld [vmem:[#allocation8_spill] sm:$0xff] }
 0x6cb   : > { %3782 = vmatpush.msra.mxu0 %v3604_v57  ;;  %v4104_v62 = vsel %vm4103_vm4, %v10500_v4, %v4100_v5  ;;  %vm3581_vm10 = vweird.f32 %v10503_v30  ;;  %vm4086_vm13 = vweird.f32 %v10505_v40  ;;  %v4090_v14 = vand.u32 2147483647, %v10505_v40 }
 0x6cc   : > { %v4109_v44 = vsel %vm4106_vm6, %v4108_v9, %v4104_v62  ;;  %v3580_v56 = vadd.f32 %v10504_v38, %v3579_v18  ;;  %v4083_v55 = vsub.f32 1.0, %v4082_v31  ;;  %vm3583_vm1 = vmor %vm3581_vm10, %vm3582_vm0  ;;  %vm3586_vm12 = vcmp.eq.f32.partialorder %v3585_v58, 8.507059e+37  ;;  %v10516_v9 = vld [vmem:[#allocation6_spill] sm:$0xff] }
 0x6cd   : > { %4223 = vmatpush.msra.mxu1 %v4109_v44  ;;  %v3588_v7 = vor.u32 1.1754944e-38, %v3587_v19  ;;  %v4092_v61 = vand.u32 2147483648, %v10505_v40  ;;  %v3562_v33 = vmul.f32 %v10508_v35, %v10507_v45  ;;  %vm4087_vm7 = vweird.f32 %v10506_v23 }
 0x6ce   : > { %v3584_v34 = vsel %vm3583_vm1, %v10504_v38, %v3580_v56  ;;  %v4084_v49 = vmul.f32 %v10506_v23, %v4083_v55  ;;  %v3570_v52 = vand.u32 2147483647, %v10507_v45  ;;  %vm3566_vm5 = vweird.f32 %v10507_v45  ;;  %vm4088_vm4 = vmor %vm4086_vm13, %vm4087_vm7 }
 0x6cf   : > { %v3589_v59 = vsel %vm3586_vm12, %v3588_v7, %v3584_v34  ;;  %v3563_v36 = vsub.f32 1.0, %v3562_v33  ;;  %v3572_v11 = vand.u32 2147483648, %v10507_v45  ;;  %vm4091_vm8 = vcmp.eq.f32.partialorder %v4090_v14, 8.507059e+37 }
 0x6d0   : > { %3783 = vmatpush.msra.mxu0 %v3589_v59  ;;  %v4085_v26 = vadd.f32 %v10506_v23, %v4084_v49  ;;  %vm3567_vm14 = vweird.f32 %v10508_v35  ;;  %v4067_v4 = vmul.f32 %v10510_v48, %v10509_v3  ;;  %v4093_v42 = vor.u32 1.1754944e-38, %v4092_v61  ;;  %v9518_v59 = vpop.permute.xlu2 %4731 }
 0x6d1   : > { %v3564_v32 = vmul.f32 %v10508_v35, %v3563_v36  ;;  %vm9461_vm0 = vcmp.eq.f32.partialorder %v3570_v52, 8.507059e+37  ;;  %v4075_v21 = vand.u32 2147483647, %v10509_v3  ;;  %vm4071_vm6 = vweird.f32 %v10509_v3  ;;  %vm3568_vm10 = vmor %vm3566_vm5, %vm3567_vm14 }
 0x6d2   : > { %v4089_v22 = vsel %vm4088_vm4, %v10506_v23, %v4085_v26  ;;  %v4068_v6 = vsub.f32 1.0, %v4067_v4  ;;  %v3547_v50 = vmul.f32 %v8929_v37, %v8863_v54  ;;  %v3573_v30 = vor.u32 1.1754944e-38, %v3572_v11  ;;  %v9525_v4 = vpop.permute.xlu1 %4721 }
 0x6d3   : > { %v4094_v20 = vsel %vm4091_vm8, %v4093_v42, %v4089_v22  ;;  %v3565_v28 = vadd.f32 %v10508_v35, %v3564_v32  ;;  %v4077_v38 = vand.u32 2147483648, %v10509_v3  ;;  %vm4072_vm13 = vweird.f32 %v10510_v48 }
 0x6d4   : > { %4224 = vmatpush.msra.mxu1 %v4094_v20  ;;  %v4069_v8 = vmul.f32 %v10510_v48, %v4068_v6  ;;  %vm9480_vm1 = vcmp.eq.f32.partialorder %v4075_v21, 8.507059e+37  ;;  %v3548_v29 = vsub.f32 1.0, %v3547_v50  ;;  %vm3552_vm12 = vweird.f32 %v8929_v37  ;;  %vm4073_vm7 = vmor %vm4071_vm6, %vm4072_vm13 }
 0x6d5   : > { %v3569_v43 = vsel %vm3568_vm10, %v10508_v35, %v3565_v28  ;;  %v3557_v63 = vand.u32 2147483648, %v8863_v54  ;;  %v4052_v46 = vmul.f32 %v10516_v9, %v10515_v39  ;;  %v3555_v19 = vand.u32 2147483647, %v8863_v54 }
 0x6d6   : > { %v3574_v60 = vsel %vm9461_vm0, %v3573_v30, %v3569_v43  ;;  %v4070_v5 = vadd.f32 %v10510_v48, %v4069_v8  ;;  %v3549_v58 = vmul.f32 %v8929_v37, %v3548_v29  ;;  %v4078_v57 = vor.u32 1.1754944e-38, %v4077_v38 }
 0x6d7   : > { %3784 = vmatpush.msra.mxu0 %v3574_v60  ;;  %vm3551_vm5 = vweird.f32 %v8863_v54  ;;  %v3558_v18 = vor.u32 1.1754944e-38, %v3557_v63  ;;  %v4053_v40 = vsub.f32 1.0, %v4052_v46  ;;  %v4060_v62 = vand.u32 2147483647, %v10515_v39  ;;  %v10517_v54 = vld [vmem:[#allocation4_spill] sm:$0xff]  ;;  %v9555_v63 = vpop.permute.xlu0 %4726 }
 0x6d8   : > { %v4074_v23 = vsel %vm4073_vm7, %v10510_v48, %v4070_v5  ;;  %v3550_v31 = vadd.f32 %v8929_v37, %v3549_v58  ;;  %v4062_v44 = vand.u32 2147483648, %v10515_v39  ;;  %vm3553_vm8 = vmor %vm3551_vm5, %vm3552_vm12  ;;  %vm4057_vm14 = vweird.f32 %v10516_v9 }
 0x6d9   : > { %v4079_v56 = vsel %vm9480_vm1, %v4078_v57, %v4074_v23  ;;  %v4054_v55 = vmul.f32 %v10516_v9, %v4053_v40  ;;  %v4037_v14 = vmul.f32 %v8875_v0, %v10517_v54  ;;  %vm3556_vm4 = vcmp.eq.f32.partialorder %v3555_v19, 8.507059e+37 }
 0x6da   : > { %4225 = vmatpush.msra.mxu1 %v4079_v56  ;;  %v3554_v7 = vsel %vm3553_vm8, %v8929_v37, %v3550_v31  ;;  %vm4056_vm0 = vweird.f32 %v10515_v39  ;;  %vm4041_vm6 = vweird.f32 %v10517_v54  ;;  %v4045_v33 = vand.u32 2147483647, %v10517_v54 }
 0x6db   : > { %v3559_v61 = vsel %vm3556_vm4, %v3558_v18, %v3554_v7  ;;  %v4055_v45 = vadd.f32 %v10516_v9, %v4054_v55  ;;  %v4038_v35 = vsub.f32 1.0, %v4037_v14  ;;  %vm4058_vm10 = vmor %vm4056_vm0, %vm4057_vm14  ;;  %vm4061_vm13 = vcmp.eq.f32.partialorder %v4060_v62, 8.507059e+37  ;;  %v2369_v18 = vpop.xlane.xlu1 %2368 }
 0x6dc   : > { %3785 = vmatpush.msra.mxu0 %v3559_v61  ;;  %v4063_v34 = vor.u32 1.1754944e-38, %v4062_v44  ;;  %v4047_v49 = vand.u32 2147483648, %v10517_v54  ;;  %v4022_v37 = vmul.f32 %v9162_v2, %v9117_v13  ;;  %vm4042_vm1 = vweird.f32 %v8875_v0  ;;  %v2371_v44 = vpop.xlane.xlu2 %2370  ;;  %v10522_v54 = vld [vmem:[#allocation81_spill] sm:$0xff] }
 0x6dd   : > { %v4059_v52 = vsel %vm4058_vm10, %v10516_v9, %v4055_v45  ;;  %v4039_v36 = vmul.f32 %v8875_v0, %v4038_v35  ;;  %v4030_v11 = vand.u32 2147483647, %v9117_v13  ;;  %vm4026_vm12 = vweird.f32 %v9117_v13  ;;  %vm4043_vm8 = vmor %vm4041_vm6, %vm4042_vm1 }
 0x6de   : > { %v4064_v26 = vsel %vm4061_vm13, %v4063_v34, %v4059_v52  ;;  %v4023_v3 = vsub.f32 1.0, %v4022_v37  ;;  %v4032_v48 = vand.u32 2147483648, %v9117_v13  ;;  %vm4046_vm7 = vcmp.eq.f32.partialorder %v4045_v33, 8.507059e+37  ;;  %v10523_v33 = vld [vmem:[#allocation39_spill] sm:$0xff] }
 0x6df   : > { %4226 = vmatpush.msra.mxu1 %v4064_v26  ;;  %v4040_v42 = vadd.f32 %v8875_v0, %v4039_v36  ;;  %vm4027_vm5 = vweird.f32 %v9162_v2  ;;  %v3532_v32 = vmul.f32 %v9206_v15, %v9153_v25  ;;  %v4048_v27 = vor.u32 1.1754944e-38, %v4047_v49  ;;  %v2373_v52 = vpop.xlane.xlu0 %2372 }
 0x6e0   : > { %v4024_v21 = vmul.f32 %v9162_v2, %v4023_v3  ;;  %vm9534_vm14 = vcmp.eq.f32.partialorder %v4030_v11, 8.507059e+37  ;;  %v3540_v6 = vand.u32 2147483647, %v9153_v25  ;;  %vm3536_vm4 = vweird.f32 %v9153_v25  ;;  %vm4028_vm0 = vmor %vm4026_vm12, %vm4027_vm5 }
 0x6e1   : > { %v4044_v50 = vsel %vm4043_vm8, %v8875_v0, %v4040_v42  ;;  %v3533_v20 = vsub.f32 1.0, %v3532_v32  ;;  %v4422_v28 = vmul.f32 %v9213_v41, %v9164_v10  ;;  %v4033_v8 = vor.u32 1.1754944e-38, %v4032_v48  ;;  %v10524_v42 = vld [vmem:[#allocation42_spill] sm:$0xff] }
 0x6e2   : > { %v4049_v30 = vsel %vm4046_vm7, %v4048_v27, %v4044_v50  ;;  %v4025_v38 = vadd.f32 %v9162_v2, %v4024_v21  ;;  %v3542_v17 = vand.u32 2147483648, %v9153_v25  ;;  %vm3537_vm6 = vweird.f32 %v9206_v15  ;;  %v10525_v21 = vld [vmem:[#allocation32_spill] sm:$0xff] }
 0x6e3   : > { %4227 = vmatpush.msra.mxu1 %v4049_v30  ;;  %v3534_v0 = vmul.f32 %v9206_v15, %v3533_v20  ;;  %vm9551_vm10 = vcmp.eq.f32.partialorder %v3540_v6, 8.507059e+37  ;;  %v4423_v43 = vsub.f32 1.0, %v4422_v28  ;;  %vm4427_vm13 = vweird.f32 %v9213_v41  ;;  %vm3538_vm1 = vmor %vm3536_vm4, %vm3537_vm6  ;;  %v2375_v11 = vpop.xlane.xlu1 %2374  ;;  %v10526_v20 = vld [vmem:[#allocation21_spill] sm:$0xff]  ;;  %v10528_v30 = vld [vmem:[#allocation35_spill] sm:$0xff] }
 0x6e4   : > { %v4029_v39 = vsel %vm4028_vm0, %v9162_v2, %v4025_v38  ;;  %v4432_v9 = vand.u32 2147483648, %v9164_v10  ;;  %v4007_v13 = vmul.f32 %v8942_v47, %v8880_v53  ;;  %v4430_v58 = vand.u32 2147483647, %v9164_v10  ;;  %v2377_v50 = vpop.xlane.xlu2 %2376 }
 0x6e5   : > { %v4034_v46 = vsel %vm9534_vm14, %v4033_v8, %v4029_v39  ;;  %v3535_v60 = vadd.f32 %v9206_v15, %v3534_v0  ;;  %v4424_v5 = vmul.f32 %v9213_v41, %v4423_v43  ;;  %v3543_v2 = vor.u32 1.1754944e-38, %v3542_v17  ;;  %v10530_v8 = vld [vmem:[#allocation24_spill] sm:$0xff]  ;;  %v10531_v0 = vld [vmem:[#allocation22_spill] sm:$0xff] }
 0x6e6   : > { %4228 = vmatpush.msra.mxu1 %v4034_v46  ;;  %vm4426_vm12 = vweird.f32 %v9164_v10  ;;  %v4433_v19 = vor.u32 1.1754944e-38, %v4432_v9  ;;  %v4008_v57 = vsub.f32 1.0, %v4007_v13  ;;  %v4015_v31 = vand.u32 2147483647, %v8880_v53  ;;  %v10534_v13 = vld [vmem:[#allocation38_spill] sm:$0xff] }
 0x6e7   : > { %v3539_v40 = vsel %vm3538_vm1, %v9206_v15, %v3535_v60  ;;  %v4425_v23 = vadd.f32 %v9213_v41, %v4424_v5  ;;  %v4017_v62 = vand.u32 2147483648, %v8880_v53  ;;  %vm4428_vm7 = vmor %vm4426_vm12, %vm4427_vm13  ;;  %vm4012_vm5 = vweird.f32 %v8942_v47  ;;  %v10535_v5 = vld [vmem:[#allocation37_spill] sm:$0xff] }
 0x6e8   : > { %v3544_v56 = vsel %vm9551_vm10, %v3543_v2, %v3539_v40  ;;  %v4009_v25 = vmul.f32 %v8942_v47, %v4008_v57  ;;  %v3992_v10 = vmul.f32 %v8971_v16, %v8914_v24  ;;  %vm4431_vm8 = vcmp.eq.f32.partialorder %v4430_v58, 8.507059e+37  ;;  %v10536_v2 = vld [vmem:[#allocation73_spill] sm:$0xff]  ;;  %v2381_v57 = vpop.xlane.xlu0 %2380 }
 0x6e9   : > { %3786 = vmatpush.msra.mxu0 %v3544_v56  ;;  %v4429_v15 = vsel %vm4428_vm7, %v9213_v41, %v4425_v23  ;;  %vm4011_vm14 = vweird.f32 %v8880_v53  ;;  %vm4016_vm0 = vcmp.eq.f32.partialorder %v4015_v31, 8.507059e+37  ;;  %v4018_v61 = vor.u32 1.1754944e-38, %v4017_v62  ;;  %v10539_v23 = vld [vmem:[#allocation80_spill] sm:$0xff] }
 0x6ea   : > { %v4434_v55 = vsel %vm4431_vm8, %v4433_v19, %v4429_v15  ;;  %3787 = vmatmul.f32.vlgmr.msra.gmra.mxu0 %v10522_v54  ;;  %v4010_v14 = vadd.f32 %v8942_v47, %v4009_v25  ;;  %v3993_v7 = vsub.f32 1.0, %v3992_v10  ;;  %vm4013_vm4 = vmor %vm4011_vm14, %vm4012_vm5  ;;  %v4002_v45 = vand.u32 2147483648, %v8914_v24  ;;  %v10541_v25 = vld [vmem:[#allocation44_spill] sm:$0xff]  ;;  %v10543_v54 = vld [vmem:[#allocation19_spill] sm:$0xff] }
 0x6eb   : > { %4676 = vmatpush.msra.mxu2 %v4434_v55  ;;  %v3977_v35 = vmul.f32 %v9334_v12, %v9285_v1  ;;  %vm3997_vm6 = vweird.f32 %v8971_v16  ;;  %v4000_v53 = vand.u32 2147483647, %v8914_v24  ;;  %vm3996_vm10 = vweird.f32 %v8914_v24  ;;  %v2379_v60 = vpop.xlane.xlu1 %2378  ;;  %v10542_v10 = vld [vmem:[#allocation76_spill] sm:$0xff] }
 0x6ec   : > { %v4014_v41 = vsel %vm4013_vm4, %v8942_v47, %v4010_v14  ;;  %4677 = vmatmul.f32.vlgmr.msra.gmra.mxu2 %v10523_v33  ;;  %v3994_v34 = vmul.f32 %v8971_v16, %v3993_v7  ;;  %vm3982_vm13 = vweird.f32 %v9334_v12  ;;  %v3987_v47 = vand.u32 2147483648, %v9285_v1  ;;  %vm3998_vm1 = vmor %vm3996_vm10, %vm3997_vm6  ;;  %v2383_v62 = vpop.xlane.xlu2 %2382  ;;  %v10547_v33 = vld [vmem:[#allocation49_spill] sm:$0xff] }
 0x6ed   : > { %v4019_v49 = vsel %vm4016_vm0, %v4018_v61, %v4014_v41  ;;  %v3978_v37 = vsub.f32 1.0, %v3977_v35  ;;  %v4003_v26 = vor.u32 1.1754944e-38, %v4002_v45  ;;  %v3985_v48 = vand.u32 2147483647, %v9285_v1  ;;  %v10544_v45 = vld [vmem:[#allocation51_spill] sm:$0xff]  ;;  %v10545_v35 = vld [vmem:[#allocation29_spill] sm:$0xff] }
 0x6ee   : > { %4229 = vmatpush.msra.mxu1 %v4019_v49  ;;  %v3995_v36 = vadd.f32 %v8971_v16, %v3994_v34  ;;  %v2415_v32 = vperm.slane %v2369_v18, %v10524_v42  ;;  %vm4001_vm12 = vcmp.eq.f32.partialorder %v4000_v53, 8.507059e+37  ;;  %v2417_v22 = vperm.slane %v2371_v44, %v10525_v21  ;;  %v10538_v18 = vld [vmem:[#allocation79_spill] sm:$0xff]  ;;  %v10540_v44 = vld [vmem:[#allocation26_spill] sm:$0xff] }
 0x6ef   : > { %v3979_v3 = vmul.f32 %v9334_v12, %v3978_v37  ;;  %vm3981_vm7 = vweird.f32 %v9285_v1  ;;  %vm10527_vm5 = vcmask 523712   ;;  %v3988_v38 = vor.u32 1.1754944e-38, %v3987_v47  ;;  %v10532_v1 = vld [vmem:[#allocation87_spill] sm:$0xff]  ;;  %v10546_v41 = vld [vmem:[#allocation58_spill] sm:$0xff] }
 0x6f0   : > { %v3999_v27 = vsel %vm3998_vm1, %v8971_v16, %v3995_v36  ;;  %v2416_v28 = vsel %vm10527_vm5, %v2415_v32, %v10526_v20  ;;  %vm3983_vm8 = vmor %vm3981_vm7, %vm3982_vm13  ;;  %vm10529_vm14 = vcmask 589312   ;;  %v2421_v17 = vperm.slane %v2375_v11, %v10530_v8 }
 0x6f1   : > { %v4004_v6 = vsel %vm4001_vm12, %v4003_v26, %v3999_v27  ;;  %v3980_v24 = vadd.f32 %v9334_v12, %v3979_v3  ;;  %v2418_v16 = vsel %vm10529_vm14, %v2417_v22, %v2416_v28  ;;  %v2419_v29 = vperm.slane %v2373_v52, %v10531_v0 }
 0x6f2   : > { %4230 = vmatpush.msra.mxu1 %v4004_v6  ;;  %3790 = vmatmul.f32.gmra.mxu0 %v10528_v30  ;;  %vm3986_vm4 = vcmp.eq.f32.partialorder %v3985_v48, 8.507059e+37  ;;  %vm10533_vm0 = vcmask 654912   ;;  %v2423_v58 = vperm.slane %v2377_v50, %v10535_v5  ;;  %v2425_v19 = vperm.slane %v2379_v60, %v10536_v2 }
 0x6f3   : > { %v3984_v43 = vsel %vm3983_vm8, %v9334_v12, %v3980_v24  ;;  %v2420_v9 = vsel %vm10533_vm0, %v2419_v29, %v2418_v16  ;;  %vm10537_vm6 = vcmask 786112   ;;  %v2427_v31 = vperm.slane %v2381_v57, %v10539_v23  ;;  %v2385_v55 = vpop.xlane.xlu1 %2384  ;;  %v4706_v29 = vld [vmem:[%s9733_s13] sm:$0xff] }
 0x6f4   : > { %4680 = vmatmul.f32.gmra.mxu2 %v10532_v1  ;;  %v3989_v39 = vsel %vm3986_vm4, %v3988_v38, %v3984_v43  ;;  %v2422_v46 = vsel %vm2109_vm2, %v2421_v17, %v2420_v9  ;;  %v2429_v15 = vperm.slane %v2383_v62, %v10542_v10  ;;  %v2431_v14 = vperm.slane %v2385_v55, %v10543_v54  ;;  %v4709_v55 = vld [vmem:[%s9733_s13 + $0x18] sm:$0xff] }
 0x6f5   : > { %4231 = vmatpush.msra.mxu1 %v3989_v39  ;;  %v2424_v12 = vsel %vm10537_vm6, %v2423_v58, %v2422_v46  ;;  %vm10548_vm13 = vcmask 261120  }
 0x6f6   : > { %4232 = vmatmul.f32.vlgmr.msra.gmra.mxu1 %v10534_v13  ;;  %v2426_v40 = vsel %vm2117_vm9, %v2425_v19, %v2424_v12  ;;  %vm10549_vm4 = vmmov %vm10548_vm13 }
 0x6f7   : > { %v2428_v56 = vsel %vm2121_vm11, %v2427_v31, %v2426_v40  ;;  %v4707_v31 = vld [vmem:[%s9733_s13 + $0x8] sm:$0xff]  ;;  %vm10550_vm0 = vmmov %vm10549_vm4 }
 0x6f8   : > { %v2430_v7 = vsel %vm2125_vm3, %v2429_v15, %v2428_v56  ;;  %vm10551_vm6 = vmmov %vm10550_vm0  ;;  %v4708_v15 = vld [vmem:[%s9733_s13 + $0x10] sm:$0xff] }
 0x6f9   : > { %v2432_v61 = vsel %vm2129_vm15, %v2431_v14, %v2430_v7 }
 0x6fa   : > { %3793 = vmatmul.f32.gmra.mxu0 %v10538_v18  ;;  %2434 = vst [vmem:[%s8089_s19 + $0x2] sm:$0x1] %v2432_v61 }
 0x6fc   : > { %4683 = vmatmul.f32.gmra.mxu2 %v10540_v44 }
 0x6fe   : > { %4235 = vmatmul.f32.gmra.mxu1 %v10541_v25 }
 0x702   : > { %3796 = vmatmul.f32.gmra.mxu0 %v10544_v45 }
 0x704   : > { %4686 = vmatmul.f32.gmra.mxu2 %v10545_v35 }
 0x706   : > { %4238 = vmatmul.f32.gmra.mxu1 %v10546_v41 }
 0x70e   : > { %4241 = vmatmul.f32.gmra.mxu1 %v10547_v33 }
 0x767   : > { %v3788_v34 = vpop.f32.mrf.mxu0 }
 0x768   : > { %v3800_v32 = vmul.f32 0.125, %v3788_v34 }
 0x76a   : > { %v3808_v50 = vmul.f32 0.2, %v3800_v32  ;;  %vm3804_vm3 = vcmp.ge.f32.partialorder %v3800_v32, 0.0 }
 0x76c   : > { %v3812_v0 = vsel %vm3804_vm3, %v3800_v32, %v3808_v50  ;;  %vm10555_vm3 = vmmov %vm10550_vm0 }
 0x76f   : > { %v4678_v53 = vpop.f32.mrf.mxu2  ;;  %v3791_v49 = vpop.f32.mrf.mxu0 }
 0x770   : > { %v3801_v48 = vmul.f32 0.125, %v3791_v49  ;;  %v4690_v17 = vmul.f32 0.125, %v4678_v53 }
 0x772   : > { %v3809_v6 = vmul.f32 0.2, %v3801_v48  ;;  %vm3805_vm11 = vcmp.ge.f32.partialorder %v3801_v48, 0.0  ;;  %v4698_v58 = vmul.f32 0.2, %v4690_v17  ;;  %vm4694_vm7 = vcmp.ge.f32.partialorder %v4690_v17, 0.0 }
 0x773   : > { %v4233_v37 = vpop.f32.mrf.mxu1 }
 0x774   : > { %v3813_v8 = vsel %vm3805_vm11, %v3801_v48, %v3809_v6  ;;  %v4245_v2 = vmul.f32 0.125, %v4233_v37  ;;  %v4702_v44 = vsel %vm4694_vm7, %v4690_v17, %v4698_v58  ;;  %vm10554_vm11 = vmmov %vm10550_vm0  ;;  %v4883_v58 = vld [vmem:[%s9735_s15 + $0x10] sm:$0xff] }
 0x776   : > { %v4253_v62 = vmul.f32 0.2, %v4245_v2  ;;  %vm4249_vm14 = vcmp.ge.f32.partialorder %v4245_v2, 0.0 }
 0x777   : > { %v4681_v52 = vpop.f32.mrf.mxu2  ;;  %v3794_v36 = vpop.f32.mrf.mxu0 }
 0x778   : > { %v3802_v11 = vmul.f32 0.125, %v3794_v36  ;;  %v4691_v38 = vmul.f32 0.125, %v4681_v52  ;;  %v4257_v10 = vsel %vm4249_vm14, %v4245_v2, %v4253_v62 }
 0x77a   : > { %v3810_v27 = vmul.f32 0.2, %v3802_v11  ;;  %vm3806_vm9 = vcmp.ge.f32.partialorder %v3802_v11, 0.0  ;;  %v4699_v13 = vmul.f32 0.2, %v4691_v38  ;;  %vm4695_vm1 = vcmp.ge.f32.partialorder %v4691_v38, 0.0 }
 0x77b   : > { %v4236_v47 = vpop.f32.mrf.mxu1 }
 0x77c   : > { %v3814_v28 = vsel %vm3806_vm9, %v3802_v11, %v3810_v27  ;;  %v4246_v46 = vmul.f32 0.125, %v4236_v47  ;;  %v4703_v40 = vsel %vm4695_vm1, %v4691_v38, %v4699_v13  ;;  %vm10553_vm9 = vmmov %vm10550_vm0  ;;  %v10561_v38 = vld [vmem:[#allocation96_spill] sm:$0xff] }
 0x77d   : > { %vm10559_vm1 = vmmov %vm10550_vm0 }
 0x77e   : > { %v4254_v18 = vmul.f32 0.2, %v4246_v46  ;;  %vm4250_vm8 = vcmp.ge.f32.partialorder %v4246_v46, 0.0 }
 0x77f   : > { %v4684_v26 = vpop.f32.mrf.mxu2  ;;  %v3797_v3 = vpop.f32.mrf.mxu0 }
 0x780   : > { %v3803_v42 = vmul.f32 0.125, %v3797_v3  ;;  %v4692_v20 = vmul.f32 0.125, %v4684_v26  ;;  %v4258_v25 = vsel %vm4250_vm8, %v4246_v46, %v4254_v18  ;;  %v10565_v18 = vld [vmem:[#allocation41_spill] sm:$0xff] }
 0x782   : > { %vm3807_vm2 = vcmp.ge.f32.partialorder %v3803_v42, 0.0  ;;  %v3811_v21 = vmul.f32 0.2, %v3803_v42  ;;  %v4700_v43 = vmul.f32 0.2, %v4692_v20  ;;  %vm4696_vm10 = vcmp.ge.f32.partialorder %v4692_v20, 0.0 }
 0x783   : > { %v4239_v22 = vpop.f32.mrf.mxu1 }
 0x784   : > { %v3815_v24 = vsel %vm3807_vm2, %v3803_v42, %v3811_v21  ;;  %v4247_v1 = vmul.f32 0.125, %v4239_v22  ;;  %v4704_v12 = vsel %vm4696_vm10, %v4692_v20, %v4700_v43  ;;  %vm10552_vm2 = vmmov %vm10550_vm0 }
 0x785   : > { %4758 = vmatpush.msrb.mxu3 %v3815_v24  ;;  %vm10557_vm10 = vmmov %vm10550_vm0 }
 0x786   : > { %v4255_v19 = vmul.f32 0.2, %v4247_v1  ;;  %vm4251_vm5 = vcmp.ge.f32.partialorder %v4247_v1, 0.0 }
 0x787   : > { %v4687_v30 = vpop.f32.mrf.mxu2  ;;  %4759 = vmatpush.msrb.mxu3 %v3814_v28 }
 0x788   : > { %v4693_v16 = vmul.f32 0.125, %v4687_v30  ;;  %v4259_v56 = vsel %vm4251_vm5, %v4247_v1, %v4255_v19  ;;  %v10560_v30 = vld [vmem:[#allocation50_spill] sm:$0xff]  ;;  %v10563_v1 = vld [vmem:[#allocation91_spill] sm:$0xff] }
 0x789   : > { %4760 = vmatpush.msrb.mxu3 %v3813_v8  ;;  %v4882_v8 = vld [vmem:[%s9735_s15 + $0x8] sm:$0xff] }
 0x78a   : > { %vm4697_vm15 = vcmp.ge.f32.partialorder %v4693_v16, 0.0  ;;  %v4701_v39 = vmul.f32 0.2, %v4693_v16 }
 0x78b   : > { %v4242_v9 = vpop.f32.mrf.mxu1  ;;  %4761 = vmatpush.msrb.mxu3 %v3812_v0 }
 0x78c   : > { %v4248_v60 = vmul.f32 0.125, %v4242_v9  ;;  %v4705_v5 = vsel %vm4697_vm15, %v4693_v16, %v4701_v39  ;;  %5269 = vmatmul.msk.f32.vlgmr.msrb.gmra.mxu3 %vm10548_vm13, %v4706_v29  ;;  %vm10556_vm15 = vmmov %vm10550_vm0  ;;  %v10564_v9 = vld [vmem:[#allocation90_spill] sm:$0xff] }
 0x78d   : > { %4816 = vmatpush.msrb.mxu1 %v4705_v5  ;;  %vm10558_vm13 = vmmov %vm10550_vm0 }
 0x78e   : > { %vm4252_vm12 = vcmp.ge.f32.partialorder %v4248_v60, 0.0  ;;  %v4256_v57 = vmul.f32 0.2, %v4248_v60 }
 0x78f   : > { %4817 = vmatpush.msrb.mxu1 %v4704_v12 }
 0x790   : > { %v4260_v23 = vsel %vm4252_vm12, %v4248_v60, %v4256_v57  ;;  %v4881_v60 = vld [vmem:[%s9735_s15] sm:$0xff] }
 0x791   : > { %4818 = vmatpush.msrb.mxu1 %v4703_v40  ;;  %4787 = vmatpush.msrb.mxu0 %v4260_v23 }
 0x793   : > { %4819 = vmatpush.msrb.mxu1 %v4702_v44  ;;  %4788 = vmatpush.msrb.mxu0 %v4259_v56 }
 0x794   : > { %5277 = vmatmul.msk.f32.vlgmr.msrb.gmra.mxu1 %vm10549_vm4, %v4706_v29  ;;  %5270 = vmatmul.msk.f32.gmra.mxu3 %vm10550_vm0, %v4707_v31 }
 0x795   : > { %4789 = vmatpush.msrb.mxu0 %v4258_v25 }
 0x797   : > { %4790 = vmatpush.msrb.mxu0 %v4257_v10  ;;  %v10566_v10 = vld [vmem:[#allocation98_spill] sm:$0xff] }
 0x798   : > { %5273 = vmatmul.msk.f32.vlgmr.msrb.gmra.mxu0 %vm10551_vm6, %v4706_v29  ;;  %v10562_v29 = vld [vmem:[#allocation94_spill] sm:$0xff] }
 0x79c   : > { %5278 = vmatmul.msk.f32.gmra.mxu1 %vm10552_vm2, %v4707_v31  ;;  %5271 = vmatmul.msk.f32.gmra.mxu3 %vm10553_vm9, %v4708_v15 }
 0x7a0   : > { %5274 = vmatmul.msk.f32.gmra.mxu0 %vm10554_vm11, %v4707_v31 }
 0x7a4   : > { %5279 = vmatmul.msk.f32.gmra.mxu1 %vm10555_vm3, %v4708_v15  ;;  %5272 = vmatmul.msk.f32.gmra.mxu3 %vm10556_vm15, %v4709_v55 }
 0x7a8   : > { %5275 = vmatmul.msk.f32.gmra.mxu0 %vm10557_vm10, %v4708_v15 }
 0x7ac   : > { %5280 = vmatmul.msk.f32.gmra.mxu1 %vm10558_vm13, %v4709_v55 }
 0x7b0   : > { %5276 = vmatmul.msk.f32.gmra.mxu0 %vm10559_vm1, %v4709_v55 }
 0x80f   : > { %v4763_v54 = vpop.f32.mrf.mxu3 }
 0x810   : > { %v4764_v33 = vadd.f32 %v4763_v54, %v9470_v51  ;;  %v10567_v54 = vld [vmem:[#allocation86_spill] sm:$0xff] }
 0x811   : > { %v4821_v14 = vpop.f32.mrf.mxu1 }
 0x812   : > { %v4822_v34 = vadd.f32 %v4821_v14, %v9470_v51  ;;  %v4845_v52 = vmul.f32 0.2, %v4764_v33  ;;  %vm4833_vm5 = vcmp.ge.f32.partialorder %v4764_v33, 0.0 }
 0x814   : > { %v4847_v36 = vmul.f32 0.2, %v4822_v34  ;;  %vm4835_vm8 = vcmp.ge.f32.partialorder %v4822_v34, 0.0  ;;  %v4857_v22 = vsel %vm4833_vm5, %v4764_v33, %v4845_v52  ;;  %v10568_v33 = vld [vmem:[#allocation61_spill] sm:$0xff] }
 0x815   : > { %v4792_v7 = vpop.f32.mrf.mxu0  ;;  %v4869_v43 = vadd.f32 %v4857_v22, %v10562_v29 }
 0x816   : > { %v4793_v3 = vadd.f32 %v4792_v7, %v9470_v51  ;;  %v4859_v6 = vsel %vm4835_vm8, %v4822_v34, %v4847_v36 }
 0x817   : > { %v4766_v61 = vpop.f32.mrf.mxu3  ;;  %v4871_v39 = vadd.f32 %v4859_v6, %v10563_v1  ;;  %v4885_v56 = vmul.f32 %v4881_v60, %v4869_v43 }
 0x818   : > { %v4767_v45 = vadd.f32 %v4766_v61, %v9525_v4  ;;  %v4846_v28 = vmul.f32 0.2, %v4793_v3  ;;  %vm4834_vm6 = vcmp.ge.f32.partialorder %v4793_v3, 0.0  ;;  %v4884_v61 = vld [vmem:[%s9735_s15 + $0x18] sm:$0xff] }
 0x819   : > { %v4824_v35 = vpop.f32.mrf.mxu1  ;;  %v4887_v25 = vmul.f32 %v4881_v60, %v4871_v39 }
 0x81a   : > { %v4825_v41 = vadd.f32 %v4824_v35, %v9525_v4  ;;  %v4848_v53 = vmul.f32 0.2, %v4767_v45  ;;  %vm4836_vm12 = vcmp.ge.f32.partialorder %v4767_v45, 0.0  ;;  %v4858_v19 = vsel %vm4834_vm6, %v4793_v3, %v4846_v28 }
 0x81b   : > { %v4870_v14 = vadd.f32 %v4858_v19, %v10567_v54 }
 0x81c   : > { %v4850_v37 = vmul.f32 0.2, %v4825_v41  ;;  %vm4838_vm7 = vcmp.ge.f32.partialorder %v4825_v41, 0.0  ;;  %v4860_v48 = vsel %vm4836_vm12, %v4767_v45, %v4848_v53  ;;  %v10569_v53 = vld [vmem:[#allocation62_spill] sm:$0xff] }
 0x81d   : > { %v4795_v49 = vpop.f32.mrf.mxu0 }
 0x81e   : > { %v4796_v11 = vadd.f32 %v4795_v49, %v9525_v4  ;;  %v4862_v32 = vsel %vm4838_vm7, %v4825_v41, %v4850_v37  ;;  %v4872_v4 = vadd.f32 %v4860_v48, %v10560_v30  ;;  %v10570_v48 = vld [vmem:[#allocation55_spill] sm:$0xff] }
 0x81f   : > { %v4769_v47 = vpop.f32.mrf.mxu3  ;;  %v4874_v16 = vadd.f32 %v4862_v32, %v10561_v38  ;;  %v4886_v32 = vmul.f32 %v4881_v60, %v4870_v14  ;;  %v4924_v60 = vld [vmem:[%s9736_s16] sm:$0x1] }
 0x820   : > { %v4770_v26 = vadd.f32 %v4769_v47, %v9555_v63  ;;  %v4849_v24 = vmul.f32 0.2, %v4796_v11  ;;  %vm4837_vm0 = vcmp.ge.f32.partialorder %v4796_v11, 0.0  ;;  %v4888_v57 = vmul.f32 %v4882_v8, %v4872_v4  ;;  %v10571_v4 = vld [vmem:[#allocation52_spill] sm:$0xff] }
 0x821   : > { %v4827_v42 = vpop.f32.mrf.mxu1  ;;  %v4890_v12 = vmul.f32 %v4882_v8, %v4874_v16 }
 0x822   : > { %vm4839_vm14 = vcmp.ge.f32.partialorder %v4770_v26, 0.0  ;;  %v4851_v27 = vmul.f32 0.2, %v4770_v26  ;;  %v4828_v21 = vadd.f32 %v4827_v42, %v9555_v63  ;;  %v4861_v5 = vsel %vm4837_vm0, %v4796_v11, %v4849_v24 }
 0x823   : > { %v4873_v15 = vadd.f32 %v4861_v5, %v10566_v10  ;;  %v4897_v35 = vadd.f32 %v4888_v57, %v4885_v56  ;;  %v4915_v52 = vadd.f32 %v4890_v12, %v4887_v25 }
 0x824   : > { %v4863_v50 = vsel %vm4839_vm14, %v4770_v26, %v4851_v27  ;;  %vm4841_vm4 = vcmp.ge.f32.partialorder %v4828_v21, 0.0  ;;  %v4853_v20 = vmul.f32 0.2, %v4828_v21 }
 0x825   : > { %v4798_v51 = vpop.f32.mrf.mxu0  ;;  %v4875_v13 = vadd.f32 %v4863_v50, %v10564_v9  ;;  %v4889_v11 = vmul.f32 %v4882_v8, %v4873_v15 }
 0x826   : > { %v4865_v17 = vsel %vm4841_vm4, %v4828_v21, %v4853_v20  ;;  %v4799_v0 = vadd.f32 %v4798_v51, %v9555_v63 }
 0x827   : > { %v4772_v46 = vpop.f32.mrf.mxu3  ;;  %v4877_v40 = vadd.f32 %v4865_v17, %v10565_v18  ;;  %v4891_v55 = vmul.f32 %v4883_v58, %v4875_v13  ;;  %v4906_v20 = vadd.f32 %v4889_v11, %v4886_v32 }
 0x828   : > { %vm4840_vm2 = vcmp.ge.f32.partialorder %v4799_v0, 0.0  ;;  %v4852_v2 = vmul.f32 0.2, %v4799_v0  ;;  %v4773_v63 = vadd.f32 %v4772_v46, %v9518_v59 }
 0x829   : > { %v4830_v23 = vpop.f32.mrf.mxu1  ;;  %v4893_v41 = vmul.f32 %v4883_v58, %v4877_v40  ;;  %v4898_v26 = vadd.f32 %v4897_v35, %v4891_v55 }
 0x82a   : > { %v4864_v31 = vsel %vm4840_vm2, %v4799_v0, %v4852_v2  ;;  %vm4842_vm9 = vcmp.ge.f32.partialorder %v4773_v63, 0.0  ;;  %v4854_v62 = vmul.f32 0.2, %v4773_v63  ;;  %v4831_v44 = vadd.f32 %v4830_v23, %v9518_v59  ;;  %v4927_v23 = vld [vmem:[%s9736_s16] sm:$0x1] }
 0x82b   : > { %v4876_v34 = vadd.f32 %v4864_v31, %v10568_v33  ;;  %v4916_v21 = vadd.f32 %v4915_v52, %v4893_v41 }
 0x82c   : > { %v4866_v7 = vsel %vm4842_vm9, %v4773_v63, %v4854_v62  ;;  %vm4844_vm11 = vcmp.ge.f32.partialorder %v4831_v44, 0.0  ;;  %v4856_v45 = vmul.f32 0.2, %v4831_v44  ;;  %v4930_v63 = vld [vmem:[%s9736_s16] sm:$0x1] }
 0x82d   : > { %v4878_v49 = vadd.f32 %v4866_v7, %v10569_v53  ;;  %v4801_v37 = vpop.f32.mrf.mxu0  ;;  %v4892_v22 = vmul.f32 %v4883_v58, %v4876_v34 }
 0x82e   : > { %v4868_v36 = vsel %vm4844_vm11, %v4831_v44, %v4856_v45  ;;  %v4802_v47 = vadd.f32 %v4801_v37, %v9518_v59 }
 0x82f   : > { %v4894_v3 = vmul.f32 %v4884_v61, %v4878_v49  ;;  %v4880_v42 = vadd.f32 %v4868_v36, %v10570_v48  ;;  %v4907_v16 = vadd.f32 %v4906_v20, %v4892_v22 }
 0x830   : > { %vm4843_vm3 = vcmp.ge.f32.partialorder %v4802_v47, 0.0  ;;  %v4855_v27 = vmul.f32 0.2, %v4802_v47 }
 0x831   : > { %v4899_v6 = vadd.f32 %v4898_v26, %v4894_v3  ;;  %v4896_v24 = vmul.f32 %v4884_v61, %v4880_v42 }
 0x832   : > { %v4867_v50 = vsel %vm4843_vm3, %v4802_v47, %v4855_v27 }
 0x833   : > { %v4900_v28 = vrot.slane %v4899_v6, 4  ;;  %v4917_v30 = vadd.f32 %v4916_v21, %v4896_v24  ;;  %v4879_v38 = vadd.f32 %v4867_v50, %v10571_v4 }
 0x835   : > { %v4901_v59 = vadd.f32 %v4900_v28, %v4899_v6  ;;  %v4918_v51 = vrot.slane %v4917_v30, 4  ;;  %v4895_v8 = vmul.f32 %v4884_v61, %v4879_v38 }
 0x837   : > { %v4902_v17 = vrot.slane %v4901_v59, 2  ;;  %v4919_v0 = vadd.f32 %v4918_v51, %v4917_v30  ;;  %v4908_v29 = vadd.f32 %v4907_v16, %v4895_v8 }
 0x839   : > { %v4903_v43 = vadd.f32 %v4902_v17, %v4901_v59  ;;  %v4920_v1 = vrot.slane %v4919_v0, 2  ;;  %v4909_v39 = vrot.slane %v4908_v29, 4 }
 0x83b   : > { %v4904_v9 = vrot.slane %v4903_v43, 1  ;;  %v4921_v13 = vadd.f32 %v4920_v1, %v4919_v0  ;;  %v4910_v46 = vadd.f32 %v4909_v39, %v4908_v29 }
 0x83d   : > { %v4905_v5 = vadd.f32 %v4904_v9, %v4903_v43  ;;  %v4922_v58 = vrot.slane %v4921_v13, 1  ;;  %v4911_v2 = vrot.slane %v4910_v46, 2 }
 0x83f   : > { %v4925_v19 = vadd.f32 %v4924_v60, %v4905_v5  ;;  %v4923_v57 = vadd.f32 %v4922_v58, %v4921_v13  ;;  %v4912_v12 = vadd.f32 %v4911_v2, %v4910_v46 }
 0x841   : > { %4926 = vst [vmem:[%s627_s25] sm:$0x1] %v4925_v19  ;;  %v4931_v18 = vadd.f32 %v4930_v63, %v4923_v57  ;;  %v4913_v40 = vrot.slane %v4912_v12, 1 }
 0x843   : > { %4932 = vst [vmem:[%s627_s25 + $0x2] sm:$0x1] %v4931_v18  ;;  %v4914_v31 = vadd.f32 %v4913_v40, %v4912_v12 }
 0x845   : > { %v4928_v62 = vadd.f32 %v4927_v23, %v4914_v31 }
 0x847   : > { %4929 = vst [vmem:[%s627_s25 + $0x1] sm:$0x1] %v4928_v62 }
 0x848 PF: > { %p26_p9 = scmp.ge.s32.totalorder %s5895_s0, 4   ;;  %s10572_s27 = smov %s5773_s28 }
 0x849   : > { %s10573_s28 = smov %s5904_s20  ;;  %s10574_s29 = smov %s5895_s0 }
 0x84a   :  { %28 = sbr.rel (!%p26_p9) target bundleno = 6 (0x6), region = 158 }

</bundles_post_ra>
